<compile_context>
chip_gen: v6e
topology: v6e:2x2x1
jax: 0.10.0
libtpu: 0.0.40
codegen_flags: <defaults>
</compile_context>

<pallas_src>
import functools
import math

import jax
import jax.numpy as jnp
from jax.experimental import pallas as pl
from jax.experimental.pallas import tpu as pltpu


def _layer_norm(x, gamma, beta, eps=1e-12):
    # BertLayerNorm: biased variance, eps inside the sqrt; rsqrt goes to the EUP.
    u = jnp.mean(x, axis=-1, keepdims=True)
    s = jnp.mean((x - u) ** 2, axis=-1, keepdims=True)
    return gamma * ((x - u) * jax.lax.rsqrt(s + eps)) + beta


_NT_DIMS = (((1,), (1,)), ((), ()))  # A @ B.T via dimension numbers (no transpose value)


# ------------------------------ fused forward kernel ------------------------------
def _fused_forward_kernel(x_ref, pos_ref, wqkv_ref, wo1_ref, w2_ref, w3_ref,
                          lvec_ref, wp_ref, wgrp_ref, wc_ref, hvec_ref, o_ref,
                          *, n_layers, n_heads, d_head, H, H2, S):
    f32, bf16 = jnp.float32, jnp.bfloat16
    scale = 1.0 / math.sqrt(d_head)

    # ---- embedding glue: tokens = [rows ; columns] + learned position table ----
    xb = x_ref[0].astype(f32)                                            # (H1, H1)
    x = jnp.concatenate([xb, xb.T], axis=0) + pos_ref[...].astype(f32)   # (S, H)

    for l in range(n_layers):                     # static unroll over layers
        lv = lvec_ref[l]                          # (8, Wl) packed per-layer vectors (f32)
        bqkv = lv[0:1, 0:3 * H]
        bo1, g1, be1 = lv[1:2, 0:H], lv[2:3, 0:H], lv[3:4, 0:H]
        b2 = lv[4:5, 0:H2]
        b3, g3, be3 = lv[5:6, 0:H], lv[6:7, 0:H], lv[7:8, 0:H]

        x_bf = x.astype(bf16)
        o1 = jnp.zeros((S, H), f32)

        for h in range(n_heads):                  # stream heads: one head live at a time
            base = (l * n_heads + h) * 3
            q = (jnp.dot(x_bf, wqkv_ref[base + 0], preferred_element_type=f32)
                 + bqkv[:, h * d_head:(h + 1) * d_head]).astype(bf16)            # (S, d)
            k = (jnp.dot(x_bf, wqkv_ref[base + 1], preferred_element_type=f32)
                 + bqkv[:, H + h * d_head:H + (h + 1) * d_head]).astype(bf16)
            v = (jnp.dot(x_bf, wqkv_ref[base + 2], preferred_element_type=f32)
                 + bqkv[:, 2 * H + h * d_head:2 * H + (h + 1) * d_head]).astype(bf16)

            s = jax.lax.dot_general(q, k, _NT_DIMS, preferred_element_type=f32) * scale
            s = s - jnp.max(s, axis=-1, keepdims=True)
            p = jnp.exp(s)
            p = p * pl.reciprocal(jnp.sum(p, axis=-1, keepdims=True), approx=True)
            ctx = jnp.dot(p.astype(bf16), v, preferred_element_type=f32)         # (S, d)
            # fold this head's context straight into attn_out1 (no ctx concat)
            o1 = o1 + jnp.dot(ctx.astype(bf16), wo1_ref[l * n_heads + h],
                              preferred_element_type=f32)                        # (S, H)

        # output projection bias + residual + LN
        r1 = _layer_norm(o1 + bo1 + x, g1, be1)
        # FFN (ReLU) + residual + LN
        hdn = jnp.maximum(jnp.dot(r1.astype(bf16), w2_ref[l],
                                  preferred_element_type=f32) + b2, 0.0)
        o3 = jnp.dot(hdn.astype(bf16), w3_ref[l], preferred_element_type=f32) + b3
        x = _layer_norm(o3 + r1, g3, be3)

    # ---- pooler ----
    hv = hvec_ref[...]                                     # (8, 128) f32
    bp, bfb, gf, bef = hv[0:1, 0:H], hv[1:2, 0:H], hv[2:3, 0:H], hv[3:4, 0:H]
    bc = hv[4:5, :]                                        # (1, 128)
    pooled = jnp.tanh(jnp.dot(x.astype(bf16), wp_ref[...],
                              preferred_element_type=f32) + bp)                  # (S, H)

    # ---- flat head:  vec(pooled) @ Wf  without any flatten/concat ----
    # Rows of `pooled` are grouped 8 at a time (vreg-aligned slices).  For group g,
    # P_g(8,H) @ Wgrp[g](H,8H) produces every (r', r) cross term of
    # sum_h pooled[8g+r', h] * Wf[(8g+r)*H + h, :]; the wanted r'==r terms sit on the
    # block diagonal, which is selected with a static iota mask and accumulated.
    n_groups = S // 8
    GW = 8 * H
    rr = jax.lax.broadcasted_iota(jnp.int32, (8, GW), 0)
    cc = jax.lax.broadcasted_iota(jnp.int32, (8, GW), 1)
    diag = (cc >= rr * H) & (cc < rr * H + H)              # block-diagonal mask (8, 8H)
    acc = jnp.zeros((8, GW), f32)
    for g in range(n_groups):
        pg = pooled[8 * g:8 * (g + 1), :].astype(bf16)     # vreg-aligned (8, H) slice
        cg = jnp.dot(pg, wgrp_ref[g], preferred_element_type=f32)   # (8, 8H) lane dense
        acc = acc + jnp.where(diag, cg, 0.0)
    rowacc = jnp.sum(acc, axis=0, keepdims=True)           # (1, 8H)
    flat = bfb
    for r in range(8):
        flat = flat + rowacc[:, r * H:(r + 1) * H]         # fold the 8 diagonal blocks
    hflat = _layer_norm(jnp.maximum(flat, 0.0), gf, bef)                         # (1, H)

    # ---- classifier (padded to 128 lanes -> unmasked store) ----
    out = jnp.dot(hflat.astype(bf16), wc_ref[...], preferred_element_type=f32) + bc
    o_ref[0] = out.astype(o_ref.dtype)                     # (1, 128)


# --------------------------------- wrapper / call ----------------------------------
def row_column_attention_forward(x, packed, *, n_heads, n_classes):
    B, H1, _ = x.shape
    H = H1
    S = 2 * H1
    d_head = packed['wqkv'].shape[-1]
    n_layers = packed['wqkv'].shape[0] // (3 * n_heads)
    H2 = packed['w2'].shape[-1]
    CP = packed['wc'].shape[-1]

    kern = functools.partial(_fused_forward_kernel, n_layers=n_layers, n_heads=n_heads,
                             d_head=d_head, H=H, H2=H2, S=S)

    weights = (packed['pos'], packed['wqkv'], packed['wo1'], packed['w2'], packed['w3'],
               packed['lvec'], packed['wp'], packed['wgrp'], packed['wc'], packed['hvec'])

    def _const_spec(w):
        zeros = (0,) * w.ndim
        return pl.BlockSpec(w.shape, lambda b, _z=zeros: _z)

    out = pl.pallas_call(
        kern,
        out_shape=jax.ShapeDtypeStruct((B, 1, CP), x.dtype),
        grid=(B,),
        in_specs=[pl.BlockSpec((1, H1, H1), lambda b: (b, 0, 0))]
                 + [_const_spec(w) for w in weights],
        out_specs=pl.BlockSpec((1, 1, CP), lambda b: (b, 0, 0)),
        compiler_params=pltpu.CompilerParams(dimension_semantics=("parallel",)),
    )(x, *weights)
    return out[:, 0, :n_classes]


# ------------------------------- parameter handling --------------------------------
def init_params(key, H1, H2, n_layers, n_classes):
    H = H1
    S = 2 * H1

    def linear(k, din, dout, scale=0.05):
        kw, kb = jax.random.split(k)
        w = jax.random.normal(kw, (din, dout), jnp.float32) * scale      # (in, out)
        b = jax.random.normal(kb, (1, dout), jnp.float32) * scale
        return w, b

    keys = jax.random.split(key, 4 + n_layers)
    params = {}
    params['pos_table'] = jax.random.normal(keys[0], (S, H), jnp.float32) * 0.05

    layers = []
    for i in range(n_layers):
        lk = jax.random.split(keys[1 + i], 6)
        wq, bq = linear(lk[0], H, H)
        wk, bk = linear(lk[1], H, H)
        wv, bv = linear(lk[2], H, H)
        wo1, bo1 = linear(lk[3], H, H)
        w2, b2 = linear(lk[4], H, H2)
        w3, b3 = linear(lk[5], H2, H)
        layers.append(dict(
            wq=wq, bq=bq, wk=wk, bk=bk, wv=wv, bv=bv,
            wo1=wo1, bo1=bo1,
            g1=jnp.ones((1, H), jnp.float32), be1=jnp.zeros((1, H), jnp.float32),
            w2=w2, b2=b2, w3=w3, b3=b3,
            g3=jnp.ones((1, H), jnp.float32), be3=jnp.zeros((1, H), jnp.float32)))
    params['layers'] = layers

    k0 = 1 + n_layers
    params['wp'], params['bp'] = linear(keys[k0], H, H)
    params['wf'], params['bf'] = linear(keys[k0 + 1], S * H, H)          # (S*H) -> H
    params['gf'] = jnp.ones((1, H), jnp.float32)
    params['bef'] = jnp.zeros((1, H), jnp.float32)
    params['wc'], params['bc'] = linear(keys[k0 + 2], H, n_classes)
    return params


def pack_params(params, H, H2, C, n_heads):
    """One-time packing: per-head Q/K/V and Wo1, bf16 matmul weights, grouped Wf,
    classifier padded to 128 lanes, tiny vectors packed into (L,8,.) / (8,128) arrays."""
    d = H // n_heads
    S = params['pos_table'].shape[0]
    bf16 = jnp.bfloat16
    Wl = max(3 * H, H2)
    CP = 128
    assert H % n_heads == 0 and S % 8 == 0
    assert C <= CP and H <= CP

    def pad_cols(v, w):
        return jnp.pad(v, ((0, 0), (0, w - v.shape[1])))

    wqkv, wo1, w2s, w3s, lvecs = [], [], [], [], []
    for lp in params['layers']:
        for h in range(n_heads):
            sl = slice(h * d, (h + 1) * d)
            wqkv.append(lp['wq'][:, sl])                    # (H, d)
            wqkv.append(lp['wk'][:, sl])
            wqkv.append(lp['wv'][:, sl])
            wo1.append(lp['wo1'][h * d:(h + 1) * d, :])     # (d, H)
        w2s.append(lp['w2'])
        w3s.append(lp['w3'])
        rows = [pad_cols(jnp.concatenate([lp['bq'], lp['bk'], lp['bv']], axis=1), Wl),
                pad_cols(lp['bo1'], Wl), pad_cols(lp['g1'], Wl), pad_cols(lp['be1'], Wl),
                pad_cols(lp['b2'], Wl), pad_cols(lp['b3'], Wl),
                pad_cols(lp['g3'], Wl), pad_cols(lp['be3'], Wl)]
        lvecs.append(jnp.concatenate(rows, axis=0))         # (8, Wl)

    # flat head: Wf (S*H, H) -> (S//8, H, 8*H) with Wgrp[g, h, r*H + j] = Wf[(8g+r)*H + h, j]
    n_groups = S // 8
    wf3 = params['wf'].reshape(S, H, H)
    wgrp = wf3.reshape(n_groups, 8, H, H).transpose(0, 2, 1, 3).reshape(n_groups, H, 8 * H)

    hrows = [pad_cols(params['bp'], CP), pad_cols(params['bf'], CP),
             pad_cols(params['gf'], CP), pad_cols(params['bef'], CP),
             pad_cols(params['bc'], CP)] + [jnp.zeros((1, CP), jnp.float32)] * 3

    return dict(
        pos=params['pos_table'],                            # (S, H)  f32
        wqkv=jnp.stack(wqkv).astype(bf16),                  # (L*n_heads*3, H, d) bf16
        wo1=jnp.stack(wo1).astype(bf16),                    # (L*n_heads, d, H)   bf16
        w2=jnp.stack(w2s).astype(bf16),                     # (L, H, H2)          bf16
        w3=jnp.stack(w3s).astype(bf16),                     # (L, H2, H)          bf16
        lvec=jnp.stack(lvecs),                              # (L, 8, Wl)          f32
        wp=params['wp'].astype(bf16),                       # (H, H)              bf16
        wgrp=wgrp.astype(bf16),                             # (S//8, H, 8H)       bf16
        wc=pad_cols(params['wc'], CP).astype(bf16),         # (H, 128)            bf16
        hvec=jnp.concatenate(hrows, axis=0),                # (8, 128)            f32
    )


# -------------------------- pure-JAX reference (f32, for checking) --------------------------
def reference_forward(x, params, *, n_heads):
    B, H1, _ = x.shape
    H, S = H1, 2 * H1
    d = H // n_heads
    h = jnp.concatenate([x, jnp.transpose(x, (0, 2, 1))], axis=1) + params['pos_table'][None]
    for lp in params['layers']:
        q = h @ lp['wq'] + lp['bq']
        k = h @ lp['wk'] + lp['bk']
        v = h @ lp['wv'] + lp['bv']
        split = lambda t: t.reshape(B, S, n_heads, d).transpose(0, 2, 1, 3)
        qh, kh, vh = split(q), split(k), split(v)
        sc = jnp.einsum('bnsd,bntd->bnst', qh, kh) / math.sqrt(d)
        p = jax.nn.softmax(sc, axis=-1)
        ctx = jnp.einsum('bnst,bntd->bnsd', p, vh).transpose(0, 2, 1, 3).reshape(B, S, H)
        o1 = ctx @ lp['wo1'] + lp['bo1']
        r1 = _layer_norm(o1 + h, lp['g1'], lp['be1'])
        hid = jax.nn.relu(r1 @ lp['w2'] + lp['b2'])
        o3 = hid @ lp['w3'] + lp['b3']
        h = _layer_norm(o3 + r1, lp['g3'], lp['be3'])
    pooled = jnp.tanh(h @ params['wp'] + params['bp'])
    flat = pooled.reshape(B, S * H) @ params['wf'] + params['bf']
    z = _layer_norm(jax.nn.relu(flat), params['gf'], params['bef'])
    return z @ params['wc'] + params['bc']


if __name__ == "__main__":
    # config: color=False, hidden_dim1=32, hidden_dim2=64, n_layers=2, n_attn_heads=4,
    # n_classes=10, dropout=0.0, position_embedding='learned', segment_embedding='none'
    H1, H2, n_layers, n_heads, n_classes = 32, 64, 2, 4, 10
    key = jax.random.PRNGKey(0)
    kx, kp = jax.random.split(key)
    x = jax.random.normal(kx, (2, H1, H1), jnp.float32)

    params = init_params(kp, H1, H2, n_layers, n_classes)
    packed = pack_params(params, H1, H2, n_classes, n_heads)      # one-time weight packing

    fwd = jax.jit(functools.partial(row_column_attention_forward,
                                    n_heads=n_heads, n_classes=n_classes))
    out = jax.block_until_ready(fwd(x, packed))

    assert out.shape == (2, n_classes), out.shape
    assert bool(jnp.all(jnp.isfinite(out)))

    # correctness vs. a pure-JAX f32 reference of the PyTorch module (kernel uses bf16 MXU
    # operands + approx reciprocal, hence the loose tolerance)
    ref = reference_forward(x, params, n_heads=n_heads)
    err = float(jnp.max(jnp.abs(out - ref)))
    assert err < 1e-1, f"max abs err vs reference: {err}"
    print("KERNEL_OK")
</pallas_src>

<mosaic_0001>
module attributes {stable_mosaic.version = 11 : i64} {
  func.func @_fused_forward_kernel(%arg0: i32, %arg1: memref<1x32x32xf32, #tpu.memory_space<vmem>>, %arg2: memref<64x32xf32, #tpu.memory_space<vmem>>, %arg3: memref<24x32x8xbf16, #tpu.memory_space<vmem>>, %arg4: memref<8x8x32xbf16, #tpu.memory_space<vmem>>, %arg5: memref<2x32x64xbf16, #tpu.memory_space<vmem>>, %arg6: memref<2x64x32xbf16, #tpu.memory_space<vmem>>, %arg7: memref<2x8x96xf32, #tpu.memory_space<vmem>>, %arg8: memref<32x32xbf16, #tpu.memory_space<vmem>>, %arg9: memref<8x32x256xbf16, #tpu.memory_space<vmem>>, %arg10: memref<32x128xbf16, #tpu.memory_space<vmem>>, %arg11: memref<8x128xf32, #tpu.memory_space<vmem>>, %arg12: memref<1x1x128xf32, #tpu.memory_space<vmem>>) attributes {dimension_semantics = [#tpu.dimension_semantics<parallel>], iteration_bounds = array<i64: 2>, scalar_prefetch = 0 : i64, scratch_operands = 0 : i64, tpu.core_type = #tpu.core_type<tc>, window_params = [{transform_indices = @transform_0, window_bounds = array<i64: 1, 32, 32>}, {pipeline_mode = #tpu.pipeline_mode<synchronous>, transform_indices = @transform_1, window_bounds = array<i64: 64, 32>}, {pipeline_mode = #tpu.pipeline_mode<synchronous>, transform_indices = @transform_2, window_bounds = array<i64: 24, 32, 8>}, {pipeline_mode = #tpu.pipeline_mode<synchronous>, transform_indices = @transform_3, window_bounds = array<i64: 8, 8, 32>}, {pipeline_mode = #tpu.pipeline_mode<synchronous>, transform_indices = @transform_4, window_bounds = array<i64: 2, 32, 64>}, {pipeline_mode = #tpu.pipeline_mode<synchronous>, transform_indices = @transform_5, window_bounds = array<i64: 2, 64, 32>}, {pipeline_mode = #tpu.pipeline_mode<synchronous>, transform_indices = @transform_6, window_bounds = array<i64: 2, 8, 96>}, {pipeline_mode = #tpu.pipeline_mode<synchronous>, transform_indices = @transform_7, window_bounds = array<i64: 32, 32>}, {pipeline_mode = #tpu.pipeline_mode<synchronous>, transform_indices = @transform_8, window_bounds = array<i64: 8, 32, 256>}, {pipeline_mode = #tpu.pipeline_mode<synchronous>, transform_indices = @transform_9, window_bounds = array<i64: 32, 128>}, {pipeline_mode = #tpu.pipeline_mode<synchronous>, transform_indices = @transform_10, window_bounds = array<i64: 8, 128>}, {transform_indices = @transform_11, window_bounds = array<i64: 1, 1, 128>}]} {
    %c0 = arith.constant 0 : index
    %c0_0 = arith.constant 0 : index
    %c0_1 = arith.constant 0 : index
    %0 = vector.load %arg1[%c0, %c0_0, %c0_1] : memref<1x32x32xf32, #tpu.memory_space<vmem>>, vector<1x32x32xf32>
    %1 = vector.shape_cast %0 : vector<1x32x32xf32> to vector<32x32xf32>
    %2 = tpu.transpose %1, [1, 0] : vector<32x32xf32> -> vector<32x32xf32>
    %3 = tpu.concatenate %1, %2 in 0 : vector<32x32xf32>, vector<32x32xf32> -> vector<64x32xf32>
    %c0_2 = arith.constant 0 : index
    %c0_3 = arith.constant 0 : index
    %4 = vector.load %arg2[%c0_2, %c0_3] : memref<64x32xf32, #tpu.memory_space<vmem>>, vector<64x32xf32>
    %5 = arith.addf %3, %4 : vector<64x32xf32>
    %c0_4 = arith.constant 0 : index
    %c0_5 = arith.constant 0 : index
    %c0_6 = arith.constant 0 : index
    %6 = vector.load %arg7[%c0_4, %c0_5, %c0_6] : memref<2x8x96xf32, #tpu.memory_space<vmem>>, vector<1x8x96xf32>
    %7 = vector.shape_cast %6 : vector<1x8x96xf32> to vector<8x96xf32>
    %8 = vector.extract_strided_slice %7 {offsets = [0, 0], sizes = [1, 96], strides = [1, 1]} : vector<8x96xf32> to vector<1x96xf32>
    %9 = vector.extract_strided_slice %7 {offsets = [1, 0], sizes = [1, 32], strides = [1, 1]} : vector<8x96xf32> to vector<1x32xf32>
    %10 = vector.extract_strided_slice %7 {offsets = [2, 0], sizes = [1, 32], strides = [1, 1]} : vector<8x96xf32> to vector<1x32xf32>
    %11 = vector.extract_strided_slice %7 {offsets = [3, 0], sizes = [1, 32], strides = [1, 1]} : vector<8x96xf32> to vector<1x32xf32>
    %12 = vector.extract_strided_slice %7 {offsets = [4, 0], sizes = [1, 64], strides = [1, 1]} : vector<8x96xf32> to vector<1x64xf32>
    %13 = vector.extract_strided_slice %7 {offsets = [5, 0], sizes = [1, 32], strides = [1, 1]} : vector<8x96xf32> to vector<1x32xf32>
    %14 = vector.extract_strided_slice %7 {offsets = [6, 0], sizes = [1, 32], strides = [1, 1]} : vector<8x96xf32> to vector<1x32xf32>
    %15 = vector.extract_strided_slice %7 {offsets = [7, 0], sizes = [1, 32], strides = [1, 1]} : vector<8x96xf32> to vector<1x32xf32>
    %16 = arith.truncf %5 : vector<64x32xf32> to vector<64x32xbf16>
    %cst = arith.constant 0.000000e+00 : f32
    %17 = vector.broadcast %cst : f32 to vector<64x32xf32>
    %c0_7 = arith.constant 0 : index
    %c0_8 = arith.constant 0 : index
    %c0_9 = arith.constant 0 : index
    %18 = vector.load %arg3[%c0_7, %c0_8, %c0_9] : memref<24x32x8xbf16, #tpu.memory_space<vmem>>, vector<1x32x8xbf16>
    %19 = vector.shape_cast %18 : vector<1x32x8xbf16> to vector<32x8xbf16>
    %cst_10 = arith.constant dense<0.000000e+00> : vector<64x8xf32>
    %20 = tpu.matmul %16, %19, %cst_10 {dimension_numbers = #tpu.dot_dimension_numbers<[1], [0], [0], [1], [0, 0, 1, 1], [], []>} : vector<64x32xbf16>, vector<32x8xbf16>, vector<64x8xf32> -> vector<64x8xf32>
    %21 = vector.extract_strided_slice %8 {offsets = [0, 0], sizes = [1, 8], strides = [1, 1]} : vector<1x96xf32> to vector<1x8xf32>
    %22 = vector.broadcast %21 : vector<1x8xf32> to vector<64x8xf32>
    %23 = arith.addf %20, %22 : vector<64x8xf32>
    %24 = arith.truncf %23 : vector<64x8xf32> to vector<64x8xbf16>
    %c1 = arith.constant 1 : index
    %c0_11 = arith.constant 0 : index
    %c0_12 = arith.constant 0 : index
    %25 = vector.load %arg3[%c1, %c0_11, %c0_12] : memref<24x32x8xbf16, #tpu.memory_space<vmem>>, vector<1x32x8xbf16>
    %26 = vector.shape_cast %25 : vector<1x32x8xbf16> to vector<32x8xbf16>
    %cst_13 = arith.constant dense<0.000000e+00> : vector<64x8xf32>
    %27 = tpu.matmul %16, %26, %cst_13 {dimension_numbers = #tpu.dot_dimension_numbers<[1], [0], [0], [1], [0, 0, 1, 1], [], []>} : vector<64x32xbf16>, vector<32x8xbf16>, vector<64x8xf32> -> vector<64x8xf32>
    %28 = vector.extract_strided_slice %8 {offsets = [0, 32], sizes = [1, 8], strides = [1, 1]} : vector<1x96xf32> to vector<1x8xf32>
    %29 = vector.broadcast %28 : vector<1x8xf32> to vector<64x8xf32>
    %30 = arith.addf %27, %29 : vector<64x8xf32>
    %31 = arith.truncf %30 : vector<64x8xf32> to vector<64x8xbf16>
    %c2 = arith.constant 2 : index
    %c0_14 = arith.constant 0 : index
    %c0_15 = arith.constant 0 : index
    %32 = vector.load %arg3[%c2, %c0_14, %c0_15] : memref<24x32x8xbf16, #tpu.memory_space<vmem>>, vector<1x32x8xbf16>
    %33 = vector.shape_cast %32 : vector<1x32x8xbf16> to vector<32x8xbf16>
    %cst_16 = arith.constant dense<0.000000e+00> : vector<64x8xf32>
    %34 = tpu.matmul %16, %33, %cst_16 {dimension_numbers = #tpu.dot_dimension_numbers<[1], [0], [0], [1], [0, 0, 1, 1], [], []>} : vector<64x32xbf16>, vector<32x8xbf16>, vector<64x8xf32> -> vector<64x8xf32>
    %35 = vector.extract_strided_slice %8 {offsets = [0, 64], sizes = [1, 8], strides = [1, 1]} : vector<1x96xf32> to vector<1x8xf32>
    %36 = vector.broadcast %35 : vector<1x8xf32> to vector<64x8xf32>
    %37 = arith.addf %34, %36 : vector<64x8xf32>
    %38 = arith.truncf %37 : vector<64x8xf32> to vector<64x8xbf16>
    %cst_17 = arith.constant dense<0.000000e+00> : vector<64x64xf32>
    %39 = tpu.matmul %24, %31, %cst_17 {dimension_numbers = #tpu.dot_dimension_numbers<[1], [1], [0], [0], [0, 0, 1, 0], [], []>} : vector<64x8xbf16>, vector<64x8xbf16>, vector<64x64xf32> -> vector<64x64xf32>
    %cst_18 = arith.constant 0.353553385 : f32
    %40 = vector.broadcast %cst_18 : f32 to vector<64x64xf32>
    %41 = arith.mulf %39, %40 : vector<64x64xf32>
    %cst_19 = arith.constant dense<0xFF800000> : vector<64xf32>
    %42 = vector.multi_reduction <maximumf>, %41, %cst_19 [1] : vector<64x64xf32> to vector<64xf32>
    %43 = vector.shape_cast %42 : vector<64xf32> to vector<64x1xf32>
    %44 = vector.broadcast %43 : vector<64x1xf32> to vector<64x64xf32>
    %45 = arith.subf %41, %44 : vector<64x64xf32>
    %46 = math.exp %45 : vector<64x64xf32>
    %cst_20 = arith.constant dense<0.000000e+00> : vector<64xf32>
    %47 = vector.multi_reduction <add>, %46, %cst_20 [1] : vector<64x64xf32> to vector<64xf32>
    %48 = vector.shape_cast %47 : vector<64xf32> to vector<64x1xf32>
    %49 = tpu.reciprocal %48 {approx = true} : vector<64x1xf32> -> vector<64x1xf32>
    %50 = vector.broadcast %49 : vector<64x1xf32> to vector<64x64xf32>
    %51 = arith.mulf %46, %50 : vector<64x64xf32>
    %52 = arith.truncf %51 : vector<64x64xf32> to vector<64x64xbf16>
    %cst_21 = arith.constant dense<0.000000e+00> : vector<64x8xf32>
    %53 = tpu.matmul %52, %38, %cst_21 {dimension_numbers = #tpu.dot_dimension_numbers<[1], [0], [0], [1], [0, 0, 1, 1], [], []>} : vector<64x64xbf16>, vector<64x8xbf16>, vector<64x8xf32> -> vector<64x8xf32>
    %54 = arith.truncf %53 : vector<64x8xf32> to vector<64x8xbf16>
    %c0_22 = arith.constant 0 : index
    %c0_23 = arith.constant 0 : index
    %c0_24 = arith.constant 0 : index
    %55 = vector.load %arg4[%c0_22, %c0_23, %c0_24] : memref<8x8x32xbf16, #tpu.memory_space<vmem>>, vector<1x8x32xbf16>
    %56 = vector.shape_cast %55 : vector<1x8x32xbf16> to vector<8x32xbf16>
    %cst_25 = arith.constant dense<0.000000e+00> : vector<64x32xf32>
    %57 = tpu.matmul %54, %56, %cst_25 {dimension_numbers = #tpu.dot_dimension_numbers<[1], [0], [0], [1], [0, 0, 1, 1], [], []>} : vector<64x8xbf16>, vector<8x32xbf16>, vector<64x32xf32> -> vector<64x32xf32>
    %58 = arith.addf %17, %57 : vector<64x32xf32>
    %c3 = arith.constant 3 : index
    %c0_26 = arith.constant 0 : index
    %c0_27 = arith.constant 0 : index
    %59 = vector.load %arg3[%c3, %c0_26, %c0_27] : memref<24x32x8xbf16, #tpu.memory_space<vmem>>, vector<1x32x8xbf16>
    %60 = vector.shape_cast %59 : vector<1x32x8xbf16> to vector<32x8xbf16>
    %cst_28 = arith.constant dense<0.000000e+00> : vector<64x8xf32>
    %61 = tpu.matmul %16, %60, %cst_28 {dimension_numbers = #tpu.dot_dimension_numbers<[1], [0], [0], [1], [0, 0, 1, 1], [], []>} : vector<64x32xbf16>, vector<32x8xbf16>, vector<64x8xf32> -> vector<64x8xf32>
    %62 = vector.extract_strided_slice %8 {offsets = [0, 8], sizes = [1, 8], strides = [1, 1]} : vector<1x96xf32> to vector<1x8xf32>
    %63 = vector.broadcast %62 : vector<1x8xf32> to vector<64x8xf32>
    %64 = arith.addf %61, %63 : vector<64x8xf32>
    %65 = arith.truncf %64 : vector<64x8xf32> to vector<64x8xbf16>
    %c4 = arith.constant 4 : index
    %c0_29 = arith.constant 0 : index
    %c0_30 = arith.constant 0 : index
    %66 = vector.load %arg3[%c4, %c0_29, %c0_30] : memref<24x32x8xbf16, #tpu.memory_space<vmem>>, vector<1x32x8xbf16>
    %67 = vector.shape_cast %66 : vector<1x32x8xbf16> to vector<32x8xbf16>
    %cst_31 = arith.constant dense<0.000000e+00> : vector<64x8xf32>
    %68 = tpu.matmul %16, %67, %cst_31 {dimension_numbers = #tpu.dot_dimension_numbers<[1], [0], [0], [1], [0, 0, 1, 1], [], []>} : vector<64x32xbf16>, vector<32x8xbf16>, vector<64x8xf32> -> vector<64x8xf32>
    %69 = vector.extract_strided_slice %8 {offsets = [0, 40], sizes = [1, 8], strides = [1, 1]} : vector<1x96xf32> to vector<1x8xf32>
    %70 = vector.broadcast %69 : vector<1x8xf32> to vector<64x8xf32>
    %71 = arith.addf %68, %70 : vector<64x8xf32>
    %72 = arith.truncf %71 : vector<64x8xf32> to vector<64x8xbf16>
    %c5 = arith.constant 5 : index
    %c0_32 = arith.constant 0 : index
    %c0_33 = arith.constant 0 : index
    %73 = vector.load %arg3[%c5, %c0_32, %c0_33] : memref<24x32x8xbf16, #tpu.memory_space<vmem>>, vector<1x32x8xbf16>
    %74 = vector.shape_cast %73 : vector<1x32x8xbf16> to vector<32x8xbf16>
    %cst_34 = arith.constant dense<0.000000e+00> : vector<64x8xf32>
    %75 = tpu.matmul %16, %74, %cst_34 {dimension_numbers = #tpu.dot_dimension_numbers<[1], [0], [0], [1], [0, 0, 1, 1], [], []>} : vector<64x32xbf16>, vector<32x8xbf16>, vector<64x8xf32> -> vector<64x8xf32>
    %76 = vector.extract_strided_slice %8 {offsets = [0, 72], sizes = [1, 8], strides = [1, 1]} : vector<1x96xf32> to vector<1x8xf32>
    %77 = vector.broadcast %76 : vector<1x8xf32> to vector<64x8xf32>
    %78 = arith.addf %75, %77 : vector<64x8xf32>
    %79 = arith.truncf %78 : vector<64x8xf32> to vector<64x8xbf16>
    %cst_35 = arith.constant dense<0.000000e+00> : vector<64x64xf32>
    %80 = tpu.matmul %65, %72, %cst_35 {dimension_numbers = #tpu.dot_dimension_numbers<[1], [1], [0], [0], [0, 0, 1, 0], [], []>} : vector<64x8xbf16>, vector<64x8xbf16>, vector<64x64xf32> -> vector<64x64xf32>
    %cst_36 = arith.constant 0.353553385 : f32
    %81 = vector.broadcast %cst_36 : f32 to vector<64x64xf32>
    %82 = arith.mulf %80, %81 : vector<64x64xf32>
    %cst_37 = arith.constant dense<0xFF800000> : vector<64xf32>
    %83 = vector.multi_reduction <maximumf>, %82, %cst_37 [1] : vector<64x64xf32> to vector<64xf32>
    %84 = vector.shape_cast %83 : vector<64xf32> to vector<64x1xf32>
    %85 = vector.broadcast %84 : vector<64x1xf32> to vector<64x64xf32>
    %86 = arith.subf %82, %85 : vector<64x64xf32>
    %87 = math.exp %86 : vector<64x64xf32>
    %cst_38 = arith.constant dense<0.000000e+00> : vector<64xf32>
    %88 = vector.multi_reduction <add>, %87, %cst_38 [1] : vector<64x64xf32> to vector<64xf32>
    %89 = vector.shape_cast %88 : vector<64xf32> to vector<64x1xf32>
    %90 = tpu.reciprocal %89 {approx = true} : vector<64x1xf32> -> vector<64x1xf32>
    %91 = vector.broadcast %90 : vector<64x1xf32> to vector<64x64xf32>
    %92 = arith.mulf %87, %91 : vector<64x64xf32>
    %93 = arith.truncf %92 : vector<64x64xf32> to vector<64x64xbf16>
    %cst_39 = arith.constant dense<0.000000e+00> : vector<64x8xf32>
    %94 = tpu.matmul %93, %79, %cst_39 {dimension_numbers = #tpu.dot_dimension_numbers<[1], [0], [0], [1], [0, 0, 1, 1], [], []>} : vector<64x64xbf16>, vector<64x8xbf16>, vector<64x8xf32> -> vector<64x8xf32>
    %95 = arith.truncf %94 : vector<64x8xf32> to vector<64x8xbf16>
    %c1_40 = arith.constant 1 : index
    %c0_41 = arith.constant 0 : index
    %c0_42 = arith.constant 0 : index
    %96 = vector.load %arg4[%c1_40, %c0_41, %c0_42] : memref<8x8x32xbf16, #tpu.memory_space<vmem>>, vector<1x8x32xbf16>
    %97 = vector.shape_cast %96 : vector<1x8x32xbf16> to vector<8x32xbf16>
    %cst_43 = arith.constant dense<0.000000e+00> : vector<64x32xf32>
    %98 = tpu.matmul %95, %97, %cst_43 {dimension_numbers = #tpu.dot_dimension_numbers<[1], [0], [0], [1], [0, 0, 1, 1], [], []>} : vector<64x8xbf16>, vector<8x32xbf16>, vector<64x32xf32> -> vector<64x32xf32>
    %99 = arith.addf %58, %98 : vector<64x32xf32>
    %c6 = arith.constant 6 : index
    %c0_44 = arith.constant 0 : index
    %c0_45 = arith.constant 0 : index
    %100 = vector.load %arg3[%c6, %c0_44, %c0_45] : memref<24x32x8xbf16, #tpu.memory_space<vmem>>, vector<1x32x8xbf16>
    %101 = vector.shape_cast %100 : vector<1x32x8xbf16> to vector<32x8xbf16>
    %cst_46 = arith.constant dense<0.000000e+00> : vector<64x8xf32>
    %102 = tpu.matmul %16, %101, %cst_46 {dimension_numbers = #tpu.dot_dimension_numbers<[1], [0], [0], [1], [0, 0, 1, 1], [], []>} : vector<64x32xbf16>, vector<32x8xbf16>, vector<64x8xf32> -> vector<64x8xf32>
    %103 = vector.extract_strided_slice %8 {offsets = [0, 16], sizes = [1, 8], strides = [1, 1]} : vector<1x96xf32> to vector<1x8xf32>
    %104 = vector.broadcast %103 : vector<1x8xf32> to vector<64x8xf32>
    %105 = arith.addf %102, %104 : vector<64x8xf32>
    %106 = arith.truncf %105 : vector<64x8xf32> to vector<64x8xbf16>
    %c7 = arith.constant 7 : index
    %c0_47 = arith.constant 0 : index
    %c0_48 = arith.constant 0 : index
    %107 = vector.load %arg3[%c7, %c0_47, %c0_48] : memref<24x32x8xbf16, #tpu.memory_space<vmem>>, vector<1x32x8xbf16>
    %108 = vector.shape_cast %107 : vector<1x32x8xbf16> to vector<32x8xbf16>
    %cst_49 = arith.constant dense<0.000000e+00> : vector<64x8xf32>
    %109 = tpu.matmul %16, %108, %cst_49 {dimension_numbers = #tpu.dot_dimension_numbers<[1], [0], [0], [1], [0, 0, 1, 1], [], []>} : vector<64x32xbf16>, vector<32x8xbf16>, vector<64x8xf32> -> vector<64x8xf32>
    %110 = vector.extract_strided_slice %8 {offsets = [0, 48], sizes = [1, 8], strides = [1, 1]} : vector<1x96xf32> to vector<1x8xf32>
    %111 = vector.broadcast %110 : vector<1x8xf32> to vector<64x8xf32>
    %112 = arith.addf %109, %111 : vector<64x8xf32>
    %113 = arith.truncf %112 : vector<64x8xf32> to vector<64x8xbf16>
    %c8 = arith.constant 8 : index
    %c0_50 = arith.constant 0 : index
    %c0_51 = arith.constant 0 : index
    %114 = vector.load %arg3[%c8, %c0_50, %c0_51] : memref<24x32x8xbf16, #tpu.memory_space<vmem>>, vector<1x32x8xbf16>
    %115 = vector.shape_cast %114 : vector<1x32x8xbf16> to vector<32x8xbf16>
    %cst_52 = arith.constant dense<0.000000e+00> : vector<64x8xf32>
    %116 = tpu.matmul %16, %115, %cst_52 {dimension_numbers = #tpu.dot_dimension_numbers<[1], [0], [0], [1], [0, 0, 1, 1], [], []>} : vector<64x32xbf16>, vector<32x8xbf16>, vector<64x8xf32> -> vector<64x8xf32>
    %117 = vector.extract_strided_slice %8 {offsets = [0, 80], sizes = [1, 8], strides = [1, 1]} : vector<1x96xf32> to vector<1x8xf32>
    %118 = vector.broadcast %117 : vector<1x8xf32> to vector<64x8xf32>
    %119 = arith.addf %116, %118 : vector<64x8xf32>
    %120 = arith.truncf %119 : vector<64x8xf32> to vector<64x8xbf16>
    %cst_53 = arith.constant dense<0.000000e+00> : vector<64x64xf32>
    %121 = tpu.matmul %106, %113, %cst_53 {dimension_numbers = #tpu.dot_dimension_numbers<[1], [1], [0], [0], [0, 0, 1, 0], [], []>} : vector<64x8xbf16>, vector<64x8xbf16>, vector<64x64xf32> -> vector<64x64xf32>
    %cst_54 = arith.constant 0.353553385 : f32
    %122 = vector.broadcast %cst_54 : f32 to vector<64x64xf32>
    %123 = arith.mulf %121, %122 : vector<64x64xf32>
    %cst_55 = arith.constant dense<0xFF800000> : vector<64xf32>
    %124 = vector.multi_reduction <maximumf>, %123, %cst_55 [1] : vector<64x64xf32> to vector<64xf32>
    %125 = vector.shape_cast %124 : vector<64xf32> to vector<64x1xf32>
    %126 = vector.broadcast %125 : vector<64x1xf32> to vector<64x64xf32>
    %127 = arith.subf %123, %126 : vector<64x64xf32>
    %128 = math.exp %127 : vector<64x64xf32>
    %cst_56 = arith.constant dense<0.000000e+00> : vector<64xf32>
    %129 = vector.multi_reduction <add>, %128, %cst_56 [1] : vector<64x64xf32> to vector<64xf32>
    %130 = vector.shape_cast %129 : vector<64xf32> to vector<64x1xf32>
    %131 = tpu.reciprocal %130 {approx = true} : vector<64x1xf32> -> vector<64x1xf32>
    %132 = vector.broadcast %131 : vector<64x1xf32> to vector<64x64xf32>
    %133 = arith.mulf %128, %132 : vector<64x64xf32>
    %134 = arith.truncf %133 : vector<64x64xf32> to vector<64x64xbf16>
    %cst_57 = arith.constant dense<0.000000e+00> : vector<64x8xf32>
    %135 = tpu.matmul %134, %120, %cst_57 {dimension_numbers = #tpu.dot_dimension_numbers<[1], [0], [0], [1], [0, 0, 1, 1], [], []>} : vector<64x64xbf16>, vector<64x8xbf16>, vector<64x8xf32> -> vector<64x8xf32>
    %136 = arith.truncf %135 : vector<64x8xf32> to vector<64x8xbf16>
    %c2_58 = arith.constant 2 : index
    %c0_59 = arith.constant 0 : index
    %c0_60 = arith.constant 0 : index
    %137 = vector.load %arg4[%c2_58, %c0_59, %c0_60] : memref<8x8x32xbf16, #tpu.memory_space<vmem>>, vector<1x8x32xbf16>
    %138 = vector.shape_cast %137 : vector<1x8x32xbf16> to vector<8x32xbf16>
    %cst_61 = arith.constant dense<0.000000e+00> : vector<64x32xf32>
    %139 = tpu.matmul %136, %138, %cst_61 {dimension_numbers = #tpu.dot_dimension_numbers<[1], [0], [0], [1], [0, 0, 1, 1], [], []>} : vector<64x8xbf16>, vector<8x32xbf16>, vector<64x32xf32> -> vector<64x32xf32>
    %140 = arith.addf %99, %139 : vector<64x32xf32>
    %c9 = arith.constant 9 : index
    %c0_62 = arith.constant 0 : index
    %c0_63 = arith.constant 0 : index
    %141 = vector.load %arg3[%c9, %c0_62, %c0_63] : memref<24x32x8xbf16, #tpu.memory_space<vmem>>, vector<1x32x8xbf16>
    %142 = vector.shape_cast %141 : vector<1x32x8xbf16> to vector<32x8xbf16>
    %cst_64 = arith.constant dense<0.000000e+00> : vector<64x8xf32>
    %143 = tpu.matmul %16, %142, %cst_64 {dimension_numbers = #tpu.dot_dimension_numbers<[1], [0], [0], [1], [0, 0, 1, 1], [], []>} : vector<64x32xbf16>, vector<32x8xbf16>, vector<64x8xf32> -> vector<64x8xf32>
    %144 = vector.extract_strided_slice %8 {offsets = [0, 24], sizes = [1, 8], strides = [1, 1]} : vector<1x96xf32> to vector<1x8xf32>
    %145 = vector.broadcast %144 : vector<1x8xf32> to vector<64x8xf32>
    %146 = arith.addf %143, %145 : vector<64x8xf32>
    %147 = arith.truncf %146 : vector<64x8xf32> to vector<64x8xbf16>
    %c10 = arith.constant 10 : index
    %c0_65 = arith.constant 0 : index
    %c0_66 = arith.constant 0 : index
    %148 = vector.load %arg3[%c10, %c0_65, %c0_66] : memref<24x32x8xbf16, #tpu.memory_space<vmem>>, vector<1x32x8xbf16>
    %149 = vector.shape_cast %148 : vector<1x32x8xbf16> to vector<32x8xbf16>
    %cst_67 = arith.constant dense<0.000000e+00> : vector<64x8xf32>
    %150 = tpu.matmul %16, %149, %cst_67 {dimension_numbers = #tpu.dot_dimension_numbers<[1], [0], [0], [1], [0, 0, 1, 1], [], []>} : vector<64x32xbf16>, vector<32x8xbf16>, vector<64x8xf32> -> vector<64x8xf32>
    %151 = vector.extract_strided_slice %8 {offsets = [0, 56], sizes = [1, 8], strides = [1, 1]} : vector<1x96xf32> to vector<1x8xf32>
    %152 = vector.broadcast %151 : vector<1x8xf32> to vector<64x8xf32>
    %153 = arith.addf %150, %152 : vector<64x8xf32>
    %154 = arith.truncf %153 : vector<64x8xf32> to vector<64x8xbf16>
    %c11 = arith.constant 11 : index
    %c0_68 = arith.constant 0 : index
    %c0_69 = arith.constant 0 : index
    %155 = vector.load %arg3[%c11, %c0_68, %c0_69] : memref<24x32x8xbf16, #tpu.memory_space<vmem>>, vector<1x32x8xbf16>
    %156 = vector.shape_cast %155 : vector<1x32x8xbf16> to vector<32x8xbf16>
    %cst_70 = arith.constant dense<0.000000e+00> : vector<64x8xf32>
    %157 = tpu.matmul %16, %156, %cst_70 {dimension_numbers = #tpu.dot_dimension_numbers<[1], [0], [0], [1], [0, 0, 1, 1], [], []>} : vector<64x32xbf16>, vector<32x8xbf16>, vector<64x8xf32> -> vector<64x8xf32>
    %158 = vector.extract_strided_slice %8 {offsets = [0, 88], sizes = [1, 8], strides = [1, 1]} : vector<1x96xf32> to vector<1x8xf32>
    %159 = vector.broadcast %158 : vector<1x8xf32> to vector<64x8xf32>
    %160 = arith.addf %157, %159 : vector<64x8xf32>
    %161 = arith.truncf %160 : vector<64x8xf32> to vector<64x8xbf16>
    %cst_71 = arith.constant dense<0.000000e+00> : vector<64x64xf32>
    %162 = tpu.matmul %147, %154, %cst_71 {dimension_numbers = #tpu.dot_dimension_numbers<[1], [1], [0], [0], [0, 0, 1, 0], [], []>} : vector<64x8xbf16>, vector<64x8xbf16>, vector<64x64xf32> -> vector<64x64xf32>
    %cst_72 = arith.constant 0.353553385 : f32
    %163 = vector.broadcast %cst_72 : f32 to vector<64x64xf32>
    %164 = arith.mulf %162, %163 : vector<64x64xf32>
    %cst_73 = arith.constant dense<0xFF800000> : vector<64xf32>
    %165 = vector.multi_reduction <maximumf>, %164, %cst_73 [1] : vector<64x64xf32> to vector<64xf32>
    %166 = vector.shape_cast %165 : vector<64xf32> to vector<64x1xf32>
    %167 = vector.broadcast %166 : vector<64x1xf32> to vector<64x64xf32>
    %168 = arith.subf %164, %167 : vector<64x64xf32>
    %169 = math.exp %168 : vector<64x64xf32>
    %cst_74 = arith.constant dense<0.000000e+00> : vector<64xf32>
    %170 = vector.multi_reduction <add>, %169, %cst_74 [1] : vector<64x64xf32> to vector<64xf32>
    %171 = vector.shape_cast %170 : vector<64xf32> to vector<64x1xf32>
    %172 = tpu.reciprocal %171 {approx = true} : vector<64x1xf32> -> vector<64x1xf32>
    %173 = vector.broadcast %172 : vector<64x1xf32> to vector<64x64xf32>
    %174 = arith.mulf %169, %173 : vector<64x64xf32>
    %175 = arith.truncf %174 : vector<64x64xf32> to vector<64x64xbf16>
    %cst_75 = arith.constant dense<0.000000e+00> : vector<64x8xf32>
    %176 = tpu.matmul %175, %161, %cst_75 {dimension_numbers = #tpu.dot_dimension_numbers<[1], [0], [0], [1], [0, 0, 1, 1], [], []>} : vector<64x64xbf16>, vector<64x8xbf16>, vector<64x8xf32> -> vector<64x8xf32>
    %177 = arith.truncf %176 : vector<64x8xf32> to vector<64x8xbf16>
    %c3_76 = arith.constant 3 : index
    %c0_77 = arith.constant 0 : index
    %c0_78 = arith.constant 0 : index
    %178 = vector.load %arg4[%c3_76, %c0_77, %c0_78] : memref<8x8x32xbf16, #tpu.memory_space<vmem>>, vector<1x8x32xbf16>
    %179 = vector.shape_cast %178 : vector<1x8x32xbf16> to vector<8x32xbf16>
    %cst_79 = arith.constant dense<0.000000e+00> : vector<64x32xf32>
    %180 = tpu.matmul %177, %179, %cst_79 {dimension_numbers = #tpu.dot_dimension_numbers<[1], [0], [0], [1], [0, 0, 1, 1], [], []>} : vector<64x8xbf16>, vector<8x32xbf16>, vector<64x32xf32> -> vector<64x32xf32>
    %181 = arith.addf %140, %180 : vector<64x32xf32>
    %182 = vector.broadcast %9 : vector<1x32xf32> to vector<64x32xf32>
    %183 = arith.addf %181, %182 : vector<64x32xf32>
    %184 = arith.addf %183, %5 : vector<64x32xf32>
    %cst_80 = arith.constant dense<0.000000e+00> : vector<64xf32>
    %185 = vector.multi_reduction <add>, %184, %cst_80 [1] : vector<64x32xf32> to vector<64xf32>
    %186 = vector.shape_cast %185 : vector<64xf32> to vector<64x1xf32>
    %cst_81 = arith.constant 3.200000e+01 : f32
    %187 = vector.broadcast %cst_81 : f32 to vector<64x1xf32>
    %188 = arith.divf %186, %187 : vector<64x1xf32>
    %189 = vector.broadcast %188 : vector<64x1xf32> to vector<64x32xf32>
    %190 = arith.subf %184, %189 : vector<64x32xf32>
    %191 = arith.mulf %190, %190 : vector<64x32xf32>
    %cst_82 = arith.constant dense<0.000000e+00> : vector<64xf32>
    %192 = vector.multi_reduction <add>, %191, %cst_82 [1] : vector<64x32xf32> to vector<64xf32>
    %193 = vector.shape_cast %192 : vector<64xf32> to vector<64x1xf32>
    %cst_83 = arith.constant 3.200000e+01 : f32
    %194 = vector.broadcast %cst_83 : f32 to vector<64x1xf32>
    %195 = arith.divf %193, %194 : vector<64x1xf32>
    %196 = vector.broadcast %188 : vector<64x1xf32> to vector<64x32xf32>
    %197 = arith.subf %184, %196 : vector<64x32xf32>
    %cst_84 = arith.constant 9.99999996E-13 : f32
    %198 = vector.broadcast %cst_84 : f32 to vector<64x1xf32>
    %199 = arith.addf %195, %198 : vector<64x1xf32>
    %200 = math.rsqrt %199 : vector<64x1xf32>
    %201 = vector.broadcast %200 : vector<64x1xf32> to vector<64x32xf32>
    %202 = arith.mulf %197, %201 : vector<64x32xf32>
    %203 = vector.broadcast %10 : vector<1x32xf32> to vector<64x32xf32>
    %204 = arith.mulf %203, %202 : vector<64x32xf32>
    %205 = vector.broadcast %11 : vector<1x32xf32> to vector<64x32xf32>
    %206 = arith.addf %204, %205 : vector<64x32xf32>
    %207 = arith.truncf %206 : vector<64x32xf32> to vector<64x32xbf16>
    %c0_85 = arith.constant 0 : index
    %c0_86 = arith.constant 0 : index
    %c0_87 = arith.constant 0 : index
    %208 = vector.load %arg5[%c0_85, %c0_86, %c0_87] : memref<2x32x64xbf16, #tpu.memory_space<vmem>>, vector<1x32x64xbf16>
    %209 = vector.shape_cast %208 : vector<1x32x64xbf16> to vector<32x64xbf16>
    %cst_88 = arith.constant dense<0.000000e+00> : vector<64x64xf32>
    %210 = tpu.matmul %207, %209, %cst_88 {dimension_numbers = #tpu.dot_dimension_numbers<[1], [0], [0], [1], [0, 0, 1, 1], [], []>} : vector<64x32xbf16>, vector<32x64xbf16>, vector<64x64xf32> -> vector<64x64xf32>
    %211 = vector.broadcast %12 : vector<1x64xf32> to vector<64x64xf32>
    %212 = arith.addf %210, %211 : vector<64x64xf32>
    %cst_89 = arith.constant 0.000000e+00 : f32
    %213 = vector.broadcast %cst_89 : f32 to vector<64x64xf32>
    %214 = arith.maximumf %212, %213 : vector<64x64xf32>
    %215 = arith.truncf %214 : vector<64x64xf32> to vector<64x64xbf16>
    %c0_90 = arith.constant 0 : index
    %c0_91 = arith.constant 0 : index
    %c0_92 = arith.constant 0 : index
    %216 = vector.load %arg6[%c0_90, %c0_91, %c0_92] : memref<2x64x32xbf16, #tpu.memory_space<vmem>>, vector<1x64x32xbf16>
    %217 = vector.shape_cast %216 : vector<1x64x32xbf16> to vector<64x32xbf16>
    %cst_93 = arith.constant dense<0.000000e+00> : vector<64x32xf32>
    %218 = tpu.matmul %215, %217, %cst_93 {dimension_numbers = #tpu.dot_dimension_numbers<[1], [0], [0], [1], [0, 0, 1, 1], [], []>} : vector<64x64xbf16>, vector<64x32xbf16>, vector<64x32xf32> -> vector<64x32xf32>
    %219 = vector.broadcast %13 : vector<1x32xf32> to vector<64x32xf32>
    %220 = arith.addf %218, %219 : vector<64x32xf32>
    %221 = arith.addf %220, %206 : vector<64x32xf32>
    %cst_94 = arith.constant dense<0.000000e+00> : vector<64xf32>
    %222 = vector.multi_reduction <add>, %221, %cst_94 [1] : vector<64x32xf32> to vector<64xf32>
    %223 = vector.shape_cast %222 : vector<64xf32> to vector<64x1xf32>
    %cst_95 = arith.constant 3.200000e+01 : f32
    %224 = vector.broadcast %cst_95 : f32 to vector<64x1xf32>
    %225 = arith.divf %223, %224 : vector<64x1xf32>
    %226 = vector.broadcast %225 : vector<64x1xf32> to vector<64x32xf32>
    %227 = arith.subf %221, %226 : vector<64x32xf32>
    %228 = arith.mulf %227, %227 : vector<64x32xf32>
    %cst_96 = arith.constant dense<0.000000e+00> : vector<64xf32>
    %229 = vector.multi_reduction <add>, %228, %cst_96 [1] : vector<64x32xf32> to vector<64xf32>
    %230 = vector.shape_cast %229 : vector<64xf32> to vector<64x1xf32>
    %cst_97 = arith.constant 3.200000e+01 : f32
    %231 = vector.broadcast %cst_97 : f32 to vector<64x1xf32>
    %232 = arith.divf %230, %231 : vector<64x1xf32>
    %233 = vector.broadcast %225 : vector<64x1xf32> to vector<64x32xf32>
    %234 = arith.subf %221, %233 : vector<64x32xf32>
    %cst_98 = arith.constant 9.99999996E-13 : f32
    %235 = vector.broadcast %cst_98 : f32 to vector<64x1xf32>
    %236 = arith.addf %232, %235 : vector<64x1xf32>
    %237 = math.rsqrt %236 : vector<64x1xf32>
    %238 = vector.broadcast %237 : vector<64x1xf32> to vector<64x32xf32>
    %239 = arith.mulf %234, %238 : vector<64x32xf32>
    %240 = vector.broadcast %14 : vector<1x32xf32> to vector<64x32xf32>
    %241 = arith.mulf %240, %239 : vector<64x32xf32>
    %242 = vector.broadcast %15 : vector<1x32xf32> to vector<64x32xf32>
    %243 = arith.addf %241, %242 : vector<64x32xf32>
    %c1_99 = arith.constant 1 : index
    %c0_100 = arith.constant 0 : index
    %c0_101 = arith.constant 0 : index
    %244 = vector.load %arg7[%c1_99, %c0_100, %c0_101] : memref<2x8x96xf32, #tpu.memory_space<vmem>>, vector<1x8x96xf32>
    %245 = vector.shape_cast %244 : vector<1x8x96xf32> to vector<8x96xf32>
    %246 = vector.extract_strided_slice %245 {offsets = [0, 0], sizes = [1, 96], strides = [1, 1]} : vector<8x96xf32> to vector<1x96xf32>
    %247 = vector.extract_strided_slice %245 {offsets = [1, 0], sizes = [1, 32], strides = [1, 1]} : vector<8x96xf32> to vector<1x32xf32>
    %248 = vector.extract_strided_slice %245 {offsets = [2, 0], sizes = [1, 32], strides = [1, 1]} : vector<8x96xf32> to vector<1x32xf32>
    %249 = vector.extract_strided_slice %245 {offsets = [3, 0], sizes = [1, 32], strides = [1, 1]} : vector<8x96xf32> to vector<1x32xf32>
    %250 = vector.extract_strided_slice %245 {offsets = [4, 0], sizes = [1, 64], strides = [1, 1]} : vector<8x96xf32> to vector<1x64xf32>
    %251 = vector.extract_strided_slice %245 {offsets = [5, 0], sizes = [1, 32], strides = [1, 1]} : vector<8x96xf32> to vector<1x32xf32>
    %252 = vector.extract_strided_slice %245 {offsets = [6, 0], sizes = [1, 32], strides = [1, 1]} : vector<8x96xf32> to vector<1x32xf32>
    %253 = vector.extract_strided_slice %245 {offsets = [7, 0], sizes = [1, 32], strides = [1, 1]} : vector<8x96xf32> to vector<1x32xf32>
    %254 = arith.truncf %243 : vector<64x32xf32> to vector<64x32xbf16>
    %cst_102 = arith.constant 0.000000e+00 : f32
    %255 = vector.broadcast %cst_102 : f32 to vector<64x32xf32>
    %c12 = arith.constant 12 : index
    %c0_103 = arith.constant 0 : index
    %c0_104 = arith.constant 0 : index
    %256 = vector.load %arg3[%c12, %c0_103, %c0_104] : memref<24x32x8xbf16, #tpu.memory_space<vmem>>, vector<1x32x8xbf16>
    %257 = vector.shape_cast %256 : vector<1x32x8xbf16> to vector<32x8xbf16>
    %cst_105 = arith.constant dense<0.000000e+00> : vector<64x8xf32>
    %258 = tpu.matmul %254, %257, %cst_105 {dimension_numbers = #tpu.dot_dimension_numbers<[1], [0], [0], [1], [0, 0, 1, 1], [], []>} : vector<64x32xbf16>, vector<32x8xbf16>, vector<64x8xf32> -> vector<64x8xf32>
    %259 = vector.extract_strided_slice %246 {offsets = [0, 0], sizes = [1, 8], strides = [1, 1]} : vector<1x96xf32> to vector<1x8xf32>
    %260 = vector.broadcast %259 : vector<1x8xf32> to vector<64x8xf32>
    %261 = arith.addf %258, %260 : vector<64x8xf32>
    %262 = arith.truncf %261 : vector<64x8xf32> to vector<64x8xbf16>
    %c13 = arith.constant 13 : index
    %c0_106 = arith.constant 0 : index
    %c0_107 = arith.constant 0 : index
    %263 = vector.load %arg3[%c13, %c0_106, %c0_107] : memref<24x32x8xbf16, #tpu.memory_space<vmem>>, vector<1x32x8xbf16>
    %264 = vector.shape_cast %263 : vector<1x32x8xbf16> to vector<32x8xbf16>
    %cst_108 = arith.constant dense<0.000000e+00> : vector<64x8xf32>
    %265 = tpu.matmul %254, %264, %cst_108 {dimension_numbers = #tpu.dot_dimension_numbers<[1], [0], [0], [1], [0, 0, 1, 1], [], []>} : vector<64x32xbf16>, vector<32x8xbf16>, vector<64x8xf32> -> vector<64x8xf32>
    %266 = vector.extract_strided_slice %246 {offsets = [0, 32], sizes = [1, 8], strides = [1, 1]} : vector<1x96xf32> to vector<1x8xf32>
    %267 = vector.broadcast %266 : vector<1x8xf32> to vector<64x8xf32>
    %268 = arith.addf %265, %267 : vector<64x8xf32>
    %269 = arith.truncf %268 : vector<64x8xf32> to vector<64x8xbf16>
    %c14 = arith.constant 14 : index
    %c0_109 = arith.constant 0 : index
    %c0_110 = arith.constant 0 : index
    %270 = vector.load %arg3[%c14, %c0_109, %c0_110] : memref<24x32x8xbf16, #tpu.memory_space<vmem>>, vector<1x32x8xbf16>
    %271 = vector.shape_cast %270 : vector<1x32x8xbf16> to vector<32x8xbf16>
    %cst_111 = arith.constant dense<0.000000e+00> : vector<64x8xf32>
    %272 = tpu.matmul %254, %271, %cst_111 {dimension_numbers = #tpu.dot_dimension_numbers<[1], [0], [0], [1], [0, 0, 1, 1], [], []>} : vector<64x32xbf16>, vector<32x8xbf16>, vector<64x8xf32> -> vector<64x8xf32>
    %273 = vector.extract_strided_slice %246 {offsets = [0, 64], sizes = [1, 8], strides = [1, 1]} : vector<1x96xf32> to vector<1x8xf32>
    %274 = vector.broadcast %273 : vector<1x8xf32> to vector<64x8xf32>
    %275 = arith.addf %272, %274 : vector<64x8xf32>
    %276 = arith.truncf %275 : vector<64x8xf32> to vector<64x8xbf16>
    %cst_112 = arith.constant dense<0.000000e+00> : vector<64x64xf32>
    %277 = tpu.matmul %262, %269, %cst_112 {dimension_numbers = #tpu.dot_dimension_numbers<[1], [1], [0], [0], [0, 0, 1, 0], [], []>} : vector<64x8xbf16>, vector<64x8xbf16>, vector<64x64xf32> -> vector<64x64xf32>
    %cst_113 = arith.constant 0.353553385 : f32
    %278 = vector.broadcast %cst_113 : f32 to vector<64x64xf32>
    %279 = arith.mulf %277, %278 : vector<64x64xf32>
    %cst_114 = arith.constant dense<0xFF800000> : vector<64xf32>
    %280 = vector.multi_reduction <maximumf>, %279, %cst_114 [1] : vector<64x64xf32> to vector<64xf32>
    %281 = vector.shape_cast %280 : vector<64xf32> to vector<64x1xf32>
    %282 = vector.broadcast %281 : vector<64x1xf32> to vector<64x64xf32>
    %283 = arith.subf %279, %282 : vector<64x64xf32>
    %284 = math.exp %283 : vector<64x64xf32>
    %cst_115 = arith.constant dense<0.000000e+00> : vector<64xf32>
    %285 = vector.multi_reduction <add>, %284, %cst_115 [1] : vector<64x64xf32> to vector<64xf32>
    %286 = vector.shape_cast %285 : vector<64xf32> to vector<64x1xf32>
    %287 = tpu.reciprocal %286 {approx = true} : vector<64x1xf32> -> vector<64x1xf32>
    %288 = vector.broadcast %287 : vector<64x1xf32> to vector<64x64xf32>
    %289 = arith.mulf %284, %288 : vector<64x64xf32>
    %290 = arith.truncf %289 : vector<64x64xf32> to vector<64x64xbf16>
    %cst_116 = arith.constant dense<0.000000e+00> : vector<64x8xf32>
    %291 = tpu.matmul %290, %276, %cst_116 {dimension_numbers = #tpu.dot_dimension_numbers<[1], [0], [0], [1], [0, 0, 1, 1], [], []>} : vector<64x64xbf16>, vector<64x8xbf16>, vector<64x8xf32> -> vector<64x8xf32>
    %292 = arith.truncf %291 : vector<64x8xf32> to vector<64x8xbf16>
    %c4_117 = arith.constant 4 : index
    %c0_118 = arith.constant 0 : index
    %c0_119 = arith.constant 0 : index
    %293 = vector.load %arg4[%c4_117, %c0_118, %c0_119] : memref<8x8x32xbf16, #tpu.memory_space<vmem>>, vector<1x8x32xbf16>
    %294 = vector.shape_cast %293 : vector<1x8x32xbf16> to vector<8x32xbf16>
    %cst_120 = arith.constant dense<0.000000e+00> : vector<64x32xf32>
    %295 = tpu.matmul %292, %294, %cst_120 {dimension_numbers = #tpu.dot_dimension_numbers<[1], [0], [0], [1], [0, 0, 1, 1], [], []>} : vector<64x8xbf16>, vector<8x32xbf16>, vector<64x32xf32> -> vector<64x32xf32>
    %296 = arith.addf %255, %295 : vector<64x32xf32>
    %c15 = arith.constant 15 : index
    %c0_121 = arith.constant 0 : index
    %c0_122 = arith.constant 0 : index
    %297 = vector.load %arg3[%c15, %c0_121, %c0_122] : memref<24x32x8xbf16, #tpu.memory_space<vmem>>, vector<1x32x8xbf16>
    %298 = vector.shape_cast %297 : vector<1x32x8xbf16> to vector<32x8xbf16>
    %cst_123 = arith.constant dense<0.000000e+00> : vector<64x8xf32>
    %299 = tpu.matmul %254, %298, %cst_123 {dimension_numbers = #tpu.dot_dimension_numbers<[1], [0], [0], [1], [0, 0, 1, 1], [], []>} : vector<64x32xbf16>, vector<32x8xbf16>, vector<64x8xf32> -> vector<64x8xf32>
    %300 = vector.extract_strided_slice %246 {offsets = [0, 8], sizes = [1, 8], strides = [1, 1]} : vector<1x96xf32> to vector<1x8xf32>
    %301 = vector.broadcast %300 : vector<1x8xf32> to vector<64x8xf32>
    %302 = arith.addf %299, %301 : vector<64x8xf32>
    %303 = arith.truncf %302 : vector<64x8xf32> to vector<64x8xbf16>
    %c16 = arith.constant 16 : index
    %c0_124 = arith.constant 0 : index
    %c0_125 = arith.constant 0 : index
    %304 = vector.load %arg3[%c16, %c0_124, %c0_125] : memref<24x32x8xbf16, #tpu.memory_space<vmem>>, vector<1x32x8xbf16>
    %305 = vector.shape_cast %304 : vector<1x32x8xbf16> to vector<32x8xbf16>
    %cst_126 = arith.constant dense<0.000000e+00> : vector<64x8xf32>
    %306 = tpu.matmul %254, %305, %cst_126 {dimension_numbers = #tpu.dot_dimension_numbers<[1], [0], [0], [1], [0, 0, 1, 1], [], []>} : vector<64x32xbf16>, vector<32x8xbf16>, vector<64x8xf32> -> vector<64x8xf32>
    %307 = vector.extract_strided_slice %246 {offsets = [0, 40], sizes = [1, 8], strides = [1, 1]} : vector<1x96xf32> to vector<1x8xf32>
    %308 = vector.broadcast %307 : vector<1x8xf32> to vector<64x8xf32>
    %309 = arith.addf %306, %308 : vector<64x8xf32>
    %310 = arith.truncf %309 : vector<64x8xf32> to vector<64x8xbf16>
    %c17 = arith.constant 17 : index
    %c0_127 = arith.constant 0 : index
    %c0_128 = arith.constant 0 : index
    %311 = vector.load %arg3[%c17, %c0_127, %c0_128] : memref<24x32x8xbf16, #tpu.memory_space<vmem>>, vector<1x32x8xbf16>
    %312 = vector.shape_cast %311 : vector<1x32x8xbf16> to vector<32x8xbf16>
    %cst_129 = arith.constant dense<0.000000e+00> : vector<64x8xf32>
    %313 = tpu.matmul %254, %312, %cst_129 {dimension_numbers = #tpu.dot_dimension_numbers<[1], [0], [0], [1], [0, 0, 1, 1], [], []>} : vector<64x32xbf16>, vector<32x8xbf16>, vector<64x8xf32> -> vector<64x8xf32>
    %314 = vector.extract_strided_slice %246 {offsets = [0, 72], sizes = [1, 8], strides = [1, 1]} : vector<1x96xf32> to vector<1x8xf32>
    %315 = vector.broadcast %314 : vector<1x8xf32> to vector<64x8xf32>
    %316 = arith.addf %313, %315 : vector<64x8xf32>
    %317 = arith.truncf %316 : vector<64x8xf32> to vector<64x8xbf16>
    %cst_130 = arith.constant dense<0.000000e+00> : vector<64x64xf32>
    %318 = tpu.matmul %303, %310, %cst_130 {dimension_numbers = #tpu.dot_dimension_numbers<[1], [1], [0], [0], [0, 0, 1, 0], [], []>} : vector<64x8xbf16>, vector<64x8xbf16>, vector<64x64xf32> -> vector<64x64xf32>
    %cst_131 = arith.constant 0.353553385 : f32
    %319 = vector.broadcast %cst_131 : f32 to vector<64x64xf32>
    %320 = arith.mulf %318, %319 : vector<64x64xf32>
    %cst_132 = arith.constant dense<0xFF800000> : vector<64xf32>
    %321 = vector.multi_reduction <maximumf>, %320, %cst_132 [1] : vector<64x64xf32> to vector<64xf32>
    %322 = vector.shape_cast %321 : vector<64xf32> to vector<64x1xf32>
    %323 = vector.broadcast %322 : vector<64x1xf32> to vector<64x64xf32>
    %324 = arith.subf %320, %323 : vector<64x64xf32>
    %325 = math.exp %324 : vector<64x64xf32>
    %cst_133 = arith.constant dense<0.000000e+00> : vector<64xf32>
    %326 = vector.multi_reduction <add>, %325, %cst_133 [1] : vector<64x64xf32> to vector<64xf32>
    %327 = vector.shape_cast %326 : vector<64xf32> to vector<64x1xf32>
    %328 = tpu.reciprocal %327 {approx = true} : vector<64x1xf32> -> vector<64x1xf32>
    %329 = vector.broadcast %328 : vector<64x1xf32> to vector<64x64xf32>
    %330 = arith.mulf %325, %329 : vector<64x64xf32>
    %331 = arith.truncf %330 : vector<64x64xf32> to vector<64x64xbf16>
    %cst_134 = arith.constant dense<0.000000e+00> : vector<64x8xf32>
    %332 = tpu.matmul %331, %317, %cst_134 {dimension_numbers = #tpu.dot_dimension_numbers<[1], [0], [0], [1], [0, 0, 1, 1], [], []>} : vector<64x64xbf16>, vector<64x8xbf16>, vector<64x8xf32> -> vector<64x8xf32>
    %333 = arith.truncf %332 : vector<64x8xf32> to vector<64x8xbf16>
    %c5_135 = arith.constant 5 : index
    %c0_136 = arith.constant 0 : index
    %c0_137 = arith.constant 0 : index
    %334 = vector.load %arg4[%c5_135, %c0_136, %c0_137] : memref<8x8x32xbf16, #tpu.memory_space<vmem>>, vector<1x8x32xbf16>
    %335 = vector.shape_cast %334 : vector<1x8x32xbf16> to vector<8x32xbf16>
    %cst_138 = arith.constant dense<0.000000e+00> : vector<64x32xf32>
    %336 = tpu.matmul %333, %335, %cst_138 {dimension_numbers = #tpu.dot_dimension_numbers<[1], [0], [0], [1], [0, 0, 1, 1], [], []>} : vector<64x8xbf16>, vector<8x32xbf16>, vector<64x32xf32> -> vector<64x32xf32>
    %337 = arith.addf %296, %336 : vector<64x32xf32>
    %c18 = arith.constant 18 : index
    %c0_139 = arith.constant 0 : index
    %c0_140 = arith.constant 0 : index
    %338 = vector.load %arg3[%c18, %c0_139, %c0_140] : memref<24x32x8xbf16, #tpu.memory_space<vmem>>, vector<1x32x8xbf16>
    %339 = vector.shape_cast %338 : vector<1x32x8xbf16> to vector<32x8xbf16>
    %cst_141 = arith.constant dense<0.000000e+00> : vector<64x8xf32>
    %340 = tpu.matmul %254, %339, %cst_141 {dimension_numbers = #tpu.dot_dimension_numbers<[1], [0], [0], [1], [0, 0, 1, 1], [], []>} : vector<64x32xbf16>, vector<32x8xbf16>, vector<64x8xf32> -> vector<64x8xf32>
    %341 = vector.extract_strided_slice %246 {offsets = [0, 16], sizes = [1, 8], strides = [1, 1]} : vector<1x96xf32> to vector<1x8xf32>
    %342 = vector.broadcast %341 : vector<1x8xf32> to vector<64x8xf32>
    %343 = arith.addf %340, %342 : vector<64x8xf32>
    %344 = arith.truncf %343 : vector<64x8xf32> to vector<64x8xbf16>
    %c19 = arith.constant 19 : index
    %c0_142 = arith.constant 0 : index
    %c0_143 = arith.constant 0 : index
    %345 = vector.load %arg3[%c19, %c0_142, %c0_143] : memref<24x32x8xbf16, #tpu.memory_space<vmem>>, vector<1x32x8xbf16>
    %346 = vector.shape_cast %345 : vector<1x32x8xbf16> to vector<32x8xbf16>
    %cst_144 = arith.constant dense<0.000000e+00> : vector<64x8xf32>
    %347 = tpu.matmul %254, %346, %cst_144 {dimension_numbers = #tpu.dot_dimension_numbers<[1], [0], [0], [1], [0, 0, 1, 1], [], []>} : vector<64x32xbf16>, vector<32x8xbf16>, vector<64x8xf32> -> vector<64x8xf32>
    %348 = vector.extract_strided_slice %246 {offsets = [0, 48], sizes = [1, 8], strides = [1, 1]} : vector<1x96xf32> to vector<1x8xf32>
    %349 = vector.broadcast %348 : vector<1x8xf32> to vector<64x8xf32>
    %350 = arith.addf %347, %349 : vector<64x8xf32>
    %351 = arith.truncf %350 : vector<64x8xf32> to vector<64x8xbf16>
    %c20 = arith.constant 20 : index
    %c0_145 = arith.constant 0 : index
    %c0_146 = arith.constant 0 : index
    %352 = vector.load %arg3[%c20, %c0_145, %c0_146] : memref<24x32x8xbf16, #tpu.memory_space<vmem>>, vector<1x32x8xbf16>
    %353 = vector.shape_cast %352 : vector<1x32x8xbf16> to vector<32x8xbf16>
    %cst_147 = arith.constant dense<0.000000e+00> : vector<64x8xf32>
    %354 = tpu.matmul %254, %353, %cst_147 {dimension_numbers = #tpu.dot_dimension_numbers<[1], [0], [0], [1], [0, 0, 1, 1], [], []>} : vector<64x32xbf16>, vector<32x8xbf16>, vector<64x8xf32> -> vector<64x8xf32>
    %355 = vector.extract_strided_slice %246 {offsets = [0, 80], sizes = [1, 8], strides = [1, 1]} : vector<1x96xf32> to vector<1x8xf32>
    %356 = vector.broadcast %355 : vector<1x8xf32> to vector<64x8xf32>
    %357 = arith.addf %354, %356 : vector<64x8xf32>
    %358 = arith.truncf %357 : vector<64x8xf32> to vector<64x8xbf16>
    %cst_148 = arith.constant dense<0.000000e+00> : vector<64x64xf32>
    %359 = tpu.matmul %344, %351, %cst_148 {dimension_numbers = #tpu.dot_dimension_numbers<[1], [1], [0], [0], [0, 0, 1, 0], [], []>} : vector<64x8xbf16>, vector<64x8xbf16>, vector<64x64xf32> -> vector<64x64xf32>
    %cst_149 = arith.constant 0.353553385 : f32
    %360 = vector.broadcast %cst_149 : f32 to vector<64x64xf32>
    %361 = arith.mulf %359, %360 : vector<64x64xf32>
    %cst_150 = arith.constant dense<0xFF800000> : vector<64xf32>
    %362 = vector.multi_reduction <maximumf>, %361, %cst_150 [1] : vector<64x64xf32> to vector<64xf32>
    %363 = vector.shape_cast %362 : vector<64xf32> to vector<64x1xf32>
    %364 = vector.broadcast %363 : vector<64x1xf32> to vector<64x64xf32>
    %365 = arith.subf %361, %364 : vector<64x64xf32>
    %366 = math.exp %365 : vector<64x64xf32>
    %cst_151 = arith.constant dense<0.000000e+00> : vector<64xf32>
    %367 = vector.multi_reduction <add>, %366, %cst_151 [1] : vector<64x64xf32> to vector<64xf32>
    %368 = vector.shape_cast %367 : vector<64xf32> to vector<64x1xf32>
    %369 = tpu.reciprocal %368 {approx = true} : vector<64x1xf32> -> vector<64x1xf32>
    %370 = vector.broadcast %369 : vector<64x1xf32> to vector<64x64xf32>
    %371 = arith.mulf %366, %370 : vector<64x64xf32>
    %372 = arith.truncf %371 : vector<64x64xf32> to vector<64x64xbf16>
    %cst_152 = arith.constant dense<0.000000e+00> : vector<64x8xf32>
    %373 = tpu.matmul %372, %358, %cst_152 {dimension_numbers = #tpu.dot_dimension_numbers<[1], [0], [0], [1], [0, 0, 1, 1], [], []>} : vector<64x64xbf16>, vector<64x8xbf16>, vector<64x8xf32> -> vector<64x8xf32>
    %374 = arith.truncf %373 : vector<64x8xf32> to vector<64x8xbf16>
    %c6_153 = arith.constant 6 : index
    %c0_154 = arith.constant 0 : index
    %c0_155 = arith.constant 0 : index
    %375 = vector.load %arg4[%c6_153, %c0_154, %c0_155] : memref<8x8x32xbf16, #tpu.memory_space<vmem>>, vector<1x8x32xbf16>
    %376 = vector.shape_cast %375 : vector<1x8x32xbf16> to vector<8x32xbf16>
    %cst_156 = arith.constant dense<0.000000e+00> : vector<64x32xf32>
    %377 = tpu.matmul %374, %376, %cst_156 {dimension_numbers = #tpu.dot_dimension_numbers<[1], [0], [0], [1], [0, 0, 1, 1], [], []>} : vector<64x8xbf16>, vector<8x32xbf16>, vector<64x32xf32> -> vector<64x32xf32>
    %378 = arith.addf %337, %377 : vector<64x32xf32>
    %c21 = arith.constant 21 : index
    %c0_157 = arith.constant 0 : index
    %c0_158 = arith.constant 0 : index
    %379 = vector.load %arg3[%c21, %c0_157, %c0_158] : memref<24x32x8xbf16, #tpu.memory_space<vmem>>, vector<1x32x8xbf16>
    %380 = vector.shape_cast %379 : vector<1x32x8xbf16> to vector<32x8xbf16>
    %cst_159 = arith.constant dense<0.000000e+00> : vector<64x8xf32>
    %381 = tpu.matmul %254, %380, %cst_159 {dimension_numbers = #tpu.dot_dimension_numbers<[1], [0], [0], [1], [0, 0, 1, 1], [], []>} : vector<64x32xbf16>, vector<32x8xbf16>, vector<64x8xf32> -> vector<64x8xf32>
    %382 = vector.extract_strided_slice %246 {offsets = [0, 24], sizes = [1, 8], strides = [1, 1]} : vector<1x96xf32> to vector<1x8xf32>
    %383 = vector.broadcast %382 : vector<1x8xf32> to vector<64x8xf32>
    %384 = arith.addf %381, %383 : vector<64x8xf32>
    %385 = arith.truncf %384 : vector<64x8xf32> to vector<64x8xbf16>
    %c22 = arith.constant 22 : index
    %c0_160 = arith.constant 0 : index
    %c0_161 = arith.constant 0 : index
    %386 = vector.load %arg3[%c22, %c0_160, %c0_161] : memref<24x32x8xbf16, #tpu.memory_space<vmem>>, vector<1x32x8xbf16>
    %387 = vector.shape_cast %386 : vector<1x32x8xbf16> to vector<32x8xbf16>
    %cst_162 = arith.constant dense<0.000000e+00> : vector<64x8xf32>
    %388 = tpu.matmul %254, %387, %cst_162 {dimension_numbers = #tpu.dot_dimension_numbers<[1], [0], [0], [1], [0, 0, 1, 1], [], []>} : vector<64x32xbf16>, vector<32x8xbf16>, vector<64x8xf32> -> vector<64x8xf32>
    %389 = vector.extract_strided_slice %246 {offsets = [0, 56], sizes = [1, 8], strides = [1, 1]} : vector<1x96xf32> to vector<1x8xf32>
    %390 = vector.broadcast %389 : vector<1x8xf32> to vector<64x8xf32>
    %391 = arith.addf %388, %390 : vector<64x8xf32>
    %392 = arith.truncf %391 : vector<64x8xf32> to vector<64x8xbf16>
    %c23 = arith.constant 23 : index
    %c0_163 = arith.constant 0 : index
    %c0_164 = arith.constant 0 : index
    %393 = vector.load %arg3[%c23, %c0_163, %c0_164] : memref<24x32x8xbf16, #tpu.memory_space<vmem>>, vector<1x32x8xbf16>
    %394 = vector.shape_cast %393 : vector<1x32x8xbf16> to vector<32x8xbf16>
    %cst_165 = arith.constant dense<0.000000e+00> : vector<64x8xf32>
    %395 = tpu.matmul %254, %394, %cst_165 {dimension_numbers = #tpu.dot_dimension_numbers<[1], [0], [0], [1], [0, 0, 1, 1], [], []>} : vector<64x32xbf16>, vector<32x8xbf16>, vector<64x8xf32> -> vector<64x8xf32>
    %396 = vector.extract_strided_slice %246 {offsets = [0, 88], sizes = [1, 8], strides = [1, 1]} : vector<1x96xf32> to vector<1x8xf32>
    %397 = vector.broadcast %396 : vector<1x8xf32> to vector<64x8xf32>
    %398 = arith.addf %395, %397 : vector<64x8xf32>
    %399 = arith.truncf %398 : vector<64x8xf32> to vector<64x8xbf16>
    %cst_166 = arith.constant dense<0.000000e+00> : vector<64x64xf32>
    %400 = tpu.matmul %385, %392, %cst_166 {dimension_numbers = #tpu.dot_dimension_numbers<[1], [1], [0], [0], [0, 0, 1, 0], [], []>} : vector<64x8xbf16>, vector<64x8xbf16>, vector<64x64xf32> -> vector<64x64xf32>
    %cst_167 = arith.constant 0.353553385 : f32
    %401 = vector.broadcast %cst_167 : f32 to vector<64x64xf32>
    %402 = arith.mulf %400, %401 : vector<64x64xf32>
    %cst_168 = arith.constant dense<0xFF800000> : vector<64xf32>
    %403 = vector.multi_reduction <maximumf>, %402, %cst_168 [1] : vector<64x64xf32> to vector<64xf32>
    %404 = vector.shape_cast %403 : vector<64xf32> to vector<64x1xf32>
    %405 = vector.broadcast %404 : vector<64x1xf32> to vector<64x64xf32>
    %406 = arith.subf %402, %405 : vector<64x64xf32>
    %407 = math.exp %406 : vector<64x64xf32>
    %cst_169 = arith.constant dense<0.000000e+00> : vector<64xf32>
    %408 = vector.multi_reduction <add>, %407, %cst_169 [1] : vector<64x64xf32> to vector<64xf32>
    %409 = vector.shape_cast %408 : vector<64xf32> to vector<64x1xf32>
    %410 = tpu.reciprocal %409 {approx = true} : vector<64x1xf32> -> vector<64x1xf32>
    %411 = vector.broadcast %410 : vector<64x1xf32> to vector<64x64xf32>
    %412 = arith.mulf %407, %411 : vector<64x64xf32>
    %413 = arith.truncf %412 : vector<64x64xf32> to vector<64x64xbf16>
    %cst_170 = arith.constant dense<0.000000e+00> : vector<64x8xf32>
    %414 = tpu.matmul %413, %399, %cst_170 {dimension_numbers = #tpu.dot_dimension_numbers<[1], [0], [0], [1], [0, 0, 1, 1], [], []>} : vector<64x64xbf16>, vector<64x8xbf16>, vector<64x8xf32> -> vector<64x8xf32>
    %415 = arith.truncf %414 : vector<64x8xf32> to vector<64x8xbf16>
    %c7_171 = arith.constant 7 : index
    %c0_172 = arith.constant 0 : index
    %c0_173 = arith.constant 0 : index
    %416 = vector.load %arg4[%c7_171, %c0_172, %c0_173] : memref<8x8x32xbf16, #tpu.memory_space<vmem>>, vector<1x8x32xbf16>
    %417 = vector.shape_cast %416 : vector<1x8x32xbf16> to vector<8x32xbf16>
    %cst_174 = arith.constant dense<0.000000e+00> : vector<64x32xf32>
    %418 = tpu.matmul %415, %417, %cst_174 {dimension_numbers = #tpu.dot_dimension_numbers<[1], [0], [0], [1], [0, 0, 1, 1], [], []>} : vector<64x8xbf16>, vector<8x32xbf16>, vector<64x32xf32> -> vector<64x32xf32>
    %419 = arith.addf %378, %418 : vector<64x32xf32>
    %420 = vector.broadcast %247 : vector<1x32xf32> to vector<64x32xf32>
    %421 = arith.addf %419, %420 : vector<64x32xf32>
    %422 = arith.addf %421, %243 : vector<64x32xf32>
    %cst_175 = arith.constant dense<0.000000e+00> : vector<64xf32>
    %423 = vector.multi_reduction <add>, %422, %cst_175 [1] : vector<64x32xf32> to vector<64xf32>
    %424 = vector.shape_cast %423 : vector<64xf32> to vector<64x1xf32>
    %cst_176 = arith.constant 3.200000e+01 : f32
    %425 = vector.broadcast %cst_176 : f32 to vector<64x1xf32>
    %426 = arith.divf %424, %425 : vector<64x1xf32>
    %427 = vector.broadcast %426 : vector<64x1xf32> to vector<64x32xf32>
    %428 = arith.subf %422, %427 : vector<64x32xf32>
    %429 = arith.mulf %428, %428 : vector<64x32xf32>
    %cst_177 = arith.constant dense<0.000000e+00> : vector<64xf32>
    %430 = vector.multi_reduction <add>, %429, %cst_177 [1] : vector<64x32xf32> to vector<64xf32>
    %431 = vector.shape_cast %430 : vector<64xf32> to vector<64x1xf32>
    %cst_178 = arith.constant 3.200000e+01 : f32
    %432 = vector.broadcast %cst_178 : f32 to vector<64x1xf32>
    %433 = arith.divf %431, %432 : vector<64x1xf32>
    %434 = vector.broadcast %426 : vector<64x1xf32> to vector<64x32xf32>
    %435 = arith.subf %422, %434 : vector<64x32xf32>
    %cst_179 = arith.constant 9.99999996E-13 : f32
    %436 = vector.broadcast %cst_179 : f32 to vector<64x1xf32>
    %437 = arith.addf %433, %436 : vector<64x1xf32>
    %438 = math.rsqrt %437 : vector<64x1xf32>
    %439 = vector.broadcast %438 : vector<64x1xf32> to vector<64x32xf32>
    %440 = arith.mulf %435, %439 : vector<64x32xf32>
    %441 = vector.broadcast %248 : vector<1x32xf32> to vector<64x32xf32>
    %442 = arith.mulf %441, %440 : vector<64x32xf32>
    %443 = vector.broadcast %249 : vector<1x32xf32> to vector<64x32xf32>
    %444 = arith.addf %442, %443 : vector<64x32xf32>
    %445 = arith.truncf %444 : vector<64x32xf32> to vector<64x32xbf16>
    %c1_180 = arith.constant 1 : index
    %c0_181 = arith.constant 0 : index
    %c0_182 = arith.constant 0 : index
    %446 = vector.load %arg5[%c1_180, %c0_181, %c0_182] : memref<2x32x64xbf16, #tpu.memory_space<vmem>>, vector<1x32x64xbf16>
    %447 = vector.shape_cast %446 : vector<1x32x64xbf16> to vector<32x64xbf16>
    %cst_183 = arith.constant dense<0.000000e+00> : vector<64x64xf32>
    %448 = tpu.matmul %445, %447, %cst_183 {dimension_numbers = #tpu.dot_dimension_numbers<[1], [0], [0], [1], [0, 0, 1, 1], [], []>} : vector<64x32xbf16>, vector<32x64xbf16>, vector<64x64xf32> -> vector<64x64xf32>
    %449 = vector.broadcast %250 : vector<1x64xf32> to vector<64x64xf32>
    %450 = arith.addf %448, %449 : vector<64x64xf32>
    %cst_184 = arith.constant 0.000000e+00 : f32
    %451 = vector.broadcast %cst_184 : f32 to vector<64x64xf32>
    %452 = arith.maximumf %450, %451 : vector<64x64xf32>
    %453 = arith.truncf %452 : vector<64x64xf32> to vector<64x64xbf16>
    %c1_185 = arith.constant 1 : index
    %c0_186 = arith.constant 0 : index
    %c0_187 = arith.constant 0 : index
    %454 = vector.load %arg6[%c1_185, %c0_186, %c0_187] : memref<2x64x32xbf16, #tpu.memory_space<vmem>>, vector<1x64x32xbf16>
    %455 = vector.shape_cast %454 : vector<1x64x32xbf16> to vector<64x32xbf16>
    %cst_188 = arith.constant dense<0.000000e+00> : vector<64x32xf32>
    %456 = tpu.matmul %453, %455, %cst_188 {dimension_numbers = #tpu.dot_dimension_numbers<[1], [0], [0], [1], [0, 0, 1, 1], [], []>} : vector<64x64xbf16>, vector<64x32xbf16>, vector<64x32xf32> -> vector<64x32xf32>
    %457 = vector.broadcast %251 : vector<1x32xf32> to vector<64x32xf32>
    %458 = arith.addf %456, %457 : vector<64x32xf32>
    %459 = arith.addf %458, %444 : vector<64x32xf32>
    %cst_189 = arith.constant dense<0.000000e+00> : vector<64xf32>
    %460 = vector.multi_reduction <add>, %459, %cst_189 [1] : vector<64x32xf32> to vector<64xf32>
    %461 = vector.shape_cast %460 : vector<64xf32> to vector<64x1xf32>
    %cst_190 = arith.constant 3.200000e+01 : f32
    %462 = vector.broadcast %cst_190 : f32 to vector<64x1xf32>
    %463 = arith.divf %461, %462 : vector<64x1xf32>
    %464 = vector.broadcast %463 : vector<64x1xf32> to vector<64x32xf32>
    %465 = arith.subf %459, %464 : vector<64x32xf32>
    %466 = arith.mulf %465, %465 : vector<64x32xf32>
    %cst_191 = arith.constant dense<0.000000e+00> : vector<64xf32>
    %467 = vector.multi_reduction <add>, %466, %cst_191 [1] : vector<64x32xf32> to vector<64xf32>
    %468 = vector.shape_cast %467 : vector<64xf32> to vector<64x1xf32>
    %cst_192 = arith.constant 3.200000e+01 : f32
    %469 = vector.broadcast %cst_192 : f32 to vector<64x1xf32>
    %470 = arith.divf %468, %469 : vector<64x1xf32>
    %471 = vector.broadcast %463 : vector<64x1xf32> to vector<64x32xf32>
    %472 = arith.subf %459, %471 : vector<64x32xf32>
    %cst_193 = arith.constant 9.99999996E-13 : f32
    %473 = vector.broadcast %cst_193 : f32 to vector<64x1xf32>
    %474 = arith.addf %470, %473 : vector<64x1xf32>
    %475 = math.rsqrt %474 : vector<64x1xf32>
    %476 = vector.broadcast %475 : vector<64x1xf32> to vector<64x32xf32>
    %477 = arith.mulf %472, %476 : vector<64x32xf32>
    %478 = vector.broadcast %252 : vector<1x32xf32> to vector<64x32xf32>
    %479 = arith.mulf %478, %477 : vector<64x32xf32>
    %480 = vector.broadcast %253 : vector<1x32xf32> to vector<64x32xf32>
    %481 = arith.addf %479, %480 : vector<64x32xf32>
    %c0_194 = arith.constant 0 : index
    %c0_195 = arith.constant 0 : index
    %482 = vector.load %arg11[%c0_194, %c0_195] : memref<8x128xf32, #tpu.memory_space<vmem>>, vector<8x128xf32>
    %483 = vector.extract_strided_slice %482 {offsets = [0, 0], sizes = [1, 32], strides = [1, 1]} : vector<8x128xf32> to vector<1x32xf32>
    %484 = vector.extract_strided_slice %482 {offsets = [1, 0], sizes = [1, 32], strides = [1, 1]} : vector<8x128xf32> to vector<1x32xf32>
    %485 = vector.extract_strided_slice %482 {offsets = [2, 0], sizes = [1, 32], strides = [1, 1]} : vector<8x128xf32> to vector<1x32xf32>
    %486 = vector.extract_strided_slice %482 {offsets = [3, 0], sizes = [1, 32], strides = [1, 1]} : vector<8x128xf32> to vector<1x32xf32>
    %487 = vector.extract_strided_slice %482 {offsets = [4, 0], sizes = [1, 128], strides = [1, 1]} : vector<8x128xf32> to vector<1x128xf32>
    %488 = arith.truncf %481 : vector<64x32xf32> to vector<64x32xbf16>
    %c0_196 = arith.constant 0 : index
    %c0_197 = arith.constant 0 : index
    %489 = vector.load %arg8[%c0_196, %c0_197] : memref<32x32xbf16, #tpu.memory_space<vmem>>, vector<32x32xbf16>
    %cst_198 = arith.constant dense<0.000000e+00> : vector<64x32xf32>
    %490 = tpu.matmul %488, %489, %cst_198 {dimension_numbers = #tpu.dot_dimension_numbers<[1], [0], [0], [1], [0, 0, 1, 1], [], []>} : vector<64x32xbf16>, vector<32x32xbf16>, vector<64x32xf32> -> vector<64x32xf32>
    %491 = vector.broadcast %483 : vector<1x32xf32> to vector<64x32xf32>
    %492 = arith.addf %490, %491 : vector<64x32xf32>
    %493 = math.tanh %492 : vector<64x32xf32>
    %494 = tpu.iota {dimensions = array<i32: 0>} : vector<8x256xi32>
    %495 = tpu.iota {dimensions = array<i32: 1>} : vector<8x256xi32>
    %c32_i32 = arith.constant 32 : i32
    %496 = vector.broadcast %c32_i32 : i32 to vector<8x256xi32>
    %497 = arith.muli %494, %496 : vector<8x256xi32>
    %498 = arith.cmpi sge, %495, %497 : vector<8x256xi32>
    %c32_i32_199 = arith.constant 32 : i32
    %499 = vector.broadcast %c32_i32_199 : i32 to vector<8x256xi32>
    %500 = arith.muli %494, %499 : vector<8x256xi32>
    %c32_i32_200 = arith.constant 32 : i32
    %501 = vector.broadcast %c32_i32_200 : i32 to vector<8x256xi32>
    %502 = arith.addi %500, %501 : vector<8x256xi32>
    %503 = arith.cmpi slt, %495, %502 : vector<8x256xi32>
    %504 = arith.andi %498, %503 : vector<8x256xi1>
    %cst_201 = arith.constant 0.000000e+00 : f32
    %505 = vector.broadcast %cst_201 : f32 to vector<8x256xf32>
    %506 = vector.extract_strided_slice %493 {offsets = [0, 0], sizes = [8, 32], strides = [1, 1]} : vector<64x32xf32> to vector<8x32xf32>
    %507 = arith.truncf %506 : vector<8x32xf32> to vector<8x32xbf16>
    %c0_202 = arith.constant 0 : index
    %c0_203 = arith.constant 0 : index
    %c0_204 = arith.constant 0 : index
    %508 = vector.load %arg9[%c0_202, %c0_203, %c0_204] : memref<8x32x256xbf16, #tpu.memory_space<vmem>>, vector<1x32x256xbf16>
    %509 = vector.shape_cast %508 : vector<1x32x256xbf16> to vector<32x256xbf16>
    %cst_205 = arith.constant dense<0.000000e+00> : vector<8x256xf32>
    %510 = tpu.matmul %507, %509, %cst_205 {dimension_numbers = #tpu.dot_dimension_numbers<[1], [0], [0], [1], [0, 0, 1, 1], [], []>} : vector<8x32xbf16>, vector<32x256xbf16>, vector<8x256xf32> -> vector<8x256xf32>
    %cst_206 = arith.constant 0.000000e+00 : f32
    %511 = vector.broadcast %cst_206 : f32 to vector<8x256xf32>
    %512 = arith.select %504, %510, %511 : vector<8x256xi1>, vector<8x256xf32>
    %513 = arith.addf %505, %512 : vector<8x256xf32>
    %514 = vector.extract_strided_slice %493 {offsets = [8, 0], sizes = [8, 32], strides = [1, 1]} : vector<64x32xf32> to vector<8x32xf32>
    %515 = arith.truncf %514 : vector<8x32xf32> to vector<8x32xbf16>
    %c1_207 = arith.constant 1 : index
    %c0_208 = arith.constant 0 : index
    %c0_209 = arith.constant 0 : index
    %516 = vector.load %arg9[%c1_207, %c0_208, %c0_209] : memref<8x32x256xbf16, #tpu.memory_space<vmem>>, vector<1x32x256xbf16>
    %517 = vector.shape_cast %516 : vector<1x32x256xbf16> to vector<32x256xbf16>
    %cst_210 = arith.constant dense<0.000000e+00> : vector<8x256xf32>
    %518 = tpu.matmul %515, %517, %cst_210 {dimension_numbers = #tpu.dot_dimension_numbers<[1], [0], [0], [1], [0, 0, 1, 1], [], []>} : vector<8x32xbf16>, vector<32x256xbf16>, vector<8x256xf32> -> vector<8x256xf32>
    %cst_211 = arith.constant 0.000000e+00 : f32
    %519 = vector.broadcast %cst_211 : f32 to vector<8x256xf32>
    %520 = arith.select %504, %518, %519 : vector<8x256xi1>, vector<8x256xf32>
    %521 = arith.addf %513, %520 : vector<8x256xf32>
    %522 = vector.extract_strided_slice %493 {offsets = [16, 0], sizes = [8, 32], strides = [1, 1]} : vector<64x32xf32> to vector<8x32xf32>
    %523 = arith.truncf %522 : vector<8x32xf32> to vector<8x32xbf16>
    %c2_212 = arith.constant 2 : index
    %c0_213 = arith.constant 0 : index
    %c0_214 = arith.constant 0 : index
    %524 = vector.load %arg9[%c2_212, %c0_213, %c0_214] : memref<8x32x256xbf16, #tpu.memory_space<vmem>>, vector<1x32x256xbf16>
    %525 = vector.shape_cast %524 : vector<1x32x256xbf16> to vector<32x256xbf16>
    %cst_215 = arith.constant dense<0.000000e+00> : vector<8x256xf32>
    %526 = tpu.matmul %523, %525, %cst_215 {dimension_numbers = #tpu.dot_dimension_numbers<[1], [0], [0], [1], [0, 0, 1, 1], [], []>} : vector<8x32xbf16>, vector<32x256xbf16>, vector<8x256xf32> -> vector<8x256xf32>
    %cst_216 = arith.constant 0.000000e+00 : f32
    %527 = vector.broadcast %cst_216 : f32 to vector<8x256xf32>
    %528 = arith.select %504, %526, %527 : vector<8x256xi1>, vector<8x256xf32>
    %529 = arith.addf %521, %528 : vector<8x256xf32>
    %530 = vector.extract_strided_slice %493 {offsets = [24, 0], sizes = [8, 32], strides = [1, 1]} : vector<64x32xf32> to vector<8x32xf32>
    %531 = arith.truncf %530 : vector<8x32xf32> to vector<8x32xbf16>
    %c3_217 = arith.constant 3 : index
    %c0_218 = arith.constant 0 : index
    %c0_219 = arith.constant 0 : index
    %532 = vector.load %arg9[%c3_217, %c0_218, %c0_219] : memref<8x32x256xbf16, #tpu.memory_space<vmem>>, vector<1x32x256xbf16>
    %533 = vector.shape_cast %532 : vector<1x32x256xbf16> to vector<32x256xbf16>
    %cst_220 = arith.constant dense<0.000000e+00> : vector<8x256xf32>
    %534 = tpu.matmul %531, %533, %cst_220 {dimension_numbers = #tpu.dot_dimension_numbers<[1], [0], [0], [1], [0, 0, 1, 1], [], []>} : vector<8x32xbf16>, vector<32x256xbf16>, vector<8x256xf32> -> vector<8x256xf32>
    %cst_221 = arith.constant 0.000000e+00 : f32
    %535 = vector.broadcast %cst_221 : f32 to vector<8x256xf32>
    %536 = arith.select %504, %534, %535 : vector<8x256xi1>, vector<8x256xf32>
    %537 = arith.addf %529, %536 : vector<8x256xf32>
    %538 = vector.extract_strided_slice %493 {offsets = [32, 0], sizes = [8, 32], strides = [1, 1]} : vector<64x32xf32> to vector<8x32xf32>
    %539 = arith.truncf %538 : vector<8x32xf32> to vector<8x32xbf16>
    %c4_222 = arith.constant 4 : index
    %c0_223 = arith.constant 0 : index
    %c0_224 = arith.constant 0 : index
    %540 = vector.load %arg9[%c4_222, %c0_223, %c0_224] : memref<8x32x256xbf16, #tpu.memory_space<vmem>>, vector<1x32x256xbf16>
    %541 = vector.shape_cast %540 : vector<1x32x256xbf16> to vector<32x256xbf16>
    %cst_225 = arith.constant dense<0.000000e+00> : vector<8x256xf32>
    %542 = tpu.matmul %539, %541, %cst_225 {dimension_numbers = #tpu.dot_dimension_numbers<[1], [0], [0], [1], [0, 0, 1, 1], [], []>} : vector<8x32xbf16>, vector<32x256xbf16>, vector<8x256xf32> -> vector<8x256xf32>
    %cst_226 = arith.constant 0.000000e+00 : f32
    %543 = vector.broadcast %cst_226 : f32 to vector<8x256xf32>
    %544 = arith.select %504, %542, %543 : vector<8x256xi1>, vector<8x256xf32>
    %545 = arith.addf %537, %544 : vector<8x256xf32>
    %546 = vector.extract_strided_slice %493 {offsets = [40, 0], sizes = [8, 32], strides = [1, 1]} : vector<64x32xf32> to vector<8x32xf32>
    %547 = arith.truncf %546 : vector<8x32xf32> to vector<8x32xbf16>
    %c5_227 = arith.constant 5 : index
    %c0_228 = arith.constant 0 : index
    %c0_229 = arith.constant 0 : index
    %548 = vector.load %arg9[%c5_227, %c0_228, %c0_229] : memref<8x32x256xbf16, #tpu.memory_space<vmem>>, vector<1x32x256xbf16>
    %549 = vector.shape_cast %548 : vector<1x32x256xbf16> to vector<32x256xbf16>
    %cst_230 = arith.constant dense<0.000000e+00> : vector<8x256xf32>
    %550 = tpu.matmul %547, %549, %cst_230 {dimension_numbers = #tpu.dot_dimension_numbers<[1], [0], [0], [1], [0, 0, 1, 1], [], []>} : vector<8x32xbf16>, vector<32x256xbf16>, vector<8x256xf32> -> vector<8x256xf32>
    %cst_231 = arith.constant 0.000000e+00 : f32
    %551 = vector.broadcast %cst_231 : f32 to vector<8x256xf32>
    %552 = arith.select %504, %550, %551 : vector<8x256xi1>, vector<8x256xf32>
    %553 = arith.addf %545, %552 : vector<8x256xf32>
    %554 = vector.extract_strided_slice %493 {offsets = [48, 0], sizes = [8, 32], strides = [1, 1]} : vector<64x32xf32> to vector<8x32xf32>
    %555 = arith.truncf %554 : vector<8x32xf32> to vector<8x32xbf16>
    %c6_232 = arith.constant 6 : index
    %c0_233 = arith.constant 0 : index
    %c0_234 = arith.constant 0 : index
    %556 = vector.load %arg9[%c6_232, %c0_233, %c0_234] : memref<8x32x256xbf16, #tpu.memory_space<vmem>>, vector<1x32x256xbf16>
    %557 = vector.shape_cast %556 : vector<1x32x256xbf16> to vector<32x256xbf16>
    %cst_235 = arith.constant dense<0.000000e+00> : vector<8x256xf32>
    %558 = tpu.matmul %555, %557, %cst_235 {dimension_numbers = #tpu.dot_dimension_numbers<[1], [0], [0], [1], [0, 0, 1, 1], [], []>} : vector<8x32xbf16>, vector<32x256xbf16>, vector<8x256xf32> -> vector<8x256xf32>
    %cst_236 = arith.constant 0.000000e+00 : f32
    %559 = vector.broadcast %cst_236 : f32 to vector<8x256xf32>
    %560 = arith.select %504, %558, %559 : vector<8x256xi1>, vector<8x256xf32>
    %561 = arith.addf %553, %560 : vector<8x256xf32>
    %562 = vector.extract_strided_slice %493 {offsets = [56, 0], sizes = [8, 32], strides = [1, 1]} : vector<64x32xf32> to vector<8x32xf32>
    %563 = arith.truncf %562 : vector<8x32xf32> to vector<8x32xbf16>
    %c7_237 = arith.constant 7 : index
    %c0_238 = arith.constant 0 : index
    %c0_239 = arith.constant 0 : index
    %564 = vector.load %arg9[%c7_237, %c0_238, %c0_239] : memref<8x32x256xbf16, #tpu.memory_space<vmem>>, vector<1x32x256xbf16>
    %565 = vector.shape_cast %564 : vector<1x32x256xbf16> to vector<32x256xbf16>
    %cst_240 = arith.constant dense<0.000000e+00> : vector<8x256xf32>
    %566 = tpu.matmul %563, %565, %cst_240 {dimension_numbers = #tpu.dot_dimension_numbers<[1], [0], [0], [1], [0, 0, 1, 1], [], []>} : vector<8x32xbf16>, vector<32x256xbf16>, vector<8x256xf32> -> vector<8x256xf32>
    %cst_241 = arith.constant 0.000000e+00 : f32
    %567 = vector.broadcast %cst_241 : f32 to vector<8x256xf32>
    %568 = arith.select %504, %566, %567 : vector<8x256xi1>, vector<8x256xf32>
    %569 = arith.addf %561, %568 : vector<8x256xf32>
    %cst_242 = arith.constant dense<0.000000e+00> : vector<256xf32>
    %570 = vector.multi_reduction <add>, %569, %cst_242 [0] : vector<8x256xf32> to vector<256xf32>
    %571 = vector.shape_cast %570 : vector<256xf32> to vector<1x256xf32>
    %572 = vector.extract_strided_slice %571 {offsets = [0, 0], sizes = [1, 32], strides = [1, 1]} : vector<1x256xf32> to vector<1x32xf32>
    %573 = arith.addf %484, %572 : vector<1x32xf32>
    %574 = vector.extract_strided_slice %571 {offsets = [0, 32], sizes = [1, 32], strides = [1, 1]} : vector<1x256xf32> to vector<1x32xf32>
    %575 = arith.addf %573, %574 : vector<1x32xf32>
    %576 = vector.extract_strided_slice %571 {offsets = [0, 64], sizes = [1, 32], strides = [1, 1]} : vector<1x256xf32> to vector<1x32xf32>
    %577 = arith.addf %575, %576 : vector<1x32xf32>
    %578 = vector.extract_strided_slice %571 {offsets = [0, 96], sizes = [1, 32], strides = [1, 1]} : vector<1x256xf32> to vector<1x32xf32>
    %579 = arith.addf %577, %578 : vector<1x32xf32>
    %580 = vector.extract_strided_slice %571 {offsets = [0, 128], sizes = [1, 32], strides = [1, 1]} : vector<1x256xf32> to vector<1x32xf32>
    %581 = arith.addf %579, %580 : vector<1x32xf32>
    %582 = vector.extract_strided_slice %571 {offsets = [0, 160], sizes = [1, 32], strides = [1, 1]} : vector<1x256xf32> to vector<1x32xf32>
    %583 = arith.addf %581, %582 : vector<1x32xf32>
    %584 = vector.extract_strided_slice %571 {offsets = [0, 192], sizes = [1, 32], strides = [1, 1]} : vector<1x256xf32> to vector<1x32xf32>
    %585 = arith.addf %583, %584 : vector<1x32xf32>
    %586 = vector.extract_strided_slice %571 {offsets = [0, 224], sizes = [1, 32], strides = [1, 1]} : vector<1x256xf32> to vector<1x32xf32>
    %587 = arith.addf %585, %586 : vector<1x32xf32>
    %cst_243 = arith.constant 0.000000e+00 : f32
    %588 = vector.broadcast %cst_243 : f32 to vector<1x32xf32>
    %589 = arith.maximumf %587, %588 : vector<1x32xf32>
    %cst_244 = arith.constant dense<0.000000e+00> : vector<1xf32>
    %590 = vector.multi_reduction <add>, %589, %cst_244 [1] : vector<1x32xf32> to vector<1xf32>
    %591 = vector.shape_cast %590 : vector<1xf32> to vector<1x1xf32>
    %cst_245 = arith.constant 3.200000e+01 : f32
    %592 = vector.broadcast %cst_245 : f32 to vector<1x1xf32>
    %593 = arith.divf %591, %592 : vector<1x1xf32>
    %594 = vector.broadcast %593 : vector<1x1xf32> to vector<1x32xf32>
    %595 = arith.subf %589, %594 : vector<1x32xf32>
    %596 = arith.mulf %595, %595 : vector<1x32xf32>
    %cst_246 = arith.constant dense<0.000000e+00> : vector<1xf32>
    %597 = vector.multi_reduction <add>, %596, %cst_246 [1] : vector<1x32xf32> to vector<1xf32>
    %598 = vector.shape_cast %597 : vector<1xf32> to vector<1x1xf32>
    %cst_247 = arith.constant 3.200000e+01 : f32
    %599 = vector.broadcast %cst_247 : f32 to vector<1x1xf32>
    %600 = arith.divf %598, %599 : vector<1x1xf32>
    %601 = vector.broadcast %593 : vector<1x1xf32> to vector<1x32xf32>
    %602 = arith.subf %589, %601 : vector<1x32xf32>
    %cst_248 = arith.constant 9.99999996E-13 : f32
    %603 = vector.broadcast %cst_248 : f32 to vector<1x1xf32>
    %604 = arith.addf %600, %603 : vector<1x1xf32>
    %605 = math.rsqrt %604 : vector<1x1xf32>
    %606 = vector.broadcast %605 : vector<1x1xf32> to vector<1x32xf32>
    %607 = arith.mulf %602, %606 : vector<1x32xf32>
    %608 = arith.mulf %485, %607 : vector<1x32xf32>
    %609 = arith.addf %608, %486 : vector<1x32xf32>
    %610 = arith.truncf %609 : vector<1x32xf32> to vector<1x32xbf16>
    %c0_249 = arith.constant 0 : index
    %c0_250 = arith.constant 0 : index
    %611 = vector.load %arg10[%c0_249, %c0_250] : memref<32x128xbf16, #tpu.memory_space<vmem>>, vector<32x128xbf16>
    %cst_251 = arith.constant dense<0.000000e+00> : vector<1x128xf32>
    %612 = tpu.matmul %610, %611, %cst_251 {dimension_numbers = #tpu.dot_dimension_numbers<[1], [0], [0], [1], [0, 0, 1, 1], [], []>} : vector<1x32xbf16>, vector<32x128xbf16>, vector<1x128xf32> -> vector<1x128xf32>
    %613 = arith.addf %612, %487 : vector<1x128xf32>
    %c0_252 = arith.constant 0 : index
    %c0_253 = arith.constant 0 : index
    %c0_254 = arith.constant 0 : index
    %614 = vector.load %arg12[%c0_252, %c0_253, %c0_254] : memref<1x1x128xf32, #tpu.memory_space<vmem>>, vector<1x1x128xf32>
    %615 = vector.shape_cast %614 : vector<1x1x128xf32> to vector<1x128xf32>
    %616 = vector.shape_cast %613 : vector<1x128xf32> to vector<1x1x128xf32>
    tpu.vector_store %arg12[%c0_252, %c0_253, %c0_254], %616 {strides = array<i32>} : memref<1x1x128xf32, #tpu.memory_space<vmem>>, vector<1x1x128xf32>,
    return
  }
  func.func @transform_0(%arg0: i32) -> (i32, i32, i32) {
    %c0_i32 = arith.constant 0 : i32
    %c0_i32_0 = arith.constant 0 : i32
    %c0_i32_1 = arith.constant 0 : i32
    return %arg0, %c0_i32, %c0_i32_0 : i32, i32, i32
  }
  func.func @transform_1(%arg0: i32) -> (i32, i32) {
    %c0_i32 = arith.constant 0 : i32
    %c0_i32_0 = arith.constant 0 : i32
    %c0_i32_1 = arith.constant 0 : i32
    return %c0_i32, %c0_i32_0 : i32, i32
  }
  func.func @transform_2(%arg0: i32) -> (i32, i32, i32) {
    %c0_i32 = arith.constant 0 : i32
    %c0_i32_0 = arith.constant 0 : i32
    %c0_i32_1 = arith.constant 0 : i32
    %c0_i32_2 = arith.constant 0 : i32
    return %c0_i32, %c0_i32_0, %c0_i32_1 : i32, i32, i32
  }
  func.func @transform_3(%arg0: i32) -> (i32, i32, i32) {
    %c0_i32 = arith.constant 0 : i32
    %c0_i32_0 = arith.constant 0 : i32
    %c0_i32_1 = arith.constant 0 : i32
    %c0_i32_2 = arith.constant 0 : i32
    return %c0_i32, %c0_i32_0, %c0_i32_1 : i32, i32, i32
  }
  func.func @transform_4(%arg0: i32) -> (i32, i32, i32) {
    %c0_i32 = arith.constant 0 : i32
    %c0_i32_0 = arith.constant 0 : i32
    %c0_i32_1 = arith.constant 0 : i32
    %c0_i32_2 = arith.constant 0 : i32
    return %c0_i32, %c0_i32_0, %c0_i32_1 : i32, i32, i32
  }
  func.func @transform_5(%arg0: i32) -> (i32, i32, i32) {
    %c0_i32 = arith.constant 0 : i32
    %c0_i32_0 = arith.constant 0 : i32
    %c0_i32_1 = arith.constant 0 : i32
    %c0_i32_2 = arith.constant 0 : i32
    return %c0_i32, %c0_i32_0, %c0_i32_1 : i32, i32, i32
  }
  func.func @transform_6(%arg0: i32) -> (i32, i32, i32) {
    %c0_i32 = arith.constant 0 : i32
    %c0_i32_0 = arith.constant 0 : i32
    %c0_i32_1 = arith.constant 0 : i32
    %c0_i32_2 = arith.constant 0 : i32
    return %c0_i32, %c0_i32_0, %c0_i32_1 : i32, i32, i32
  }
  func.func @transform_7(%arg0: i32) -> (i32, i32) {
    %c0_i32 = arith.constant 0 : i32
    %c0_i32_0 = arith.constant 0 : i32
    %c0_i32_1 = arith.constant 0 : i32
    return %c0_i32, %c0_i32_0 : i32, i32
  }
  func.func @transform_8(%arg0: i32) -> (i32, i32, i32) {
    %c0_i32 = arith.constant 0 : i32
    %c0_i32_0 = arith.constant 0 : i32
    %c0_i32_1 = arith.constant 0 : i32
    %c0_i32_2 = arith.constant 0 : i32
    return %c0_i32, %c0_i32_0, %c0_i32_1 : i32, i32, i32
  }
  func.func @transform_9(%arg0: i32) -> (i32, i32) {
    %c0_i32 = arith.constant 0 : i32
    %c0_i32_0 = arith.constant 0 : i32
    %c0_i32_1 = arith.constant 0 : i32
    return %c0_i32, %c0_i32_0 : i32, i32
  }
  func.func @transform_10(%arg0: i32) -> (i32, i32) {
    %c0_i32 = arith.constant 0 : i32
    %c0_i32_0 = arith.constant 0 : i32
    %c0_i32_1 = arith.constant 0 : i32
    return %c0_i32, %c0_i32_0 : i32, i32
  }
  func.func @transform_11(%arg0: i32) -> (i32, i32, i32) {
    %c0_i32 = arith.constant 0 : i32
    %c0_i32_0 = arith.constant 0 : i32
    %c0_i32_1 = arith.constant 0 : i32
    return %arg0, %c0_i32, %c0_i32_0 : i32, i32, i32
  }
}

</mosaic_0001>

<bundles_post_ra>
// kernel: row_column_attention_forward.1
= control target key start
LH: loop header
LB: loop body
LE: loop exit
PB: predicated region body
PF: predicated region fallthrough
CT: control target
= control target key end

     0   :  { %16 = vsyncpa [#allocation3], 0  ;;  %s11574_s0 = inlined_call_operand.vmem [shape: f32[2,32,32], index: 0, kind: input, shape index: {}]   ;;  %s11575_s1 = inlined_call_operand.vmem [shape: f32[64,32], index: 1, kind: input, shape index: {}]   ;;  %s11576_s2 = inlined_call_operand.vmem [shape: bf16[24,32,8], index: 2, kind: input, shape index: {}]   ;;  %s11577_s3 = inlined_call_operand.vmem [shape: bf16[8,8,32], index: 3, kind: input, shape index: {}]   ;;  %s11578_s4 = inlined_call_operand.vmem [shape: bf16[2,32,64], index: 4, kind: input, shape index: {}]   ;;  %s11579_s5 = inlined_call_operand.vmem [shape: bf16[2,64,32], index: 5, kind: input, shape index: {}]   ;;  %s11580_s6 = inlined_call_operand.vmem [shape: f32[2,8,96], index: 6, kind: input, shape index: {}]   ;;  %s11581_s7 = inlined_call_operand.vmem [shape: bf16[32,32], index: 7, kind: input, shape index: {}]   ;;  %s11582_s8 = inlined_call_operand.vmem [shape: bf16[8,32,256], index: 8, kind: input, shape index: {}]   ;;  %s11583_s9 = inlined_call_operand.vmem [shape: bf16[32,128], index: 9, kind: input, shape index: {}]   ;;  %s11584_s10 = inlined_call_operand.vmem [shape: f32[8,128], index: 10, kind: input, shape index: {}]   ;;  %s11585_s11 = inlined_call_operand.hbm [shape: f32[2,1,128], index: 11, kind: output, shape index: {}]  }
   0x1   :  { %18 = vsyncpa [#allocation3 + $0x1], 0  ;;  %s9595_s17 = smov 0   ;;  %s9597_s18 = smov 0  }
   0x2   :  { %s9599_s19 = smov 0   ;;  %s9601_s20 = smov 0  }
   0x3 LB: > { %11607 = sst [smem:[#allocation5_spill]] %s9513_s19  ;;  %s9616_s21 = sadd.s32 4294967295, %s9517_s20   ;;  %s9517_s20 = sphi %s9601_s20, %s11637_s20   ;;  %s9513_s19 = sphi %s9599_s19, %s11639_s19   ;;  %s9509_s18 = sphi %s9597_s18, %s11641_s18   ;;  %s9505_s17 = sphi %s9595_s17, %s11640_s17  }
   0x4   : > { %s7395_s22 = sadd.s32 4294967294, %s9517_s20   ;;  %s9620_s23 = sadd.s32 1, %s9517_s20  }
   0x5   : > { %11608 = sst [smem:[#allocation6_spill]] %s9620_s23  ;;  %s267_s24 = sadd.s32 1, %s9513_s19 }
   0x6   : > { %s264_s25 = ssub.s32 %s9517_s20, %s9620_s23  ;;  %p277_p0 = scmp.ne.s32.totalorder %s9513_s19, %s9509_s18 }
   0x7   : > { %p265_p1 = scmp.eq.s32.totalorder %s264_s25, 0  ;;  %p278_p2 = scmp.eq.s32.totalorder %s9616_s21, 1 }
   0x8   : > { %p283_p3 = scmp.ne.s32.totalorder %s9509_s18, %s9505_s17  ;;  %p284_p4 = scmp.eq.s32.totalorder %s7395_s22, 1 }
   0x9   : > { %s9631_s26 = scalar_select %p265_p1, %s9513_s19, %s267_s24  }
   0xa   : > { %p9633_p5 = por %p278_p2, %p277_p0  ;;  %p9637_p6 = por %p284_p4, %p283_p3 }
   0xb   : > { %11609 = sst [smem:[#allocation7_spill]] %s9631_s26  ;;  %p7398_p7 = scmp.ge.s32.totalorder %s9517_s20, 1 }
   0xc   : > { %p340_p8 = scmp.lt.s32.totalorder %s9517_s20, 3 }
   0xe   : > { %p341_p9 = pnand %p7398_p7, %p340_p8 }
  0x10   : > { %344 = sbr.rel (%p341_p9) target bundleno = 11121 (0x2b71), region = 64 }
  0x15   : > { %p379_p10 = scmp.lt.s32.totalorder %s9616_s21, 1  ;;  %v421_v0 = vld [vmem:[%s11575_s1] sm:$0xff]  ;;  %v422_v1 = vld [vmem:[%s11575_s1 + $0x8] sm:$0xff]  ;;  %v9005_v2 = vld [vmem:[%s11576_s2 + $0x18] sm:$0xff]   ;;  %vm462_vm0 = vcmask 261120   ;;  %v11589_v20 = vlaneseq  ;;  %s9519_s12 = smov 96  }
  0x16   : > { %v9006_v3 = vld [vmem:[%s11576_s2 + $0x10] sm:$0xff]   ;;  %8223 = vmatprep.subr.bf16.mxu1 %v9005_v2  ;;  %v9007_v5 = vld [vmem:[%s11576_s2 + $0x8] sm:$0xff]   ;;  %v424_v6 = vld [vmem:[%s11575_s1 + $0x18] sm:$0xff]  ;;  %vm723_vm1 = vcmask 64512   ;;  %vm821_vm2 = vcmask 523264   ;;  %s9520_s13 = smov 64  }
  0x17   : > { %s380_s29 = scalar_select %p379_p10, %s9616_s21, 1  ;;  %v423_v4 = vld [vmem:[%s11575_s1 + $0x10] sm:$0xff]  ;;  %8224 = vmatpush3.bf16.msra.mxu1 %v9005_v2  ;;  %v9008_v7 = vld [vmem:[%s11576_s2] sm:$0xff]   ;;  %8211 = vmatprep.subr.bf16.mxu0 %v9007_v5  ;;  %v9009_v18 = vld [vmem:[%s11576_s2 + $0x28] sm:$0xff]   ;;  %v9706_v22 = vshrl.u32 %v11589_v20, 7  ;;  %vm1547_vm3 = vcmask 1043456  }
  0x18   : > { %8225 = vmatprep.subr.bf16.mxu1 %v9006_v3  ;;  %8212 = vmatpush3.bf16.msra.mxu0 %v9007_v5  ;;  %v9010_v19 = vld [vmem:[%s11576_s2 + $0x20] sm:$0xff]   ;;  %v426_v27 = vld [vmem:[%s11575_s1 + $0x28] sm:$0xff]  ;;  %v427_v33 = vld [vmem:[%s11575_s1 + $0x30] sm:$0xff]  ;;  %s9521_s14 = smov 88   ;;  %s9522_s15 = smov 120   ;;  %vm7240_vm10 = vcmask 254977  }
  0x19   : > { %s7861_s25 = sshll.u32 %s380_s29, 5  ;;  %8213 = vmatprep.subr.bf16.mxu0 %v9008_v7  ;;  %v437_v21 = vld [vmem:[%s11580_s6] sm:$0xff]  ;;  %v9709_v23 = vsub.s32 0, %v9706_v22  ;;  %v428_v34 = vld [vmem:[%s11575_s1 + $0x38] sm:$0xff]  ;;  %s11597_s26 = smov 56   ;;  %vm9533_vm11 = vmmov 0  }
  0x1a   : > { %s383_s23 = scalar_lea.vmem %s11574_s0, %s7861_s25  ;;  %v425_v26 = vld [vmem:[%s11575_s1 + $0x20] sm:$0xff]  ;;  %s9524_s24 = smov 80  }
  0x1b   : > { %v385_v8 = vld [vmem:[%s383_s23] sm:$0xff]  ;;  %v386_v9 = vld [vmem:[%s383_s23 + $0x8] sm:$0xff]  ;;  %v387_v10 = vld [vmem:[%s383_s23 + $0x10] sm:$0xff]  ;;  %8226 = vmatpush3.bf16.msra.mxu1 %v9006_v3  ;;  %11612 = vst [vmem:[#allocation8_spill] sm:$0xff] %v9709_v23  ;;  %v9712_v24 = vrot.slane %v437_v21, %v9709_v23  ;;  %s11598_s29 = smov 112   ;;  %s11593_s25 = smov 72  }
  0x1c   : > { %389 = vxpose.xlu0.b32.start [1/4] (short) (narrow) %v385_v8, 32  ;;  %v9672_v11 = vadd.f32 %v421_v0, %v385_v8  ;;  %v9674_v12 = vadd.f32 %v422_v1, %v386_v9  ;;  %v9676_v13 = vadd.f32 %v423_v4, %v387_v10  ;;  %v388_v14 = vld [vmem:[%s383_s23 + $0x18] sm:$0xff]  ;;  %8214 = vmatpush3.bf16.msra.mxu0 %v9008_v7  ;;  %s11595_s30 = smov 104   ;;  %s11596_s16 = smov 48  }
  0x1d   : > { %v9678_v15 = vadd.f32 %v424_v6, %v388_v14  ;;  %8235 = vmatprep.subr.bf16.mxu0 %v9009_v18  ;;  %562 = vrot.lane.b32.xlu1 %v9712_v24, %s9519_s12  ;;  %s11620_s22 = smov 104  }
  0x1e   : > { %v9682_v16 = vpack.c.bf16 %v9674_v12, %v9672_v11 }
  0x1f   : > { %v9686_v17 = vpack.c.bf16 %v9678_v15, %v9676_v13 }
  0x20   : > { %390 = vxpose.xlu0.b32.cont [2/4] (short) (narrow) %v386_v9, 32  ;;  %8227 = vmatprep.mubr.msk.bf16.mxu1 %vm462_vm0, %v9682_v16 }
  0x21   : > { %8228 = vmatmul.mubr.msk.bf16.vlgmr.msra.gmra.mxu1 %vm462_vm0, %v9686_v17  ;;  %8215 = vmatprep.mubr.msk.bf16.mxu0 %vm462_vm0, %v9682_v16 }
  0x22   : > { %8216 = vmatmul.mubr.msk.bf16.vlgmr.msra.gmra.mxu0 %vm462_vm0, %v9686_v17 }
  0x23   : > { %8236 = vmatpush3.bf16.msra.mxu0 %v9009_v18  ;;  %v9011_v18 = vld [vmem:[%s11576_s2 + $0x48] sm:$0xff]  }
  0x24   : > { %391 = vxpose.xlu0.b32.cont [3/4] (short) (narrow) %v387_v10, 32  ;;  %8237 = vmatprep.subr.bf16.mxu0 %v9010_v19 }
  0x27   : > { %8238 = vmatpush3.bf16.msra.mxu0 %v9010_v19 }
  0x28   : > { %392 = vxpose.xlu0.b32.end [4/4] (short) (narrow) %v388_v14, 32 }
  0x8f   : > { %v563_v55 = vpop.permute.xlu1 %562 }
  0x98   : > { %v405_v25 = vpop.trf.xlu0 }
  0x99   : > { %v9722_v29 = vadd.f32 %v425_v26, %v405_v25 }
  0x9c   : > { %v406_v28 = vpop.trf.xlu0 }
  0x9d   : > { %v9724_v30 = vadd.f32 %v426_v27, %v406_v28  ;;  %v9012_v27 = vld [vmem:[%s11576_s2 + $0x40] sm:$0xff]  }
  0x9f   : > { %v9728_v31 = vpack.c.bf16 %v9724_v30, %v9722_v29 }
  0xa0   : > { %v407_v32 = vpop.trf.xlu0 }
  0xa1   : > { %8219 = vmatprep.mubr.msk.bf16.mxu0 %vm462_vm0, %v9728_v31  ;;  %8231 = vmatprep.mubr.msk.bf16.mxu1 %vm462_vm0, %v9728_v31  ;;  %v9740_v36 = vadd.f32 %v427_v33, %v407_v32 }
  0xa4   : > { %v408_v35 = vpop.trf.xlu0 }
  0xa5   : > { %v9742_v37 = vadd.f32 %v428_v34, %v408_v35 }
  0xa7   : > { %11613 = vst [vmem:[#allocation9_spill] sm:$0xff] %v9742_v37  ;;  %v9746_v38 = vpack.c.bf16 %v9742_v37, %v9740_v36 }
  0xa9   : > { %8220 = vmatmul.mubr.msk.bf16.gmra.mxu0 %vm462_vm0, %v9746_v38  ;;  %8232 = vmatmul.mubr.msk.bf16.gmra.mxu1 %vm462_vm0, %v9746_v38 }
  0xaa   : > { %8239 = vmatprep.mubr.msk.bf16.mxu0 %vm462_vm0, %v9682_v16 }
  0xb1   : > { %8240 = vmatmul.mubr.msk.bf16.vlgmr.msra.gmra.mxu0 %vm462_vm0, %v9686_v17 }
  0xb2   : > { %8243 = vmatprep.mubr.msk.bf16.mxu0 %vm462_vm0, %v9728_v31 }
  0xb9   : > { %8244 = vmatmul.mubr.msk.bf16.gmra.mxu0 %vm462_vm0, %v9746_v38 }
  0xe1   : > { %v8229_v49 = vpop.f32.mrf.mxu1 }
  0xe2   : > { %v8217_v39 = vpop.f32.mrf.mxu0  ;;  %v608_v1 = vadd.f32 %v8229_v49, %v563_v55 }
  0xe3   : > { %v518_v41 = vadd.f32 %v8217_v39, %v9712_v24  ;;  %v599_v50 = vpop.f32.mrf.mxu1 }
  0xe4   : > { %v509_v40 = vpop.f32.mrf.mxu0  ;;  %v600_v5 = vadd.f32 %v599_v50, %v563_v55 }
  0xe5   : > { %v510_v43 = vadd.f32 %v509_v40, %v9712_v24  ;;  %v8230_v51 = vpop.f32.mrf.mxu1 }
  0xe6   : > { %v8218_v42 = vpop.f32.mrf.mxu0  ;;  %v611_v2 = vadd.f32 %v8230_v51, %v563_v55 }
  0xe7   : > { %v521_v44 = vadd.f32 %v8218_v42, %v9712_v24  ;;  %v602_v52 = vpop.f32.mrf.mxu1 }
  0xe8   : > { %v512_v45 = vpop.f32.mrf.mxu0  ;;  %v631_v4 = vpack.c.bf16 %v611_v2, %v608_v1  ;;  %v603_v6 = vadd.f32 %v602_v52, %v563_v55 }
  0xe9   : > { %v541_v46 = vpack.c.bf16 %v521_v44, %v518_v41  ;;  %v513_v47 = vadd.f32 %v512_v45, %v9712_v24 }
  0xea   : > { %v630_v8 = vpack.c.bf16 %v603_v6, %v600_v5  ;;  %v740_v10 = vsel %vm723_vm1, %v631_v4, 0 }
  0xeb   : > { %v540_v48 = vpack.c.bf16 %v513_v47, %v510_v43 }
  0xec   : > { %v737_v21 = vsel %vm723_vm1, %v630_v8, 0 }
  0xed   : > { %8255 = vmatprep.mubr.msk.bf16.mxu1 %vm723_vm1, %v540_v48 }
 0x169   : > { %v8233_v53 = vpop.f32.mrf.mxu1  ;;  %v8221_v7 = vpop.f32.mrf.mxu0 }
 0x16a   : > { %v624_v57 = vadd.f32 %v8233_v53, %v563_v55  ;;  %v534_v33 = vadd.f32 %v8221_v7, %v9712_v24 }
 0x16b   : > { %v615_v54 = vpop.f32.mrf.mxu1  ;;  %v525_v9 = vpop.f32.mrf.mxu0 }
 0x16c   : > { %v616_v60 = vadd.f32 %v615_v54, %v563_v55  ;;  %v526_v26 = vadd.f32 %v525_v9, %v9712_v24 }
 0x16d   : > { %v8234_v56 = vpop.f32.mrf.mxu1  ;;  %v8222_v14 = vpop.f32.mrf.mxu0 }
 0x16e   : > { %v627_v58 = vadd.f32 %v8234_v56, %v563_v55  ;;  %v537_v32 = vadd.f32 %v8222_v14, %v9712_v24 }
 0x16f   : > { %v618_v59 = vpop.f32.mrf.mxu1  ;;  %v528_v19 = vpop.f32.mrf.mxu0 }
 0x170   : > { %v633_v61 = vpack.c.bf16 %v627_v58, %v624_v57  ;;  %v619_v62 = vadd.f32 %v618_v59, %v563_v55  ;;  %v529_v25 = vadd.f32 %v528_v19, %v9712_v24  ;;  %v543_v34 = vpack.c.bf16 %v537_v32, %v534_v33 }
 0x172   : > { %v632_v63 = vpack.c.bf16 %v619_v62, %v616_v60  ;;  %8911 = vmatprep.subr.msk.bf16.mxu1 %vm723_vm1, %v633_v61  ;;  %v746_v0 = vsel %vm723_vm1, %v633_v61, 0  ;;  %v542_v28 = vpack.c.bf16 %v529_v25, %v526_v26 }
 0x173   : > { %8248 = vmatpush3.bf16.xpose.msra.mxu1 %v746_v0 }
 0x174   : > { %8912 = vmatprep.subr.msk.bf16.mxu1 %vm723_vm1, %v632_v63  ;;  %v743_v3 = vsel %vm723_vm1, %v632_v63, 0 }
 0x17b   : > { %8250 = vmatpush3.bf16.xpose.msra.mxu1 %v743_v3 }
 0x17c   : > { %8913 = vmatprep.subr.msk.bf16.mxu1 %vm723_vm1, %v631_v4 }
 0x183   : > { %8252 = vmatpush3.bf16.xpose.msra.mxu1 %v740_v10 }
 0x184   : > { %8914 = vmatprep.subr.msk.bf16.mxu1 %vm723_vm1, %v630_v8 }
 0x18b   : > { %8254 = vmatpush3.bf16.xpose.msra.mxu1 %v737_v21 }
 0x18c   : > { %8291 = vmatprep.subr.bf16.mxu1 %v9011_v18 }
 0x192   : > { %8256 = vmatmul.mubr.msk.bf16.vlgmr.msra.gmra.mxu1 %vm723_vm1, %v541_v46 }
 0x193   : > { %8259 = vmatprep.mubr.msk.bf16.mxu1 %vm723_vm1, %v542_v28  ;;  %8292 = vmatpush3.bf16.msra.mxu1 %v9011_v18 }
 0x194   : > { %8293 = vmatprep.subr.bf16.mxu1 %v9012_v27 }
 0x197   : > { %8294 = vmatpush3.bf16.msra.mxu1 %v9012_v27 }
 0x19a   : > { %8260 = vmatmul.mubr.msk.bf16.gmra.mxu1 %vm723_vm1, %v543_v34 }
 0x19b   : > { %8295 = vmatprep.mubr.msk.bf16.mxu1 %vm462_vm0, %v9682_v16 }
 0x1a2   : > { %8296 = vmatmul.mubr.msk.bf16.vlgmr.msra.gmra.mxu1 %vm462_vm0, %v9686_v17 }
 0x1a3   : > { %8299 = vmatprep.mubr.msk.bf16.mxu1 %vm462_vm0, %v9728_v31 }
 0x1aa   : > { %8300 = vmatmul.mubr.msk.bf16.gmra.mxu1 %vm462_vm0, %v9746_v38 }
 0x252   : > { %v8257_v35 = vpop.f32.mrf.mxu1 }
 0x253   : > { %v815_v42 = vmul.f32 0.35355338, %v8257_v35 }
 0x254   : > { %v782_v39 = vpop.f32.mrf.mxu1 }
 0x255   : > { %v813_v40 = vmul.f32 0.35355338, %v782_v39  ;;  %v828_v48 = vsel %vm821_vm2, %v815_v42, -inf }
 0x256   : > { %v8258_v41 = vpop.f32.mrf.mxu1 }
 0x257   : > { %v822_v43 = vsel %vm821_vm2, %v813_v40, -inf  ;;  %v816_v47 = vmul.f32 0.35355338, %v8258_v41 }
 0x258   : > { %823 = vmax.xlane.f32.xlu1 %v822_v43  ;;  %v785_v44 = vpop.f32.mrf.mxu1 }
 0x259   : > { %v814_v45 = vmul.f32 0.35355338, %v785_v44  ;;  %v831_v52 = vsel %vm821_vm2, %v816_v47, -inf }
 0x25a   : > { %v8261_v46 = vpop.f32.mrf.mxu1 }
 0x25b   : > { %v825_v49 = vsel %vm821_vm2, %v814_v45, -inf  ;;  %v819_v51 = vmul.f32 0.35355338, %v8261_v46 }
 0x25c   : > { %829 = vmax.xlane.f32.xlu1 %v828_v48  ;;  %826 = vmax.xlane.f32.xlu0 %v825_v49  ;;  %v798_v50 = vpop.f32.mrf.mxu1 }
 0x25d   : > { %v817_v54 = vmul.f32 0.35355338, %v798_v50  ;;  %v840_v55 = vsel %vm821_vm2, %v819_v51, -inf }
 0x25e   : > { %v8262_v53 = vpop.f32.mrf.mxu1 }
 0x25f   : > { %v834_v58 = vsel %vm821_vm2, %v817_v54, -inf  ;;  %v820_v59 = vmul.f32 0.35355338, %v8262_v53 }
 0x260   : > { %832 = vmax.xlane.f32.xlu1 %v831_v52  ;;  %v801_v56 = vpop.f32.mrf.mxu1 }
 0x261   : > { %v818_v57 = vmul.f32 0.35355338, %v801_v56  ;;  %v843_v61 = vsel %vm821_vm2, %v820_v59, -inf }
 0x262   : > { %v9840_v56 = vpop.f32.mrf.mxu1 }
 0x263   : > { %v837_v60 = vsel %vm821_vm2, %v818_v57, -inf }
 0x264   : > { %841 = vmax.xlane.f32.xlu1 %v840_v55 }
 0x268   : > { %835 = vmax.xlane.f32.xlu1 %v834_v58  ;;  %v9842_v58 = vpop.f32.mrf.mxu1 }
 0x26c   : > { %838 = vmax.xlane.f32.xlu1 %v837_v60 }
 0x270   : > { %844 = vmax.xlane.f32.xlu1 %v843_v61 }
 0x2e1   : > { %v824_v62 = vpop.xlane.xlu1 %823 }
 0x2e2   : > { %v846_v63 = vsub.f32 %v813_v40, %v824_v62  ;;  %v9844_v62 = vpop.f32.mrf.mxu1 }
 0x2e4   : > { %v854_v4 = vmul.f32 1.442695, %v846_v63 }
 0x2e5   : > { %v830_v0 = vpop.xlane.xlu1 %829  ;;  %v827_v1 = vpop.xlane.xlu0 %826 }
 0x2e6   : > { %v848_v2 = vsub.f32 %v815_v42, %v830_v0  ;;  %v847_v3 = vsub.f32 %v814_v45, %v827_v1  ;;  %v9846_v1 = vpop.f32.mrf.mxu1 }
 0x2e8   : > { %v858_v5 = vmul.f32 1.442695, %v848_v2  ;;  %v856_v6 = vmul.f32 1.442695, %v847_v3 }
 0x2e9   : > { %v833_v7 = vpop.xlane.xlu1 %832 }
 0x2ea   : > { %9117 = vpow2.f32 %v858_v5  ;;  %v849_v8 = vsub.f32 %v816_v47, %v833_v7 }
 0x2eb   : > { %9119 = vpow2.f32 %v856_v6 }
 0x2ec   : > { %9121 = vpow2.f32 %v854_v4  ;;  %v860_v9 = vmul.f32 1.442695, %v849_v8  ;;  %v8301_v4 = vpop.f32.mrf.mxu1 }
 0x2ed   : > { %v842_v10 = vpop.xlane.xlu1 %841 }
 0x2ee   : > { %9123 = vpow2.f32 %v860_v9  ;;  %v852_v14 = vsub.f32 %v819_v51, %v842_v10  ;;  %v1155_v8 = vpop.f32.mrf.mxu1 }
 0x2f0   : > { %v866_v18 = vmul.f32 1.442695, %v852_v14 }
 0x2f1   : > { %v836_v19 = vpop.xlane.xlu1 %835 }
 0x2f2   : > { %9125 = vpow2.f32 %v866_v18  ;;  %v850_v21 = vsub.f32 %v817_v54, %v836_v19  ;;  %v8241_v54 = vpop.f32.mrf.mxu0 }
 0x2f4   : > { %v862_v25 = vmul.f32 1.442695, %v850_v21  ;;  %v688_v55 = vpop.f32.mrf.mxu0 }
 0x2f5   : > { %v839_v26 = vpop.xlane.xlu1 %838 }
 0x2f6   : > { %9127 = vpow2.f32 %v862_v25  ;;  %v851_v27 = vsub.f32 %v818_v57, %v839_v26  ;;  %v8242_v57 = vpop.f32.mrf.mxu0 }
 0x2f7   : > { %v9802_v28 = vpop.eup %9117 }
 0x2f8   : > { %v9804_v32 = vpop.eup %9119  ;;  %v864_v33 = vmul.f32 1.442695, %v851_v27  ;;  %v876_v34 = vsel %vm821_vm2, %v9802_v28, 0.0  ;;  %v691_v60 = vpop.f32.mrf.mxu0 }
 0x2f9   : > { %v9808_v35 = vpop.eup %9121  ;;  %877 = vadd.xlane.f32.xlu0 %v876_v34  ;;  %v873_v39 = vsel %vm821_vm2, %v9804_v32, 0.0  ;;  %v845_v40 = vpop.xlane.xlu1 %844 }
 0x2fa   : > { %9129 = vpow2.f32 %v864_v33  ;;  %874 = vadd.xlane.f32.xlu1 %v873_v39  ;;  %v853_v41 = vsub.f32 %v820_v59, %v845_v40  ;;  %v870_v44 = vsel %vm821_vm2, %v9808_v35, 0.0  ;;  %v8245_v0 = vpop.f32.mrf.mxu0  ;;  %v8302_v40 = vpop.f32.mrf.mxu1 }
 0x2fb   : > { %v9812_v42 = vpop.eup %9123 }
 0x2fc   : > { %v868_v43 = vmul.f32 1.442695, %v853_v41  ;;  %v879_v45 = vsel %vm821_vm2, %v9812_v42, 0.0  ;;  %v704_v3 = vpop.f32.mrf.mxu0 }
 0x2fd   : > { %871 = vadd.xlane.f32.xlu0 %v870_v44 }
 0x2fe   : > { %9131 = vpow2.f32 %v868_v43  ;;  %880 = vadd.xlane.f32.xlu1 %v879_v45  ;;  %v8246_v7 = vpop.f32.mrf.mxu0 }
 0x2ff   : > { %v9818_v46 = vpop.eup %9125 }
 0x300   : > { %v888_v47 = vsel %vm821_vm2, %v9818_v46, 0.0  ;;  %v707_v18 = vpop.f32.mrf.mxu0 }
 0x301   : > { %889 = vadd.xlane.f32.xlu0 %v888_v47 }
 0x303   : > { %v9822_v48 = vpop.eup %9127 }
 0x304   : > { %v882_v49 = vsel %vm821_vm2, %v9822_v48, 0.0 }
 0x305   : > { %883 = vadd.xlane.f32.xlu0 %v882_v49  ;;  %v1158_v49 = vpop.f32.mrf.mxu1 }
 0x307   : > { %v9826_v50 = vpop.eup %9129 }
 0x308   : > { %v885_v51 = vsel %vm821_vm2, %v9826_v50, 0.0 }
 0x309   : > { %886 = vadd.xlane.f32.xlu1 %v885_v51 }
 0x30b   : > { %v9830_v52 = vpop.eup %9131 }
 0x30c   : > { %v891_v53 = vsel %vm821_vm2, %v9830_v52, 0.0 }
 0x30d   : > { %892 = vadd.xlane.f32.xlu1 %v891_v53 }
 0x31b   : > { %651 = vrot.lane.b32.xlu0 %v9712_v24, %s9520_s13 }
 0x31e   : > { %1102 = vrot.lane.b32.xlu1 %v9712_v24, %s9521_s14 }
 0x322   : > { %1013 = vrot.lane.b32.xlu1 %v9712_v24, %s9522_s15 }
 0x382   : > { %v878_v59 = vpop.xlane.xlu0 %877 }
 0x383   : > { %v875_v61 = vpop.xlane.xlu1 %874 }
 0x384   : > { %9133 = vrcp.f32 %v875_v61 }
 0x386   : > { %v872_v63 = vpop.xlane.xlu0 %871 }
 0x387   : > { %9135 = vrcp.f32 %v872_v63  ;;  %v881_v5 = vpop.xlane.xlu1 %880 }
 0x388   : > { %9137 = vrcp.f32 %v881_v5 }
 0x389   : > { %9139 = vrcp.f32 %v878_v59 }
 0x38a   : > { %v890_v2 = vpop.xlane.xlu0 %889 }
 0x38e   : > { %v884_v6 = vpop.xlane.xlu0 %883 }
 0x391   : > { %v9134_v9 = vpop.eup %9133 }
 0x392   : > { %v652_v10 = vpop.permute.xlu0 %651  ;;  %v887_v14 = vpop.xlane.xlu1 %886  ;;  %v903_v39 = vmul.f32 %v9134_v9, %v9804_v32 }
 0x393   : > { %9141 = vrcp.f32 %v887_v14  ;;  %v713_v19 = vadd.f32 %v8245_v0, %v652_v10  ;;  %v716_v21 = vadd.f32 %v8246_v7, %v652_v10  ;;  %v705_v25 = vadd.f32 %v704_v3, %v652_v10 }
 0x394   : > { %v9136_v26 = vpop.eup %9135  ;;  %9143 = vrcp.f32 %v884_v6  ;;  %v708_v27 = vadd.f32 %v707_v18, %v652_v10  ;;  %v697_v43 = vadd.f32 %v8241_v54, %v652_v10  ;;  %v700_v44 = vadd.f32 %v8242_v57, %v652_v10 }
 0x395   : > { %v722_v33 = vpack.c.bf16 %v716_v21, %v713_v19  ;;  %v902_v34 = vmul.f32 %v9136_v26, %v9808_v35  ;;  %v689_v59 = vadd.f32 %v688_v55, %v652_v10  ;;  %v692_v35 = vadd.f32 %v691_v60, %v652_v10  ;;  %v9138_v57 = vpop.eup %9137 }
 0x396   : > { %v893_v41 = vpop.xlane.xlu1 %892  ;;  %v721_v45 = vpack.c.bf16 %v708_v27, %v705_v25  ;;  %v720_v53 = vpack.c.bf16 %v700_v44, %v697_v43  ;;  %v9140_v3 = vpop.eup %9139  ;;  %v905_v60 = vmul.f32 %v9138_v57, %v9812_v42  ;;  %v9014_v42 = vld [vmem:[%s11576_s2 + $0x30] sm:$0xff]  }
 0x397   : > { %8263 = vmatprep.subr.bf16.mxu0 %v722_v33  ;;  %v910_v47 = vpack.c.bf16 %v903_v39, %v902_v34  ;;  %9145 = vrcp.f32 %v893_v41  ;;  %v719_v6 = vpack.c.bf16 %v692_v35, %v689_v59  ;;  %v904_v14 = vmul.f32 %v9140_v3, %v9802_v28 }
 0x398   : > { %8264 = vmatpush3.bf16.msra.mxu0 %v722_v33  ;;  %9147 = vrcp.f32 %v890_v2 }
 0x399   : > { %8265 = vmatprep.subr.bf16.mxu0 %v721_v45  ;;  %8271 = vmatprep.mubr.msk.bf16.mxu0 %vm821_vm2, %v910_v47  ;;  %v911_v19 = vpack.c.bf16 %v905_v60, %v904_v14 }
 0x39a   : > { %v1103_v51 = vpop.permute.xlu1 %1102 }
 0x39b   : > { %v1164_v61 = vadd.f32 %v8301_v4, %v1103_v51  ;;  %v1167_v32 = vadd.f32 %v8302_v40, %v1103_v51  ;;  %v1156_v63 = vadd.f32 %v1155_v8, %v1103_v51  ;;  %v1159_v0 = vadd.f32 %v1158_v49, %v1103_v51  ;;  %v9013_v4 = vld [vmem:[%s11576_s2 + $0x38] sm:$0xff]  }
 0x39c   : > { %8266 = vmatpush3.bf16.msra.mxu0 %v721_v45  ;;  %v1148_v9 = vadd.f32 %v9840_v56, %v1103_v51  ;;  %v1151_v10 = vadd.f32 %v9844_v62, %v1103_v51  ;;  %v1140_v56 = vadd.f32 %v9842_v58, %v1103_v51  ;;  %v1143_v62 = vadd.f32 %v9846_v1, %v1103_v51  ;;  %v995_v58 = vld [vmem:[%s11577_s3] sm:$0xf] }
 0x39d   : > { %8267 = vmatprep.subr.bf16.mxu0 %v720_v53  ;;  %v1173_v54 = vpack.c.bf16 %v1167_v32, %v1164_v61  ;;  %v1172_v7 = vpack.c.bf16 %v1159_v0, %v1156_v63 }
 0x39e   : > { %v1171_v26 = vpack.c.bf16 %v1151_v10, %v1148_v9  ;;  %v1170_v40 = vpack.c.bf16 %v1143_v62, %v1140_v56  ;;  %v1014_v61 = vpop.permute.xlu1 %1013 }
 0x39f   : > { %8915 = vmatprep.subr.msk.bf16.mxu1 %vm723_vm1, %v1173_v54  ;;  %v1285_v5 = vsel %vm723_vm1, %v1173_v54, 0  ;;  %v1282_v28 = vsel %vm723_vm1, %v1172_v7, 0 }
 0x3a0   : > { %v9142_v2 = vpop.eup %9141  ;;  %8268 = vmatpush3.bf16.msra.mxu0 %v720_v53  ;;  %8316 = vmatpush3.bf16.xpose.msra.mxu1 %v1285_v5  ;;  %v1279_v39 = vsel %vm723_vm1, %v1171_v26, 0 }
 0x3a1   : > { %v9144_v55 = vpop.eup %9143  ;;  %8269 = vmatprep.subr.bf16.mxu0 %v719_v6  ;;  %8916 = vmatprep.subr.msk.bf16.mxu1 %vm723_vm1, %v1172_v7  ;;  %v907_v8 = vmul.f32 %v9142_v2, %v9826_v50  ;;  %v9015_v50 = vld [vmem:[%s11576_s2 + $0x58] sm:$0xff]   ;;  %v1629_v2 = vsel %vm1547_vm3, %v995_v58, 0 }
 0x3a2   : > { %v906_v18 = vmul.f32 %v9144_v55, %v9822_v48  ;;  %v9017_v55 = vld [vmem:[%s11576_s2 + $0x78] sm:$0xff]  }
 0x3a4   : > { %8270 = vmatpush3.bf16.msra.mxu0 %v719_v6  ;;  %v9146_v21 = vpop.eup %9145  ;;  %v912_v25 = vpack.c.bf16 %v907_v8, %v906_v18 }
 0x3a5   : > { %8279 = vmatprep.subr.bf16.mxu0 %v9013_v4  ;;  %v9148_v27 = vpop.eup %9147  ;;  %v909_v48 = vmul.f32 %v9146_v21, %v9830_v52  ;;  %v9016_v52 = vld [vmem:[%s11576_s2 + $0x50] sm:$0xff]  }
 0x3a6   : > { %v908_v33 = vmul.f32 %v9148_v27, %v9818_v46  ;;  %v1276_v46 = vsel %vm723_vm1, %v1170_v40, 0 }
 0x3a7   : > { %8272 = vmatmul.mubr.msk.bf16.vlgmr.msra.gmra.mxu0 %vm821_vm2, %v911_v19 }
 0x3a8   : > { %8275 = vmatprep.mubr.msk.bf16.mxu0 %vm821_vm2, %v912_v25  ;;  %8280 = vmatpush3.bf16.msra.mxu0 %v9013_v4  ;;  %v913_v34 = vpack.c.bf16 %v909_v48, %v908_v33  ;;  %v9018_v25 = vld [vmem:[%s11576_s2 + $0x70] sm:$0xff]  }
 0x3a9   : > { %8318 = vmatpush3.bf16.xpose.msra.mxu1 %v1282_v28  ;;  %8281 = vmatprep.subr.bf16.mxu0 %v9014_v42 }
 0x3aa   : > { %8917 = vmatprep.subr.msk.bf16.mxu1 %vm723_vm1, %v1171_v26 }
 0x3ac   : > { %8282 = vmatpush3.bf16.msra.mxu0 %v9014_v42 }
 0x3ad   : > { %8303 = vmatprep.subr.bf16.mxu0 %v9015_v50 }
 0x3af   : > { %8276 = vmatmul.mubr.msk.bf16.gmra.mxu0 %vm821_vm2, %v913_v34 }
 0x3b0   : > { %8283 = vmatprep.mubr.msk.bf16.mxu0 %vm462_vm0, %v9682_v16 }
 0x3b1   : > { %8320 = vmatpush3.bf16.xpose.msra.mxu1 %v1279_v39 }
 0x3b2   : > { %8918 = vmatprep.subr.msk.bf16.mxu1 %vm723_vm1, %v1170_v40 }
 0x3b7   : > { %8284 = vmatmul.mubr.msk.bf16.vlgmr.msra.gmra.mxu0 %vm462_vm0, %v9686_v17 }
 0x3b8   : > { %8287 = vmatprep.mubr.msk.bf16.mxu0 %vm462_vm0, %v9728_v31  ;;  %8304 = vmatpush3.bf16.msra.mxu0 %v9015_v50 }
 0x3b9   : > { %8305 = vmatprep.subr.bf16.mxu0 %v9016_v52  ;;  %8322 = vmatpush3.bf16.xpose.msra.mxu1 %v1276_v46 }
 0x3ba   : > { %8920 = vmatprep.subr.msk.bf16.mxu1 %vm1547_vm3, %v995_v58 }
 0x3bc   : > { %8306 = vmatpush3.bf16.msra.mxu0 %v9016_v52 }
 0x3bf   : > { %8288 = vmatmul.mubr.msk.bf16.gmra.mxu0 %vm462_vm0, %v9746_v38 }
 0x3c0   : > { %8307 = vmatprep.mubr.msk.bf16.mxu0 %vm462_vm0, %v9682_v16 }
 0x3c7   : > { %8308 = vmatmul.mubr.msk.bf16.vlgmr.msra.gmra.mxu0 %vm462_vm0, %v9686_v17 }
 0x3c8   : > { %8311 = vmatprep.mubr.msk.bf16.mxu0 %vm462_vm0, %v9728_v31 }
 0x3cf   : > { %8312 = vmatmul.mubr.msk.bf16.gmra.mxu0 %vm462_vm0, %v9746_v38 }
 0x467   : > { %v8273_v1 = vpop.f32.mrf.mxu0 }
 0x469   : > { %v960_v41 = vpop.f32.mrf.mxu0 }
 0x46b   : > { %v8274_v43 = vpop.f32.mrf.mxu0 }
 0x46c   : > { %v992_v21 = vpack.c.bf16 %v8274_v43, %v8273_v1 }
 0x46d   : > { %v963_v44 = vpop.f32.mrf.mxu0 }
 0x46e   : > { %v991_v42 = vpack.c.bf16 %v963_v44, %v960_v41 }
 0x46f   : > { %v8277_v45 = vpop.f32.mrf.mxu0 }
 0x471   : > { %v976_v47 = vpop.f32.mrf.mxu0 }
 0x473   : > { %v8278_v49 = vpop.f32.mrf.mxu0 }
 0x474   : > { %v994_v27 = vpack.c.bf16 %v8278_v49, %v8277_v45 }
 0x475   : > { %v979_v51 = vpop.f32.mrf.mxu0 }
 0x476   : > { %v993_v26 = vpack.c.bf16 %v979_v51, %v976_v47 }
 0x477   : > { %v8285_v53 = vpop.f32.mrf.mxu0 }
 0x478   : > { %v1059_v57 = vadd.f32 %v8285_v53, %v1014_v61 }
 0x479   : > { %v1050_v59 = vpop.f32.mrf.mxu0 }
 0x47a   : > { %v1051_v0 = vadd.f32 %v1050_v59, %v1014_v61 }
 0x47b   : > { %v8286_v35 = vpop.f32.mrf.mxu0 }
 0x47c   : > { %v1062_v32 = vadd.f32 %v8286_v35, %v1014_v61 }
 0x47d   : > { %v1053_v63 = vpop.f32.mrf.mxu0 }
 0x47e   : > { %v1054_v54 = vadd.f32 %v1053_v63, %v1014_v61  ;;  %v1082_v6 = vpack.c.bf16 %v1062_v32, %v1059_v57 }
 0x47f   : > { %v8289_v3 = vpop.f32.mrf.mxu0 }
 0x480   : > { %v1081_v5 = vpack.c.bf16 %v1054_v54, %v1051_v0  ;;  %v1075_v14 = vadd.f32 %v8289_v3, %v1014_v61 }
 0x481   : > { %v1066_v7 = vpop.f32.mrf.mxu0 }
 0x482   : > { %8323 = vmatprep.mubr.msk.bf16.mxu1 %vm723_vm1, %v1081_v5  ;;  %v1067_v9 = vadd.f32 %v1066_v7, %v1014_v61 }
 0x483   : > { %v8290_v60 = vpop.f32.mrf.mxu0  ;;  %8324 = vmatmul.mubr.msk.bf16.vlgmr.msra.gmra.mxu1 %vm723_vm1, %v1082_v6 }
 0x484   : > { %8358 = vmatpush3.bf16.msra.mxu1 %v1629_v2  ;;  %v1078_v4 = vadd.f32 %v8290_v60, %v1014_v61 }
 0x485   : > { %v1069_v8 = vpop.f32.mrf.mxu0  ;;  %8379 = vmatprep.subr.bf16.mxu1 %v9017_v55 }
 0x486   : > { %v1070_v10 = vadd.f32 %v1069_v8, %v1014_v61  ;;  %v1084_v19 = vpack.c.bf16 %v1078_v4, %v1075_v14 }
 0x488   : > { %v1083_v18 = vpack.c.bf16 %v1070_v10, %v1067_v9 }
 0x48a   : > { %8327 = vmatprep.mubr.msk.bf16.mxu1 %vm723_vm1, %v1083_v18 }
 0x48b   : > { %8328 = vmatmul.mubr.msk.bf16.gmra.mxu1 %vm723_vm1, %v1084_v19 }
 0x48c   : > { %8359 = vmatprep.mubr.msk.bf16.mxu1 %vm723_vm1, %v991_v42 }
 0x493   : > { %8360 = vmatmul.mubr.msk.bf16.vlgmr.msra.gmra.mxu1 %vm723_vm1, %v992_v21 }
 0x494   : > { %8363 = vmatprep.mubr.msk.bf16.mxu1 %vm723_vm1, %v993_v26  ;;  %8380 = vmatpush3.bf16.msra.mxu1 %v9017_v55 }
 0x495   : > { %8381 = vmatprep.subr.bf16.mxu1 %v9018_v25 }
 0x498   : > { %8382 = vmatpush3.bf16.msra.mxu1 %v9018_v25 }
 0x49b   : > { %8364 = vmatmul.mubr.msk.bf16.gmra.mxu1 %vm723_vm1, %v994_v27 }
 0x49c   : > { %8383 = vmatprep.mubr.msk.bf16.mxu1 %vm462_vm0, %v9682_v16 }
 0x4a3   : > { %8384 = vmatmul.mubr.msk.bf16.vlgmr.msra.gmra.mxu1 %vm462_vm0, %v9686_v17 }
 0x4a4   : > { %8387 = vmatprep.mubr.msk.bf16.mxu1 %vm462_vm0, %v9728_v31 }
 0x4ab   : > { %8388 = vmatmul.mubr.msk.bf16.gmra.mxu1 %vm462_vm0, %v9746_v38 }
 0x543   : > { %v8325_v28 = vpop.f32.mrf.mxu1 }
 0x544   : > { %v1354_v62 = vmul.f32 0.35355338, %v8325_v28 }
 0x545   : > { %v1321_v48 = vpop.f32.mrf.mxu1 }
 0x546   : > { %v1352_v50 = vmul.f32 0.35355338, %v1321_v48  ;;  %v1366_v46 = vsel %vm821_vm2, %v1354_v62, -inf }
 0x547   : > { %v8326_v56 = vpop.f32.mrf.mxu1 }
 0x548   : > { %v1360_v33 = vsel %vm821_vm2, %v1352_v50, -inf  ;;  %v1355_v52 = vmul.f32 0.35355338, %v8326_v56 }
 0x549   : > { %1361 = vmax.xlane.f32.xlu0 %v1360_v33  ;;  %v1324_v34 = vpop.f32.mrf.mxu1 }
 0x54a   : > { %v1353_v39 = vmul.f32 0.35355338, %v1324_v34  ;;  %v1369_v45 = vsel %vm821_vm2, %v1355_v52, -inf }
 0x54b   : > { %v8329_v40 = vpop.f32.mrf.mxu1 }
 0x54c   : > { %v1363_v58 = vsel %vm821_vm2, %v1353_v39, -inf  ;;  %v1358_v44 = vmul.f32 0.35355338, %v8329_v40 }
 0x54d   : > { %1367 = vmax.xlane.f32.xlu0 %v1366_v46  ;;  %1364 = vmax.xlane.f32.xlu1 %v1363_v58  ;;  %v1337_v1 = vpop.f32.mrf.mxu1 }
 0x54e   : > { %v1356_v41 = vmul.f32 0.35355338, %v1337_v1  ;;  %v1378_v59 = vsel %vm821_vm2, %v1358_v44, -inf }
 0x54f   : > { %v8330_v43 = vpop.f32.mrf.mxu1 }
 0x550   : > { %v1372_v47 = vsel %vm821_vm2, %v1356_v41, -inf  ;;  %v1359_v53 = vmul.f32 0.35355338, %v8330_v43 }
 0x551   : > { %1370 = vmax.xlane.f32.xlu0 %v1369_v45  ;;  %1373 = vmax.xlane.f32.xlu1 %v1372_v47  ;;  %v1340_v49 = vpop.f32.mrf.mxu1 }
 0x552   : > { %v1357_v51 = vmul.f32 0.35355338, %v1340_v49  ;;  %v1381_v61 = vsel %vm821_vm2, %v1359_v53, -inf }
 0x553   : > { %v9971_v45 = vpop.f32.mrf.mxu1 }
 0x554   : > { %v1375_v35 = vsel %vm821_vm2, %v1357_v51, -inf }
 0x555   : > { %1379 = vmax.xlane.f32.xlu1 %v1378_v59  ;;  %1376 = vmax.xlane.f32.xlu0 %v1375_v35  ;;  %v9973_v47 = vpop.f32.mrf.mxu1 }
 0x557   : > { %v9975_v49 = vpop.f32.mrf.mxu1 }
 0x559   : > { %1382 = vmax.xlane.f32.xlu0 %v1381_v61 }
 0x5d2   : > { %v1362_v32 = vpop.xlane.xlu0 %1361 }
 0x5d3   : > { %v1384_v63 = vsub.f32 %v1352_v50, %v1362_v32  ;;  %v8309_v32 = vpop.f32.mrf.mxu0 }
 0x5d5   : > { %v1392_v5 = vmul.f32 1.442695, %v1384_v63 }
 0x5d6   : > { %v1368_v0 = vpop.xlane.xlu0 %1367  ;;  %v1365_v54 = vpop.xlane.xlu1 %1364 }
 0x5d7   : > { %v1386_v57 = vsub.f32 %v1354_v62, %v1368_v0  ;;  %v1385_v3 = vsub.f32 %v1353_v39, %v1365_v54  ;;  %v1228_v0 = vpop.f32.mrf.mxu0 }
 0x5d9   : > { %v1396_v6 = vmul.f32 1.442695, %v1386_v57  ;;  %v1394_v7 = vmul.f32 1.442695, %v1385_v3  ;;  %v8310_v57 = vpop.f32.mrf.mxu0 }
 0x5da   : > { %v1371_v2 = vpop.xlane.xlu0 %1370  ;;  %v1374_v55 = vpop.xlane.xlu1 %1373 }
 0x5db   : > { %9149 = vpow2.f32 %v1396_v6  ;;  %v1387_v60 = vsub.f32 %v1355_v52, %v1371_v2  ;;  %v1388_v8 = vsub.f32 %v1356_v41, %v1374_v55 }
 0x5dc   : > { %9151 = vpow2.f32 %v1394_v7 }
 0x5dd   : > { %9153 = vpow2.f32 %v1392_v5  ;;  %v1398_v4 = vmul.f32 1.442695, %v1387_v60  ;;  %v1400_v19 = vmul.f32 1.442695, %v1388_v8  ;;  %v1231_v5 = vpop.f32.mrf.mxu0 }
 0x5de   : > { %v1380_v9 = vpop.xlane.xlu1 %1379  ;;  %v1377_v10 = vpop.xlane.xlu0 %1376 }
 0x5df   : > { %9155 = vpow2.f32 %v1398_v4  ;;  %v1390_v14 = vsub.f32 %v1358_v44, %v1380_v9  ;;  %v1389_v18 = vsub.f32 %v1357_v51, %v1377_v10  ;;  %v9977_v51 = vpop.f32.mrf.mxu1  ;;  %v8313_v55 = vpop.f32.mrf.mxu0 }
 0x5e1   : > { %v1404_v42 = vmul.f32 1.442695, %v1390_v14  ;;  %v1402_v21 = vmul.f32 1.442695, %v1389_v18  ;;  %v1244_v9 = vpop.f32.mrf.mxu0 }
 0x5e2   : > { %v1383_v25 = vpop.xlane.xlu0 %1382 }
 0x5e3   : > { %9157 = vpow2.f32 %v1404_v42  ;;  %v1391_v26 = vsub.f32 %v1359_v53, %v1383_v25  ;;  %v9979_v53 = vpop.f32.mrf.mxu1 }
 0x5e4   : > { %9159 = vpow2.f32 %v1402_v21 }
 0x5e5   : > { %9161 = vpow2.f32 %v1400_v19  ;;  %v1406_v27 = vmul.f32 1.442695, %v1391_v26  ;;  %v9981_v59 = vpop.f32.mrf.mxu1  ;;  %v8314_v19 = vpop.f32.mrf.mxu0 }
 0x5e7   : > { %9163 = vpow2.f32 %v1406_v27  ;;  %v9983_v35 = vpop.f32.mrf.mxu1  ;;  %v1247_v27 = vpop.f32.mrf.mxu0 }
 0x5e8   : > { %v9935_v28 = vpop.eup %9149 }
 0x5e9   : > { %v9937_v48 = vpop.eup %9151  ;;  %v1414_v50 = vsel %vm821_vm2, %v9935_v28, 0.0  ;;  %v9985_v61 = vpop.f32.mrf.mxu1 }
 0x5ea   : > { %v9941_v56 = vpop.eup %9153  ;;  %1415 = vadd.xlane.f32.xlu1 %v1414_v50  ;;  %v1411_v62 = vsel %vm821_vm2, %v9937_v48, 0.0 }
 0x5eb   : > { %1412 = vadd.xlane.f32.xlu0 %v1411_v62  ;;  %v1408_v34 = vsel %vm821_vm2, %v9941_v56, 0.0  ;;  %v9987_v63 = vpop.f32.mrf.mxu1 }
 0x5ec   : > { %v9945_v33 = vpop.eup %9155 }
 0x5ed   : > { %v1417_v39 = vsel %vm821_vm2, %v9945_v33, 0.0  ;;  %v9989_v54 = vpop.f32.mrf.mxu1 }
 0x5ee   : > { %1409 = vadd.xlane.f32.xlu1 %v1408_v34 }
 0x5ef   : > { %1418 = vadd.xlane.f32.xlu0 %v1417_v39  ;;  %v9991_v3 = vpop.f32.mrf.mxu1 }
 0x5f0   : > { %v9951_v40 = vpop.eup %9157 }
 0x5f1   : > { %v9953_v52 = vpop.eup %9159  ;;  %v1426_v46 = vsel %vm821_vm2, %v9951_v40, 0.0  ;;  %v9993_v7 = vpop.f32.mrf.mxu1 }
 0x5f2   : > { %v9957_v58 = vpop.eup %9161  ;;  %1427 = vadd.xlane.f32.xlu1 %v1426_v46  ;;  %v1423_v1 = vsel %vm821_vm2, %v9953_v52, 0.0 }
 0x5f3   : > { %1424 = vadd.xlane.f32.xlu0 %v1423_v1  ;;  %v1420_v43 = vsel %vm821_vm2, %v9957_v58, 0.0  ;;  %v8389_v4 = vpop.f32.mrf.mxu1 }
 0x5f4   : > { %v9961_v41 = vpop.eup %9163 }
 0x5f5   : > { %v1429_v44 = vsel %vm821_vm2, %v9961_v41, 0.0  ;;  %v1855_v14 = vpop.f32.mrf.mxu1 }
 0x5f6   : > { %1421 = vadd.xlane.f32.xlu1 %v1420_v43 }
 0x5f7   : > { %1430 = vadd.xlane.f32.xlu0 %v1429_v44  ;;  %v8390_v21 = vpop.f32.mrf.mxu1 }
 0x5f9   : > { %v1858_v62 = vpop.f32.mrf.mxu1 }
 0x607   : > { %1191 = vrot.lane.b32.xlu1 %v9712_v24, %s11597_s26  ;;  %s11617_s26 = smov 112  }
 0x60b   : > { %1713 = vrot.lane.b32.xlu1 %v9712_v24, %s11598_s29  ;;  %s11618_s29 = smov 56  }
 0x60d   : > { %1802 = vrot.lane.b32.xlu0 %v9712_v24, %s9524_s24 }
 0x673   : > { %v1416_v6 = vpop.xlane.xlu1 %1415 }
 0x674   : > { %v1413_v2 = vpop.xlane.xlu0 %1412 }
 0x675   : > { %9165 = vrcp.f32 %v1413_v2 }
 0x677   : > { %v1410_v60 = vpop.xlane.xlu1 %1409 }
 0x678   : > { %9167 = vrcp.f32 %v1410_v60  ;;  %v1419_v8 = vpop.xlane.xlu0 %1418 }
 0x679   : > { %9169 = vrcp.f32 %v1416_v6 }
 0x67a   : > { %9171 = vrcp.f32 %v1419_v8 }
 0x67b   : > { %v1428_v10 = vpop.xlane.xlu1 %1427 }
 0x67c   : > { %v1425_v18 = vpop.xlane.xlu0 %1424 }
 0x67d   : > { %9173 = vrcp.f32 %v1425_v18 }
 0x67f   : > { %v1422_v42 = vpop.xlane.xlu1 %1421 }
 0x680   : > { %v1431_v25 = vpop.xlane.xlu0 %1430  ;;  %9175 = vrcp.f32 %v1422_v42 }
 0x681   : > { %9177 = vrcp.f32 %v1431_v25 }
 0x682   : > { %v9166_v26 = vpop.eup %9165  ;;  %9179 = vrcp.f32 %v1428_v10 }
 0x683   : > { %v1192_v50 = vpop.permute.xlu1 %1191  ;;  %v1441_v20 = vmul.f32 %v9166_v26, %v9937_v48 }
 0x684   : > { %v9995_v34 = vpop.permute.xlu0 %1802  ;;  %v1253_v39 = vadd.f32 %v8313_v55, %v1192_v50  ;;  %v1256_v46 = vadd.f32 %v8314_v19, %v1192_v50  ;;  %v1245_v1 = vadd.f32 %v1244_v9, %v1192_v50  ;;  %v1248_v43 = vadd.f32 %v1247_v27, %v1192_v50 }
 0x685   : > { %v9168_v44 = vpop.eup %9167  ;;  %v1864_v2 = vadd.f32 %v8389_v4, %v9995_v34  ;;  %v1867_v60 = vadd.f32 %v8390_v21, %v9995_v34  ;;  %v1856_v6 = vadd.f32 %v1855_v14, %v9995_v34  ;;  %v1859_v8 = vadd.f32 %v1858_v62, %v9995_v34 }
 0x686   : > { %v1262_v18 = vpack.c.bf16 %v1256_v46, %v1253_v39  ;;  %v1440_v42 = vmul.f32 %v9168_v44, %v9941_v56  ;;  %v1261_v55 = vpack.c.bf16 %v1248_v43, %v1245_v1  ;;  %v1237_v9 = vadd.f32 %v8309_v32, %v1192_v50 }
 0x687   : > { %v1873_v23 = vpack.c.bf16 %v1867_v60, %v1864_v2  ;;  %v1240_v27 = vadd.f32 %v8310_v57, %v1192_v50  ;;  %v1872_v21 = vpack.c.bf16 %v1859_v8, %v1856_v6  ;;  %v1229_v56 = vadd.f32 %v1228_v0, %v1192_v50  ;;  %v7473_v0 = vld [vmem:[%s11577_s3 + $0x4] sm:$0xf] }
 0x688   : > { %8331 = vmatprep.subr.bf16.mxu0 %v1262_v18  ;;  %v1448_v19 = vpack.c.bf16 %v1441_v20, %v1440_v42  ;;  %v1232_v14 = vadd.f32 %v1231_v5, %v1192_v50  ;;  %v9170_v20 = vpop.eup %9169  ;;  %v1549_v46 = vsel %vm1547_vm3, %v7473_v0, 0  ;;  %v1848_v2 = vadd.f32 %v9987_v63, %v9995_v34 }
 0x689   : > { %8921 = vmatprep.subr.msk.bf16.mxu1 %vm723_vm1, %v1873_v23  ;;  %8332 = vmatpush3.bf16.msra.mxu0 %v1262_v18  ;;  %v1985_v4 = vsel %vm723_vm1, %v1873_v23, 0  ;;  %v1260_v48 = vpack.c.bf16 %v1240_v27, %v1237_v9  ;;  %v9172_v32 = vpop.eup %9171  ;;  %v1982_v23 = vsel %vm723_vm1, %v1872_v21, 0  ;;  %v1442_v5 = vmul.f32 %v9170_v20, %v9935_v28  ;;  %v9020_v9 = vld [vmem:[%s11576_s2 + $0x60] sm:$0xff]  }
 0x68a   : > { %8404 = vmatpush3.bf16.xpose.msra.mxu1 %v1985_v4  ;;  %8333 = vmatprep.subr.bf16.mxu0 %v1261_v55  ;;  %v9174_v57 = vpop.eup %9173  ;;  %v1259_v62 = vpack.c.bf16 %v1232_v14, %v1229_v56  ;;  %v1443_v25 = vmul.f32 %v9172_v32, %v9945_v33  ;;  %v1851_v60 = vadd.f32 %v9991_v3, %v9995_v34  ;;  %v9022_v20 = vld [vmem:[%s11576_s2 + $0x80] sm:$0xff]   ;;  %v9023_v32 = vld [vmem:[%s11576_s2 + $0x98] sm:$0xff]  }
 0x68b   : > { %8339 = vmatprep.mubr.msk.bf16.mxu0 %vm821_vm2, %v1448_v19  ;;  %8922 = vmatprep.subr.msk.bf16.mxu1 %vm723_vm1, %v1872_v21  ;;  %v1445_v10 = vmul.f32 %v9174_v57, %v9953_v52  ;;  %v9019_v52 = vld [vmem:[%s11576_s2 + $0x68] sm:$0xff]   ;;  %v1840_v6 = vadd.f32 %v9989_v54, %v9995_v34 }
 0x68c   : > { %v1449_v50 = vpack.c.bf16 %v1443_v25, %v1442_v5  ;;  %v9021_v21 = vld [vmem:[%s11576_s2 + $0x88] sm:$0xff]  }
 0x68d   : > { %8334 = vmatpush3.bf16.msra.mxu0 %v1261_v55  ;;  %v9176_v26 = vpop.eup %9175 }
 0x68e   : > { %8335 = vmatprep.subr.bf16.mxu0 %v1260_v48  ;;  %v1444_v39 = vmul.f32 %v9176_v26, %v9957_v58  ;;  %v9178_v1 = vpop.eup %9177 }
 0x68f   : > { %v9180_v43 = vpop.eup %9179  ;;  %v1447_v58 = vmul.f32 %v9178_v1, %v9961_v41  ;;  %v1871_v41 = vpack.c.bf16 %v1851_v60, %v1848_v2  ;;  %v1714_v1 = vpop.permute.xlu1 %1713 }
 0x690   : > { %v1450_v33 = vpack.c.bf16 %v1445_v10, %v1444_v39  ;;  %v1446_v28 = vmul.f32 %v9180_v43, %v9951_v40  ;;  %v1843_v40 = vadd.f32 %v9993_v7, %v9995_v34 }
 0x691   : > { %8336 = vmatpush3.bf16.msra.mxu0 %v1260_v48  ;;  %v1979_v18 = vsel %vm723_vm1, %v1871_v41, 0 }
 0x692   : > { %8406 = vmatpush3.bf16.xpose.msra.mxu1 %v1982_v23  ;;  %8337 = vmatprep.subr.bf16.mxu0 %v1259_v62  ;;  %v1451_v44 = vpack.c.bf16 %v1447_v58, %v1446_v28  ;;  %v1870_v8 = vpack.c.bf16 %v1843_v40, %v1840_v6  ;;  %v9024_v40 = vld [vmem:[%s11576_s2 + $0x90] sm:$0xff]  }
 0x693   : > { %8923 = vmatprep.subr.msk.bf16.mxu1 %vm723_vm1, %v1871_v41 }
 0x694   : > { %v1976_v63 = vsel %vm723_vm1, %v1870_v8, 0 }
 0x695   : > { %8338 = vmatpush3.bf16.msra.mxu0 %v1259_v62 }
 0x696   : > { %8919 = vmatprep.subr.msk.bf16.mxu0 %vm1547_vm3, %v7473_v0 }
 0x698   : > { %8340 = vmatmul.mubr.msk.bf16.vlgmr.msra.gmra.mxu0 %vm821_vm2, %v1449_v50 }
 0x699   : > { %8343 = vmatprep.mubr.msk.bf16.mxu0 %vm821_vm2, %v1450_v33  ;;  %8348 = vmatpush3.bf16.msra.mxu0 %v1549_v46 }
 0x69a   : > { %8367 = vmatprep.subr.bf16.mxu0 %v9019_v52  ;;  %8408 = vmatpush3.bf16.xpose.msra.mxu1 %v1979_v18 }
 0x69b   : > { %8924 = vmatprep.subr.msk.bf16.mxu1 %vm723_vm1, %v1870_v8 }
 0x6a0   : > { %8344 = vmatmul.mubr.msk.bf16.gmra.mxu0 %vm821_vm2, %v1451_v44 }
 0x6a2   : > { %8410 = vmatpush3.bf16.xpose.msra.mxu1 %v1976_v63  ;;  %v9025_v63 = vld [vmem:[%s11576_s2 + $0xb8] sm:$0xff]  }
 0x6a3   : > { %8445 = vmatprep.subr.bf16.mxu1 %v9023_v32 }
 0x758   : > { %v8341_v54 = vpop.f32.mrf.mxu0 }
 0x75a   : > { %v1498_v3 = vpop.f32.mrf.mxu0 }
 0x75c   : > { %v8342_v42 = vpop.f32.mrf.mxu0 }
 0x75d   : > { %v1530_v55 = vpack.c.bf16 %v8342_v42, %v8341_v54 }
 0x75e   : > { %v1501_v7 = vpop.f32.mrf.mxu0 }
 0x75f   : > { %v1529_v34 = vpack.c.bf16 %v1501_v7, %v1498_v3 }
 0x760   : > { %v8345_v19 = vpop.f32.mrf.mxu0 }
 0x761   : > { %8349 = vmatprep.mubr.msk.bf16.mxu0 %vm723_vm1, %v1529_v34 }
 0x762   : > { %v1514_v27 = vpop.f32.mrf.mxu0  ;;  %8350 = vmatmul.mubr.msk.bf16.vlgmr.msra.gmra.mxu0 %vm723_vm1, %v1530_v55  ;;  %v9026_v55 = vld [vmem:[%s11576_s2 + $0xb0] sm:$0xff]  }
 0x763   : > { %8368 = vmatpush3.bf16.msra.mxu0 %v9019_v52 }
 0x764   : > { %v8346_v4 = vpop.f32.mrf.mxu0  ;;  %8369 = vmatprep.subr.bf16.mxu0 %v9020_v9 }
 0x765   : > { %v1532_v14 = vpack.c.bf16 %v8346_v4, %v8345_v19 }
 0x766   : > { %v1517_v48 = vpop.f32.mrf.mxu0 }
 0x767   : > { %v1531_v56 = vpack.c.bf16 %v1517_v48, %v1514_v27  ;;  %8370 = vmatpush3.bf16.msra.mxu0 %v9020_v9 }
 0x768   : > { %8391 = vmatprep.subr.bf16.mxu0 %v9021_v21 }
 0x769   : > { %8353 = vmatprep.mubr.msk.bf16.mxu0 %vm723_vm1, %v1531_v56 }
 0x76a   : > { %8354 = vmatmul.mubr.msk.bf16.gmra.mxu0 %vm723_vm1, %v1532_v14 }
 0x76b   : > { %8371 = vmatprep.mubr.msk.bf16.mxu0 %vm462_vm0, %v9682_v16 }
 0x772   : > { %8372 = vmatmul.mubr.msk.bf16.vlgmr.msra.gmra.mxu0 %vm462_vm0, %v9686_v17 }
 0x773   : > { %8375 = vmatprep.mubr.msk.bf16.mxu0 %vm462_vm0, %v9728_v31  ;;  %8392 = vmatpush3.bf16.msra.mxu0 %v9021_v21 }
 0x774   : > { %8393 = vmatprep.subr.bf16.mxu0 %v9022_v20 }
 0x777   : > { %8394 = vmatpush3.bf16.msra.mxu0 %v9022_v20 }
 0x77a   : > { %8376 = vmatmul.mubr.msk.bf16.gmra.mxu0 %vm462_vm0, %v9746_v38 }
 0x77b   : > { %8395 = vmatprep.mubr.msk.bf16.mxu0 %vm462_vm0, %v9682_v16 }
 0x782   : > { %8396 = vmatmul.mubr.msk.bf16.vlgmr.msra.gmra.mxu0 %vm462_vm0, %v9686_v17 }
 0x783   : > { %8399 = vmatprep.mubr.msk.bf16.mxu0 %vm462_vm0, %v9728_v31 }
 0x78a   : > { %8400 = vmatmul.mubr.msk.bf16.gmra.mxu0 %vm462_vm0, %v9746_v38 }
 0x822   : > { %v10071_v57 = vpop.f32.mrf.mxu0 }
 0x824   : > { %v10073_v26 = vpop.f32.mrf.mxu0 }
 0x826   : > { %v10075_v62 = vpop.f32.mrf.mxu0 }
 0x828   : > { %v10077_v23 = vpop.f32.mrf.mxu0 }
 0x82a   : > { %v10079_v25 = vpop.f32.mrf.mxu0 }
 0x82c   : > { %v10081_v39 = vpop.f32.mrf.mxu0 }
 0x82e   : > { %v10083_v0 = vpop.f32.mrf.mxu0 }
 0x830   : > { %v10085_v5 = vpop.f32.mrf.mxu0 }
 0x832   : > { %v8373_v10 = vpop.f32.mrf.mxu0 }
 0x833   : > { %v1759_v44 = vadd.f32 %v8373_v10, %v1714_v1 }
 0x834   : > { %v1750_v50 = vpop.f32.mrf.mxu0 }
 0x835   : > { %v1751_v58 = vadd.f32 %v1750_v50, %v1714_v1 }
 0x836   : > { %v8374_v46 = vpop.f32.mrf.mxu0 }
 0x837   : > { %v1762_v33 = vadd.f32 %v8374_v46, %v1714_v1 }
 0x838   : > { %v1753_v43 = vpop.f32.mrf.mxu0 }
 0x839   : > { %v1754_v28 = vadd.f32 %v1753_v43, %v1714_v1  ;;  %v1782_v60 = vpack.c.bf16 %v1762_v33, %v1759_v44 }
 0x83a   : > { %v8377_v52 = vpop.f32.mrf.mxu0 }
 0x83b   : > { %v1781_v2 = vpack.c.bf16 %v1754_v28, %v1751_v58  ;;  %v1775_v42 = vadd.f32 %v8377_v52, %v1714_v1 }
 0x83c   : > { %v1766_v6 = vpop.f32.mrf.mxu0 }
 0x83d   : > { %8411 = vmatprep.mubr.msk.bf16.mxu1 %vm723_vm1, %v1781_v2  ;;  %v1767_v54 = vadd.f32 %v1766_v6, %v1714_v1 }
 0x83e   : > { %v8378_v41 = vpop.f32.mrf.mxu0  ;;  %8412 = vmatmul.mubr.msk.bf16.vlgmr.msra.gmra.mxu1 %vm723_vm1, %v1782_v60 }
 0x83f   : > { %8446 = vmatpush3.bf16.msra.mxu1 %v9023_v32  ;;  %v1778_v8 = vadd.f32 %v8378_v41, %v1714_v1 }
 0x840   : > { %v1769_v18 = vpop.f32.mrf.mxu0  ;;  %8447 = vmatprep.subr.bf16.mxu1 %v9024_v40 }
 0x841   : > { %v1770_v3 = vadd.f32 %v1769_v18, %v1714_v1  ;;  %v1784_v34 = vpack.c.bf16 %v1778_v8, %v1775_v42 }
 0x843   : > { %v1783_v7 = vpack.c.bf16 %v1770_v3, %v1767_v54  ;;  %8448 = vmatpush3.bf16.msra.mxu1 %v9024_v40 }
 0x844   : > { %8469 = vmatprep.subr.bf16.mxu1 %v9025_v63 }
 0x845   : > { %8415 = vmatprep.mubr.msk.bf16.mxu1 %vm723_vm1, %v1783_v7 }
 0x846   : > { %8416 = vmatmul.mubr.msk.bf16.gmra.mxu1 %vm723_vm1, %v1784_v34 }
 0x847   : > { %8449 = vmatprep.mubr.msk.bf16.mxu1 %vm462_vm0, %v9682_v16 }
 0x84e   : > { %8450 = vmatmul.mubr.msk.bf16.vlgmr.msra.gmra.mxu1 %vm462_vm0, %v9686_v17 }
 0x84f   : > { %8453 = vmatprep.mubr.msk.bf16.mxu1 %vm462_vm0, %v9728_v31  ;;  %8470 = vmatpush3.bf16.msra.mxu1 %v9025_v63 }
 0x850   : > { %8471 = vmatprep.subr.bf16.mxu1 %v9026_v55 }
 0x853   : > { %8472 = vmatpush3.bf16.msra.mxu1 %v9026_v55 }
 0x856   : > { %8454 = vmatmul.mubr.msk.bf16.gmra.mxu1 %vm462_vm0, %v9746_v38 }
 0x857   : > { %8473 = vmatprep.mubr.msk.bf16.mxu1 %vm462_vm0, %v9682_v16 }
 0x85e   : > { %8474 = vmatmul.mubr.msk.bf16.vlgmr.msra.gmra.mxu1 %vm462_vm0, %v9686_v17 }
 0x85f   : > { %8477 = vmatprep.mubr.msk.bf16.mxu1 %vm462_vm0, %v9728_v31 }
 0x866   : > { %8478 = vmatmul.mubr.msk.bf16.gmra.mxu1 %vm462_vm0, %v9746_v38 }
 0x8fe   : > { %v8413_v19 = vpop.f32.mrf.mxu1 }
 0x8ff   : > { %v2054_v32 = vmul.f32 0.35355338, %v8413_v19 }
 0x900   : > { %v2021_v9 = vpop.f32.mrf.mxu1 }
 0x901   : > { %v2052_v27 = vmul.f32 0.35355338, %v2021_v9  ;;  %v2066_v43 = vsel %vm821_vm2, %v2054_v32, -inf }
 0x902   : > { %v8414_v4 = vpop.f32.mrf.mxu1 }
 0x903   : > { %v2055_v21 = vmul.f32 0.35355338, %v8414_v4  ;;  %v2060_v48 = vsel %vm821_vm2, %v2052_v27, -inf }
 0x904   : > { %2061 = vmax.xlane.f32.xlu1 %v2060_v48  ;;  %v2024_v56 = vpop.f32.mrf.mxu1 }
 0x905   : > { %v2053_v14 = vmul.f32 0.35355338, %v2024_v56  ;;  %v2069_v10 = vsel %vm821_vm2, %v2055_v21, -inf }
 0x906   : > { %v8417_v20 = vpop.f32.mrf.mxu1 }
 0x907   : > { %v2063_v50 = vsel %vm821_vm2, %v2053_v14, -inf  ;;  %v2058_v44 = vmul.f32 0.35355338, %v8417_v20 }
 0x908   : > { %2070 = vmax.xlane.f32.xlu1 %v2069_v10  ;;  %2064 = vmax.xlane.f32.xlu0 %v2063_v50  ;;  %v2037_v46 = vpop.f32.mrf.mxu1 }
 0x909   : > { %v2056_v33 = vmul.f32 0.35355338, %v2037_v46  ;;  %v2078_v6 = vsel %vm821_vm2, %v2058_v44, -inf }
 0x90a   : > { %v8418_v1 = vpop.f32.mrf.mxu1 }
 0x90b   : > { %v2059_v52 = vmul.f32 0.35355338, %v8418_v1  ;;  %v2072_v2 = vsel %vm821_vm2, %v2056_v33, -inf }
 0x90c   : > { %2067 = vmax.xlane.f32.xlu0 %v2066_v43  ;;  %v2040_v58 = vpop.f32.mrf.mxu1 }
 0x90d   : > { %v2057_v28 = vmul.f32 0.35355338, %v2040_v58  ;;  %v2081_v40 = vsel %vm821_vm2, %v2059_v52, -inf }
 0x90f   : > { %v2075_v60 = vsel %vm821_vm2, %v2057_v28, -inf }
 0x910   : > { %2073 = vmax.xlane.f32.xlu0 %v2072_v2  ;;  %2076 = vmax.xlane.f32.xlu1 %v2075_v60 }
 0x914   : > { %2079 = vmax.xlane.f32.xlu0 %v2078_v6  ;;  %2082 = vmax.xlane.f32.xlu1 %v2081_v40 }
 0x98d   : > { %v2062_v41 = vpop.xlane.xlu1 %2061 }
 0x98e   : > { %v2084_v3 = vsub.f32 %v2052_v27, %v2062_v41 }
 0x990   : > { %v2092_v19 = vmul.f32 1.442695, %v2084_v3 }
 0x991   : > { %v2071_v8 = vpop.xlane.xlu1 %2070  ;;  %v2065_v18 = vpop.xlane.xlu0 %2064 }
 0x992   : > { %v2087_v63 = vsub.f32 %v2055_v21, %v2071_v8  ;;  %v2085_v54 = vsub.f32 %v2053_v14, %v2065_v18 }
 0x994   : > { %v2094_v42 = vmul.f32 1.442695, %v2085_v54  ;;  %v2098_v7 = vmul.f32 1.442695, %v2087_v63 }
 0x995   : > { %v2068_v34 = vpop.xlane.xlu0 %2067 }
 0x996   : > { %v2086_v55 = vsub.f32 %v2054_v32, %v2068_v34  ;;  %9181 = vpow2.f32 %v2094_v42  ;;  %v8397_v42 = vpop.f32.mrf.mxu0 }
 0x997   : > { %9183 = vpow2.f32 %v2098_v7 }
 0x998   : > { %v2096_v9 = vmul.f32 1.442695, %v2086_v55  ;;  %v1928_v7 = vpop.f32.mrf.mxu0 }
 0x999   : > { %v2074_v4 = vpop.xlane.xlu0 %2073  ;;  %v2077_v48 = vpop.xlane.xlu1 %2076 }
 0x99a   : > { %9185 = vpow2.f32 %v2096_v9  ;;  %v2089_v56 = vsub.f32 %v2057_v28, %v2077_v48  ;;  %v2088_v20 = vsub.f32 %v2056_v33, %v2074_v4  ;;  %v8398_v34 = vpop.f32.mrf.mxu0 }
 0x99b   : > { %9187 = vpow2.f32 %v2092_v19 }
 0x99c   : > { %v2102_v10 = vmul.f32 1.442695, %v2089_v56  ;;  %v2100_v27 = vmul.f32 1.442695, %v2088_v20  ;;  %v1931_v55 = vpop.f32.mrf.mxu0 }
 0x99d   : > { %v2080_v50 = vpop.xlane.xlu0 %2079  ;;  %v2083_v46 = vpop.xlane.xlu1 %2082 }
 0x99e   : > { %v2090_v21 = vsub.f32 %v2058_v44, %v2080_v50  ;;  %v2091_v14 = vsub.f32 %v2059_v52, %v2083_v46  ;;  %9189 = vpow2.f32 %v2102_v10  ;;  %v8401_v4 = vpop.f32.mrf.mxu0 }
 0x9a0   : > { %v2104_v1 = vmul.f32 1.442695, %v2090_v21  ;;  %v2106_v43 = vmul.f32 1.442695, %v2091_v14  ;;  %v1944_v56 = vpop.f32.mrf.mxu0 }
 0x9a2   : > { %9191 = vpow2.f32 %v2104_v1  ;;  %v8402_v50 = vpop.f32.mrf.mxu0 }
 0x9a3   : > { %9193 = vpow2.f32 %v2106_v43  ;;  %v9182_v32 = vpop.eup %9181 }
 0x9a4   : > { %9195 = vpow2.f32 %v2100_v27  ;;  %v2111_v58 = vsel %vm821_vm2, %v9182_v32, 0.0  ;;  %v10125_v2 = vpop.eup %9183  ;;  %v1947_v27 = vpop.f32.mrf.mxu0 }
 0x9a5   : > { %2112 = vadd.xlane.f32.xlu1 %v2111_v58  ;;  %v2117_v52 = vsel %vm821_vm2, %v10125_v2, 0.0 }
 0x9a7   : > { %v10127_v28 = vpop.eup %9185 }
 0x9a8   : > { %v2114_v33 = vsel %vm821_vm2, %v10127_v28, 0.0  ;;  %v9188_v44 = vpop.eup %9187 }
 0x9a9   : > { %2115 = vadd.xlane.f32.xlu0 %v2114_v33  ;;  %2118 = vadd.xlane.f32.xlu1 %v2117_v52  ;;  %v2108_v6 = vsel %vm821_vm2, %v9188_v44, 0.0 }
 0x9ab   : > { %v10133_v60 = vpop.eup %9189 }
 0x9ac   : > { %v2123_v40 = vsel %vm821_vm2, %v10133_v60, 0.0 }
 0x9ad   : > { %2109 = vadd.xlane.f32.xlu0 %v2108_v6  ;;  %2124 = vadd.xlane.f32.xlu1 %v2123_v40 }
 0x9af   : > { %v10138_v41 = vpop.eup %9191 }
 0x9b0   : > { %v10140_v8 = vpop.eup %9193  ;;  %v2126_v18 = vsel %vm821_vm2, %v10138_v41, 0.0 }
 0x9b1   : > { %v10144_v63 = vpop.eup %9195  ;;  %2127 = vadd.xlane.f32.xlu0 %v2126_v18  ;;  %v2129_v54 = vsel %vm821_vm2, %v10140_v8, 0.0 }
 0x9b2   : > { %2130 = vadd.xlane.f32.xlu1 %v2129_v54  ;;  %v2120_v3 = vsel %vm821_vm2, %v10144_v63, 0.0 }
 0x9b5   : > { %2121 = vadd.xlane.f32.xlu0 %v2120_v3 }
 0x9c3   : > { %2429 = vrot.lane.b32.xlu1 %v9712_v24, %s11593_s25  ;;  %s11594_s25 = smov 40  }
 0x9c7   : > { %2340 = vrot.lane.b32.xlu1 %v9712_v24, %s11595_s30 }
 0x9cb   : > { %1891 = vrot.lane.b32.xlu0 %v9712_v24, %s11596_s16  ;;  %s9531_s16 = smov 32  }
 0xa2e   : > { %v2113_v19 = vpop.xlane.xlu1 %2112 }
 0xa2f   : > { %9197 = vrcp.f32 %v2113_v19 }
 0xa32   : > { %v2116_v9 = vpop.xlane.xlu0 %2115  ;;  %v2119_v20 = vpop.xlane.xlu1 %2118 }
 0xa36   : > { %v2110_v48 = vpop.xlane.xlu0 %2109  ;;  %v2125_v21 = vpop.xlane.xlu1 %2124 }
 0xa37   : > { %9199 = vrcp.f32 %v2110_v48 }
 0xa38   : > { %9201 = vrcp.f32 %v2116_v9 }
 0xa39   : > { %9203 = vrcp.f32 %v2119_v20 }
 0xa3a   : > { %v2128_v10 = vpop.xlane.xlu0 %2127 }
 0xa3b   : > { %v2131_v3 = vpop.xlane.xlu1 %2130 }
 0xa3c   : > { %v9198_v14 = vpop.eup %9197 }
 0xa3d   : > { %v2141_v54 = vmul.f32 %v9198_v14, %v9182_v32 }
 0xa3e   : > { %v2122_v46 = vpop.xlane.xlu0 %2121 }
 0xa3f   : > { %9205 = vrcp.f32 %v2122_v46 }
 0xa40   : > { %9207 = vrcp.f32 %v2125_v21 }
 0xa41   : > { %9209 = vrcp.f32 %v2128_v10 }
 0xa42   : > { %v1892_v1 = vpop.permute.xlu0 %1891  ;;  %9211 = vrcp.f32 %v2131_v3 }
 0xa43   : > { %v1953_v43 = vadd.f32 %v8401_v4, %v1892_v1  ;;  %v1956_v58 = vadd.f32 %v8402_v50, %v1892_v1  ;;  %v1945_v33 = vadd.f32 %v1944_v56, %v1892_v1  ;;  %v1948_v52 = vadd.f32 %v1947_v27, %v1892_v1 }
 0xa44   : > { %v9200_v6 = vpop.eup %9199  ;;  %v1937_v9 = vadd.f32 %v8397_v42, %v1892_v1  ;;  %v1940_v37 = vadd.f32 %v8398_v34, %v1892_v1  ;;  %v1929_v56 = vadd.f32 %v1928_v7, %v1892_v1  ;;  %v1932_v20 = vadd.f32 %v1931_v55, %v1892_v1 }
 0xa45   : > { %v1962_v40 = vpack.c.bf16 %v1956_v58, %v1953_v43  ;;  %v2140_v18 = vmul.f32 %v9200_v6, %v9188_v44  ;;  %v1961_v19 = vpack.c.bf16 %v1948_v52, %v1945_v33  ;;  %v9202_v50 = vpop.eup %9201 }
 0xa46   : > { %v1960_v4 = vpack.c.bf16 %v1940_v37, %v1937_v9  ;;  %v9204_v44 = vpop.eup %9203  ;;  %v1959_v46 = vpack.c.bf16 %v1932_v20, %v1929_v56  ;;  %v2142_v42 = vmul.f32 %v9202_v50, %v10127_v28  ;;  %v7520_v37 = vld [vmem:[%s11577_s3 + $0x8] sm:$0xf]  ;;  %v2430_v20 = vpop.permute.xlu1 %2429 }
 0xa47   : > { %8419 = vmatprep.subr.bf16.mxu0 %v1962_v40  ;;  %v2148_v48 = vpack.c.bf16 %v2141_v54, %v2140_v18  ;;  %v2143_v34 = vmul.f32 %v9204_v44, %v10125_v2  ;;  %v2248_v27 = vsel %vm1547_vm3, %v7520_v37, 0 }
 0xa48   : > { %8420 = vmatpush3.bf16.msra.mxu0 %v1962_v40 }
 0xa49   : > { %8421 = vmatprep.subr.bf16.mxu0 %v1961_v19  ;;  %8427 = vmatprep.mubr.msk.bf16.mxu0 %vm821_vm2, %v2148_v48  ;;  %v2149_v14 = vpack.c.bf16 %v2143_v34, %v2142_v42 }
 0xa4c   : > { %8422 = vmatpush3.bf16.msra.mxu0 %v1961_v19  ;;  %v9206_v32 = vpop.eup %9205 }
 0xa4d   : > { %8423 = vmatprep.subr.bf16.mxu0 %v1960_v4  ;;  %v9208_v21 = vpop.eup %9207  ;;  %v2144_v10 = vmul.f32 %v9206_v32, %v10144_v63  ;;  %v10193_v32 = vpop.permute.xlu1 %2340 }
 0xa4e   : > { %v2145_v7 = vmul.f32 %v9208_v21, %v10133_v60  ;;  %v9210_v55 = vpop.eup %9209  ;;  %v9027_v60 = vld [vmem:[%s11576_s2 + $0xa8] sm:$0xff]   ;;  %v1666_v21 = vadd.f32 %v9973_v47, %v10073_v26  ;;  %v1682_v47 = vadd.f32 %v9981_v59, %v10081_v39 }
 0xa4f   : > { %v9212_v1 = vpop.eup %9211  ;;  %v2146_v2 = vmul.f32 %v9210_v55, %v10138_v41  ;;  %v9028_v41 = vld [vmem:[%s11576_s2 + $0xa0] sm:$0xff]  }
 0xa50   : > { %8424 = vmatpush3.bf16.msra.mxu0 %v1960_v4  ;;  %v2150_v28 = vpack.c.bf16 %v2145_v7, %v2144_v10  ;;  %v2147_v63 = vmul.f32 %v9212_v1, %v10140_v8  ;;  %v10189_v4 = vpop.f32.mrf.mxu1  ;;  %v1677_v10 = vadd.f32 %v9975_v49, %v10075_v62  ;;  %v1693_v49 = vadd.f32 %v9983_v35, %v10083_v0 }
 0xa51   : > { %8425 = vmatprep.subr.bf16.mxu0 %v1959_v46 }
 0xa52   : > { %v2151_v43 = vpack.c.bf16 %v2147_v63, %v2146_v2  ;;  %v2377_v56 = vpop.f32.mrf.mxu1 }
 0xa54   : > { %8426 = vmatpush3.bf16.msra.mxu0 %v1959_v46  ;;  %v10191_v50 = vpop.f32.mrf.mxu1 }
 0xa55   : > { %8925 = vmatprep.subr.msk.bf16.mxu0 %vm1547_vm3, %v7520_v37 }
 0xa56   : > { %v2380_v44 = vpop.f32.mrf.mxu1 }
 0xa57   : > { %8428 = vmatmul.mubr.msk.bf16.vlgmr.msra.gmra.mxu0 %vm821_vm2, %v2149_v14  ;;  %v2381_v46 = vadd.f32 %v2380_v44, %v10193_v32 }
 0xa58   : > { %8431 = vmatprep.mubr.msk.bf16.mxu0 %vm821_vm2, %v2150_v28  ;;  %8436 = vmatpush3.bf16.msra.mxu0 %v2248_v27 }
 0xa59   : > { %8457 = vmatprep.subr.bf16.mxu0 %v9027_v60 }
 0xa5f   : > { %8432 = vmatmul.mubr.msk.bf16.gmra.mxu0 %vm821_vm2, %v2151_v43 }
 0xb17   : > { %v8429_v58 = vpop.f32.mrf.mxu0 }
 0xb19   : > { %v2198_v33 = vpop.f32.mrf.mxu0 }
 0xb1b   : > { %v8430_v52 = vpop.f32.mrf.mxu0 }
 0xb1c   : > { %v2230_v18 = vpack.c.bf16 %v8430_v52, %v8429_v58 }
 0xb1d   : > { %v2201_v6 = vpop.f32.mrf.mxu0 }
 0xb1e   : > { %v2229_v40 = vpack.c.bf16 %v2201_v6, %v2198_v33 }
 0xb1f   : > { %v8433_v54 = vpop.f32.mrf.mxu0 }
 0xb20   : > { %8437 = vmatprep.mubr.msk.bf16.mxu0 %vm723_vm1, %v2229_v40 }
 0xb21   : > { %v2214_v8 = vpop.f32.mrf.mxu0  ;;  %8438 = vmatmul.mubr.msk.bf16.vlgmr.msra.gmra.mxu0 %vm723_vm1, %v2230_v18 }
 0xb22   : > { %8458 = vmatpush3.bf16.msra.mxu0 %v9027_v60 }
 0xb23   : > { %v8434_v3 = vpop.f32.mrf.mxu0  ;;  %8459 = vmatprep.subr.bf16.mxu0 %v9028_v41 }
 0xb24   : > { %v2232_v9 = vpack.c.bf16 %v8434_v3, %v8433_v54 }
 0xb25   : > { %v2217_v19 = vpop.f32.mrf.mxu0 }
 0xb26   : > { %v2231_v48 = vpack.c.bf16 %v2217_v19, %v2214_v8  ;;  %8460 = vmatpush3.bf16.msra.mxu0 %v9028_v41 }
 0xb28   : > { %8441 = vmatprep.mubr.msk.bf16.mxu0 %vm723_vm1, %v2231_v48  ;;  %v8455_v48 = vpop.f32.mrf.mxu1 }
 0xb29   : > { %8442 = vmatmul.mubr.msk.bf16.gmra.mxu0 %vm723_vm1, %v2232_v9 }
 0xb2a   : > { %8461 = vmatprep.mubr.msk.bf16.mxu0 %vm462_vm0, %v9682_v16  ;;  %v2378_v16 = vadd.f32 %v2377_v56, %v10193_v32 }
 0xb31   : > { %8462 = vmatmul.mubr.msk.bf16.vlgmr.msra.gmra.mxu0 %vm462_vm0, %v9686_v17  ;;  %v2408_v17 = vpack.c.bf16 %v2381_v46, %v2378_v16  ;;  %v2393_v16 = vpop.f32.mrf.mxu1 }
 0xb32   : > { %8465 = vmatprep.mubr.msk.bf16.mxu0 %vm462_vm0, %v9728_v31  ;;  %v1674_v31 = vadd.f32 %v9971_v45, %v10071_v57  ;;  %v1690_v45 = vadd.f32 %v9979_v53, %v10079_v25 }
 0xb33   : > { %v8456_v46 = vpop.f32.mrf.mxu1 }
 0xb39   : > { %8466 = vmatmul.mubr.msk.bf16.gmra.mxu0 %vm462_vm0, %v9746_v38 }
 0xb3a   : > { %8489 = vmatprep.mubr.msk.bf16.mxu0 %vm723_vm1, %v2408_v17 }
 0xbe1   : > { %v8439_v38 = vpop.f32.mrf.mxu0 }
 0xbe2   : > { %v10202_v42 = vadd.f32 %v8439_v38, %v1674_v31  ;;  %v2396_v31 = vpop.f32.mrf.mxu1  ;;  %v2386_v38 = vadd.f32 %v10189_v4, %v10193_v32 }
 0xbe3   : > { %v2284_v34 = vpop.f32.mrf.mxu0 }
 0xbe4   : > { %v10206_v37 = vadd.f32 %v2284_v34, %v1666_v21  ;;  %v2389_v21 = vadd.f32 %v10191_v50, %v10193_v32  ;;  %v2397_v34 = vadd.f32 %v2396_v31, %v10193_v32 }
 0xbe5   : > { %v8440_v7 = vpop.f32.mrf.mxu0 }
 0xbe6   : > { %v10208_v55 = vadd.f32 %v8440_v7, %v1677_v10  ;;  %v2409_v10 = vpack.c.bf16 %v2389_v21, %v2386_v38 }
 0xbe7   : > { %v10210_v14 = vpop.f32.mrf.mxu0 }
 0xbe9   : > { %v8443_v57 = vpop.f32.mrf.mxu0 }
 0xbea   : > { %v10216_v26 = vadd.f32 %v8443_v57, %v1690_v45  ;;  %v2402_v45 = vadd.f32 %v8455_v48, %v10193_v32  ;;  %v2405_v57 = vadd.f32 %v8456_v46, %v10193_v32 }
 0xbeb   : > { %v2300_v27 = vpop.f32.mrf.mxu0 }
 0xbec   : > { %v10220_v62 = vadd.f32 %v2300_v27, %v1682_v47  ;;  %v2411_v47 = vpack.c.bf16 %v2405_v57, %v2402_v45 }
 0xbed   : > { %v8444_v1 = vpop.f32.mrf.mxu0 }
 0xbee   : > { %v10222_v28 = vadd.f32 %v8444_v1, %v1693_v49 }
 0xbef   : > { %v10224_v2 = vpop.f32.mrf.mxu0 }
 0xbf1   : > { %v8463_v63 = vpop.f32.mrf.mxu0 }
 0xbf2   : > { %v2475_v41 = vadd.f32 %v8463_v63, %v2430_v20 }
 0xbf3   : > { %v2466_v43 = vpop.f32.mrf.mxu0 }
 0xbf4   : > { %v2467_v9 = vadd.f32 %v2466_v43, %v2430_v20 }
 0xbf5   : > { %v8464_v53 = vpop.f32.mrf.mxu0 }
 0xbf6   : > { %v2478_v54 = vadd.f32 %v8464_v53, %v2430_v20 }
 0xbf7   : > { %v2469_v25 = vpop.f32.mrf.mxu0 }
 0xbf8   : > { %v2498_v8 = vpack.c.bf16 %v2478_v54, %v2475_v41  ;;  %v2470_v19 = vadd.f32 %v2469_v25, %v2430_v20 }
 0xbf9   : > { %v8467_v60 = vpop.f32.mrf.mxu0 }
 0xbfa   : > { %v2491_v39 = vadd.f32 %v8467_v60, %v2430_v20  ;;  %v2497_v56 = vpack.c.bf16 %v2470_v19, %v2467_v9  ;;  %v2606_v44 = vsel %vm723_vm1, %v2498_v8, 0 }
 0xbfb   : > { %v2482_v58 = vpop.f32.mrf.mxu0 }
 0xbfc   : > { %v2483_v6 = vadd.f32 %v2482_v58, %v2430_v20  ;;  %v2603_v17 = vsel %vm723_vm1, %v2497_v56, 0 }
 0xbfd   : > { %v8468_v59 = vpop.f32.mrf.mxu0 }
 0xbfe   : > { %v2494_v33 = vadd.f32 %v8468_v59, %v2430_v20 }
 0xbff   : > { %v2485_v52 = vpop.f32.mrf.mxu0 }
 0xc00   : > { %v2500_v40 = vpack.c.bf16 %v2494_v33, %v2491_v39  ;;  %v2486_v35 = vadd.f32 %v2485_v52, %v2430_v20  ;;  %v2394_v20 = vadd.f32 %v2393_v16, %v10193_v32 }
 0xc02   : > { %v2499_v0 = vpack.c.bf16 %v2486_v35, %v2483_v6  ;;  %8926 = vmatprep.subr.msk.bf16.mxu0 %vm723_vm1, %v2500_v40  ;;  %v2612_v18 = vsel %vm723_vm1, %v2500_v40, 0  ;;  %v2410_v7 = vpack.c.bf16 %v2397_v34, %v2394_v20 }
 0xc03   : > { %8482 = vmatpush3.bf16.xpose.msra.mxu0 %v2612_v18 }
 0xc04   : > { %8927 = vmatprep.subr.msk.bf16.mxu0 %vm723_vm1, %v2499_v0  ;;  %v2609_v3 = vsel %vm723_vm1, %v2499_v0, 0 }
 0xc0b   : > { %8484 = vmatpush3.bf16.xpose.msra.mxu0 %v2609_v3 }
 0xc0c   : > { %8928 = vmatprep.subr.msk.bf16.mxu0 %vm723_vm1, %v2498_v8 }
 0xc13   : > { %8486 = vmatpush3.bf16.xpose.msra.mxu0 %v2606_v44 }
 0xc14   : > { %8929 = vmatprep.subr.msk.bf16.mxu0 %vm723_vm1, %v2497_v56 }
 0xc1b   : > { %8488 = vmatpush3.bf16.xpose.msra.mxu0 %v2603_v17 }
 0xc22   : > { %8490 = vmatmul.mubr.msk.bf16.vlgmr.msra.gmra.mxu0 %vm723_vm1, %v2409_v10 }
 0xc23   : > { %8493 = vmatprep.mubr.msk.bf16.mxu0 %vm723_vm1, %v2410_v7 }
 0xc2a   : > { %8494 = vmatmul.mubr.msk.bf16.gmra.mxu0 %vm723_vm1, %v2411_v47 }
 0xce2   : > { %v8491_v4 = vpop.f32.mrf.mxu0 }
 0xce3   : > { %v2681_v1 = vmul.f32 0.35355338, %v8491_v4 }
 0xce4   : > { %v2648_v27 = vpop.f32.mrf.mxu0 }
 0xce5   : > { %v2679_v50 = vmul.f32 0.35355338, %v2648_v27  ;;  %v2693_v58 = vsel %vm821_vm2, %v2681_v1, -inf }
 0xce6   : > { %v8492_v49 = vpop.f32.mrf.mxu0 }
 0xce7   : > { %v2687_v63 = vsel %vm821_vm2, %v2679_v50, -inf  ;;  %v2682_v60 = vmul.f32 0.35355338, %v8492_v49 }
 0xce8   : > { %2688 = vmax.xlane.f32.xlu0 %v2687_v63  ;;  %v2651_v43 = vpop.f32.mrf.mxu0 }
 0xce9   : > { %v2680_v53 = vmul.f32 0.35355338, %v2651_v43  ;;  %v2696_v6 = vsel %vm821_vm2, %v2682_v60, -inf }
 0xcea   : > { %v8495_v25 = vpop.f32.mrf.mxu0 }
 0xceb   : > { %v2690_v59 = vsel %vm821_vm2, %v2680_v53, -inf  ;;  %v2685_v52 = vmul.f32 0.35355338, %v8495_v25 }
 0xcec   : > { %2694 = vmax.xlane.f32.xlu0 %v2693_v58  ;;  %2691 = vmax.xlane.f32.xlu1 %v2690_v59  ;;  %v2664_v32 = vpop.f32.mrf.mxu0 }
 0xced   : > { %v2683_v39 = vmul.f32 0.35355338, %v2664_v32  ;;  %v2705_v54 = vsel %vm821_vm2, %v2685_v52, -inf }
 0xcee   : > { %v8496_v33 = vpop.f32.mrf.mxu0 }
 0xcef   : > { %v2699_v40 = vsel %vm821_vm2, %v2683_v39, -inf  ;;  %v2686_v18 = vmul.f32 0.35355338, %v8496_v33 }
 0xcf0   : > { %2697 = vmax.xlane.f32.xlu0 %v2696_v6  ;;  %2700 = vmax.xlane.f32.xlu1 %v2699_v40  ;;  %v2667_v35 = vpop.f32.mrf.mxu0 }
 0xcf1   : > { %v2684_v0 = vmul.f32 0.35355338, %v2667_v35  ;;  %v2708_v8 = vsel %vm821_vm2, %v2686_v18, -inf }
 0xcf3   : > { %v2702_v41 = vsel %vm821_vm2, %v2684_v0, -inf }
 0xcf4   : > { %2706 = vmax.xlane.f32.xlu1 %v2705_v54  ;;  %2703 = vmax.xlane.f32.xlu0 %v2702_v41  ;;  %v8475_v54 = vpop.f32.mrf.mxu1 }
 0xcf6   : > { %v2555_v41 = vpop.f32.mrf.mxu1 }
 0xcf8   : > { %2709 = vmax.xlane.f32.xlu0 %v2708_v8  ;;  %v8476_v8 = vpop.f32.mrf.mxu1 }
 0xd71   : > { %v2689_v3 = vpop.xlane.xlu0 %2688 }
 0xd72   : > { %v2711_v19 = vsub.f32 %v2679_v50, %v2689_v3  ;;  %v2558_v3 = vpop.f32.mrf.mxu1 }
 0xd74   : > { %v2719_v16 = vmul.f32 1.442695, %v2711_v19 }
 0xd75   : > { %v2695_v48 = vpop.xlane.xlu0 %2694  ;;  %v2692_v9 = vpop.xlane.xlu1 %2691 }
 0xd76   : > { %v2713_v56 = vsub.f32 %v2681_v1, %v2695_v48  ;;  %v2712_v44 = vsub.f32 %v2680_v53, %v2692_v9  ;;  %v8479_v9 = vpop.f32.mrf.mxu1 }
 0xd78   : > { %v2723_v46 = vmul.f32 1.442695, %v2713_v56  ;;  %v2721_v17 = vmul.f32 1.442695, %v2712_v44  ;;  %v2571_v44 = vpop.f32.mrf.mxu1 }
 0xd79   : > { %v2698_v31 = vpop.xlane.xlu0 %2697  ;;  %v2701_v38 = vpop.xlane.xlu1 %2700 }
 0xd7a   : > { %9213 = vpow2.f32 %v2723_v46  ;;  %v2714_v21 = vsub.f32 %v2682_v60, %v2698_v31  ;;  %v2715_v34 = vsub.f32 %v2683_v39, %v2701_v38 }
 0xd7b   : > { %9215 = vpow2.f32 %v2721_v17  ;;  %v8480_v17 = vpop.f32.mrf.mxu1 }
 0xd7c   : > { %9217 = vpow2.f32 %v2719_v16  ;;  %v2725_v20 = vmul.f32 1.442695, %v2714_v21  ;;  %v2727_v47 = vmul.f32 1.442695, %v2715_v34 }
 0xd7d   : > { %v2707_v10 = vpop.xlane.xlu1 %2706  ;;  %v2704_v7 = vpop.xlane.xlu0 %2703 }
 0xd7e   : > { %9219 = vpow2.f32 %v2725_v20  ;;  %v2717_v45 = vsub.f32 %v2685_v52, %v2707_v10  ;;  %v2716_v57 = vsub.f32 %v2684_v0, %v2704_v7 }
 0xd80   : > { %v2731_v4 = vmul.f32 1.442695, %v2717_v45  ;;  %v2729_v27 = vmul.f32 1.442695, %v2716_v57 }
 0xd81   : > { %v2710_v50 = vpop.xlane.xlu0 %2709 }
 0xd82   : > { %9221 = vpow2.f32 %v2731_v4  ;;  %v2718_v49 = vsub.f32 %v2686_v18, %v2710_v50 }
 0xd83   : > { %9223 = vpow2.f32 %v2729_v27 }
 0xd84   : > { %9225 = vpow2.f32 %v2727_v47  ;;  %v2733_v1 = vmul.f32 1.442695, %v2718_v49 }
 0xd86   : > { %9227 = vpow2.f32 %v2733_v1 }
 0xd87   : > { %v10253_v63 = vpop.eup %9213 }
 0xd88   : > { %v9216_v43 = vpop.eup %9215  ;;  %v2741_v53 = vsel %vm821_vm2, %v10253_v63, 0.0 }
 0xd89   : > { %v9218_v25 = vpop.eup %9217  ;;  %2742 = vadd.xlane.f32.xlu1 %v2741_v53  ;;  %v2738_v60 = vsel %vm821_vm2, %v9216_v43, 0.0 }
 0xd8a   : > { %2739 = vadd.xlane.f32.xlu0 %v2738_v60  ;;  %v2735_v59 = vsel %vm821_vm2, %v9218_v25, 0.0 }
 0xd8b   : > { %v10258_v58 = vpop.eup %9219 }
 0xd8c   : > { %v2744_v32 = vsel %vm821_vm2, %v10258_v58, 0.0 }
 0xd8d   : > { %2736 = vadd.xlane.f32.xlu1 %v2735_v59 }
 0xd8e   : > { %2745 = vadd.xlane.f32.xlu0 %v2744_v32 }
 0xd8f   : > { %v10263_v39 = vpop.eup %9221 }
 0xd90   : > { %v10265_v33 = vpop.eup %9223  ;;  %v2753_v52 = vsel %vm821_vm2, %v10263_v39, 0.0 }
 0xd91   : > { %v10269_v6 = vpop.eup %9225  ;;  %2754 = vadd.xlane.f32.xlu1 %v2753_v52  ;;  %v2750_v40 = vsel %vm821_vm2, %v10265_v33, 0.0 }
 0xd92   : > { %2751 = vadd.xlane.f32.xlu0 %v2750_v40  ;;  %v2747_v0 = vsel %vm821_vm2, %v10269_v6, 0.0 }
 0xd93   : > { %v10273_v35 = vpop.eup %9227 }
 0xd94   : > { %v2756_v18 = vsel %vm821_vm2, %v10273_v35, 0.0 }
 0xd95   : > { %2748 = vadd.xlane.f32.xlu1 %v2747_v0 }
 0xd96   : > { %2757 = vadd.xlane.f32.xlu0 %v2756_v18 }
 0xda6   : > { %2518 = vrot.lane.b32.xlu1 %v9712_v24, %s11594_s25  ;;  %v2574_v24 = vpop.f32.mrf.mxu1  ;;  %s11619_s25 = smov 48  }
 0xe12   : > { %v2743_v19 = vpop.xlane.xlu1 %2742 }
 0xe13   : > { %v2740_v48 = vpop.xlane.xlu0 %2739 }
 0xe14   : > { %9229 = vrcp.f32 %v2740_v48 }
 0xe16   : > { %v2737_v56 = vpop.xlane.xlu1 %2736 }
 0xe17   : > { %9231 = vrcp.f32 %v2737_v56  ;;  %v2746_v16 = vpop.xlane.xlu0 %2745 }
 0xe18   : > { %9233 = vrcp.f32 %v2743_v19  ;;  %v7563_v19 = vld [vmem:[%s11577_s3 + $0xc] sm:$0xf] }
 0xe19   : > { %9235 = vrcp.f32 %v2746_v16 }
 0xe1a   : > { %v2755_v46 = vpop.xlane.xlu1 %2754 }
 0xe1b   : > { %v2752_v38 = vpop.xlane.xlu0 %2751 }
 0xe1e   : > { %v2749_v31 = vpop.xlane.xlu1 %2748 }
 0xe1f   : > { %9237 = vrcp.f32 %v2749_v31  ;;  %v2758_v50 = vpop.xlane.xlu0 %2757 }
 0xe20   : > { %9239 = vrcp.f32 %v2752_v38 }
 0xe21   : > { %v9230_v21 = vpop.eup %9229  ;;  %9241 = vrcp.f32 %v2758_v50  ;;  %v1669_v50 = vadd.f32 %v9977_v51, %v10077_v23  ;;  %v1685_v23 = vadd.f32 %v9985_v61, %v10085_v5 }
 0xe22   : > { %v2519_v20 = vpop.permute.xlu1 %2518  ;;  %v2768_v27 = vmul.f32 %v9230_v21, %v9216_v43  ;;  %9243 = vrcp.f32 %v2755_v46 }
 0xe23   : > { %v2580_v34 = vadd.f32 %v8479_v9, %v2519_v20  ;;  %v2583_v10 = vadd.f32 %v8480_v17, %v2519_v20  ;;  %v2572_v7 = vadd.f32 %v2571_v44, %v2519_v20  ;;  %v2575_v45 = vadd.f32 %v2574_v24, %v2519_v20 }
 0xe24   : > { %v9232_v57 = vpop.eup %9231  ;;  %v2564_v53 = vadd.f32 %v8475_v54, %v2519_v20  ;;  %v2567_v60 = vadd.f32 %v8476_v8, %v2519_v20  ;;  %v2556_v32 = vadd.f32 %v2555_v41, %v2519_v20  ;;  %v2559_v52 = vadd.f32 %v2558_v3, %v2519_v20 }
 0xe25   : > { %v2589_v47 = vpack.c.bf16 %v2583_v10, %v2580_v34  ;;  %v2767_v4 = vmul.f32 %v9232_v57, %v9218_v25  ;;  %v2588_v49 = vpack.c.bf16 %v2575_v45, %v2572_v7  ;;  %v9234_v40 = vpop.eup %9233  ;;  %v2875_v9 = vsel %vm1547_vm3, %v7563_v19, 0  ;;  %v10304_v45 = vld [vmem:[%s11580_s6] sm:$0xff] }
 0xe26   : > { %v2587_v59 = vpack.c.bf16 %v2567_v60, %v2564_v53  ;;  %v9236_v25 = vpop.eup %9235  ;;  %v2586_v0 = vpack.c.bf16 %v2559_v52, %v2556_v32  ;;  %v2769_v41 = vmul.f32 %v9234_v40, %v10253_v63  ;;  %v2316_v60 = vadd.f32 %v10210_v14, %v1669_v50 }
 0xe27   : > { %8497 = vmatprep.subr.bf16.mxu1 %v2589_v47  ;;  %v2775_v1 = vpack.c.bf16 %v2768_v27, %v2767_v4  ;;  %v2770_v54 = vmul.f32 %v9236_v25, %v10258_v58 }
 0xe28   : > { %8498 = vmatpush3.bf16.msra.mxu1 %v2589_v47 }
 0xe29   : > { %8499 = vmatprep.subr.bf16.mxu1 %v2588_v49  ;;  %8505 = vmatprep.mubr.msk.bf16.mxu1 %vm821_vm2, %v2775_v1  ;;  %v2776_v48 = vpack.c.bf16 %v2770_v54, %v2769_v41 }
 0xe2c   : > { %8500 = vmatpush3.bf16.msra.mxu1 %v2588_v49  ;;  %v9238_v43 = vpop.eup %9237 }
 0xe2d   : > { %8501 = vmatprep.subr.bf16.mxu1 %v2587_v59  ;;  %v9240_v18 = vpop.eup %9239  ;;  %v2771_v8 = vmul.f32 %v9238_v43, %v10269_v6 }
 0xe2e   : > { %v2772_v3 = vmul.f32 %v9240_v18, %v10265_v33  ;;  %v9242_v56 = vpop.eup %9241 }
 0xe2f   : > { %v9244_v58 = vpop.eup %9243  ;;  %v2774_v6 = vmul.f32 %v9242_v56, %v10273_v35 }
 0xe30   : > { %8502 = vmatpush3.bf16.msra.mxu1 %v2587_v59  ;;  %v2777_v44 = vpack.c.bf16 %v2772_v3, %v2771_v8  ;;  %v2773_v63 = vmul.f32 %v9244_v58, %v10263_v39  ;;  %v11605_v39 = vsub.s32 1, %v9706_v22  ;;  %v2320_v8 = vadd.f32 %v10224_v2, %v1685_v23 }
 0xe31   : > { %8503 = vmatprep.subr.bf16.mxu1 %v2586_v0 }
 0xe32   : > { %v2778_v16 = vpack.c.bf16 %v2774_v6, %v2773_v63  ;;  %v2953_v57 = vrot.slane %v10304_v45, %v11605_v39  ;;  %v11614_v63 = vld [vmem:[#allocation9_spill] sm:$0xff] }
 0xe34   : > { %8504 = vmatpush3.bf16.msra.mxu1 %v2586_v0 }
 0xe35   : > { %8930 = vmatprep.subr.msk.bf16.mxu1 %vm1547_vm3, %v7563_v19 }
 0xe37   : > { %8506 = vmatmul.mubr.msk.bf16.vlgmr.msra.gmra.mxu1 %vm821_vm2, %v2776_v48 }
 0xe38   : > { %8509 = vmatprep.mubr.msk.bf16.mxu1 %vm821_vm2, %v2777_v44  ;;  %8514 = vmatpush3.bf16.msra.mxu1 %v2875_v9 }
 0xe3f   : > { %8510 = vmatmul.mubr.msk.bf16.gmra.mxu1 %vm821_vm2, %v2778_v16 }
 0xef7   : > { %v8507_v33 = vpop.f32.mrf.mxu1 }
 0xef9   : > { %v2825_v46 = vpop.f32.mrf.mxu1 }
 0xefb   : > { %v8508_v17 = vpop.f32.mrf.mxu1 }
 0xefc   : > { %v2857_v21 = vpack.c.bf16 %v8508_v17, %v8507_v33 }
 0xefd   : > { %v2828_v31 = vpop.f32.mrf.mxu1 }
 0xefe   : > { %v2856_v38 = vpack.c.bf16 %v2828_v31, %v2825_v46 }
 0xeff   : > { %v8511_v24 = vpop.f32.mrf.mxu1 }
 0xf00   : > { %8515 = vmatprep.mubr.msk.bf16.mxu1 %vm723_vm1, %v2856_v38 }
 0xf01   : > { %v2841_v20 = vpop.f32.mrf.mxu1  ;;  %8516 = vmatmul.mubr.msk.bf16.vlgmr.msra.gmra.mxu1 %vm723_vm1, %v2857_v21 }
 0xf03   : > { %v8512_v34 = vpop.f32.mrf.mxu1 }
 0xf04   : > { %v2859_v7 = vpack.c.bf16 %v8512_v34, %v8511_v24 }
 0xf05   : > { %v2844_v10 = vpop.f32.mrf.mxu1 }
 0xf06   : > { %v2858_v35 = vpack.c.bf16 %v2844_v10, %v2841_v20 }
 0xf08   : > { %8519 = vmatprep.mubr.msk.bf16.mxu1 %vm723_vm1, %v2858_v35 }
 0xf09   : > { %8520 = vmatmul.mubr.msk.bf16.gmra.mxu1 %vm723_vm1, %v2859_v7 }
 0xfc1   : > { %v8517_v47 = vpop.f32.mrf.mxu1 }
 0xfc2   : > { %v2944_v4 = vadd.f32 %v8517_v47, %v10202_v42 }
 0xfc3   : > { %v2911_v27 = vpop.f32.mrf.mxu1 }
 0xfc4   : > { %v2956_v49 = vadd.f32 %v2953_v57, %v2944_v4  ;;  %v2942_v1 = vadd.f32 %v2911_v27, %v10206_v37 }
 0xfc5   : > { %v8518_v53 = vpop.f32.mrf.mxu1 }
 0xfc6   : > { %v2954_v59 = vadd.f32 %v2953_v57, %v2942_v1  ;;  %v2945_v32 = vadd.f32 %v8518_v53, %v10208_v55  ;;  %v2964_v52 = vadd.f32 %v2956_v49, %v9676_v13 }
 0xfc7   : > { %v2914_v40 = vpop.f32.mrf.mxu1 }
 0xfc8   : > { %v2957_v25 = vadd.f32 %v2953_v57, %v2945_v32  ;;  %v2943_v43 = vadd.f32 %v2914_v40, %v2316_v60  ;;  %v2976_v42 = vsel %vm462_vm0, %v2964_v52, 0.0  ;;  %v2962_v0 = vadd.f32 %v2954_v59, %v9672_v11 }
 0xfc9   : > { %2977 = vadd.xlane.f32.xlu0 %v2976_v42  ;;  %v8521_v51 = vpop.f32.mrf.mxu1 }
 0xfca   : > { %v2955_v18 = vadd.f32 %v2953_v57, %v2943_v43  ;;  %v2970_v55 = vsel %vm462_vm0, %v2962_v0, 0.0  ;;  %v2965_v13 = vadd.f32 %v2957_v25, %v9678_v15  ;;  %v2948_v19 = vadd.f32 %v8521_v51, %v10216_v26 }
 0xfcb   : > { %v2927_v37 = vpop.f32.mrf.mxu1 }
 0xfcc   : > { %v2946_v14 = vadd.f32 %v2927_v37, %v10220_v62  ;;  %v2979_v48 = vsel %vm462_vm0, %v2965_v13, 0.0  ;;  %v2963_v61 = vadd.f32 %v2955_v18, %v9674_v12  ;;  %v2960_v62 = vadd.f32 %v2953_v57, %v2948_v19  ;;  %v9030_v19 = vld [vmem:[%s11578_s4] sm:$0xff]  }
 0xfcd   : > { %2971 = vadd.xlane.f32.xlu0 %v2970_v55  ;;  %v8522_v54 = vpop.f32.mrf.mxu1 }
 0xfce   : > { %v2958_v41 = vadd.f32 %v2953_v57, %v2946_v14  ;;  %v2949_v9 = vadd.f32 %v8522_v54, %v10222_v28  ;;  %v2973_v15 = vsel %vm462_vm0, %v2963_v61, 0.0  ;;  %v2968_v12 = vadd.f32 %v2960_v62, %v9740_v36 }
 0xfcf   : > { %v2930_v11 = vpop.f32.mrf.mxu1 }
 0xfd0   : > { %v2947_v3 = vadd.f32 %v2930_v11, %v2320_v8  ;;  %v2966_v2 = vadd.f32 %v2958_v41, %v9722_v29  ;;  %v2961_v44 = vadd.f32 %v2953_v57, %v2949_v9  ;;  %v2988_v6 = vsel %vm462_vm0, %v2968_v12, 0.0  ;;  %v9029_v8 = vld [vmem:[%s11578_s4 + $0x8] sm:$0xff]   ;;  %v9031_v11 = vld [vmem:[%s11579_s5 + $0x18] sm:$0xff]  }
 0xfd1   : > { %2980 = vadd.xlane.f32.xlu0 %v2979_v48  ;;  %8523 = vmatprep.subr.bf16.mxu0 %v9029_v8 }
 0xfd2   : > { %v2959_v5 = vadd.f32 %v2953_v57, %v2947_v3  ;;  %v2982_v58 = vsel %vm462_vm0, %v2966_v2, 0.0  ;;  %v2969_v28 = vadd.f32 %v2961_v44, %v11614_v63  ;;  %8524 = vmatpush3.bf16.msra.mxu0 %v9029_v8  ;;  %8535 = vmatprep.subr.bf16.mxu1 %v9031_v11 }
 0xfd3   : > { %8525 = vmatprep.subr.bf16.mxu0 %v9030_v19  ;;  %8536 = vmatpush3.bf16.msra.mxu1 %v9031_v11 }
 0xfd4   : > { %v2967_v56 = vadd.f32 %v2959_v5, %v9724_v30  ;;  %v2991_v16 = vsel %vm462_vm0, %v2969_v28, 0.0 }
 0xfd5   : > { %2974 = vadd.xlane.f32.xlu0 %v2973_v15 }
 0xfd6   : > { %v2985_v26 = vsel %vm462_vm0, %v2967_v56, 0.0  ;;  %8526 = vmatpush3.bf16.msra.mxu0 %v9030_v19 }
 0xfd7   : > { %2986 = vadd.xlane.f32.xlu1 %v2985_v26 }
 0xfd9   : > { %2983 = vadd.xlane.f32.xlu0 %v2982_v58 }
 0xfdd   : > { %2989 = vadd.xlane.f32.xlu0 %v2988_v6 }
 0xfe1   : > { %2992 = vadd.xlane.f32.xlu0 %v2991_v16 }
0x1052   : > { %v2978_v30 = vpop.xlane.xlu0 %2977 }
0x1053   : > { %v2997_v29 = vmul.f32 0.03125, %v2978_v30 }
0x1055   : > { %v10337_v33 = vsub.f32 %v2964_v52, %v2997_v29  ;;  %v11604_v29 = vsub.s32 2, %v9706_v22 }
0x1056   : > { %v2972_v46 = vpop.xlane.xlu0 %2971 }
0x1057   : > { %v2995_v17 = vmul.f32 0.03125, %v2972_v46  ;;  %v3013_v31 = vmul.f32 %v10337_v33, %v10337_v33 }
0x1059   : > { %v10341_v38 = vsub.f32 %v2962_v0, %v2995_v17  ;;  %v3025_v36 = vsel %vm462_vm0, %v3013_v31, 0.0 }
0x105a   : > { %v2981_v21 = vpop.xlane.xlu0 %2980  ;;  %3026 = vadd.xlane.f32.xlu0 %v3025_v36 }
0x105b   : > { %v2998_v24 = vmul.f32 0.03125, %v2981_v21  ;;  %v3011_v20 = vmul.f32 %v10341_v38, %v10341_v38 }
0x105d   : > { %v10346_v34 = vsub.f32 %v2965_v13, %v2998_v24  ;;  %v3019_v10 = vsel %vm462_vm0, %v3011_v20, 0.0 }
0x105e   : > { %v2975_v35 = vpop.xlane.xlu0 %2974  ;;  %3020 = vadd.xlane.f32.xlu0 %v3019_v10 }
0x105f   : > { %v2996_v7 = vmul.f32 0.03125, %v2975_v35  ;;  %v3014_v57 = vmul.f32 %v10346_v34, %v10346_v34 }
0x1060   : > { %v2987_v47 = vpop.xlane.xlu1 %2986 }
0x1061   : > { %v10351_v4 = vsub.f32 %v2963_v61, %v2996_v7  ;;  %v3000_v27 = vmul.f32 0.03125, %v2987_v47  ;;  %v3028_v50 = vsel %vm462_vm0, %v3014_v57, 0.0  ;;  %v3078_v57 = vrot.slane %v10304_v45, %v11604_v29 }
0x1062   : > { %v2984_v49 = vpop.xlane.xlu0 %2983  ;;  %3029 = vadd.xlane.f32.xlu0 %v3028_v50 }
0x1063   : > { %v2999_v1 = vmul.f32 0.03125, %v2984_v49  ;;  %v3012_v53 = vmul.f32 %v10351_v4, %v10351_v4  ;;  %v10356_v60 = vsub.f32 %v2967_v56, %v3000_v27  ;;  %v11603_v27 = vsub.s32 3, %v9706_v22 }
0x1065   : > { %v10358_v59 = vsub.f32 %v2966_v2, %v2999_v1  ;;  %v3022_v32 = vsel %vm462_vm0, %v3012_v53, 0.0  ;;  %v3016_v0 = vmul.f32 %v10356_v60, %v10356_v60 }
0x1066   : > { %v2990_v52 = vpop.xlane.xlu0 %2989  ;;  %3023 = vadd.xlane.f32.xlu0 %v3022_v32 }
0x1067   : > { %v3001_v40 = vmul.f32 0.03125, %v2990_v52  ;;  %v3015_v25 = vmul.f32 %v10358_v59, %v10358_v59  ;;  %v3034_v18 = vsel %vm462_vm0, %v3016_v0, 0.0 }
0x1069   : > { %v10363_v43 = vsub.f32 %v2968_v12, %v3001_v40  ;;  %v3031_v42 = vsel %vm462_vm0, %v3015_v25, 0.0 }
0x106a   : > { %3032 = vadd.xlane.f32.xlu0 %v3031_v42  ;;  %v2993_v51 = vpop.xlane.xlu0 %2992 }
0x106b   : > { %v3002_v23 = vmul.f32 0.03125, %v2993_v51  ;;  %v3017_v14 = vmul.f32 %v10363_v43, %v10363_v43 }
0x106d   : > { %v10368_v37 = vsub.f32 %v2969_v28, %v3002_v23  ;;  %v3037_v54 = vsel %vm462_vm0, %v3017_v14, 0.0 }
0x106e   : > { %3035 = vadd.xlane.f32.xlu0 %v3034_v18 }
0x106f   : > { %v3018_v55 = vmul.f32 %v10368_v37, %v10368_v37 }
0x1071   : > { %v3040_v13 = vsel %vm462_vm0, %v3018_v55, 0.0 }
0x1072   : > { %3041 = vadd.xlane.f32.xlu1 %v3040_v13  ;;  %3038 = vadd.xlane.f32.xlu0 %v3037_v54 }
0x10e3   : > { %v3027_v41 = vpop.xlane.xlu0 %3026 }
0x10e4   : > { %v3045_v3 = vmul.f32 0.03125, %v3027_v41 }
0x10e6   : > { %v3053_v62 = vadd.f32 1e-12, %v3045_v3 }
0x10e7   : > { %v3021_v48 = vpop.xlane.xlu0 %3020 }
0x10e8   : > { %v3043_v61 = vmul.f32 0.03125, %v3021_v48 }
0x10ea   : > { %v3051_v5 = vadd.f32 1e-12, %v3043_v61 }
0x10eb   : > { %v3030_v9 = vpop.xlane.xlu0 %3029 }
0x10ec   : > { %v3046_v15 = vmul.f32 0.03125, %v3030_v9  ;;  %9245 = vrsqrt.f32 %v3051_v5  ;;  %v11602_v9 = vsub.s32 4, %v9706_v22 }
0x10ed   : > { %9247 = vrsqrt.f32 %v3053_v62  ;;  %v9034_v62 = vld [vmem:[%s11579_s5] sm:$0xff]  }
0x10ee   : > { %v3054_v56 = vadd.f32 1e-12, %v3046_v15 }
0x10ef   : > { %v3024_v2 = vpop.xlane.xlu0 %3023 }
0x10f0   : > { %9249 = vrsqrt.f32 %v3054_v56  ;;  %v3044_v26 = vmul.f32 0.03125, %v3024_v2  ;;  %v3110_v56 = vrot.slane %v10304_v45, %v11602_v9 }
0x10f2   : > { %v3052_v44 = vadd.f32 1e-12, %v3044_v26 }
0x10f3   : > { %v3033_v58 = vpop.xlane.xlu0 %3032 }
0x10f4   : > { %9251 = vrsqrt.f32 %v3052_v44  ;;  %v3047_v12 = vmul.f32 0.03125, %v3033_v58 }
0x10f6   : > { %v3055_v6 = vadd.f32 1e-12, %v3047_v12 }
0x10f7   : > { %v3036_v63 = vpop.xlane.xlu0 %3035 }
0x10f8   : > { %9253 = vrsqrt.f32 %v3055_v6  ;;  %v3048_v28 = vmul.f32 0.03125, %v3036_v63 }
0x10f9   : > { %v9246_v30 = vpop.eup %9245 }
0x10fa   : > { %v3056_v16 = vadd.f32 1e-12, %v3048_v28  ;;  %v9248_v31 = vpop.eup %9247  ;;  %v3067_v7 = vmul.f32 %v9246_v30, %v10341_v38  ;;  %v3090_v38 = vrot.slane %v10304_v45, %v11603_v27 }
0x10fb   : > { %v3039_v46 = vpop.xlane.xlu0 %3038  ;;  %v3042_v17 = vpop.xlane.xlu1 %3041  ;;  %v3069_v47 = vmul.f32 %v9248_v31, %v10337_v33 }
0x10fc   : > { %9255 = vrsqrt.f32 %v3056_v16  ;;  %v3049_v36 = vmul.f32 0.03125, %v3039_v46  ;;  %v3050_v21 = vmul.f32 0.03125, %v3042_v17  ;;  %v3079_v53 = vmul.f32 %v3078_v57, %v3067_v7 }
0x10fd   : > { %v9250_v24 = vpop.eup %9249 }
0x10fe   : > { %v3070_v20 = vmul.f32 %v9250_v24, %v10346_v34  ;;  %v3057_v10 = vadd.f32 1e-12, %v3049_v36  ;;  %v3058_v35 = vadd.f32 1e-12, %v3050_v21  ;;  %v3081_v34 = vmul.f32 %v3078_v57, %v3069_v47 }
0x10ff   : > { %v10400_v25 = vadd.f32 %v3090_v38, %v3079_v53 }
0x1100   : > { %9257 = vrsqrt.f32 %v3057_v10  ;;  %v3082_v49 = vmul.f32 %v3078_v57, %v3070_v20  ;;  %v10405_v0 = vadd.f32 %v3090_v38, %v3081_v34 }
0x1101   : > { %v9252_v50 = vpop.eup %9251  ;;  %9259 = vrsqrt.f32 %v3058_v35 }
0x1102   : > { %v3068_v1 = vmul.f32 %v9252_v50, %v10351_v4  ;;  %v10398_v40 = vadd.f32 %v3090_v38, %v3082_v49 }
0x1104   : > { %v3080_v32 = vmul.f32 %v3078_v57, %v3068_v1  ;;  %v3100_v23 = vpack.c.bf16 %v10398_v40, %v10405_v0 }
0x1105   : > { %v9254_v52 = vpop.eup %9253 }
0x1106   : > { %v10402_v33 = vadd.f32 %v3090_v38, %v3080_v32  ;;  %v3071_v42 = vmul.f32 %v9254_v52, %v10358_v59 }
0x1108   : > { %v3099_v4 = vpack.c.bf16 %v10402_v33, %v10400_v25  ;;  %v3083_v14 = vmul.f32 %v3078_v57, %v3071_v42 }
0x1109   : > { %v9256_v51 = vpop.eup %9255 }
0x110a   : > { %8527 = vmatprep.mubr.msk.bf16.mxu0 %vm462_vm0, %v3099_v4  ;;  %v3072_v18 = vmul.f32 %v9256_v51, %v10356_v60  ;;  %v10414_v59 = vadd.f32 %v3090_v38, %v3083_v14 }
0x110b   : > { %8528 = vmatmul.mubr.msk.bf16.vlgmr.msra.gmra.mxu0 %vm462_vm0, %v3100_v23 }
0x110c   : > { %v3084_v55 = vmul.f32 %v3078_v57, %v3072_v18 }
0x110d   : > { %v9258_v13 = vpop.eup %9257 }
0x110e   : > { %v9260_v54 = vpop.eup %9259  ;;  %v10416_v8 = vadd.f32 %v3090_v38, %v3084_v55  ;;  %v3073_v19 = vmul.f32 %v9258_v13, %v10363_v43  ;;  %v9032_v43 = vld [vmem:[%s11579_s5 + $0x10] sm:$0xff]  }
0x110f   : > { %v3074_v11 = vmul.f32 %v9260_v54, %v10368_v37  ;;  %8537 = vmatprep.subr.bf16.mxu1 %v9032_v43  ;;  %v9033_v37 = vld [vmem:[%s11579_s5 + $0x8] sm:$0xff]  }
0x1110   : > { %v3101_v41 = vpack.c.bf16 %v10416_v8, %v10414_v59  ;;  %v3085_v3 = vmul.f32 %v3078_v57, %v3073_v19  ;;  %8538 = vmatpush3.bf16.msra.mxu1 %v9032_v43 }
0x1111   : > { %v3086_v48 = vmul.f32 %v3078_v57, %v3074_v11  ;;  %8539 = vmatprep.subr.bf16.mxu1 %v9033_v37 }
0x1112   : > { %8531 = vmatprep.mubr.msk.bf16.mxu0 %vm462_vm0, %v3101_v41  ;;  %v10423_v60 = vadd.f32 %v3090_v38, %v3085_v3 }
0x1113   : > { %v10425_v61 = vadd.f32 %v3090_v38, %v3086_v48  ;;  %v11601_v38 = vsub.s32 5, %v9706_v22 }
0x1114   : > { %8540 = vmatpush3.bf16.msra.mxu1 %v9033_v37 }
0x1115   : > { %v3102_v5 = vpack.c.bf16 %v10425_v61, %v10423_v60  ;;  %8541 = vmatprep.subr.bf16.mxu1 %v9034_v62  ;;  %v3223_v32 = vrot.slane %v10304_v45, %v11601_v38 }
0x1117   : > { %8532 = vmatmul.mubr.msk.bf16.gmra.mxu0 %vm462_vm0, %v3102_v5 }
0x1118   : > { %8542 = vmatpush3.bf16.msra.mxu1 %v9034_v62 }
0x11cb   : > { %v8529_v15 = vpop.f32.mrf.mxu0 }
0x11cc   : > { %v3178_v12 = vadd.f32 %v8529_v15, %v3110_v56 }
0x11cd   : > { %v3169_v2 = vpop.f32.mrf.mxu0 }
0x11ce   : > { %v3170_v44 = vadd.f32 %v3169_v2, %v3110_v56  ;;  %v3202_v46 = vmax.f32 %v3178_v12, 0.0 }
0x11cf   : > { %v8530_v26 = vpop.f32.mrf.mxu0 }
0x11d0   : > { %v3181_v58 = vadd.f32 %v8530_v26, %v3110_v56  ;;  %v3200_v16 = vmax.f32 %v3170_v44, 0.0 }
0x11d1   : > { %v3172_v6 = vpop.f32.mrf.mxu0 }
0x11d2   : > { %v3173_v63 = vadd.f32 %v3172_v6, %v3110_v56  ;;  %v3203_v28 = vmax.f32 %v3181_v58, 0.0 }
0x11d4   : > { %v3201_v30 = vmax.f32 %v3173_v63, 0.0  ;;  %v3209_v31 = vpack.c.bf16 %v3203_v28, %v3202_v46 }
0x11d6   : > { %v3208_v17 = vpack.c.bf16 %v3201_v30, %v3200_v16 }
0x11d7   : > { %v8533_v36 = vpop.f32.mrf.mxu0 }
0x11d8   : > { %8543 = vmatprep.mubr.msk.bf16.mxu1 %vm821_vm2, %v3208_v17  ;;  %v3194_v35 = vadd.f32 %v8533_v36, %v3110_v56 }
0x11d9   : > { %v3185_v21 = vpop.f32.mrf.mxu0  ;;  %8544 = vmatmul.mubr.msk.bf16.vlgmr.msra.gmra.mxu1 %vm821_vm2, %v3209_v31 }
0x11da   : > { %v3186_v20 = vadd.f32 %v3185_v21, %v3110_v56  ;;  %v3206_v1 = vmax.f32 %v3194_v35, 0.0 }
0x11db   : > { %v8534_v24 = vpop.f32.mrf.mxu0 }
0x11dc   : > { %v3197_v10 = vadd.f32 %v8534_v24, %v3110_v56  ;;  %v3204_v50 = vmax.f32 %v3186_v20, 0.0 }
0x11dd   : > { %v3188_v7 = vpop.f32.mrf.mxu0 }
0x11de   : > { %v3189_v57 = vadd.f32 %v3188_v7, %v3110_v56  ;;  %v3207_v47 = vmax.f32 %v3197_v10, 0.0 }
0x11e0   : > { %v3205_v49 = vmax.f32 %v3189_v57, 0.0  ;;  %v3211_v34 = vpack.c.bf16 %v3207_v47, %v3206_v1 }
0x11e2   : > { %v3210_v53 = vpack.c.bf16 %v3205_v49, %v3204_v50 }
0x11e4   : > { %8547 = vmatprep.mubr.msk.bf16.mxu1 %vm821_vm2, %v3210_v53 }
0x11e5   : > { %8548 = vmatmul.mubr.msk.bf16.gmra.mxu1 %vm821_vm2, %v3211_v34 }
0x1299   : > { %v8545_v52 = vpop.f32.mrf.mxu1 }
0x129a   : > { %v3303_v4 = vadd.f32 %v8545_v52, %v3223_v32 }
0x129b   : > { %v3294_v42 = vpop.f32.mrf.mxu1 }
0x129c   : > { %v3295_v51 = vadd.f32 %v3294_v42, %v3223_v32  ;;  %v3327_v55 = vadd.f32 %v3303_v4, %v10405_v0 }
0x129d   : > { %v8546_v23 = vpop.f32.mrf.mxu1 }
0x129e   : > { %v3325_v18 = vadd.f32 %v3295_v51, %v10400_v25  ;;  %v3306_v13 = vadd.f32 %v8546_v23, %v3223_v32  ;;  %v3339_v3 = vsel %vm462_vm0, %v3327_v55, 0.0 }
0x129f   : > { %v3297_v14 = vpop.f32.mrf.mxu1 }
0x12a0   : > { %v3298_v54 = vadd.f32 %v3297_v14, %v3223_v32  ;;  %v3333_v19 = vsel %vm462_vm0, %v3325_v18, 0.0  ;;  %v3328_v48 = vadd.f32 %v3306_v13, %v10398_v40 }
0x12a1   : > { %3334 = vadd.xlane.f32.xlu0 %v3333_v19 }
0x12a2   : > { %v3326_v11 = vadd.f32 %v3298_v54, %v10402_v33  ;;  %v3342_v0 = vsel %vm462_vm0, %v3328_v48, 0.0 }
0x12a4   : > { %v3336_v41 = vsel %vm462_vm0, %v3326_v11, 0.0 }
0x12a5   : > { %v8549_v5 = vpop.f32.mrf.mxu1  ;;  %3337 = vadd.xlane.f32.xlu1 %v3336_v41  ;;  %3340 = vadd.xlane.f32.xlu0 %v3339_v3 }
0x12a6   : > { %v3319_v43 = vadd.f32 %v8549_v5, %v3223_v32  ;;  %v9035_v5 = vld [vmem:[%s11576_s2 + $0xd8] sm:$0xff]  }
0x12a7   : > { %v3310_v25 = vpop.f32.mrf.mxu1  ;;  %8563 = vmatprep.subr.bf16.mxu1 %v9035_v5 }
0x12a8   : > { %v3311_v37 = vadd.f32 %v3310_v25, %v3223_v32  ;;  %v3331_v33 = vadd.f32 %v3319_v43, %v10423_v60  ;;  %v9036_v25 = vld [vmem:[%s11576_s2 + $0xc8] sm:$0xff]   ;;  %8564 = vmatpush3.bf16.msra.mxu1 %v9035_v5  ;;  %v9037_v43 = vld [vmem:[%s11576_s2 + $0xd0] sm:$0xff]  }
0x12a9   : > { %v8550_v62 = vpop.f32.mrf.mxu1  ;;  %3343 = vadd.xlane.f32.xlu1 %v3342_v0  ;;  %8551 = vmatprep.subr.bf16.mxu0 %v9036_v25  ;;  %v10522_v0 = vld [vmem:[%s11576_s2 + $0xe8] sm:$0xff]  }
0x12aa   : > { %v3329_v15 = vadd.f32 %v3311_v37, %v10414_v59  ;;  %v3322_v2 = vadd.f32 %v8550_v62, %v3223_v32  ;;  %v3351_v12 = vsel %vm462_vm0, %v3331_v33, 0.0  ;;  %8552 = vmatpush3.bf16.msra.mxu0 %v9036_v25  ;;  %v9038_v37 = vld [vmem:[%s11576_s2 + $0xc0] sm:$0xff]   ;;  %8565 = vmatprep.subr.bf16.mxu1 %v9037_v43  ;;  %v7582_v62 = vld [vmem:[%s11580_s6 + $0x8] sm:$0xff] }
0x12ab   : > { %v3313_v56 = vpop.f32.mrf.mxu1  ;;  %8553 = vmatprep.subr.bf16.mxu0 %v9038_v37 }
0x12ac   : > { %v3314_v26 = vadd.f32 %v3313_v56, %v3223_v32  ;;  %v3345_v44 = vsel %vm462_vm0, %v3329_v15, 0.0  ;;  %v3332_v6 = vadd.f32 %v3322_v2, %v10425_v61  ;;  %8566 = vmatpush3.bf16.msra.mxu1 %v9037_v43  ;;  %v9040_v43 = vld [vmem:[%s11576_s2 + $0xe0] sm:$0xff]  }
0x12ad   : > { %3346 = vadd.xlane.f32.xlu0 %v3345_v44 }
0x12ae   : > { %v3330_v40 = vadd.f32 %v3314_v26, %v10416_v8  ;;  %v3354_v59 = vsel %vm462_vm0, %v3332_v6, 0.0  ;;  %8554 = vmatpush3.bf16.msra.mxu0 %v9038_v37 }
0x12af   : > { %8575 = vmatprep.subr.bf16.mxu0 %v10522_v0 }
0x12b0   : > { %v3348_v58 = vsel %vm462_vm0, %v3330_v40, 0.0 }
0x12b1   : > { %3349 = vadd.xlane.f32.xlu1 %v3348_v58  ;;  %3352 = vadd.xlane.f32.xlu0 %v3351_v12 }
0x12b5   : > { %3355 = vadd.xlane.f32.xlu1 %v3354_v59 }
0x132a   : > { %v3335_v63 = vpop.xlane.xlu0 %3334 }
0x132b   : > { %v3357_v60 = vmul.f32 0.03125, %v3335_v63 }
0x132d   : > { %v10467_v28 = vsub.f32 %v3325_v18, %v3357_v60 }
0x132e   : > { %v3341_v16 = vpop.xlane.xlu0 %3340  ;;  %v3338_v30 = vpop.xlane.xlu1 %3337 }
0x132f   : > { %v3359_v46 = vmul.f32 0.03125, %v3341_v16  ;;  %v3358_v17 = vmul.f32 0.03125, %v3338_v30  ;;  %v3373_v8 = vmul.f32 %v10467_v28, %v10467_v28 }
0x1331   : > { %v10471_v31 = vsub.f32 %v3327_v55, %v3359_v46  ;;  %v10473_v36 = vsub.f32 %v3326_v11, %v3358_v17  ;;  %v3381_v61 = vsel %vm462_vm0, %v3373_v8, 0.0  ;;  %v11600_v8 = vsub.s32 6, %v9706_v22 }
0x1332   : > { %3382 = vadd.xlane.f32.xlu0 %v3381_v61  ;;  %v3344_v21 = vpop.xlane.xlu1 %3343 }
0x1333   : > { %v3360_v24 = vmul.f32 0.03125, %v3344_v21  ;;  %v3375_v20 = vmul.f32 %v10471_v31, %v10471_v31  ;;  %v3374_v10 = vmul.f32 %v10473_v36, %v10473_v36 }
0x1335   : > { %v10480_v35 = vsub.f32 %v3328_v48, %v3360_v24  ;;  %v3387_v7 = vsel %vm462_vm0, %v3375_v20, 0.0  ;;  %v3384_v57 = vsel %vm462_vm0, %v3374_v10, 0.0 }
0x1336   : > { %v3347_v47 = vpop.xlane.xlu0 %3346  ;;  %3388 = vadd.xlane.f32.xlu0 %v3387_v7  ;;  %3385 = vadd.xlane.f32.xlu1 %v3384_v57 }
0x1337   : > { %v3361_v50 = vmul.f32 0.03125, %v3347_v47  ;;  %v3376_v49 = vmul.f32 %v10480_v35, %v10480_v35  ;;  %v3440_v47 = vrot.slane %v10304_v45, %v11600_v8 }
0x1339   : > { %v10486_v1 = vsub.f32 %v3329_v15, %v3361_v50  ;;  %v3390_v53 = vsel %vm462_vm0, %v3376_v49, 0.0  ;;  %v11615_v15 = vld [vmem:[#allocation8_spill] sm:$0xff]  ;;  %v11599_v50 = vsub.s32 7, %v9706_v22 }
0x133a   : > { %v3353_v34 = vpop.xlane.xlu0 %3352  ;;  %v3350_v32 = vpop.xlane.xlu1 %3349  ;;  %3391 = vadd.xlane.f32.xlu1 %v3390_v53  ;;  %v10529_v56 = vrot.slane %v7582_v62, %v11615_v15 }
0x133b   : > { %v3363_v52 = vmul.f32 0.03125, %v3353_v34  ;;  %v3362_v42 = vmul.f32 0.03125, %v3350_v32  ;;  %v3377_v4 = vmul.f32 %v10486_v1, %v10486_v1 }
0x133d   : > { %v10491_v51 = vsub.f32 %v3331_v33, %v3363_v52  ;;  %v10493_v23 = vsub.f32 %v3330_v40, %v3362_v42  ;;  %v3393_v18 = vsel %vm462_vm0, %v3377_v4, 0.0 }
0x133e   : > { %3394 = vadd.xlane.f32.xlu0 %v3393_v18  ;;  %v3356_v14 = vpop.xlane.xlu1 %3355  ;;  %v3452_v18 = vrot.slane %v10304_v45, %v11599_v50 }
0x133f   : > { %v3364_v55 = vmul.f32 0.03125, %v3356_v14  ;;  %v3379_v13 = vmul.f32 %v10491_v51, %v10491_v51  ;;  %v3378_v54 = vmul.f32 %v10493_v23, %v10493_v23 }
0x1341   : > { %v10500_v19 = vsub.f32 %v3332_v6, %v3364_v55  ;;  %v3399_v11 = vsel %vm462_vm0, %v3379_v13, 0.0  ;;  %v3396_v41 = vsel %vm462_vm0, %v3378_v54, 0.0 }
0x1342   : > { %3400 = vadd.xlane.f32.xlu0 %v3399_v11  ;;  %3397 = vadd.xlane.f32.xlu1 %v3396_v41 }
0x1343   : > { %v3380_v3 = vmul.f32 %v10500_v19, %v10500_v19 }
0x1345   : > { %v3402_v48 = vsel %vm462_vm0, %v3380_v3, 0.0 }
0x1346   : > { %3403 = vadd.xlane.f32.xlu1 %v3402_v48 }
0x1358   : > { %3587 = vrot.lane.b32.xlu0 %v10529_v56, %s9519_s12 }
0x13bb   : > { %v3383_v33 = vpop.xlane.xlu0 %3382 }
0x13bc   : > { %v3405_v2 = vmul.f32 0.03125, %v3383_v33 }
0x13be   : > { %v3413_v26 = vadd.f32 1e-12, %v3405_v2 }
0x13bf   : > { %v3389_v44 = vpop.xlane.xlu0 %3388  ;;  %v3386_v40 = vpop.xlane.xlu1 %3385 }
0x13c0   : > { %9261 = vrsqrt.f32 %v3413_v26  ;;  %v3407_v58 = vmul.f32 0.03125, %v3389_v44  ;;  %v3406_v12 = vmul.f32 0.03125, %v3386_v40 }
0x13c2   : > { %v3415_v6 = vadd.f32 1e-12, %v3407_v58  ;;  %v3414_v59 = vadd.f32 1e-12, %v3406_v12 }
0x13c3   : > { %v3392_v63 = vpop.xlane.xlu1 %3391 }
0x13c4   : > { %9263 = vrsqrt.f32 %v3415_v6  ;;  %v3408_v60 = vmul.f32 0.03125, %v3392_v63 }
0x13c5   : > { %9265 = vrsqrt.f32 %v3414_v59 }
0x13c6   : > { %v3416_v16 = vadd.f32 1e-12, %v3408_v60 }
0x13c7   : > { %v3395_v30 = vpop.xlane.xlu0 %3394 }
0x13c8   : > { %9267 = vrsqrt.f32 %v3416_v16  ;;  %v3409_v46 = vmul.f32 0.03125, %v3395_v30 }
0x13ca   : > { %v3417_v17 = vadd.f32 1e-12, %v3409_v46 }
0x13cb   : > { %v3401_v61 = vpop.xlane.xlu0 %3400  ;;  %v3398_v21 = vpop.xlane.xlu1 %3397 }
0x13cc   : > { %9269 = vrsqrt.f32 %v3417_v17  ;;  %v3411_v24 = vmul.f32 0.03125, %v3401_v61  ;;  %v3410_v20 = vmul.f32 0.03125, %v3398_v21 }
0x13cd   : > { %v9262_v10 = vpop.eup %9261 }
0x13ce   : > { %v3419_v7 = vadd.f32 1e-12, %v3411_v24  ;;  %v3418_v57 = vadd.f32 1e-12, %v3410_v20  ;;  %v3429_v49 = vmul.f32 %v9262_v10, %v10467_v28 }
0x13cf   : > { %v3404_v53 = vpop.xlane.xlu1 %3403 }
0x13d0   : > { %9271 = vrsqrt.f32 %v3419_v7  ;;  %v3412_v34 = vmul.f32 0.03125, %v3404_v53  ;;  %v3441_v14 = vmul.f32 %v3440_v47, %v3429_v49 }
0x13d1   : > { %v9264_v32 = vpop.eup %9263  ;;  %9273 = vrsqrt.f32 %v3418_v57 }
0x13d2   : > { %v9266_v52 = vpop.eup %9265  ;;  %v3431_v42 = vmul.f32 %v9264_v32, %v10471_v31  ;;  %v3420_v4 = vadd.f32 1e-12, %v3412_v34  ;;  %v10545_v41 = vadd.f32 %v3452_v18, %v3441_v14 }
0x13d3   : > { %v3430_v55 = vmul.f32 %v9266_v52, %v10473_v36 }
0x13d4   : > { %9275 = vrsqrt.f32 %v3420_v4  ;;  %v3443_v28 = vmul.f32 %v3440_v47, %v3431_v42 }
0x13d5   : > { %v9268_v13 = vpop.eup %9267  ;;  %v3442_v54 = vmul.f32 %v3440_v47, %v3430_v55 }
0x13d6   : > { %v3432_v11 = vmul.f32 %v9268_v13, %v10480_v35  ;;  %v10553_v45 = vadd.f32 %v3452_v18, %v3443_v28 }
0x13d7   : > { %v10547_v3 = vadd.f32 %v3452_v18, %v3442_v54 }
0x13d8   : > { %v3444_v48 = vmul.f32 %v3440_v47, %v3432_v11 }
0x13d9   : > { %v9270_v31 = vpop.eup %9269  ;;  %v10551_v5 = vpack.c.bf16 %v10547_v3, %v10545_v41 }
0x13da   : > { %v10555_v25 = vadd.f32 %v3452_v18, %v3444_v48  ;;  %v3433_v36 = vmul.f32 %v9270_v31, %v10486_v1 }
0x13db   : > { %8555 = vmatprep.mubr.msk.bf16.mxu0 %vm462_vm0, %v10551_v5  ;;  %8567 = vmatprep.mubr.msk.bf16.mxu1 %vm462_vm0, %v10551_v5 }
0x13dc   : > { %v10564_v35 = vpack.c.bf16 %v10555_v25, %v10553_v45  ;;  %v3445_v1 = vmul.f32 %v3440_v47, %v3433_v36 }
0x13dd   : > { %v9272_v37 = vpop.eup %9271 }
0x13de   : > { %v9274_v62 = vpop.eup %9273  ;;  %v3435_v33 = vmul.f32 %v9272_v37, %v10491_v51  ;;  %8556 = vmatmul.mubr.msk.bf16.vlgmr.msra.gmra.mxu0 %vm462_vm0, %v10564_v35  ;;  %8568 = vmatmul.mubr.msk.bf16.vlgmr.msra.gmra.mxu1 %vm462_vm0, %v10564_v35  ;;  %v10577_v12 = vadd.f32 %v3452_v18, %v3445_v1 }
0x13df   : > { %v3434_v2 = vmul.f32 %v9274_v62, %v10493_v23  ;;  %8576 = vmatpush3.bf16.msra.mxu0 %v10522_v0 }
0x13e0   : > { %8577 = vmatprep.subr.bf16.mxu0 %v9040_v43  ;;  %v3447_v40 = vmul.f32 %v3440_v47, %v3435_v33  ;;  %v9041_v33 = vld [vmem:[%s11576_s2 + $0x108] sm:$0xff]  }
0x13e1   : > { %v9276_v26 = vpop.eup %9275  ;;  %v3446_v44 = vmul.f32 %v3440_v47, %v3434_v2 }
0x13e2   : > { %v3436_v58 = vmul.f32 %v9276_v26, %v10500_v19  ;;  %v10585_v63 = vadd.f32 %v3452_v18, %v3447_v40 }
0x13e3   : > { %v10579_v51 = vadd.f32 %v3452_v18, %v3446_v44  ;;  %8578 = vmatpush3.bf16.msra.mxu0 %v9040_v43 }
0x13e4   : > { %v3448_v6 = vmul.f32 %v3440_v47, %v3436_v58  ;;  %v3588_v47 = vpop.permute.xlu0 %3587 }
0x13e5   : > { %v10583_v59 = vpack.c.bf16 %v10579_v51, %v10577_v12 }
0x13e6   : > { %v10587_v23 = vadd.f32 %v3452_v18, %v3448_v6 }
0x13e7   : > { %8559 = vmatprep.mubr.msk.bf16.mxu0 %vm462_vm0, %v10583_v59  ;;  %8571 = vmatprep.mubr.msk.bf16.mxu1 %vm462_vm0, %v10583_v59 }
0x13e8   : > { %11616 = vst [vmem:[#allocation9_spill] sm:$0xff] %v10587_v23  ;;  %v10595_v19 = vpack.c.bf16 %v10587_v23, %v10585_v63 }
0x13ea   : > { %8560 = vmatmul.mubr.msk.bf16.gmra.mxu0 %vm462_vm0, %v10595_v19  ;;  %8572 = vmatmul.mubr.msk.bf16.gmra.mxu1 %vm462_vm0, %v10595_v19 }
0x13eb   : > { %8579 = vmatprep.mubr.msk.bf16.mxu0 %vm462_vm0, %v10551_v5 }
0x13f2   : > { %8580 = vmatmul.mubr.msk.bf16.vlgmr.msra.gmra.mxu0 %vm462_vm0, %v10564_v35 }
0x13f3   : > { %8583 = vmatprep.mubr.msk.bf16.mxu0 %vm462_vm0, %v10583_v59 }
0x13fa   : > { %8584 = vmatmul.mubr.msk.bf16.gmra.mxu0 %vm462_vm0, %v10595_v19 }
0x149e   : > { %v8557_v0 = vpop.f32.mrf.mxu0  ;;  %v8569_v60 = vpop.f32.mrf.mxu1 }
0x149f   : > { %v3633_v13 = vadd.f32 %v8569_v60, %v3588_v47  ;;  %v3543_v40 = vadd.f32 %v8557_v0, %v10529_v56  ;;  %v9042_v60 = vld [vmem:[%s11576_s2 + $0x100] sm:$0xff]  }
0x14a0   : > { %v3534_v16 = vpop.f32.mrf.mxu0  ;;  %v3624_v30 = vpop.f32.mrf.mxu1 }
0x14a1   : > { %v3535_v21 = vadd.f32 %v3534_v16, %v10529_v56  ;;  %v3625_v31 = vadd.f32 %v3624_v30, %v3588_v47 }
0x14a2   : > { %v8558_v46 = vpop.f32.mrf.mxu0  ;;  %v8570_v17 = vpop.f32.mrf.mxu1 }
0x14a3   : > { %v3636_v55 = vadd.f32 %v8570_v17, %v3588_v47  ;;  %v3546_v26 = vadd.f32 %v8558_v46, %v10529_v56 }
0x14a4   : > { %v3537_v61 = vpop.f32.mrf.mxu0  ;;  %v3627_v10 = vpop.f32.mrf.mxu1 }
0x14a5   : > { %v3538_v24 = vadd.f32 %v3537_v61, %v10529_v56  ;;  %v3656_v54 = vpack.c.bf16 %v3636_v55, %v3633_v13  ;;  %v3628_v11 = vadd.f32 %v3627_v10, %v3588_v47  ;;  %v3566_v6 = vpack.c.bf16 %v3546_v26, %v3543_v40 }
0x14a7   : > { %v3565_v20 = vpack.c.bf16 %v3538_v24, %v3535_v21  ;;  %v3655_v36 = vpack.c.bf16 %v3628_v11, %v3625_v31  ;;  %v3764_v37 = vsel %vm723_vm1, %v3656_v54, 0 }
0x14a9   : > { %8595 = vmatprep.mubr.msk.bf16.mxu1 %vm723_vm1, %v3565_v20  ;;  %v3761_v2 = vsel %vm723_vm1, %v3655_v36, 0 }
0x14aa   : > { %v8573_v7 = vpop.f32.mrf.mxu1  ;;  %v8561_v48 = vpop.f32.mrf.mxu0 }
0x14ab   : > { %v3649_v53 = vadd.f32 %v8573_v7, %v3588_v47  ;;  %v3559_v46 = vadd.f32 %v8561_v48, %v10529_v56 }
0x14ac   : > { %v3640_v57 = vpop.f32.mrf.mxu1  ;;  %v3550_v43 = vpop.f32.mrf.mxu0 }
0x14ad   : > { %v3641_v52 = vadd.f32 %v3640_v57, %v3588_v47  ;;  %v3551_v58 = vadd.f32 %v3550_v43, %v10529_v56 }
0x14ae   : > { %v8574_v49 = vpop.f32.mrf.mxu1  ;;  %v8562_v62 = vpop.f32.mrf.mxu0 }
0x14af   : > { %v3652_v34 = vadd.f32 %v8574_v49, %v3588_v47  ;;  %v3562_v30 = vadd.f32 %v8562_v62, %v10529_v56 }
0x14b0   : > { %v3643_v32 = vpop.f32.mrf.mxu1  ;;  %v3553_v1 = vpop.f32.mrf.mxu0 }
0x14b1   : > { %v3658_v42 = vpack.c.bf16 %v3652_v34, %v3649_v53  ;;  %v3644_v4 = vadd.f32 %v3643_v32, %v3588_v47  ;;  %v3554_v44 = vadd.f32 %v3553_v1, %v10529_v56  ;;  %v3568_v0 = vpack.c.bf16 %v3562_v30, %v3559_v46 }
0x14b3   : > { %v3657_v18 = vpack.c.bf16 %v3644_v4, %v3641_v52  ;;  %8931 = vmatprep.subr.msk.bf16.mxu1 %vm723_vm1, %v3658_v42  ;;  %v3770_v14 = vsel %vm723_vm1, %v3658_v42, 0  ;;  %v3567_v16 = vpack.c.bf16 %v3554_v44, %v3551_v58 }
0x14b4   : > { %8588 = vmatpush3.bf16.xpose.msra.mxu1 %v3770_v14 }
0x14b5   : > { %8932 = vmatprep.subr.msk.bf16.mxu1 %vm723_vm1, %v3657_v18  ;;  %v3767_v28 = vsel %vm723_vm1, %v3657_v18, 0 }
0x14bc   : > { %8590 = vmatpush3.bf16.xpose.msra.mxu1 %v3767_v28 }
0x14bd   : > { %8933 = vmatprep.subr.msk.bf16.mxu1 %vm723_vm1, %v3656_v54 }
0x14c4   : > { %8592 = vmatpush3.bf16.xpose.msra.mxu1 %v3764_v37 }
0x14c5   : > { %8934 = vmatprep.subr.msk.bf16.mxu1 %vm723_vm1, %v3655_v36 }
0x14cc   : > { %8594 = vmatpush3.bf16.xpose.msra.mxu1 %v3761_v2 }
0x14cd   : > { %8631 = vmatprep.subr.bf16.mxu1 %v9041_v33 }
0x14d3   : > { %8596 = vmatmul.mubr.msk.bf16.vlgmr.msra.gmra.mxu1 %vm723_vm1, %v3566_v6 }
0x14d4   : > { %8599 = vmatprep.mubr.msk.bf16.mxu1 %vm723_vm1, %v3567_v16  ;;  %8632 = vmatpush3.bf16.msra.mxu1 %v9041_v33 }
0x14d5   : > { %8633 = vmatprep.subr.bf16.mxu1 %v9042_v60 }
0x14d8   : > { %8634 = vmatpush3.bf16.msra.mxu1 %v9042_v60 }
0x14db   : > { %8600 = vmatmul.mubr.msk.bf16.gmra.mxu1 %vm723_vm1, %v3568_v0 }
0x14dc   : > { %8635 = vmatprep.mubr.msk.bf16.mxu1 %vm462_vm0, %v10551_v5 }
0x14e3   : > { %8636 = vmatmul.mubr.msk.bf16.vlgmr.msra.gmra.mxu1 %vm462_vm0, %v10564_v35 }
0x14e4   : > { %8639 = vmatprep.mubr.msk.bf16.mxu1 %vm462_vm0, %v10583_v59 }
0x14eb   : > { %8640 = vmatmul.mubr.msk.bf16.gmra.mxu1 %vm462_vm0, %v10595_v19 }
0x1593   : > { %v8597_v17 = vpop.f32.mrf.mxu1 }
0x1594   : > { %v3839_v61 = vmul.f32 0.35355338, %v8597_v17 }
0x1595   : > { %v3806_v21 = vpop.f32.mrf.mxu1 }
0x1596   : > { %v3837_v24 = vmul.f32 0.35355338, %v3806_v21  ;;  %v3851_v20 = vsel %vm821_vm2, %v3839_v61, -inf }
0x1597   : > { %3852 = vmax.xlane.f32.xlu1 %v3851_v20  ;;  %v8598_v10 = vpop.f32.mrf.mxu1 }
0x1598   : > { %v3840_v57 = vmul.f32 0.35355338, %v8598_v10  ;;  %v3845_v47 = vsel %vm821_vm2, %v3837_v24, -inf }
0x1599   : > { %v3809_v7 = vpop.f32.mrf.mxu1 }
0x159a   : > { %v3838_v32 = vmul.f32 0.35355338, %v3809_v7  ;;  %v3854_v52 = vsel %vm821_vm2, %v3840_v57, -inf }
0x159b   : > { %3846 = vmax.xlane.f32.xlu1 %v3845_v47  ;;  %v8601_v49 = vpop.f32.mrf.mxu1 }
0x159c   : > { %v3843_v53 = vmul.f32 0.35355338, %v8601_v49  ;;  %v3848_v14 = vsel %vm821_vm2, %v3838_v32, -inf }
0x159d   : > { %v3822_v34 = vpop.f32.mrf.mxu1 }
0x159e   : > { %v3863_v42 = vsel %vm821_vm2, %v3843_v53, -inf  ;;  %v3841_v18 = vmul.f32 0.35355338, %v3822_v34 }
0x159f   : > { %3855 = vmax.xlane.f32.xlu1 %v3854_v52  ;;  %3864 = vmax.xlane.f32.xlu0 %v3863_v42  ;;  %v8602_v4 = vpop.f32.mrf.mxu1 }
0x15a0   : > { %v3857_v54 = vsel %vm821_vm2, %v3841_v18, -inf  ;;  %v3844_v28 = vmul.f32 0.35355338, %v8602_v4 }
0x15a1   : > { %v3825_v55 = vpop.f32.mrf.mxu1 }
0x15a2   : > { %v3842_v13 = vmul.f32 0.35355338, %v3825_v55  ;;  %v3866_v48 = vsel %vm821_vm2, %v3844_v28, -inf }
0x15a3   : > { %3849 = vmax.xlane.f32.xlu1 %v3848_v14 }
0x15a4   : > { %v3860_v11 = vsel %vm821_vm2, %v3842_v13, -inf }
0x15a7   : > { %3858 = vmax.xlane.f32.xlu1 %v3857_v54 }
0x15ab   : > { %3861 = vmax.xlane.f32.xlu1 %v3860_v11 }
0x15af   : > { %3867 = vmax.xlane.f32.xlu1 %v3866_v48  ;;  %v8581_v48 = vpop.f32.mrf.mxu0 }
0x1620   : > { %v3853_v31 = vpop.xlane.xlu1 %3852 }
0x1621   : > { %v3871_v36 = vsub.f32 %v3839_v61, %v3853_v31  ;;  %v10683_v31 = vpop.f32.mrf.mxu1 }
0x1623   : > { %v3881_v43 = vmul.f32 1.442695, %v3871_v36 }
0x1624   : > { %v3847_v37 = vpop.xlane.xlu1 %3846 }
0x1625   : > { %9277 = vpow2.f32 %v3881_v43  ;;  %v3869_v62 = vsub.f32 %v3837_v24, %v3847_v37  ;;  %v3713_v43 = vpop.f32.mrf.mxu0  ;;  %v10685_v37 = vpop.f32.mrf.mxu1 }
0x1627   : > { %v3877_v33 = vmul.f32 1.442695, %v3869_v62 }
0x1628   : > { %v3856_v1 = vpop.xlane.xlu1 %3855  ;;  %v3865_v2 = vpop.xlane.xlu0 %3864 }
0x1629   : > { %9279 = vpow2.f32 %v3877_v33  ;;  %v3872_v26 = vsub.f32 %v3840_v57, %v3856_v1  ;;  %v3875_v40 = vsub.f32 %v3843_v53, %v3865_v2  ;;  %v8582_v33 = vpop.f32.mrf.mxu0  ;;  %v8638_v1 = vpop.f32.mrf.mxu1 }
0x162b   : > { %v3883_v44 = vmul.f32 1.442695, %v3872_v26  ;;  %v3889_v60 = vmul.f32 1.442695, %v3875_v40  ;;  %v3716_v26 = vpop.f32.mrf.mxu0 }
0x162c   : > { %v3850_v58 = vpop.xlane.xlu1 %3849 }
0x162d   : > { %9281 = vpow2.f32 %v3883_v44  ;;  %v3870_v6 = vsub.f32 %v3838_v32, %v3850_v58  ;;  %v10687_v44 = vpop.f32.mrf.mxu1  ;;  %v8585_v58 = vpop.f32.mrf.mxu0 }
0x162f   : > { %v3879_v16 = vmul.f32 1.442695, %v3870_v6  ;;  %v8641_v6 = vpop.f32.mrf.mxu1 }
0x1630   : > { %v3859_v30 = vpop.xlane.xlu1 %3858 }
0x1631   : > { %9283 = vpow2.f32 %v3879_v16  ;;  %v3873_v46 = vsub.f32 %v3841_v18, %v3859_v30  ;;  %v3729_v16 = vpop.f32.mrf.mxu0  ;;  %v4179_v30 = vpop.f32.mrf.mxu1 }
0x1632   : > { %v10651_v0 = vpop.eup %9277  ;;  %9285 = vpow2.f32 %v3889_v60 }
0x1633   : > { %v3885_v17 = vmul.f32 1.442695, %v3873_v46  ;;  %v3899_v61 = vsel %vm821_vm2, %v10651_v0, 0.0 }
0x1634   : > { %3900 = vadd.xlane.f32.xlu1 %v3899_v61  ;;  %v3862_v21 = vpop.xlane.xlu1 %3861 }
0x1635   : > { %v3874_v24 = vsub.f32 %v3842_v13, %v3862_v21  ;;  %9287 = vpow2.f32 %v3885_v17  ;;  %v8586_v21 = vpop.f32.mrf.mxu0 }
0x1636   : > { %v9280_v20 = vpop.eup %9279 }
0x1637   : > { %v3887_v10 = vmul.f32 1.442695, %v3874_v24  ;;  %v3893_v7 = vsel %vm821_vm2, %v9280_v20, 0.0 }
0x1638   : > { %3894 = vadd.xlane.f32.xlu1 %v3893_v7  ;;  %v3868_v57 = vpop.xlane.xlu1 %3867 }
0x1639   : > { %v3876_v47 = vsub.f32 %v3844_v28, %v3868_v57  ;;  %9289 = vpow2.f32 %v3887_v10  ;;  %v8642_v10 = vpop.f32.mrf.mxu1 }
0x163a   : > { %v10656_v49 = vpop.eup %9281 }
0x163b   : > { %v3891_v53 = vmul.f32 1.442695, %v3876_v47  ;;  %v3902_v34 = vsel %vm821_vm2, %v10656_v49, 0.0 }
0x163c   : > { %3903 = vadd.xlane.f32.xlu1 %v3902_v34  ;;  %v3732_v34 = vpop.f32.mrf.mxu0 }
0x163d   : > { %9291 = vpow2.f32 %v3891_v53 }
0x163e   : > { %v9284_v32 = vpop.eup %9283 }
0x163f   : > { %v3896_v52 = vsel %vm821_vm2, %v9284_v32, 0.0  ;;  %v10661_v42 = vpop.eup %9285 }
0x1640   : > { %3897 = vadd.xlane.f32.xlu1 %v3896_v52  ;;  %v3911_v4 = vsel %vm821_vm2, %v10661_v42, 0.0 }
0x1642   : > { %v10665_v18 = vpop.eup %9287 }
0x1643   : > { %v3905_v14 = vsel %vm821_vm2, %v10665_v18, 0.0 }
0x1644   : > { %3912 = vadd.xlane.f32.xlu1 %v3911_v4 }
0x1646   : > { %v10669_v55 = vpop.eup %9289 }
0x1647   : > { %v3908_v54 = vsel %vm821_vm2, %v10669_v55, 0.0 }
0x1648   : > { %3906 = vadd.xlane.f32.xlu1 %v3905_v14 }
0x164a   : > { %v10671_v13 = vpop.eup %9291 }
0x164b   : > { %v3914_v28 = vsel %vm821_vm2, %v10671_v13, 0.0 }
0x164c   : > { %3909 = vadd.xlane.f32.xlu1 %v3908_v54  ;;  %3915 = vadd.xlane.f32.xlu0 %v3914_v28  ;;  %v4182_v28 = vpop.f32.mrf.mxu1 }
0x165d   : > { %3676 = vrot.lane.b32.xlu1 %v10529_v56, %s9520_s13 }
0x1661   : > { %4037 = vrot.lane.b32.xlu1 %v10529_v56, %s9522_s15 }
0x1662   : > { %4126 = vrot.lane.b32.xlu0 %v10529_v56, %s9521_s14  ;;  %s11622_s14 = smov 40  }
0x16bd   : > { %v3901_v11 = vpop.xlane.xlu1 %3900 }
0x16c1   : > { %v3895_v36 = vpop.xlane.xlu1 %3894 }
0x16c2   : > { %9293 = vrcp.f32 %v3895_v36 }
0x16c5   : > { %v3904_v62 = vpop.xlane.xlu1 %3903 }
0x16c9   : > { %v3898_v2 = vpop.xlane.xlu1 %3897 }
0x16ca   : > { %9295 = vrcp.f32 %v3898_v2 }
0x16cb   : > { %9297 = vrcp.f32 %v3901_v11 }
0x16cc   : > { %9299 = vrcp.f32 %v3904_v62 }
0x16cd   : > { %v3913_v40 = vpop.xlane.xlu1 %3912 }
0x16cf   : > { %v9294_v46 = vpop.eup %9293 }
0x16d0   : > { %v3925_v7 = vmul.f32 %v9294_v46, %v9280_v20 }
0x16d1   : > { %v3907_v60 = vpop.xlane.xlu1 %3906 }
0x16d2   : > { %9301 = vrcp.f32 %v3907_v60 }
0x16d5   : > { %v3916_v17 = vpop.xlane.xlu0 %3915  ;;  %v3910_v61 = vpop.xlane.xlu1 %3909 }
0x16d6   : > { %9303 = vrcp.f32 %v3910_v61 }
0x16d7   : > { %v9296_v24 = vpop.eup %9295  ;;  %9305 = vrcp.f32 %v3916_v17 }
0x16d8   : > { %v3926_v57 = vmul.f32 %v9296_v24, %v9284_v32  ;;  %9307 = vrcp.f32 %v3913_v40 }
0x16d9   : > { %v4127_v47 = vpop.permute.xlu0 %4126  ;;  %v3677_v53 = vpop.permute.xlu1 %3676 }
0x16da   : > { %v3933_v52 = vpack.c.bf16 %v3926_v57, %v3925_v7  ;;  %v3738_v4 = vadd.f32 %v8585_v58, %v3677_v53  ;;  %v3741_v14 = vadd.f32 %v8586_v21, %v3677_v53  ;;  %v4188_v54 = vadd.f32 %v8641_v6, %v4127_v47  ;;  %v9298_v21 = vpop.eup %9297 }
0x16db   : > { %v4191_v36 = vadd.f32 %v8642_v10, %v4127_v47  ;;  %v3730_v2 = vadd.f32 %v3729_v16, %v3677_v53  ;;  %v3733_v50 = vadd.f32 %v3732_v34, %v3677_v53  ;;  %v4180_v8 = vadd.f32 %v4179_v30, %v4127_v47  ;;  %v9044_v34 = vld [vmem:[%s11576_s2 + $0xf0] sm:$0xff]  }
0x16dc   : > { %8611 = vmatprep.mubr.msk.bf16.mxu0 %vm821_vm2, %v3933_v52  ;;  %v3747_v11 = vpack.c.bf16 %v3741_v14, %v3738_v4  ;;  %v4183_v62 = vadd.f32 %v4182_v28, %v4127_v47  ;;  %v3722_v32 = vadd.f32 %v8581_v48, %v3677_v53  ;;  %v3725_v46 = vadd.f32 %v8582_v33, %v3677_v53  ;;  %v9300_v33 = vpop.eup %9299 }
0x16dd   : > { %v4197_v60 = vpack.c.bf16 %v4191_v36, %v4188_v54  ;;  %v3746_v20 = vpack.c.bf16 %v3733_v50, %v3730_v2  ;;  %v3714_v30 = vadd.f32 %v3713_v43, %v3677_v53  ;;  %v3717_v61 = vadd.f32 %v3716_v26, %v3677_v53  ;;  %v9043_v43 = vld [vmem:[%s11576_s2 + $0xf8] sm:$0xff]  }
0x16de   : > { %8603 = vmatprep.subr.bf16.mxu0 %v3747_v11  ;;  %v4196_v6 = vpack.c.bf16 %v4183_v62, %v4180_v8  ;;  %v3745_v16 = vpack.c.bf16 %v3725_v46, %v3722_v32  ;;  %v4172_v50 = vadd.f32 %v10683_v31, %v4127_v47  ;;  %v4175_v48 = vadd.f32 %v8638_v1, %v4127_v47 }
0x16df   : > { %8935 = vmatprep.subr.msk.bf16.mxu1 %vm723_vm1, %v4197_v60  ;;  %8604 = vmatpush3.bf16.msra.mxu0 %v3747_v11  ;;  %v4309_v58 = vsel %vm723_vm1, %v4197_v60, 0  ;;  %v9302_v24 = vpop.eup %9301  ;;  %v3744_v7 = vpack.c.bf16 %v3717_v61, %v3714_v30  ;;  %v3928_v57 = vmul.f32 %v9300_v33, %v10656_v49  ;;  %v3927_v1 = vmul.f32 %v9298_v21, %v10651_v0 }
0x16e0   : > { %8656 = vmatpush3.bf16.xpose.msra.mxu1 %v4309_v58  ;;  %8605 = vmatprep.subr.bf16.mxu0 %v3746_v20  ;;  %v4306_v8 = vsel %vm723_vm1, %v4196_v6, 0  ;;  %v4195_v17 = vpack.c.bf16 %v4175_v48, %v4172_v50  ;;  %v3929_v26 = vmul.f32 %v9302_v24, %v10665_v18  ;;  %v4164_v40 = vadd.f32 %v10685_v37, %v4127_v47 }
0x16e1   : > { %8936 = vmatprep.subr.msk.bf16.mxu1 %vm723_vm1, %v4196_v6  ;;  %v4167_v53 = vadd.f32 %v10687_v44, %v4127_v47  ;;  %v3934_v49 = vpack.c.bf16 %v3928_v57, %v3927_v1  ;;  %v9045_v44 = vld [vmem:[%s11576_s2 + $0x118] sm:$0xff]  }
0x16e2   : > { %v4303_v0 = vsel %vm723_vm1, %v4195_v17, 0 }
0x16e3   : > { %8606 = vmatpush3.bf16.msra.mxu0 %v3746_v20  ;;  %v9304_v10 = vpop.eup %9303  ;;  %v4194_v18 = vpack.c.bf16 %v4167_v53, %v4164_v40 }
0x16e4   : > { %8607 = vmatprep.subr.bf16.mxu0 %v3745_v16  ;;  %v3930_v31 = vmul.f32 %v9304_v10, %v10669_v55  ;;  %v9306_v52 = vpop.eup %9305 }
0x16e5   : > { %v9308_v55 = vpop.eup %9307  ;;  %v3932_v37 = vmul.f32 %v9306_v52, %v10671_v13  ;;  %v4300_v54 = vsel %vm723_vm1, %v4194_v18, 0  ;;  %v9046_v13 = vld [vmem:[%s11576_s2 + $0x110] sm:$0xff]  }
0x16e6   : > { %v3935_v4 = vpack.c.bf16 %v3930_v31, %v3929_v26  ;;  %v3931_v47 = vmul.f32 %v9308_v55, %v10661_v42  ;;  %v7621_v42 = vld [vmem:[%s11577_s3 + $0x10] sm:$0xf] }
0x16e7   : > { %8608 = vmatpush3.bf16.msra.mxu0 %v3745_v16  ;;  %v4038_v16 = vpop.permute.xlu1 %4037 }
0x16e8   : > { %8658 = vmatpush3.bf16.xpose.msra.mxu1 %v4306_v8  ;;  %8609 = vmatprep.subr.bf16.mxu0 %v3744_v7  ;;  %v3936_v14 = vpack.c.bf16 %v3932_v37, %v3931_v47  ;;  %v4652_v8 = vsel %vm1547_vm3, %v7621_v42, 0 }
0x16e9   : > { %8937 = vmatprep.subr.msk.bf16.mxu1 %vm723_vm1, %v4195_v17  ;;  %v9047_v17 = vld [vmem:[%s11576_s2 + $0x138] sm:$0xff]  }
0x16eb   : > { %8610 = vmatpush3.bf16.msra.mxu0 %v3744_v7 }
0x16ec   : > { %8619 = vmatprep.subr.bf16.mxu0 %v9043_v43 }
0x16ee   : > { %8612 = vmatmul.mubr.msk.bf16.vlgmr.msra.gmra.mxu0 %vm821_vm2, %v3934_v49 }
0x16ef   : > { %8615 = vmatprep.mubr.msk.bf16.mxu0 %vm821_vm2, %v3935_v4  ;;  %8620 = vmatpush3.bf16.msra.mxu0 %v9043_v43  ;;  %v9048_v4 = vld [vmem:[%s11576_s2 + $0x130] sm:$0xff]  }
0x16f0   : > { %8660 = vmatpush3.bf16.xpose.msra.mxu1 %v4303_v0  ;;  %8621 = vmatprep.subr.bf16.mxu0 %v9044_v34 }
0x16f1   : > { %8938 = vmatprep.subr.msk.bf16.mxu1 %vm723_vm1, %v4194_v18 }
0x16f3   : > { %8622 = vmatpush3.bf16.msra.mxu0 %v9044_v34 }
0x16f4   : > { %8643 = vmatprep.subr.bf16.mxu0 %v9045_v44 }
0x16f6   : > { %8616 = vmatmul.mubr.msk.bf16.gmra.mxu0 %vm821_vm2, %v3936_v14 }
0x16f7   : > { %8623 = vmatprep.mubr.msk.bf16.mxu0 %vm462_vm0, %v10551_v5 }
0x16f8   : > { %8662 = vmatpush3.bf16.xpose.msra.mxu1 %v4300_v54 }
0x16f9   : > { %8940 = vmatprep.subr.msk.bf16.mxu1 %vm1547_vm3, %v7621_v42 }
0x16fe   : > { %8624 = vmatmul.mubr.msk.bf16.vlgmr.msra.gmra.mxu0 %vm462_vm0, %v10564_v35 }
0x16ff   : > { %8627 = vmatprep.mubr.msk.bf16.mxu0 %vm462_vm0, %v10583_v59  ;;  %8644 = vmatpush3.bf16.msra.mxu0 %v9045_v44 }
0x1700   : > { %8645 = vmatprep.subr.bf16.mxu0 %v9046_v13 }
0x1703   : > { %8646 = vmatpush3.bf16.msra.mxu0 %v9046_v13 }
0x1706   : > { %8628 = vmatmul.mubr.msk.bf16.gmra.mxu0 %vm462_vm0, %v10595_v19 }
0x1707   : > { %8647 = vmatprep.mubr.msk.bf16.mxu0 %vm462_vm0, %v10551_v5 }
0x170e   : > { %8648 = vmatmul.mubr.msk.bf16.vlgmr.msra.gmra.mxu0 %vm462_vm0, %v10564_v35 }
0x170f   : > { %8651 = vmatprep.mubr.msk.bf16.mxu0 %vm462_vm0, %v10583_v59 }
0x1716   : > { %8652 = vmatmul.mubr.msk.bf16.gmra.mxu0 %vm462_vm0, %v10595_v19 }
0x17ae   : > { %v8613_v28 = vpop.f32.mrf.mxu0 }
0x17b0   : > { %v3983_v36 = vpop.f32.mrf.mxu0 }
0x17b2   : > { %v8614_v2 = vpop.f32.mrf.mxu0 }
0x17b3   : > { %v4015_v52 = vpack.c.bf16 %v8614_v2, %v8613_v28 }
0x17b4   : > { %v3986_v11 = vpop.f32.mrf.mxu0 }
0x17b5   : > { %v4014_v34 = vpack.c.bf16 %v3986_v11, %v3983_v36 }
0x17b6   : > { %v8617_v62 = vpop.f32.mrf.mxu0 }
0x17b8   : > { %v3999_v60 = vpop.f32.mrf.mxu0 }
0x17ba   : > { %v8618_v20 = vpop.f32.mrf.mxu0 }
0x17bb   : > { %v4017_v0 = vpack.c.bf16 %v8618_v20, %v8617_v62 }
0x17bc   : > { %v4002_v32 = vpop.f32.mrf.mxu0 }
0x17bd   : > { %v4016_v55 = vpack.c.bf16 %v4002_v32, %v3999_v60 }
0x17be   : > { %v8625_v46 = vpop.f32.mrf.mxu0 }
0x17bf   : > { %v4083_v48 = vadd.f32 %v8625_v46, %v4038_v16 }
0x17c0   : > { %v4074_v58 = vpop.f32.mrf.mxu0 }
0x17c1   : > { %v4075_v21 = vadd.f32 %v4074_v58, %v4038_v16 }
0x17c2   : > { %v8626_v6 = vpop.f32.mrf.mxu0 }
0x17c3   : > { %v4086_v30 = vadd.f32 %v8626_v6, %v4038_v16 }
0x17c4   : > { %v4077_v61 = vpop.f32.mrf.mxu0 }
0x17c5   : > { %v4078_v50 = vadd.f32 %v4077_v61, %v4038_v16  ;;  %v4106_v10 = vpack.c.bf16 %v4086_v30, %v4083_v48 }
0x17c6   : > { %v8629_v33 = vpop.f32.mrf.mxu0 }
0x17c7   : > { %v4105_v24 = vpack.c.bf16 %v4078_v50, %v4075_v21  ;;  %v4099_v40 = vadd.f32 %v8629_v33, %v4038_v16 }
0x17c8   : > { %v4090_v7 = vpop.f32.mrf.mxu0 }
0x17c9   : > { %8663 = vmatprep.mubr.msk.bf16.mxu1 %vm723_vm1, %v4105_v24  ;;  %v4091_v1 = vadd.f32 %v4090_v7, %v4038_v16 }
0x17ca   : > { %v8630_v57 = vpop.f32.mrf.mxu0  ;;  %8664 = vmatmul.mubr.msk.bf16.vlgmr.msra.gmra.mxu1 %vm723_vm1, %v4106_v10 }
0x17cb   : > { %8698 = vmatpush3.bf16.msra.mxu1 %v4652_v8  ;;  %v4102_v43 = vadd.f32 %v8630_v57, %v4038_v16 }
0x17cc   : > { %v4093_v31 = vpop.f32.mrf.mxu0  ;;  %8719 = vmatprep.subr.bf16.mxu1 %v9047_v17 }
0x17cd   : > { %v4094_v26 = vadd.f32 %v4093_v31, %v4038_v16  ;;  %v4108_v49 = vpack.c.bf16 %v4102_v43, %v4099_v40 }
0x17cf   : > { %v4107_v53 = vpack.c.bf16 %v4094_v26, %v4091_v1 }
0x17d1   : > { %8667 = vmatprep.mubr.msk.bf16.mxu1 %vm723_vm1, %v4107_v53 }
0x17d2   : > { %8668 = vmatmul.mubr.msk.bf16.gmra.mxu1 %vm723_vm1, %v4108_v49 }
0x17d3   : > { %8699 = vmatprep.mubr.msk.bf16.mxu1 %vm723_vm1, %v4014_v34 }
0x17da   : > { %8700 = vmatmul.mubr.msk.bf16.vlgmr.msra.gmra.mxu1 %vm723_vm1, %v4015_v52 }
0x17db   : > { %8703 = vmatprep.mubr.msk.bf16.mxu1 %vm723_vm1, %v4016_v55  ;;  %8720 = vmatpush3.bf16.msra.mxu1 %v9047_v17 }
0x17dc   : > { %8721 = vmatprep.subr.bf16.mxu1 %v9048_v4 }
0x17df   : > { %8722 = vmatpush3.bf16.msra.mxu1 %v9048_v4 }
0x17e2   : > { %8704 = vmatmul.mubr.msk.bf16.gmra.mxu1 %vm723_vm1, %v4017_v0 }
0x17e3   : > { %8723 = vmatprep.mubr.msk.bf16.mxu1 %vm462_vm0, %v10551_v5 }
0x17ea   : > { %8724 = vmatmul.mubr.msk.bf16.vlgmr.msra.gmra.mxu1 %vm462_vm0, %v10564_v35 }
0x17eb   : > { %8727 = vmatprep.mubr.msk.bf16.mxu1 %vm462_vm0, %v10583_v59 }
0x17f2   : > { %8728 = vmatmul.mubr.msk.bf16.gmra.mxu1 %vm462_vm0, %v10595_v19 }
0x188a   : > { %v8665_v18 = vpop.f32.mrf.mxu1 }
0x188b   : > { %v4378_v36 = vmul.f32 0.35355338, %v8665_v18 }
0x188c   : > { %v4345_v37 = vpop.f32.mrf.mxu1 }
0x188d   : > { %v4376_v44 = vmul.f32 0.35355338, %v4345_v37  ;;  %v4390_v32 = vsel %vm821_vm2, %v4378_v36, -inf }
0x188e   : > { %v8666_v47 = vpop.f32.mrf.mxu1 }
0x188f   : > { %v4379_v14 = vmul.f32 0.35355338, %v8666_v47  ;;  %v4384_v54 = vsel %vm821_vm2, %v4376_v44, -inf }
0x1890   : > { %4385 = vmax.xlane.f32.xlu1 %v4384_v54  ;;  %v4348_v13 = vpop.f32.mrf.mxu1 }
0x1891   : > { %v4377_v42 = vmul.f32 0.35355338, %v4348_v13  ;;  %v4393_v2 = vsel %vm821_vm2, %v4379_v14, -inf }
0x1892   : > { %v8669_v28 = vpop.f32.mrf.mxu1 }
0x1893   : > { %v4387_v11 = vsel %vm821_vm2, %v4377_v42, -inf  ;;  %v4382_v6 = vmul.f32 0.35355338, %v8669_v28 }
0x1894   : > { %4394 = vmax.xlane.f32.xlu1 %v4393_v2  ;;  %4388 = vmax.xlane.f32.xlu0 %v4387_v11  ;;  %v4361_v62 = vpop.f32.mrf.mxu1 }
0x1895   : > { %v4380_v20 = vmul.f32 0.35355338, %v4361_v62  ;;  %v4402_v21 = vsel %vm821_vm2, %v4382_v6, -inf }
0x1896   : > { %v8670_v60 = vpop.f32.mrf.mxu1 }
0x1897   : > { %v4383_v16 = vmul.f32 0.35355338, %v8670_v60  ;;  %v4396_v30 = vsel %vm821_vm2, %v4380_v20, -inf }
0x1898   : > { %4391 = vmax.xlane.f32.xlu0 %v4390_v32  ;;  %v4364_v46 = vpop.f32.mrf.mxu1 }
0x1899   : > { %v4381_v58 = vmul.f32 0.35355338, %v4364_v46  ;;  %v4405_v50 = vsel %vm821_vm2, %v4383_v16, -inf }
0x189b   : > { %v4399_v61 = vsel %vm821_vm2, %v4381_v58, -inf }
0x189c   : > { %4397 = vmax.xlane.f32.xlu0 %v4396_v30  ;;  %4400 = vmax.xlane.f32.xlu1 %v4399_v61  ;;  %v10811_v30 = vpop.f32.mrf.mxu1 }
0x189e   : > { %v10813_v61 = vpop.f32.mrf.mxu1 }
0x18a0   : > { %4403 = vmax.xlane.f32.xlu0 %v4402_v21  ;;  %4406 = vmax.xlane.f32.xlu1 %v4405_v50  ;;  %v10815_v21 = vpop.f32.mrf.mxu1 }
0x18a2   : > { %v10817_v50 = vpop.f32.mrf.mxu1 }
0x1919   : > { %v4386_v48 = vpop.xlane.xlu1 %4385 }
0x191a   : > { %v4408_v8 = vsub.f32 %v4376_v44, %v4386_v48  ;;  %v10819_v48 = vpop.f32.mrf.mxu1 }
0x191c   : > { %v4416_v1 = vmul.f32 1.442695, %v4408_v8  ;;  %v8649_v8 = vpop.f32.mrf.mxu0 }
0x191d   : > { %v4395_v33 = vpop.xlane.xlu1 %4394  ;;  %v4389_v24 = vpop.xlane.xlu0 %4388 }
0x191e   : > { %v4411_v10 = vsub.f32 %v4379_v14, %v4395_v33  ;;  %v4409_v7 = vsub.f32 %v4377_v42, %v4389_v24  ;;  %v10821_v33 = vpop.f32.mrf.mxu1 }
0x1920   : > { %v4418_v17 = vmul.f32 1.442695, %v4409_v7  ;;  %v4422_v57 = vmul.f32 1.442695, %v4411_v10  ;;  %v10823_v24 = vpop.f32.mrf.mxu1 }
0x1921   : > { %v4392_v43 = vpop.xlane.xlu0 %4391 }
0x1922   : > { %v4410_v31 = vsub.f32 %v4378_v36, %v4392_v43  ;;  %9309 = vpow2.f32 %v4418_v17  ;;  %v10825_v10 = vpop.f32.mrf.mxu1 }
0x1923   : > { %9311 = vpow2.f32 %v4422_v57  ;;  %v4252_v57 = vpop.f32.mrf.mxu0 }
0x1924   : > { %v4420_v26 = vmul.f32 1.442695, %v4410_v31  ;;  %v8725_v7 = vpop.f32.mrf.mxu1 }
0x1925   : > { %v4398_v40 = vpop.xlane.xlu0 %4397  ;;  %v4401_v53 = vpop.xlane.xlu1 %4400 }
0x1926   : > { %9313 = vpow2.f32 %v4420_v26  ;;  %v4413_v49 = vsub.f32 %v4381_v58, %v4401_v53  ;;  %v4412_v34 = vsub.f32 %v4380_v20, %v4398_v40  ;;  %v10827_v17 = vpop.f32.mrf.mxu1  ;;  %v8650_v31 = vpop.f32.mrf.mxu0 }
0x1927   : > { %9315 = vpow2.f32 %v4416_v1 }
0x1928   : > { %v4426_v52 = vmul.f32 1.442695, %v4413_v49  ;;  %v4424_v37 = vmul.f32 1.442695, %v4412_v34  ;;  %v8726_v43 = vpop.f32.mrf.mxu1  ;;  %v4255_v40 = vpop.f32.mrf.mxu0 }
0x1929   : > { %v4404_v4 = vpop.xlane.xlu0 %4403  ;;  %v4407_v55 = vpop.xlane.xlu1 %4406 }
0x192a   : > { %v4414_v0 = vsub.f32 %v4382_v6, %v4404_v4  ;;  %v4415_v18 = vsub.f32 %v4383_v16, %v4407_v55  ;;  %9317 = vpow2.f32 %v4426_v52  ;;  %v10829_v1 = vpop.f32.mrf.mxu1  ;;  %v8653_v52 = vpop.f32.mrf.mxu0 }
0x192c   : > { %v4428_v44 = vmul.f32 1.442695, %v4414_v0  ;;  %v4430_v47 = vmul.f32 1.442695, %v4415_v18  ;;  %v8729_v49 = vpop.f32.mrf.mxu1  ;;  %v4268_v18 = vpop.f32.mrf.mxu0 }
0x192e   : > { %9319 = vpow2.f32 %v4428_v44  ;;  %v4878_v55 = vpop.f32.mrf.mxu1 }
0x192f   : > { %9321 = vpow2.f32 %v4430_v47  ;;  %v10773_v14 = vpop.eup %9309 }
0x1930   : > { %9323 = vpow2.f32 %v4424_v37  ;;  %v4435_v54 = vsel %vm821_vm2, %v10773_v14, 0.0  ;;  %v10777_v13 = vpop.eup %9311  ;;  %v8730_v44 = vpop.f32.mrf.mxu1 }
0x1931   : > { %4436 = vadd.xlane.f32.xlu1 %v4435_v54  ;;  %v4441_v2 = vsel %vm821_vm2, %v10777_v13, 0.0  ;;  %v8654_v54 = vpop.f32.mrf.mxu0 }
0x1933   : > { %v10779_v42 = vpop.eup %9313  ;;  %v4271_v38 = vpop.f32.mrf.mxu0 }
0x1934   : > { %v4438_v28 = vsel %vm821_vm2, %v10779_v42, 0.0  ;;  %v10783_v36 = vpop.eup %9315 }
0x1935   : > { %4439 = vadd.xlane.f32.xlu0 %v4438_v28  ;;  %4442 = vadd.xlane.f32.xlu1 %v4441_v2  ;;  %v4432_v62 = vsel %vm821_vm2, %v10783_v36, 0.0  ;;  %v4881_v2 = vpop.f32.mrf.mxu1 }
0x1937   : > { %v10787_v11 = vpop.eup %9317 }
0x1938   : > { %v4447_v60 = vsel %vm821_vm2, %v10787_v11, 0.0 }
0x1939   : > { %4433 = vadd.xlane.f32.xlu0 %v4432_v62  ;;  %4448 = vadd.xlane.f32.xlu1 %v4447_v60 }
0x193b   : > { %v10793_v20 = vpop.eup %9319 }
0x193c   : > { %v10795_v32 = vpop.eup %9321  ;;  %v4450_v46 = vsel %vm821_vm2, %v10793_v20, 0.0 }
0x193d   : > { %v10799_v58 = vpop.eup %9323  ;;  %4451 = vadd.xlane.f32.xlu0 %v4450_v46  ;;  %v4453_v6 = vsel %vm821_vm2, %v10795_v32, 0.0 }
0x193e   : > { %4454 = vadd.xlane.f32.xlu1 %v4453_v6  ;;  %v4444_v16 = vsel %vm821_vm2, %v10799_v58, 0.0 }
0x1941   : > { %4445 = vadd.xlane.f32.xlu0 %v4444_v16 }
0x194f   : > { %4825 = vrot.lane.b32.xlu1 %v10529_v56, %s9524_s24 }
0x1953   : > { %4736 = vrot.lane.b32.xlu1 %v10529_v56, %s11617_s26  ;;  %s11621_s26 = smov 72  }
0x1957   : > { %4215 = vrot.lane.b32.xlu0 %v10529_v56, %s11618_s29 }
0x19ba   : > { %v4437_v26 = vpop.xlane.xlu1 %4436 }
0x19bb   : > { %9325 = vrcp.f32 %v4437_v26 }
0x19be   : > { %v4440_v53 = vpop.xlane.xlu0 %4439  ;;  %v4443_v34 = vpop.xlane.xlu1 %4442 }
0x19c2   : > { %v4434_v4 = vpop.xlane.xlu0 %4433  ;;  %v4449_v0 = vpop.xlane.xlu1 %4448 }
0x19c3   : > { %9327 = vrcp.f32 %v4434_v4 }
0x19c4   : > { %9329 = vrcp.f32 %v4440_v53 }
0x19c5   : > { %9331 = vrcp.f32 %v4443_v34 }
0x19c6   : > { %v4452_v37 = vpop.xlane.xlu0 %4451 }
0x19c7   : > { %v4455_v47 = vpop.xlane.xlu1 %4454 }
0x19c8   : > { %v9326_v26 = vpop.eup %9325 }
0x19ca   : > { %v4446_v28 = vpop.xlane.xlu0 %4445 }
0x19cb   : > { %v4826_v62 = vpop.permute.xlu1 %4825  ;;  %9333 = vrcp.f32 %v4446_v28 }
0x19cc   : > { %v4887_v60 = vadd.f32 %v8729_v49, %v4826_v62  ;;  %v4890_v46 = vadd.f32 %v8730_v44, %v4826_v62  ;;  %v4879_v6 = vadd.f32 %v4878_v55, %v4826_v62  ;;  %v4882_v16 = vadd.f32 %v4881_v2, %v4826_v62 }
0x19cd   : > { %9335 = vrcp.f32 %v4449_v0  ;;  %v4465_v44 = vmul.f32 %v9326_v26, %v10773_v14  ;;  %v4871_v0 = vadd.f32 %v8725_v7, %v4826_v62  ;;  %v4874_v28 = vadd.f32 %v8726_v43, %v4826_v62  ;;  %v9049_v26 = vld [vmem:[%s11576_s2 + $0x128] sm:$0xff]  }
0x19ce   : > { %v4216_v9 = vpop.permute.xlu0 %4215  ;;  %v4896_v4 = vpack.c.bf16 %v4890_v46, %v4887_v60  ;;  %v4895_v49 = vpack.c.bf16 %v4882_v16, %v4879_v6  ;;  %9337 = vrcp.f32 %v4452_v37  ;;  %v4866_v43 = vadd.f32 %v10829_v1, %v4826_v62  ;;  %v7660_v37 = vld [vmem:[%s11577_s3 + $0x14] sm:$0xf] }
0x19cf   : > { %v4277_v27 = vadd.f32 %v8653_v52, %v4216_v9  ;;  %v4280_v29 = vadd.f32 %v8654_v54, %v4216_v9  ;;  %v4269_v39 = vadd.f32 %v4268_v18, %v4216_v9  ;;  %v4272_v15 = vadd.f32 %v4271_v38, %v4216_v9 }
0x19d0   : > { %v9328_v23 = vpop.eup %9327  ;;  %8941 = vmatprep.subr.msk.bf16.mxu1 %vm723_vm1, %v4896_v4  ;;  %v5008_v53 = vsel %vm723_vm1, %v4896_v4, 0  ;;  %v4261_v18 = vadd.f32 %v8649_v8, %v4216_v9  ;;  %v4264_v38 = vadd.f32 %v8650_v31, %v4216_v9  ;;  %9339 = vrcp.f32 %v4455_v47 }
0x19d1   : > { %8744 = vmatpush3.bf16.xpose.msra.mxu1 %v5008_v53  ;;  %v4286_v55 = vpack.c.bf16 %v4280_v29, %v4277_v27  ;;  %v4464_v34 = vmul.f32 %v9328_v23, %v10783_v36  ;;  %v4285_v52 = vpack.c.bf16 %v4272_v15, %v4269_v39  ;;  %v4253_v27 = vadd.f32 %v4252_v57, %v4216_v9  ;;  %v9330_v36 = vpop.eup %9329 }
0x19d2   : > { %8942 = vmatprep.subr.msk.bf16.mxu1 %vm723_vm1, %v4895_v49  ;;  %v4284_v29 = vpack.c.bf16 %v4264_v38, %v4261_v18  ;;  %v4256_v23 = vadd.f32 %v4255_v40, %v4216_v9  ;;  %v5005_v14 = vsel %vm723_vm1, %v4895_v49, 0  ;;  %v4894_v2 = vpack.c.bf16 %v4874_v28, %v4871_v0  ;;  %v9332_v39 = vpop.eup %9331  ;;  %v9051_v18 = vld [vmem:[%s11576_s2 + $0x148] sm:$0xff]  }
0x19d3   : > { %8671 = vmatprep.subr.bf16.mxu0 %v4286_v55  ;;  %v4472_v54 = vpack.c.bf16 %v4465_v44, %v4464_v34  ;;  %v4863_v8 = vadd.f32 %v10827_v17, %v4826_v62  ;;  %v4466_v9 = vmul.f32 %v9330_v36, %v10779_v42  ;;  %v4467_v57 = vmul.f32 %v9332_v39, %v10777_v13 }
0x19d4   : > { %8672 = vmatpush3.bf16.msra.mxu0 %v4286_v55  ;;  %v4283_v7 = vpack.c.bf16 %v4256_v23, %v4253_v27  ;;  %v5002_v47 = vsel %vm723_vm1, %v4894_v2, 0  ;;  %v4572_v13 = vsel %vm1547_vm3, %v7660_v37, 0  ;;  %v9053_v27 = vld [vmem:[%s11576_s2 + $0x158] sm:$0xff]  }
0x19d5   : > { %8673 = vmatprep.subr.bf16.mxu0 %v4285_v52  ;;  %8679 = vmatprep.mubr.msk.bf16.mxu0 %vm821_vm2, %v4472_v54  ;;  %v4893_v60 = vpack.c.bf16 %v4866_v43, %v4863_v8  ;;  %v4473_v1 = vpack.c.bf16 %v4467_v57, %v4466_v9  ;;  %v4737_v57 = vpop.permute.xlu1 %4736 }
0x19d7   : > { %v4999_v6 = vsel %vm723_vm1, %v4893_v60, 0 }
0x19d8   : > { %8674 = vmatpush3.bf16.msra.mxu0 %v4285_v52  ;;  %v9334_v15 = vpop.eup %9333 }
0x19d9   : > { %8746 = vmatpush3.bf16.xpose.msra.mxu1 %v5005_v14  ;;  %8675 = vmatprep.subr.bf16.mxu0 %v4284_v29  ;;  %v4468_v40 = vmul.f32 %v9334_v15, %v10799_v58 }
0x19da   : > { %8943 = vmatprep.subr.msk.bf16.mxu1 %vm723_vm1, %v4894_v2  ;;  %v9336_v31 = vpop.eup %9335 }
0x19db   : > { %v4469_v17 = vmul.f32 %v9336_v31, %v10787_v11  ;;  %v9338_v46 = vpop.eup %9337 }
0x19dc   : > { %8676 = vmatpush3.bf16.msra.mxu0 %v4284_v29  ;;  %v4470_v62 = vmul.f32 %v9338_v46, %v10793_v20  ;;  %v9052_v29 = vld [vmem:[%s11576_s2 + $0x140] sm:$0xff]  }
0x19dd   : > { %8677 = vmatprep.subr.bf16.mxu0 %v4283_v7  ;;  %v9340_v42 = vpop.eup %9339  ;;  %v4474_v58 = vpack.c.bf16 %v4469_v17, %v4468_v40 }
0x19de   : > { %v4471_v11 = vmul.f32 %v9340_v42, %v10795_v32  ;;  %v9050_v32 = vld [vmem:[%s11576_s2 + $0x120] sm:$0xff]  }
0x19e0   : > { %8678 = vmatpush3.bf16.msra.mxu0 %v4283_v7  ;;  %v4475_v16 = vpack.c.bf16 %v4471_v11, %v4470_v62 }
0x19e1   : > { %8748 = vmatpush3.bf16.xpose.msra.mxu1 %v5002_v47  ;;  %8939 = vmatprep.subr.msk.bf16.mxu0 %vm1547_vm3, %v7660_v37 }
0x19e2   : > { %8944 = vmatprep.subr.msk.bf16.mxu1 %vm723_vm1, %v4893_v60 }
0x19e3   : > { %8680 = vmatmul.mubr.msk.bf16.vlgmr.msra.gmra.mxu0 %vm821_vm2, %v4473_v1 }
0x19e4   : > { %8683 = vmatprep.mubr.msk.bf16.mxu0 %vm821_vm2, %v4474_v58  ;;  %8688 = vmatpush3.bf16.msra.mxu0 %v4572_v13  ;;  %v9054_v58 = vld [vmem:[%s11576_s2 + $0x150] sm:$0xff]  }
0x19e5   : > { %8707 = vmatprep.subr.bf16.mxu0 %v9049_v26 }
0x19e9   : > { %8750 = vmatpush3.bf16.xpose.msra.mxu1 %v4999_v6 }
0x19ea   : > { %8785 = vmatprep.subr.bf16.mxu1 %v9053_v27 }
0x19eb   : > { %8684 = vmatmul.mubr.msk.bf16.gmra.mxu0 %vm821_vm2, %v4475_v16  ;;  %v9055_v16 = vld [vmem:[%s11576_s2 + $0x178] sm:$0xff]  }
0x1aa3   : > { %v8681_v4 = vpop.f32.mrf.mxu0 }
0x1aa5   : > { %v4522_v53 = vpop.f32.mrf.mxu0 }
0x1aa7   : > { %v8682_v49 = vpop.f32.mrf.mxu0 }
0x1aa8   : > { %v4554_v44 = vpack.c.bf16 %v8682_v49, %v8681_v4 }
0x1aa9   : > { %v4525_v55 = vpop.f32.mrf.mxu0 }
0x1aaa   : > { %v4553_v34 = vpack.c.bf16 %v4525_v55, %v4522_v53 }
0x1aab   : > { %v8685_v20 = vpop.f32.mrf.mxu0 }
0x1aac   : > { %8689 = vmatprep.mubr.msk.bf16.mxu0 %vm723_vm1, %v4553_v34  ;;  %v9056_v34 = vld [vmem:[%s11576_s2 + $0x170] sm:$0xff]  }
0x1aad   : > { %v4538_v52 = vpop.f32.mrf.mxu0  ;;  %8690 = vmatmul.mubr.msk.bf16.vlgmr.msra.gmra.mxu0 %vm723_vm1, %v4554_v44 }
0x1aae   : > { %8708 = vmatpush3.bf16.msra.mxu0 %v9049_v26 }
0x1aaf   : > { %v8686_v54 = vpop.f32.mrf.mxu0  ;;  %8709 = vmatprep.subr.bf16.mxu0 %v9050_v32 }
0x1ab0   : > { %v4556_v28 = vpack.c.bf16 %v8686_v54, %v8685_v20 }
0x1ab1   : > { %v4541_v38 = vpop.f32.mrf.mxu0 }
0x1ab2   : > { %v4555_v0 = vpack.c.bf16 %v4541_v38, %v4538_v52  ;;  %8710 = vmatpush3.bf16.msra.mxu0 %v9050_v32 }
0x1ab3   : > { %8731 = vmatprep.subr.bf16.mxu0 %v9051_v18 }
0x1ab4   : > { %8693 = vmatprep.mubr.msk.bf16.mxu0 %vm723_vm1, %v4555_v0 }
0x1ab5   : > { %8694 = vmatmul.mubr.msk.bf16.gmra.mxu0 %vm723_vm1, %v4556_v28 }
0x1ab6   : > { %8711 = vmatprep.mubr.msk.bf16.mxu0 %vm462_vm0, %v10551_v5 }
0x1abd   : > { %8712 = vmatmul.mubr.msk.bf16.vlgmr.msra.gmra.mxu0 %vm462_vm0, %v10564_v35 }
0x1abe   : > { %8715 = vmatprep.mubr.msk.bf16.mxu0 %vm462_vm0, %v10583_v59  ;;  %8732 = vmatpush3.bf16.msra.mxu0 %v9051_v18 }
0x1abf   : > { %8733 = vmatprep.subr.bf16.mxu0 %v9052_v29 }
0x1ac2   : > { %8734 = vmatpush3.bf16.msra.mxu0 %v9052_v29 }
0x1ac5   : > { %8716 = vmatmul.mubr.msk.bf16.gmra.mxu0 %vm462_vm0, %v10595_v19 }
0x1ac6   : > { %8735 = vmatprep.mubr.msk.bf16.mxu0 %vm462_vm0, %v10551_v5 }
0x1acd   : > { %8736 = vmatmul.mubr.msk.bf16.vlgmr.msra.gmra.mxu0 %vm462_vm0, %v10564_v35 }
0x1ace   : > { %8739 = vmatprep.mubr.msk.bf16.mxu0 %vm462_vm0, %v10583_v59 }
0x1ad5   : > { %8740 = vmatmul.mubr.msk.bf16.gmra.mxu0 %vm462_vm0, %v10595_v19 }
0x1b6d   : > { %v10893_v23 = vpop.f32.mrf.mxu0 }
0x1b6f   : > { %v10895_v36 = vpop.f32.mrf.mxu0 }
0x1b71   : > { %v10897_v14 = vpop.f32.mrf.mxu0 }
0x1b73   : > { %v10899_v2 = vpop.f32.mrf.mxu0 }
0x1b75   : > { %v10901_v39 = vpop.f32.mrf.mxu0 }
0x1b77   : > { %v10903_v15 = vpop.f32.mrf.mxu0 }
0x1b79   : > { %v10905_v7 = vpop.f32.mrf.mxu0 }
0x1b7b   : > { %v10907_v8 = vpop.f32.mrf.mxu0 }
0x1b7d   : > { %v8713_v43 = vpop.f32.mrf.mxu0 }
0x1b7e   : > { %v4782_v17 = vadd.f32 %v8713_v43, %v4737_v57 }
0x1b7f   : > { %v4773_v31 = vpop.f32.mrf.mxu0 }
0x1b80   : > { %v4774_v47 = vadd.f32 %v4773_v31, %v4737_v57 }
0x1b81   : > { %v8714_v9 = vpop.f32.mrf.mxu0 }
0x1b82   : > { %v4785_v40 = vadd.f32 %v8714_v9, %v4737_v57 }
0x1b83   : > { %v4776_v37 = vpop.f32.mrf.mxu0 }
0x1b84   : > { %v4777_v60 = vadd.f32 %v4776_v37, %v4737_v57  ;;  %v4805_v13 = vpack.c.bf16 %v4785_v40, %v4782_v17 }
0x1b85   : > { %v8717_v46 = vpop.f32.mrf.mxu0 }
0x1b86   : > { %v4804_v1 = vpack.c.bf16 %v4777_v60, %v4774_v47  ;;  %v4798_v53 = vadd.f32 %v8717_v46, %v4737_v57 }
0x1b87   : > { %v4789_v42 = vpop.f32.mrf.mxu0 }
0x1b88   : > { %8751 = vmatprep.mubr.msk.bf16.mxu1 %vm723_vm1, %v4804_v1  ;;  %v4790_v26 = vadd.f32 %v4789_v42, %v4737_v57 }
0x1b89   : > { %v8718_v62 = vpop.f32.mrf.mxu0  ;;  %8752 = vmatmul.mubr.msk.bf16.vlgmr.msra.gmra.mxu1 %vm723_vm1, %v4805_v13 }
0x1b8a   : > { %8786 = vmatpush3.bf16.msra.mxu1 %v9053_v27  ;;  %v4801_v11 = vadd.f32 %v8718_v62, %v4737_v57 }
0x1b8b   : > { %v4792_v6 = vpop.f32.mrf.mxu0  ;;  %8787 = vmatprep.subr.bf16.mxu1 %v9054_v58 }
0x1b8c   : > { %v4793_v4 = vadd.f32 %v4792_v6, %v4737_v57  ;;  %v4807_v55 = vpack.c.bf16 %v4801_v11, %v4798_v53 }
0x1b8e   : > { %v4806_v49 = vpack.c.bf16 %v4793_v4, %v4790_v26  ;;  %8788 = vmatpush3.bf16.msra.mxu1 %v9054_v58 }
0x1b8f   : > { %8809 = vmatprep.subr.bf16.mxu1 %v9055_v16 }
0x1b90   : > { %8755 = vmatprep.mubr.msk.bf16.mxu1 %vm723_vm1, %v4806_v49 }
0x1b91   : > { %8756 = vmatmul.mubr.msk.bf16.gmra.mxu1 %vm723_vm1, %v4807_v55 }
0x1b92   : > { %8789 = vmatprep.mubr.msk.bf16.mxu1 %vm462_vm0, %v10551_v5 }
0x1b99   : > { %8790 = vmatmul.mubr.msk.bf16.vlgmr.msra.gmra.mxu1 %vm462_vm0, %v10564_v35 }
0x1b9a   : > { %8793 = vmatprep.mubr.msk.bf16.mxu1 %vm462_vm0, %v10583_v59  ;;  %8810 = vmatpush3.bf16.msra.mxu1 %v9055_v16 }
0x1b9b   : > { %8811 = vmatprep.subr.bf16.mxu1 %v9056_v34 }
0x1b9e   : > { %8812 = vmatpush3.bf16.msra.mxu1 %v9056_v34 }
0x1ba1   : > { %8794 = vmatmul.mubr.msk.bf16.gmra.mxu1 %vm462_vm0, %v10595_v19 }
0x1ba2   : > { %8813 = vmatprep.mubr.msk.bf16.mxu1 %vm462_vm0, %v10551_v5 }
0x1ba9   : > { %8814 = vmatmul.mubr.msk.bf16.vlgmr.msra.gmra.mxu1 %vm462_vm0, %v10564_v35 }
0x1baa   : > { %8817 = vmatprep.mubr.msk.bf16.mxu1 %vm462_vm0, %v10583_v59 }
0x1bb1   : > { %8818 = vmatmul.mubr.msk.bf16.gmra.mxu1 %vm462_vm0, %v10595_v19 }
0x1c49   : > { %v8753_v44 = vpop.f32.mrf.mxu1 }
0x1c4a   : > { %v5077_v54 = vmul.f32 0.35355338, %v8753_v44 }
0x1c4b   : > { %v5044_v20 = vpop.f32.mrf.mxu1 }
0x1c4c   : > { %v5075_v32 = vmul.f32 0.35355338, %v5044_v20  ;;  %v5089_v27 = vsel %vm821_vm2, %v5077_v54, -inf }
0x1c4d   : > { %v8754_v52 = vpop.f32.mrf.mxu1 }
0x1c4e   : > { %v5083_v18 = vsel %vm821_vm2, %v5075_v32, -inf  ;;  %v5078_v29 = vmul.f32 0.35355338, %v8754_v52 }
0x1c4f   : > { %5084 = vmax.xlane.f32.xlu0 %v5083_v18  ;;  %v5047_v38 = vpop.f32.mrf.mxu1 }
0x1c50   : > { %v5076_v0 = vmul.f32 0.35355338, %v5047_v38  ;;  %v5092_v37 = vsel %vm821_vm2, %v5078_v29, -inf }
0x1c51   : > { %v8757_v28 = vpop.f32.mrf.mxu1 }
0x1c52   : > { %v5086_v43 = vsel %vm821_vm2, %v5076_v0, -inf  ;;  %v5081_v40 = vmul.f32 0.35355338, %v8757_v28 }
0x1c53   : > { %5090 = vmax.xlane.f32.xlu0 %v5089_v27  ;;  %5087 = vmax.xlane.f32.xlu1 %v5086_v43  ;;  %v5060_v31 = vpop.f32.mrf.mxu1 }
0x1c54   : > { %v5079_v9 = vmul.f32 0.35355338, %v5060_v31  ;;  %v5101_v1 = vsel %vm821_vm2, %v5081_v40, -inf }
0x1c55   : > { %v8758_v57 = vpop.f32.mrf.mxu1 }
0x1c56   : > { %v5095_v47 = vsel %vm821_vm2, %v5079_v9, -inf  ;;  %v5082_v46 = vmul.f32 0.35355338, %v8758_v57 }
0x1c57   : > { %5093 = vmax.xlane.f32.xlu0 %v5092_v37  ;;  %5096 = vmax.xlane.f32.xlu1 %v5095_v47  ;;  %v5063_v60 = vpop.f32.mrf.mxu1 }
0x1c58   : > { %v5080_v17 = vmul.f32 0.35355338, %v5063_v60  ;;  %v5104_v42 = vsel %vm821_vm2, %v5082_v46, -inf }
0x1c5a   : > { %v5098_v13 = vsel %vm821_vm2, %v5080_v17, -inf }
0x1c5b   : > { %5102 = vmax.xlane.f32.xlu1 %v5101_v1  ;;  %5099 = vmax.xlane.f32.xlu0 %v5098_v13 }
0x1c5f   : > { %5105 = vmax.xlane.f32.xlu0 %v5104_v42 }
0x1cd8   : > { %v5085_v58 = vpop.xlane.xlu0 %5084 }
0x1cd9   : > { %v5107_v62 = vsub.f32 %v5075_v32, %v5085_v58 }
0x1cdb   : > { %v5115_v4 = vmul.f32 1.442695, %v5107_v62 }
0x1cdc   : > { %v5091_v11 = vpop.xlane.xlu0 %5090  ;;  %v5088_v6 = vpop.xlane.xlu1 %5087 }
0x1cdd   : > { %v5109_v16 = vsub.f32 %v5077_v54, %v5091_v11  ;;  %v5108_v26 = vsub.f32 %v5076_v0, %v5088_v6 }
0x1cdf   : > { %v5119_v53 = vmul.f32 1.442695, %v5109_v16  ;;  %v5117_v49 = vmul.f32 1.442695, %v5108_v26  ;;  %v8737_v26 = vpop.f32.mrf.mxu0 }
0x1ce0   : > { %v5094_v55 = vpop.xlane.xlu0 %5093  ;;  %v5097_v34 = vpop.xlane.xlu1 %5096 }
0x1ce1   : > { %9341 = vpow2.f32 %v5119_v53  ;;  %v5110_v44 = vsub.f32 %v5078_v29, %v5094_v55  ;;  %v5111_v52 = vsub.f32 %v5079_v9, %v5097_v34 }
0x1ce2   : > { %9343 = vpow2.f32 %v5117_v49 }
0x1ce3   : > { %9345 = vpow2.f32 %v5115_v4  ;;  %v5121_v20 = vmul.f32 1.442695, %v5110_v44  ;;  %v5123_v27 = vmul.f32 1.442695, %v5111_v52  ;;  %v4951_v4 = vpop.f32.mrf.mxu0 }
0x1ce4   : > { %v5103_v18 = vpop.xlane.xlu1 %5102  ;;  %v5100_v38 = vpop.xlane.xlu0 %5099 }
0x1ce5   : > { %9347 = vpow2.f32 %v5121_v20  ;;  %v5113_v28 = vsub.f32 %v5081_v40, %v5103_v18  ;;  %v5112_v32 = vsub.f32 %v5080_v17, %v5100_v38  ;;  %v8738_v53 = vpop.f32.mrf.mxu0 }
0x1ce7   : > { %v5127_v43 = vmul.f32 1.442695, %v5113_v28  ;;  %v5125_v54 = vmul.f32 1.442695, %v5112_v32  ;;  %v4954_v49 = vpop.f32.mrf.mxu0 }
0x1ce8   : > { %v5106_v0 = vpop.xlane.xlu0 %5105 }
0x1ce9   : > { %9349 = vpow2.f32 %v5127_v43  ;;  %v5114_v31 = vsub.f32 %v5082_v46, %v5106_v0  ;;  %v8741_v44 = vpop.f32.mrf.mxu0 }
0x1cea   : > { %9351 = vpow2.f32 %v5125_v54 }
0x1ceb   : > { %9353 = vpow2.f32 %v5123_v27  ;;  %v5129_v57 = vmul.f32 1.442695, %v5114_v31  ;;  %v4967_v52 = vpop.f32.mrf.mxu0 }
0x1ced   : > { %9355 = vpow2.f32 %v5129_v57  ;;  %v8742_v28 = vpop.f32.mrf.mxu0 }
0x1cee   : > { %v10946_v29 = vpop.eup %9341 }
0x1cef   : > { %v9344_v37 = vpop.eup %9343  ;;  %v5137_v9 = vsel %vm821_vm2, %v10946_v29, 0.0  ;;  %v4970_v54 = vpop.f32.mrf.mxu0 }
0x1cf0   : > { %v9346_v47 = vpop.eup %9345  ;;  %5138 = vadd.xlane.f32.xlu1 %v5137_v9  ;;  %v5134_v40 = vsel %vm821_vm2, %v9344_v37, 0.0 }
0x1cf1   : > { %5135 = vadd.xlane.f32.xlu0 %v5134_v40  ;;  %v5131_v17 = vsel %vm821_vm2, %v9346_v47, 0.0 }
0x1cf2   : > { %v10951_v60 = vpop.eup %9347 }
0x1cf3   : > { %v5140_v46 = vsel %vm821_vm2, %v10951_v60, 0.0 }
0x1cf4   : > { %5132 = vadd.xlane.f32.xlu1 %v5131_v17 }
0x1cf5   : > { %5141 = vadd.xlane.f32.xlu0 %v5140_v46 }
0x1cf6   : > { %v10956_v1 = vpop.eup %9349 }
0x1cf7   : > { %v10958_v13 = vpop.eup %9351  ;;  %v5149_v42 = vsel %vm821_vm2, %v10956_v1, 0.0 }
0x1cf8   : > { %v10962_v58 = vpop.eup %9353  ;;  %5150 = vadd.xlane.f32.xlu1 %v5149_v42  ;;  %v5146_v62 = vsel %vm821_vm2, %v10958_v13, 0.0 }
0x1cf9   : > { %5147 = vadd.xlane.f32.xlu0 %v5146_v62  ;;  %v5143_v6 = vsel %vm821_vm2, %v10962_v58, 0.0 }
0x1cfa   : > { %v10966_v11 = vpop.eup %9355 }
0x1cfb   : > { %v5152_v16 = vsel %vm821_vm2, %v10966_v11, 0.0 }
0x1cfc   : > { %5144 = vadd.xlane.f32.xlu1 %v5143_v6 }
0x1cfd   : > { %5153 = vadd.xlane.f32.xlu0 %v5152_v16 }
0x1d0d   : > { %4914 = vrot.lane.b32.xlu1 %v10529_v56, %s11619_s25  ;;  %s377_s25 = sand.u32 1, %s9509_s18  }
0x1d0e   : > { %s7328_s30 = scalar_lea.sflag [#allocation3], %s377_s25 }
0x1d11   : > { %5363 = vrot.lane.b32.xlu1 %v10529_v56, %s11620_s22  ;;  %s7858_s22 = sshll.u32 %s9616_s21, 4  ;;  %s9534_s21 = smov [#allocation2]  }
0x1d12   : > { %s11533_s23 = scalar_lea.hbm %s11585_s11, %s7858_s22 }
0x1d13   : > { %5452 = vrot.lane.b32.xlu0 %v10529_v56, %s11621_s26  ;;  %s378_s26 = scalar_lea.vmem [#allocation2], %s377_s25 }
0x1d14   : > { %s7340_s29 = sshll.u32 %s378_s26, 4  ;;  %s11535_s29 = int_to_ptr.vmem [resolvable:$true] %s7340_s29 }
0x1d79   : > { %v5139_v55 = vpop.xlane.xlu1 %5138 }
0x1d7a   : > { %v5136_v34 = vpop.xlane.xlu0 %5135 }
0x1d7b   : > { %9357 = vrcp.f32 %v5136_v34 }
0x1d7d   : > { %v5133_v20 = vpop.xlane.xlu1 %5132 }
0x1d7e   : > { %9359 = vrcp.f32 %v5133_v20  ;;  %v5142_v18 = vpop.xlane.xlu0 %5141 }
0x1d7f   : > { %9361 = vrcp.f32 %v5139_v55 }
0x1d80   : > { %9363 = vrcp.f32 %v5142_v18 }
0x1d81   : > { %v5151_v38 = vpop.xlane.xlu1 %5150 }
0x1d82   : > { %v5148_v27 = vpop.xlane.xlu0 %5147 }
0x1d85   : > { %v5145_v32 = vpop.xlane.xlu1 %5144 }
0x1d86   : > { %9365 = vrcp.f32 %v5145_v32  ;;  %v5154_v6 = vpop.xlane.xlu0 %5153 }
0x1d87   : > { %9367 = vrcp.f32 %v5148_v27 }
0x1d88   : > { %v9358_v43 = vpop.eup %9357  ;;  %9369 = vrcp.f32 %v5154_v6 }
0x1d89   : > { %v4915_v0 = vpop.permute.xlu1 %4914  ;;  %v5164_v62 = vmul.f32 %v9358_v43, %v9344_v37  ;;  %9371 = vrcp.f32 %v5151_v38  ;;  %v7707_v38 = vld [vmem:[%s11577_s3 + $0x18] sm:$0xf] }
0x1d8a   : > { %v4976_v31 = vadd.f32 %v8741_v44, %v4915_v0  ;;  %v4979_v57 = vadd.f32 %v8742_v28, %v4915_v0  ;;  %v4968_v9 = vadd.f32 %v4967_v52, %v4915_v0  ;;  %v4971_v40 = vadd.f32 %v4970_v54, %v4915_v0 }
0x1d8b   : > { %v9360_v17 = vpop.eup %9359  ;;  %v4960_v55 = vadd.f32 %v8737_v26, %v4915_v0  ;;  %v4963_v20 = vadd.f32 %v8738_v53, %v4915_v0  ;;  %v4952_v52 = vadd.f32 %v4951_v4, %v4915_v0  ;;  %v4955_v18 = vadd.f32 %v4954_v49, %v4915_v0 }
0x1d8c   : > { %v4985_v46 = vpack.c.bf16 %v4979_v57, %v4976_v31  ;;  %v5163_v42 = vmul.f32 %v9360_v17, %v9346_v47  ;;  %v4984_v16 = vpack.c.bf16 %v4971_v40, %v4968_v9  ;;  %v9362_v28 = vpop.eup %9361  ;;  %v5271_v54 = vsel %vm1547_vm3, %v7707_v38, 0 }
0x1d8d   : > { %v4983_v44 = vpack.c.bf16 %v4963_v20, %v4960_v55  ;;  %v9364_v47 = vpop.eup %9363  ;;  %v4982_v32 = vpack.c.bf16 %v4955_v18, %v4952_v52  ;;  %v5165_v4 = vmul.f32 %v9362_v28, %v10946_v29  ;;  %v11001_v20 = vpop.f32.mrf.mxu1 }
0x1d8e   : > { %8759 = vmatprep.subr.bf16.mxu0 %v4985_v46  ;;  %v5171_v34 = vpack.c.bf16 %v5164_v62, %v5163_v42  ;;  %v5166_v26 = vmul.f32 %v9364_v47, %v10951_v60  ;;  %v11009_v28 = vpop.permute.xlu1 %5363 }
0x1d8f   : > { %8760 = vmatpush3.bf16.msra.mxu0 %v4985_v46  ;;  %v5400_v52 = vpop.f32.mrf.mxu1 }
0x1d90   : > { %8761 = vmatprep.subr.bf16.mxu0 %v4984_v16  ;;  %8767 = vmatprep.mubr.msk.bf16.mxu0 %vm821_vm2, %v5171_v34  ;;  %v5172_v43 = vpack.c.bf16 %v5166_v26, %v5165_v4 }
0x1d91   : > { %v11007_v18 = vpop.f32.mrf.mxu1 }
0x1d93   : > { %8762 = vmatpush3.bf16.msra.mxu0 %v4984_v16  ;;  %v9366_v37 = vpop.eup %9365  ;;  %v5403_v47 = vpop.f32.mrf.mxu1 }
0x1d94   : > { %8763 = vmatprep.subr.bf16.mxu0 %v4983_v44  ;;  %v9368_v27 = vpop.eup %9367  ;;  %v5167_v53 = vmul.f32 %v9366_v37, %v10962_v58  ;;  %v5401_v37 = vadd.f32 %v5400_v52, %v11009_v28 }
0x1d95   : > { %v5168_v49 = vmul.f32 %v9368_v27, %v10958_v13  ;;  %v9370_v0 = vpop.eup %9369  ;;  %v9057_v13 = vld [vmem:[%s11576_s2 + $0x168] sm:$0xff]  }
0x1d96   : > { %v9372_v60 = vpop.eup %9371  ;;  %v5170_v58 = vmul.f32 %v9370_v0, %v10966_v11  ;;  %v9058_v11 = vld [vmem:[%s11576_s2 + $0x160] sm:$0xff]  }
0x1d97   : > { %8764 = vmatpush3.bf16.msra.mxu0 %v4983_v44  ;;  %v5173_v31 = vpack.c.bf16 %v5168_v49, %v5167_v53  ;;  %v5169_v29 = vmul.f32 %v9372_v60, %v10956_v1 }
0x1d98   : > { %8765 = vmatprep.subr.bf16.mxu0 %v4982_v32 }
0x1d99   : > { %v5174_v57 = vpack.c.bf16 %v5170_v58, %v5169_v29 }
0x1d9b   : > { %8766 = vmatpush3.bf16.msra.mxu0 %v4982_v32  ;;  %v5404_v32 = vadd.f32 %v5403_v47, %v11009_v28 }
0x1d9c   : > { %8945 = vmatprep.subr.msk.bf16.mxu0 %vm1547_vm3, %v7707_v38  ;;  %v4700_v38 = vadd.f32 %v10815_v21, %v10897_v14  ;;  %v4716_v14 = vadd.f32 %v10823_v24, %v10905_v7 }
0x1d9d   : > { %v5431_v27 = vpack.c.bf16 %v5404_v32, %v5401_v37 }
0x1d9e   : > { %8768 = vmatmul.mubr.msk.bf16.vlgmr.msra.gmra.mxu0 %vm821_vm2, %v5172_v43 }
0x1d9f   : > { %8771 = vmatprep.mubr.msk.bf16.mxu0 %vm821_vm2, %v5173_v31  ;;  %8776 = vmatpush3.bf16.msra.mxu0 %v5271_v54 }
0x1da0   : > { %8797 = vmatprep.subr.bf16.mxu0 %v9057_v13 }
0x1da6   : > { %8772 = vmatmul.mubr.msk.bf16.gmra.mxu0 %vm821_vm2, %v5174_v57 }
0x1e5e   : > { %v8769_v9 = vpop.f32.mrf.mxu0 }
0x1e60   : > { %v5221_v40 = vpop.f32.mrf.mxu0 }
0x1e62   : > { %v8770_v17 = vpop.f32.mrf.mxu0 }
0x1e63   : > { %v5253_v62 = vpack.c.bf16 %v8770_v17, %v8769_v9  ;;  %v5453_v9 = vpop.permute.xlu0 %5452 }
0x1e64   : > { %v5224_v46 = vpop.f32.mrf.mxu0 }
0x1e65   : > { %v5252_v42 = vpack.c.bf16 %v5224_v46, %v5221_v40 }
0x1e66   : > { %v8773_v6 = vpop.f32.mrf.mxu0 }
0x1e67   : > { %8777 = vmatprep.mubr.msk.bf16.mxu0 %vm723_vm1, %v5252_v42 }
0x1e68   : > { %v5237_v1 = vpop.f32.mrf.mxu0  ;;  %8778 = vmatmul.mubr.msk.bf16.vlgmr.msra.gmra.mxu0 %vm723_vm1, %v5253_v62 }
0x1e69   : > { %8798 = vmatpush3.bf16.msra.mxu0 %v9057_v13 }
0x1e6a   : > { %v8774_v16 = vpop.f32.mrf.mxu0  ;;  %8799 = vmatprep.subr.bf16.mxu0 %v9058_v11 }
0x1e6b   : > { %v5255_v44 = vpack.c.bf16 %v8774_v16, %v8773_v6 }
0x1e6c   : > { %v5240_v34 = vpop.f32.mrf.mxu0 }
0x1e6d   : > { %v5254_v55 = vpack.c.bf16 %v5240_v34, %v5237_v1  ;;  %8800 = vmatpush3.bf16.msra.mxu0 %v9058_v11 }
0x1e6f   : > { %8781 = vmatprep.mubr.msk.bf16.mxu0 %vm723_vm1, %v5254_v55  ;;  %v8795_v55 = vpop.f32.mrf.mxu1 }
0x1e70   : > { %8782 = vmatmul.mubr.msk.bf16.gmra.mxu0 %vm723_vm1, %v5255_v44 }
0x1e71   : > { %8801 = vmatprep.mubr.msk.bf16.mxu0 %vm462_vm0, %v10551_v5  ;;  %v4697_v5 = vadd.f32 %v10811_v30, %v10893_v23  ;;  %v4713_v30 = vadd.f32 %v10819_v48, %v10901_v39  ;;  %v5416_v37 = vpop.f32.mrf.mxu1 }
0x1e73   : > { %v8796_v32 = vpop.f32.mrf.mxu1 }
0x1e78   : > { %8802 = vmatmul.mubr.msk.bf16.vlgmr.msra.gmra.mxu0 %vm462_vm0, %v10564_v35  ;;  %v4689_v35 = vadd.f32 %v10813_v61, %v10895_v36  ;;  %v4705_v36 = vadd.f32 %v10821_v33, %v10903_v15 }
0x1e79   : > { %8805 = vmatprep.mubr.msk.bf16.mxu0 %vm462_vm0, %v10583_v59 }
0x1e80   : > { %8806 = vmatmul.mubr.msk.bf16.gmra.mxu0 %vm462_vm0, %v10595_v19  ;;  %v4692_v19 = vadd.f32 %v10817_v50, %v10899_v2  ;;  %v4708_v2 = vadd.f32 %v10825_v10, %v10907_v8 }
0x1e81   : > { %8829 = vmatprep.mubr.msk.bf16.mxu0 %vm723_vm1, %v5431_v27 }
0x1f28   : > { %v8779_v26 = vpop.f32.mrf.mxu0 }
0x1f29   : > { %v11024_v53 = vadd.f32 %v8779_v26, %v4697_v5  ;;  %v5419_v5 = vpop.f32.mrf.mxu1  ;;  %v5409_v26 = vadd.f32 %v11001_v20, %v11009_v28 }
0x1f2a   : > { %v5307_v59 = vpop.f32.mrf.mxu0 }
0x1f2b   : > { %v11028_v4 = vadd.f32 %v5307_v59, %v4689_v35  ;;  %v5412_v35 = vadd.f32 %v11007_v18, %v11009_v28  ;;  %v5417_v59 = vadd.f32 %v5416_v37, %v11009_v28 }
0x1f2c   : > { %v8780_v49 = vpop.f32.mrf.mxu0 }
0x1f2d   : > { %v11032_v43 = vadd.f32 %v8780_v49, %v4700_v38  ;;  %v5420_v38 = vadd.f32 %v5419_v5, %v11009_v28  ;;  %v5432_v49 = vpack.c.bf16 %v5412_v35, %v5409_v26 }
0x1f2e   : > { %v5310_v54 = vpop.f32.mrf.mxu0 }
0x1f2f   : > { %v11036_v23 = vadd.f32 %v5310_v54, %v4692_v19  ;;  %v5433_v19 = vpack.c.bf16 %v5420_v38, %v5417_v59  ;;  %v5425_v54 = vadd.f32 %v8795_v55, %v11009_v28 }
0x1f30   : > { %v8783_v61 = vpop.f32.mrf.mxu0 }
0x1f31   : > { %v11040_v0 = vadd.f32 %v8783_v61, %v4713_v30  ;;  %v5428_v30 = vadd.f32 %v8796_v32, %v11009_v28 }
0x1f32   : > { %v5323_v21 = vpop.f32.mrf.mxu0 }
0x1f33   : > { %v11044_v31 = vadd.f32 %v5323_v21, %v4705_v36  ;;  %v5434_v61 = vpack.c.bf16 %v5428_v30, %v5425_v54 }
0x1f34   : > { %v8784_v50 = vpop.f32.mrf.mxu0 }
0x1f35   : > { %v11048_v60 = vadd.f32 %v8784_v50, %v4716_v14 }
0x1f36   : > { %v5326_v48 = vpop.f32.mrf.mxu0 }
0x1f37   : > { %v11050_v39 = vadd.f32 %v5326_v48, %v4708_v2 }
0x1f38   : > { %v8803_v58 = vpop.f32.mrf.mxu0 }
0x1f39   : > { %v5498_v11 = vadd.f32 %v8803_v58, %v5453_v9 }
0x1f3a   : > { %v5489_v29 = vpop.f32.mrf.mxu0 }
0x1f3b   : > { %v5490_v44 = vadd.f32 %v5489_v29, %v5453_v9 }
0x1f3c   : > { %v8804_v33 = vpop.f32.mrf.mxu0 }
0x1f3d   : > { %v5501_v6 = vadd.f32 %v8804_v33, %v5453_v9 }
0x1f3e   : > { %v5492_v15 = vpop.f32.mrf.mxu0 }
0x1f3f   : > { %v5521_v1 = vpack.c.bf16 %v5501_v6, %v5498_v11  ;;  %v5493_v34 = vadd.f32 %v5492_v15, %v5453_v9 }
0x1f40   : > { %v8807_v57 = vpop.f32.mrf.mxu0 }
0x1f41   : > { %v5514_v24 = vadd.f32 %v8807_v57, %v5453_v9  ;;  %v5520_v52 = vpack.c.bf16 %v5493_v34, %v5490_v44  ;;  %v5629_v47 = vsel %vm723_vm1, %v5521_v1, 0 }
0x1f42   : > { %v5505_v13 = vpop.f32.mrf.mxu0 }
0x1f43   : > { %v5506_v46 = vadd.f32 %v5505_v13, %v5453_v9  ;;  %v5626_v27 = vsel %vm723_vm1, %v5520_v52, 0 }
0x1f44   : > { %v8808_v40 = vpop.f32.mrf.mxu0 }
0x1f45   : > { %v5517_v7 = vadd.f32 %v8808_v40, %v5453_v9 }
0x1f46   : > { %v5508_v17 = vpop.f32.mrf.mxu0 }
0x1f47   : > { %v5523_v42 = vpack.c.bf16 %v5517_v7, %v5514_v24  ;;  %v5509_v62 = vadd.f32 %v5508_v17, %v5453_v9 }
0x1f49   : > { %v5522_v10 = vpack.c.bf16 %v5509_v62, %v5506_v46  ;;  %8946 = vmatprep.subr.msk.bf16.mxu0 %vm723_vm1, %v5523_v42  ;;  %v5635_v8 = vsel %vm723_vm1, %v5523_v42, 0 }
0x1f4a   : > { %8822 = vmatpush3.bf16.xpose.msra.mxu0 %v5635_v8 }
0x1f4b   : > { %8947 = vmatprep.subr.msk.bf16.mxu0 %vm723_vm1, %v5522_v10  ;;  %v5632_v16 = vsel %vm723_vm1, %v5522_v10, 0 }
0x1f52   : > { %8824 = vmatpush3.bf16.xpose.msra.mxu0 %v5632_v16 }
0x1f53   : > { %8948 = vmatprep.subr.msk.bf16.mxu0 %vm723_vm1, %v5521_v1 }
0x1f5a   : > { %8826 = vmatpush3.bf16.xpose.msra.mxu0 %v5629_v47 }
0x1f5b   : > { %8949 = vmatprep.subr.msk.bf16.mxu0 %vm723_vm1, %v5520_v52 }
0x1f62   : > { %8828 = vmatpush3.bf16.xpose.msra.mxu0 %v5626_v27 }
0x1f69   : > { %8830 = vmatmul.mubr.msk.bf16.vlgmr.msra.gmra.mxu0 %vm723_vm1, %v5432_v49 }
0x1f6a   : > { %8833 = vmatprep.mubr.msk.bf16.mxu0 %vm723_vm1, %v5433_v19 }
0x1f71   : > { %8834 = vmatmul.mubr.msk.bf16.gmra.mxu0 %vm723_vm1, %v5434_v61 }
0x2029   : > { %v8831_v20 = vpop.f32.mrf.mxu0 }
0x202a   : > { %v5704_v29 = vmul.f32 0.35355338, %v8831_v20 }
0x202b   : > { %v5671_v36 = vpop.f32.mrf.mxu0 }
0x202c   : > { %v5702_v18 = vmul.f32 0.35355338, %v5671_v36  ;;  %v5716_v9 = vsel %vm821_vm2, %v5704_v29, -inf }
0x202d   : > { %v8832_v21 = vpop.f32.mrf.mxu0 }
0x202e   : > { %v5705_v14 = vmul.f32 0.35355338, %v8832_v21  ;;  %v5710_v50 = vsel %vm821_vm2, %v5702_v18, -inf }
0x202f   : > { %5711 = vmax.xlane.f32.xlu1 %v5710_v50  ;;  %v5674_v2 = vpop.f32.mrf.mxu0 }
0x2030   : > { %v5703_v48 = vmul.f32 0.35355338, %v5674_v2  ;;  %v5719_v33 = vsel %vm821_vm2, %v5705_v14, -inf }
0x2031   : > { %v8835_v58 = vpop.f32.mrf.mxu0 }
0x2032   : > { %v5713_v15 = vsel %vm821_vm2, %v5703_v48, -inf  ;;  %v5708_v7 = vmul.f32 0.35355338, %v8835_v58 }
0x2033   : > { %5720 = vmax.xlane.f32.xlu1 %v5719_v33  ;;  %5714 = vmax.xlane.f32.xlu0 %v5713_v15  ;;  %v5687_v28 = vpop.f32.mrf.mxu0 }
0x2034   : > { %v5706_v13 = vmul.f32 0.35355338, %v5687_v28  ;;  %v5728_v62 = vsel %vm821_vm2, %v5708_v7, -inf }
0x2035   : > { %v8836_v57 = vpop.f32.mrf.mxu0 }
0x2036   : > { %v5709_v17 = vmul.f32 0.35355338, %v8836_v57  ;;  %v5722_v46 = vsel %vm821_vm2, %v5706_v13, -inf }
0x2037   : > { %5717 = vmax.xlane.f32.xlu0 %v5716_v9  ;;  %v5690_v40 = vpop.f32.mrf.mxu0 }
0x2038   : > { %v5707_v24 = vmul.f32 0.35355338, %v5690_v40  ;;  %v5731_v10 = vsel %vm821_vm2, %v5709_v17, -inf }
0x203a   : > { %v5725_v42 = vsel %vm821_vm2, %v5707_v24, -inf }
0x203b   : > { %5723 = vmax.xlane.f32.xlu0 %v5722_v46  ;;  %5726 = vmax.xlane.f32.xlu1 %v5725_v42 }
0x203f   : > { %5729 = vmax.xlane.f32.xlu0 %v5728_v62  ;;  %5732 = vmax.xlane.f32.xlu1 %v5731_v10 }
0x20b8   : > { %v5712_v8 = vpop.xlane.xlu1 %5711 }
0x20b9   : > { %v5734_v34 = vsub.f32 %v5702_v18, %v5712_v8 }
0x20bb   : > { %v5742_v37 = vmul.f32 1.442695, %v5734_v34 }
0x20bc   : > { %v5721_v6 = vpop.xlane.xlu1 %5720  ;;  %v5715_v11 = vpop.xlane.xlu0 %5714 }
0x20bd   : > { %v5737_v1 = vsub.f32 %v5705_v14, %v5721_v6  ;;  %v5735_v16 = vsub.f32 %v5703_v48, %v5715_v11 }
0x20bf   : > { %v5744_v55 = vmul.f32 1.442695, %v5735_v16  ;;  %v5748_v44 = vmul.f32 1.442695, %v5737_v1 }
0x20c0   : > { %v5718_v52 = vpop.xlane.xlu0 %5717 }
0x20c1   : > { %v5736_v47 = vsub.f32 %v5704_v29, %v5718_v52  ;;  %9373 = vpow2.f32 %v5744_v55 }
0x20c2   : > { %9375 = vpow2.f32 %v5748_v44 }
0x20c3   : > { %v5746_v32 = vmul.f32 1.442695, %v5736_v47 }
0x20c4   : > { %v5724_v27 = vpop.xlane.xlu0 %5723  ;;  %v5727_v5 = vpop.xlane.xlu1 %5726 }
0x20c5   : > { %9377 = vpow2.f32 %v5746_v32  ;;  %v5738_v26 = vsub.f32 %v5706_v13, %v5724_v27  ;;  %v5739_v49 = vsub.f32 %v5707_v24, %v5727_v5  ;;  %v8815_v24 = vpop.f32.mrf.mxu1 }
0x20c6   : > { %9379 = vpow2.f32 %v5742_v37 }
0x20c7   : > { %v5750_v38 = vmul.f32 1.442695, %v5738_v26  ;;  %v5752_v61 = vmul.f32 1.442695, %v5739_v49 }
0x20c8   : > { %v5730_v35 = vpop.xlane.xlu0 %5729  ;;  %v5733_v54 = vpop.xlane.xlu1 %5732 }
0x20c9   : > { %v5740_v59 = vsub.f32 %v5708_v7, %v5730_v35  ;;  %v5741_v20 = vsub.f32 %v5709_v17, %v5733_v54  ;;  %v5578_v7 = vpop.f32.mrf.mxu1 }
0x20cb   : > { %v5754_v19 = vmul.f32 1.442695, %v5740_v59  ;;  %v5756_v14 = vmul.f32 1.442695, %v5741_v20  ;;  %v8816_v17 = vpop.f32.mrf.mxu1 }
0x20cd   : > { %9381 = vpow2.f32 %v5754_v19  ;;  %v5581_v46 = vpop.f32.mrf.mxu1 }
0x20ce   : > { %v11079_v30 = vpop.eup %9373  ;;  %9383 = vpow2.f32 %v5750_v38 }
0x20cf   : > { %v5761_v36 = vsel %vm821_vm2, %v11079_v30, 0.0  ;;  %v11083_v18 = vpop.eup %9375  ;;  %9385 = vpow2.f32 %v5752_v61  ;;  %v8819_v42 = vpop.f32.mrf.mxu1 }
0x20d0   : > { %5762 = vadd.xlane.f32.xlu1 %v5761_v36  ;;  %v5767_v48 = vsel %vm821_vm2, %v11083_v18, 0.0  ;;  %9387 = vpow2.f32 %v5756_v14 }
0x20d1   : > { %v5594_v8 = vpop.f32.mrf.mxu1 }
0x20d2   : > { %v11085_v21 = vpop.eup %9377 }
0x20d3   : > { %v5764_v50 = vsel %vm821_vm2, %v11085_v21, 0.0  ;;  %v9380_v2 = vpop.eup %9379  ;;  %v8820_v1 = vpop.f32.mrf.mxu1 }
0x20d4   : > { %5765 = vadd.xlane.f32.xlu0 %v5764_v50  ;;  %5768 = vadd.xlane.f32.xlu1 %v5767_v48  ;;  %v5758_v58 = vsel %vm821_vm2, %v9380_v2, 0.0 }
0x20d5   : > { %v5597_v55 = vpop.f32.mrf.mxu1 }
0x20d8   : > { %5759 = vadd.xlane.f32.xlu0 %v5758_v58 }
0x20da   : > { %v11092_v29 = vpop.eup %9381 }
0x20db   : > { %v5776_v33 = vsel %vm821_vm2, %v11092_v29, 0.0  ;;  %v11096_v15 = vpop.eup %9383 }
0x20dc   : > { %5777 = vadd.xlane.f32.xlu1 %v5776_v33  ;;  %v5770_v28 = vsel %vm821_vm2, %v11096_v15, 0.0  ;;  %v11100_v57 = vpop.eup %9385 }
0x20dd   : > { %v5773_v13 = vsel %vm821_vm2, %v11100_v57, 0.0  ;;  %v11104_v9 = vpop.eup %9387 }
0x20de   : > { %v5779_v40 = vsel %vm821_vm2, %v11104_v9, 0.0 }
0x20e0   : > { %5771 = vadd.xlane.f32.xlu1 %v5770_v28 }
0x20e4   : > { %5774 = vadd.xlane.f32.xlu1 %v5773_v13  ;;  %v7750_v13 = vld [vmem:[%s11577_s3 + $0x1c] sm:$0xf] }
0x20e8   : > { %5780 = vadd.xlane.f32.xlu1 %v5779_v40 }
0x20ee   : > { %5541 = vrot.lane.b32.xlu0 %v10529_v56, %s11622_s14 }
0x2159   : > { %v5763_v62 = vpop.xlane.xlu1 %5762 }
0x215a   : > { %9389 = vrcp.f32 %v5763_v62 }
0x215d   : > { %v5766_v10 = vpop.xlane.xlu0 %5765  ;;  %v5769_v6 = vpop.xlane.xlu1 %5768 }
0x2161   : > { %v5760_v11 = vpop.xlane.xlu0 %5759 }
0x2162   : > { %9391 = vrcp.f32 %v5760_v11 }
0x2163   : > { %9393 = vrcp.f32 %v5766_v10 }
0x2164   : > { %9395 = vrcp.f32 %v5769_v6 }
0x2165   : > { %v5542_v16 = vpop.permute.xlu0 %5541  ;;  %v5778_v34 = vpop.xlane.xlu1 %5777 }
0x2166   : > { %v5603_v44 = vadd.f32 %v8819_v42, %v5542_v16  ;;  %v5606_v56 = vadd.f32 %v8820_v1, %v5542_v16  ;;  %v5595_v52 = vadd.f32 %v5594_v8, %v5542_v16  ;;  %v5598_v47 = vadd.f32 %v5597_v55, %v5542_v16 }
0x2167   : > { %v5587_v5 = vadd.f32 %v8815_v24, %v5542_v16  ;;  %v5590_v26 = vadd.f32 %v8816_v17, %v5542_v16  ;;  %v9390_v35 = vpop.eup %9389  ;;  %v5579_v49 = vadd.f32 %v5578_v7, %v5542_v16  ;;  %v5582_v19 = vadd.f32 %v5581_v46, %v5542_v16 }
0x2168   : > { %v5612_v37 = vpack.c.bf16 %v5606_v56, %v5603_v44  ;;  %v5611_v27 = vpack.c.bf16 %v5598_v47, %v5595_v52  ;;  %v5791_v36 = vmul.f32 %v9390_v35, %v11079_v30  ;;  %v5898_v30 = vsel %vm1547_vm3, %v7750_v13, 0  ;;  %v11133_v52 = vld [vmem:[%s11580_s6 + $0x8] sm:$0xff] }
0x2169   : > { %v5772_v32 = vpop.xlane.xlu1 %5771  ;;  %v5610_v38 = vpack.c.bf16 %v5590_v26, %v5587_v5  ;;  %v5609_v48 = vpack.c.bf16 %v5582_v19, %v5579_v49  ;;  %v11623_v47 = vsub.s32 1, %v9706_v22 }
0x216a   : > { %8837 = vmatprep.subr.bf16.mxu1 %v5612_v37  ;;  %9397 = vrcp.f32 %v5772_v32 }
0x216b   : > { %8838 = vmatpush3.bf16.msra.mxu1 %v5612_v37  ;;  %v5976_v37 = vrot.slane %v11133_v52, %v11623_v47 }
0x216c   : > { %8839 = vmatprep.subr.bf16.mxu1 %v5611_v27 }
0x216d   : > { %v5775_v59 = vpop.xlane.xlu1 %5774 }
0x216e   : > { %9399 = vrcp.f32 %v5775_v59 }
0x216f   : > { %v9392_v54 = vpop.eup %9391  ;;  %8840 = vmatpush3.bf16.msra.mxu1 %v5611_v27  ;;  %9401 = vrcp.f32 %v5778_v34 }
0x2170   : > { %v9394_v61 = vpop.eup %9393  ;;  %8841 = vmatprep.subr.bf16.mxu1 %v5610_v38  ;;  %v5790_v20 = vmul.f32 %v9392_v54, %v9380_v2 }
0x2171   : > { %v9396_v14 = vpop.eup %9395  ;;  %v5781_v50 = vpop.xlane.xlu1 %5780  ;;  %v5792_v33 = vmul.f32 %v9394_v61, %v11085_v21 }
0x2172   : > { %9403 = vrcp.f32 %v5781_v50  ;;  %v5798_v58 = vpack.c.bf16 %v5791_v36, %v5790_v20  ;;  %v5793_v28 = vmul.f32 %v9396_v14, %v11083_v18 }
0x2173   : > { %8842 = vmatpush3.bf16.msra.mxu1 %v5610_v38 }
0x2174   : > { %8843 = vmatprep.subr.bf16.mxu1 %v5609_v48  ;;  %8845 = vmatprep.mubr.msk.bf16.mxu1 %vm821_vm2, %v5798_v58  ;;  %v5799_v2 = vpack.c.bf16 %v5793_v28, %v5792_v33 }
0x2177   : > { %8844 = vmatpush3.bf16.msra.mxu1 %v5609_v48  ;;  %v9398_v40 = vpop.eup %9397 }
0x2178   : > { %8950 = vmatprep.subr.msk.bf16.mxu1 %vm1547_vm3, %v7750_v13  ;;  %v5794_v18 = vmul.f32 %v9398_v40, %v11096_v15 }
0x217a   : > { %8846 = vmatmul.mubr.msk.bf16.vlgmr.msra.gmra.mxu1 %vm821_vm2, %v5799_v2 }
0x217b   : > { %v9400_v24 = vpop.eup %9399  ;;  %8854 = vmatpush3.bf16.msra.mxu1 %v5898_v30 }
0x217c   : > { %v5795_v21 = vmul.f32 %v9400_v24, %v11100_v57  ;;  %v9402_v7 = vpop.eup %9401 }
0x217d   : > { %v5796_v42 = vmul.f32 %v9402_v7, %v11092_v29  ;;  %v11624_v7 = vld [vmem:[#allocation9_spill] sm:$0xff] }
0x217e   : > { %v5800_v17 = vpack.c.bf16 %v5795_v21, %v5794_v18 }
0x217f   : > { %v9404_v46 = vpop.eup %9403 }
0x2180   : > { %8849 = vmatprep.mubr.msk.bf16.mxu1 %vm821_vm2, %v5800_v17  ;;  %v5797_v62 = vmul.f32 %v9404_v46, %v11104_v9 }
0x2182   : > { %v5801_v10 = vpack.c.bf16 %v5797_v62, %v5796_v42 }
0x2184   : > { %8850 = vmatmul.mubr.msk.bf16.gmra.mxu1 %vm821_vm2, %v5801_v10 }
0x223a   : > { %v8847_v8 = vpop.f32.mrf.mxu1 }
0x223c   : > { %v5848_v6 = vpop.f32.mrf.mxu1 }
0x223e   : > { %v8848_v11 = vpop.f32.mrf.mxu1 }
0x223f   : > { %v5880_v15 = vpack.c.bf16 %v8848_v11, %v8847_v8 }
0x2240   : > { %v5851_v1 = vpop.f32.mrf.mxu1 }
0x2241   : > { %v5879_v16 = vpack.c.bf16 %v5851_v1, %v5848_v6 }
0x2243   : > { %8855 = vmatprep.mubr.msk.bf16.mxu1 %vm723_vm1, %v5879_v16 }
0x2244   : > { %v8851_v57 = vpop.f32.mrf.mxu1  ;;  %8856 = vmatmul.mubr.msk.bf16.vlgmr.msra.gmra.mxu1 %vm723_vm1, %v5880_v15 }
0x2246   : > { %v5864_v34 = vpop.f32.mrf.mxu1 }
0x2248   : > { %v8852_v55 = vpop.f32.mrf.mxu1 }
0x2249   : > { %v5882_v56 = vpack.c.bf16 %v8852_v55, %v8851_v57 }
0x224a   : > { %v5867_v44 = vpop.f32.mrf.mxu1 }
0x224b   : > { %v5881_v29 = vpack.c.bf16 %v5867_v44, %v5864_v34 }
0x224d   : > { %8859 = vmatprep.mubr.msk.bf16.mxu1 %vm723_vm1, %v5881_v29 }
0x224e   : > { %8860 = vmatmul.mubr.msk.bf16.gmra.mxu1 %vm723_vm1, %v5882_v56 }
0x2304   : > { %v8857_v9 = vpop.f32.mrf.mxu1 }
0x2305   : > { %v5967_v32 = vadd.f32 %v8857_v9, %v11024_v53 }
0x2306   : > { %v5934_v27 = vpop.f32.mrf.mxu1 }
0x2307   : > { %v5965_v5 = vadd.f32 %v5934_v27, %v11028_v4  ;;  %v5979_v26 = vadd.f32 %v5976_v37, %v5967_v32 }
0x2308   : > { %v8858_v35 = vpop.f32.mrf.mxu1 }
0x2309   : > { %v5977_v59 = vadd.f32 %v5976_v37, %v5965_v5  ;;  %v5968_v38 = vadd.f32 %v8858_v35, %v11032_v43  ;;  %v5987_v61 = vadd.f32 %v5979_v26, %v10553_v45 }
0x230a   : > { %v5937_v49 = vpop.f32.mrf.mxu1 }
0x230b   : > { %v5966_v19 = vadd.f32 %v5937_v49, %v11036_v23  ;;  %v5985_v54 = vadd.f32 %v5977_v59, %v10545_v41  ;;  %v5980_v20 = vadd.f32 %v5976_v37, %v5968_v38  ;;  %v5999_v43 = vsel %vm462_vm0, %v5987_v61, 0.0 }
0x230d   : > { %v5978_v36 = vadd.f32 %v5976_v37, %v5966_v19  ;;  %v5993_v14 = vsel %vm462_vm0, %v5985_v54, 0.0  ;;  %v5988_v45 = vadd.f32 %v5980_v20, %v10555_v25 }
0x230e   : > { %5994 = vadd.xlane.f32.xlu1 %v5993_v14  ;;  %v8861_v53 = vpop.f32.mrf.mxu1 }
0x230f   : > { %v5971_v4 = vadd.f32 %v8861_v53, %v11040_v0  ;;  %v5986_v50 = vadd.f32 %v5978_v36, %v10547_v3  ;;  %v6002_v0 = vsel %vm462_vm0, %v5988_v45, 0.0 }
0x2310   : > { %v5950_v48 = vpop.f32.mrf.mxu1 }
0x2311   : > { %v5983_v58 = vadd.f32 %v5976_v37, %v5971_v4  ;;  %v5969_v23 = vadd.f32 %v5950_v48, %v11044_v31  ;;  %v5996_v41 = vsel %vm462_vm0, %v5986_v50, 0.0 }
0x2312   : > { %6000 = vadd.xlane.f32.xlu1 %v5999_v43  ;;  %5997 = vadd.xlane.f32.xlu0 %v5996_v41  ;;  %v8862_v33 = vpop.f32.mrf.mxu1  ;;  %v9059_v43 = vld [vmem:[%s11578_s4 + $0x18] sm:$0xff]  }
0x2313   : > { %v5981_v13 = vadd.f32 %v5976_v37, %v5969_v23  ;;  %v5991_v3 = vadd.f32 %v5983_v58, %v10585_v63  ;;  %v5972_v30 = vadd.f32 %v8862_v33, %v11048_v60  ;;  %8863 = vmatprep.subr.bf16.mxu0 %v9059_v43  ;;  %v9060_v58 = vld [vmem:[%s11578_s4 + $0x10] sm:$0xff]   ;;  %v9061_v23 = vld [vmem:[%s11579_s5 + $0x38] sm:$0xff]  }
0x2314   : > { %v5953_v28 = vpop.f32.mrf.mxu1  ;;  %8864 = vmatpush3.bf16.msra.mxu0 %v9059_v43  ;;  %8875 = vmatprep.subr.bf16.mxu1 %v9061_v23 }
0x2315   : > { %v5970_v2 = vadd.f32 %v5953_v28, %v11050_v39  ;;  %v6011_v31 = vsel %vm462_vm0, %v5991_v3, 0.0  ;;  %v5989_v24 = vadd.f32 %v5981_v13, %v10577_v12  ;;  %v5984_v25 = vadd.f32 %v5976_v37, %v5972_v30  ;;  %8865 = vmatprep.subr.bf16.mxu0 %v9060_v58  ;;  %8876 = vmatpush3.bf16.msra.mxu1 %v9061_v23 }
0x2316   : > { %6003 = vadd.xlane.f32.xlu1 %v6002_v0 }
0x2317   : > { %v5982_v40 = vadd.f32 %v5976_v37, %v5970_v2  ;;  %v6005_v18 = vsel %vm462_vm0, %v5989_v24, 0.0  ;;  %v5992_v17 = vadd.f32 %v5984_v25, %v11624_v7  ;;  %v11625_v7 = vsub.s32 2, %v9706_v22 }
0x2318   : > { %8866 = vmatpush3.bf16.msra.mxu0 %v9060_v58 }
0x2319   : > { %v5990_v21 = vadd.f32 %v5982_v40, %v10579_v51  ;;  %v6014_v63 = vsel %vm462_vm0, %v5992_v17, 0.0 }
0x231a   : > { %6012 = vadd.xlane.f32.xlu1 %v6011_v31 }
0x231b   : > { %v6008_v39 = vsel %vm462_vm0, %v5990_v21, 0.0 }
0x231e   : > { %6006 = vadd.xlane.f32.xlu1 %v6005_v18 }
0x2322   : > { %6009 = vadd.xlane.f32.xlu1 %v6008_v39 }
0x2326   : > { %6015 = vadd.xlane.f32.xlu1 %v6014_v63 }
0x2397   : > { %v5995_v60 = vpop.xlane.xlu1 %5994 }
0x2398   : > { %v6017_v46 = vmul.f32 0.03125, %v5995_v60 }
0x239a   : > { %v11162_v42 = vsub.f32 %v5985_v54, %v6017_v46 }
0x239b   : > { %v6001_v12 = vpop.xlane.xlu1 %6000  ;;  %v5998_v62 = vpop.xlane.xlu0 %5997 }
0x239c   : > { %v6019_v10 = vmul.f32 0.03125, %v6001_v12  ;;  %v6018_v8 = vmul.f32 0.03125, %v5998_v62  ;;  %v6033_v51 = vmul.f32 %v11162_v42, %v11162_v42 }
0x239e   : > { %v11166_v6 = vsub.f32 %v5987_v61, %v6019_v10  ;;  %v11168_v11 = vsub.f32 %v5986_v50, %v6018_v8  ;;  %v6041_v1 = vsel %vm462_vm0, %v6033_v51, 0.0 }
0x239f   : > { %v6004_v16 = vpop.xlane.xlu1 %6003  ;;  %6042 = vadd.xlane.f32.xlu1 %v6041_v1 }
0x23a0   : > { %v6020_v15 = vmul.f32 0.03125, %v6004_v16  ;;  %v6035_v57 = vmul.f32 %v11166_v6, %v11166_v6  ;;  %v6034_v34 = vmul.f32 %v11168_v11, %v11168_v11 }
0x23a2   : > { %v11175_v55 = vsub.f32 %v5988_v45, %v6020_v15  ;;  %v6047_v44 = vsel %vm462_vm0, %v6035_v57, 0.0  ;;  %v6044_v29 = vsel %vm462_vm0, %v6034_v34, 0.0  ;;  %v11626_v15 = vsub.s32 3, %v9706_v22 }
0x23a3   : > { %6048 = vadd.xlane.f32.xlu0 %v6047_v44  ;;  %v6013_v56 = vpop.xlane.xlu1 %6012  ;;  %6045 = vadd.xlane.f32.xlu1 %v6044_v29 }
0x23a4   : > { %v6036_v9 = vmul.f32 %v11175_v55, %v11175_v55  ;;  %v6023_v47 = vmul.f32 0.03125, %v6013_v56  ;;  %v6112_v57 = vrot.slane %v11133_v52, %v11626_v15 }
0x23a6   : > { %v6050_v37 = vsel %vm462_vm0, %v6036_v9, 0.0  ;;  %v11182_v5 = vsub.f32 %v5991_v3, %v6023_v47 }
0x23a7   : > { %v6007_v32 = vpop.xlane.xlu1 %6006  ;;  %6051 = vadd.xlane.f32.xlu1 %v6050_v37 }
0x23a8   : > { %v6021_v27 = vmul.f32 0.03125, %v6007_v32  ;;  %v6039_v54 = vmul.f32 %v11182_v5, %v11182_v5 }
0x23aa   : > { %v11184_v26 = vsub.f32 %v5989_v24, %v6021_v27  ;;  %v6059_v53 = vsel %vm462_vm0, %v6039_v54, 0.0 }
0x23ab   : > { %v6010_v35 = vpop.xlane.xlu1 %6009 }
0x23ac   : > { %v6022_v59 = vmul.f32 0.03125, %v6010_v35  ;;  %v6037_v38 = vmul.f32 %v11184_v26, %v11184_v26 }
0x23ae   : > { %v11188_v49 = vsub.f32 %v5990_v21, %v6022_v59  ;;  %v6053_v19 = vsel %vm462_vm0, %v6037_v38, 0.0 }
0x23af   : > { %6054 = vadd.xlane.f32.xlu0 %v6053_v19  ;;  %v6016_v61 = vpop.xlane.xlu1 %6015 }
0x23b0   : > { %v6024_v20 = vmul.f32 0.03125, %v6016_v61  ;;  %v6038_v36 = vmul.f32 %v11188_v49, %v11188_v49 }
0x23b2   : > { %v11195_v14 = vsub.f32 %v5992_v17, %v6024_v20  ;;  %v6056_v4 = vsel %vm462_vm0, %v6038_v36, 0.0  ;;  %v6100_v17 = vrot.slane %v11133_v52, %v11625_v7 }
0x23b3   : > { %6060 = vadd.xlane.f32.xlu0 %v6059_v53  ;;  %6057 = vadd.xlane.f32.xlu1 %v6056_v4 }
0x23b4   : > { %v6040_v50 = vmul.f32 %v11195_v14, %v11195_v14 }
0x23b6   : > { %v6062_v48 = vsel %vm462_vm0, %v6040_v50, 0.0 }
0x23b7   : > { %6063 = vadd.xlane.f32.xlu1 %v6062_v48 }
0x2428   : > { %v6043_v41 = vpop.xlane.xlu1 %6042 }
0x2429   : > { %v6065_v45 = vmul.f32 0.03125, %v6043_v41 }
0x242b   : > { %v6073_v33 = vadd.f32 1e-12, %v6065_v45 }
0x242c   : > { %v6049_v28 = vpop.xlane.xlu0 %6048  ;;  %v6046_v13 = vpop.xlane.xlu1 %6045 }
0x242d   : > { %9405 = vrsqrt.f32 %v6073_v33  ;;  %v6067_v2 = vmul.f32 0.03125, %v6049_v28  ;;  %v6066_v0 = vmul.f32 0.03125, %v6046_v13  ;;  %v9064_v13 = vld [vmem:[%s11579_s5 + $0x20] sm:$0xff]  }
0x242f   : > { %v6075_v3 = vadd.f32 1e-12, %v6067_v2  ;;  %v6074_v30 = vadd.f32 1e-12, %v6066_v0  ;;  %v11627_v0 = vsub.s32 4, %v9706_v22 }
0x2430   : > { %v6052_v40 = vpop.xlane.xlu1 %6051 }
0x2431   : > { %9407 = vrsqrt.f32 %v6075_v3  ;;  %v6068_v31 = vmul.f32 0.03125, %v6052_v40  ;;  %v6133_v3 = vrot.slane %v11133_v52, %v11627_v0 }
0x2432   : > { %9409 = vrsqrt.f32 %v6074_v30 }
0x2433   : > { %v6076_v24 = vadd.f32 1e-12, %v6068_v31 }
0x2435   : > { %9411 = vrsqrt.f32 %v6076_v24 }
0x2438   : > { %v6055_v25 = vpop.xlane.xlu0 %6054 }
0x2439   : > { %v6069_v18 = vmul.f32 0.03125, %v6055_v25 }
0x243a   : > { %v9406_v21 = vpop.eup %9405 }
0x243b   : > { %v6077_v39 = vadd.f32 1e-12, %v6069_v18  ;;  %v6089_v46 = vmul.f32 %v9406_v21, %v11162_v42 }
0x243c   : > { %v6061_v63 = vpop.xlane.xlu0 %6060  ;;  %v6058_v60 = vpop.xlane.xlu1 %6057 }
0x243d   : > { %9413 = vrsqrt.f32 %v6077_v39  ;;  %v6071_v12 = vmul.f32 0.03125, %v6061_v63  ;;  %v6070_v62 = vmul.f32 0.03125, %v6058_v60  ;;  %v6101_v29 = vmul.f32 %v6100_v17, %v6089_v46 }
0x243e   : > { %v9408_v10 = vpop.eup %9407 }
0x243f   : > { %v9410_v8 = vpop.eup %9409  ;;  %v6091_v51 = vmul.f32 %v9408_v10, %v11166_v6  ;;  %v6079_v1 = vadd.f32 1e-12, %v6071_v12  ;;  %v6078_v16 = vadd.f32 1e-12, %v6070_v62  ;;  %v11221_v6 = vadd.f32 %v6112_v57, %v6101_v29 }
0x2440   : > { %v6064_v34 = vpop.xlane.xlu1 %6063  ;;  %v6090_v44 = vmul.f32 %v9410_v8, %v11168_v11 }
0x2441   : > { %9415 = vrsqrt.f32 %v6079_v1  ;;  %v6072_v56 = vmul.f32 0.03125, %v6064_v34  ;;  %v6103_v47 = vmul.f32 %v6100_v17, %v6091_v51 }
0x2442   : > { %v9412_v42 = vpop.eup %9411  ;;  %9417 = vrsqrt.f32 %v6078_v16  ;;  %v6102_v9 = vmul.f32 %v6100_v17, %v6090_v44 }
0x2443   : > { %v6092_v37 = vmul.f32 %v9412_v42, %v11175_v55  ;;  %v6080_v32 = vadd.f32 1e-12, %v6072_v56  ;;  %v11227_v11 = vadd.f32 %v6112_v57, %v6103_v47 }
0x2444   : > { %v11223_v27 = vadd.f32 %v6112_v57, %v6102_v9  ;;  %v11628_v9 = vsub.s32 5, %v9706_v22 }
0x2445   : > { %v6104_v35 = vmul.f32 %v6100_v17, %v6092_v37  ;;  %9419 = vrsqrt.f32 %v6080_v32 }
0x2446   : > { %v6121_v59 = vpack.c.bf16 %v11223_v27, %v11221_v6  ;;  %v6247_v47 = vrot.slane %v11133_v52, %v11628_v9 }
0x2447   : > { %v11229_v38 = vadd.f32 %v6112_v57, %v6104_v35 }
0x2448   : > { %8867 = vmatprep.mubr.msk.bf16.mxu0 %vm462_vm0, %v6121_v59 }
0x2449   : > { %v6122_v19 = vpack.c.bf16 %v11229_v38, %v11227_v11 }
0x244a   : > { %v9414_v55 = vpop.eup %9413 }
0x244b   : > { %8868 = vmatmul.mubr.msk.bf16.vlgmr.msra.gmra.mxu0 %vm462_vm0, %v6122_v19  ;;  %v6093_v54 = vmul.f32 %v9414_v55, %v11184_v26 }
0x244d   : > { %v6105_v4 = vmul.f32 %v6100_v17, %v6093_v54 }
0x244e   : > { %v9416_v61 = vpop.eup %9415 }
0x244f   : > { %v9418_v20 = vpop.eup %9417  ;;  %v6095_v36 = vmul.f32 %v9416_v61, %v11182_v5  ;;  %v11239_v23 = vadd.f32 %v6112_v57, %v6105_v4 }
0x2450   : > { %v6094_v53 = vmul.f32 %v9418_v20, %v11188_v49  ;;  %v9062_v49 = vld [vmem:[%s11579_s5 + $0x30] sm:$0xff]  }
0x2451   : > { %v6107_v58 = vmul.f32 %v6100_v17, %v6095_v36  ;;  %8877 = vmatprep.subr.bf16.mxu1 %v9062_v49 }
0x2452   : > { %v9420_v50 = vpop.eup %9419  ;;  %v6106_v48 = vmul.f32 %v6100_v17, %v6094_v53  ;;  %8878 = vmatpush3.bf16.msra.mxu1 %v9062_v49 }
0x2453   : > { %v6096_v43 = vmul.f32 %v9420_v50, %v11195_v14  ;;  %v11245_v33 = vadd.f32 %v6112_v57, %v6107_v58  ;;  %v9063_v14 = vld [vmem:[%s11579_s5 + $0x28] sm:$0xff]  }
0x2454   : > { %v11241_v41 = vadd.f32 %v6112_v57, %v6106_v48  ;;  %8879 = vmatprep.subr.bf16.mxu1 %v9063_v14 }
0x2455   : > { %v6108_v45 = vmul.f32 %v6100_v17, %v6096_v43 }
0x2456   : > { %v6123_v26 = vpack.c.bf16 %v11241_v41, %v11239_v23  ;;  %8880 = vmatpush3.bf16.msra.mxu1 %v9063_v14 }
0x2457   : > { %v11247_v28 = vadd.f32 %v6112_v57, %v6108_v45  ;;  %8881 = vmatprep.subr.bf16.mxu1 %v9064_v13 }
0x2458   : > { %8871 = vmatprep.mubr.msk.bf16.mxu0 %vm462_vm0, %v6123_v26 }
0x2459   : > { %v6124_v5 = vpack.c.bf16 %v11247_v28, %v11245_v33 }
0x245a   : > { %8882 = vmatpush3.bf16.msra.mxu1 %v9064_v13 }
0x245b   : > { %8872 = vmatmul.mubr.msk.bf16.gmra.mxu0 %vm462_vm0, %v6124_v5 }
0x250b   : > { %v8869_v2 = vpop.f32.mrf.mxu0 }
0x250c   : > { %v6201_v25 = vadd.f32 %v8869_v2, %v6133_v3 }
0x250d   : > { %v6192_v30 = vpop.f32.mrf.mxu0 }
0x250e   : > { %v6193_v31 = vadd.f32 %v6192_v30, %v6133_v3  ;;  %v6225_v63 = vmax.f32 %v6201_v25, 0.0 }
0x250f   : > { %v8870_v40 = vpop.f32.mrf.mxu0 }
0x2510   : > { %v6204_v24 = vadd.f32 %v8870_v40, %v6133_v3  ;;  %v6223_v7 = vmax.f32 %v6193_v31, 0.0 }
0x2511   : > { %v6195_v18 = vpop.f32.mrf.mxu0 }
0x2512   : > { %v6196_v21 = vadd.f32 %v6195_v18, %v6133_v3  ;;  %v6226_v39 = vmax.f32 %v6204_v24, 0.0 }
0x2514   : > { %v6224_v17 = vmax.f32 %v6196_v21, 0.0  ;;  %v6232_v46 = vpack.c.bf16 %v6226_v39, %v6225_v63 }
0x2516   : > { %v6231_v60 = vpack.c.bf16 %v6224_v17, %v6223_v7 }
0x2518   : > { %8883 = vmatprep.mubr.msk.bf16.mxu1 %vm821_vm2, %v6231_v60 }
0x2519   : > { %8884 = vmatmul.mubr.msk.bf16.vlgmr.msra.gmra.mxu1 %vm821_vm2, %v6232_v46 }
0x251b   : > { %v8873_v12 = vpop.f32.mrf.mxu0 }
0x251c   : > { %v6217_v1 = vadd.f32 %v8873_v12, %v6133_v3 }
0x251d   : > { %v6208_v62 = vpop.f32.mrf.mxu0 }
0x251e   : > { %v6209_v8 = vadd.f32 %v6208_v62, %v6133_v3  ;;  %v6229_v29 = vmax.f32 %v6217_v1, 0.0 }
0x251f   : > { %v8874_v10 = vpop.f32.mrf.mxu0 }
0x2520   : > { %v6220_v51 = vadd.f32 %v8874_v10, %v6133_v3  ;;  %v6227_v34 = vmax.f32 %v6209_v8, 0.0 }
0x2521   : > { %v6211_v16 = vpop.f32.mrf.mxu0 }
0x2522   : > { %v6212_v15 = vadd.f32 %v6211_v16, %v6133_v3  ;;  %v6230_v57 = vmax.f32 %v6220_v51, 0.0 }
0x2524   : > { %v6228_v44 = vmax.f32 %v6212_v15, 0.0  ;;  %v6234_v42 = vpack.c.bf16 %v6230_v57, %v6229_v29 }
0x2526   : > { %v6233_v56 = vpack.c.bf16 %v6228_v44, %v6227_v34 }
0x2528   : > { %8887 = vmatprep.mubr.msk.bf16.mxu1 %vm821_vm2, %v6233_v56 }
0x2529   : > { %8888 = vmatmul.mubr.msk.bf16.gmra.mxu1 %vm821_vm2, %v6234_v42 }
0x25d9   : > { %v8885_v37 = vpop.f32.mrf.mxu1 }
0x25da   : > { %v6327_v35 = vadd.f32 %v8885_v37, %v6247_v47 }
0x25db   : > { %v6318_v32 = vpop.f32.mrf.mxu1 }
0x25dc   : > { %v6319_v59 = vadd.f32 %v6318_v32, %v6247_v47  ;;  %v6351_v61 = vadd.f32 %v6327_v35, %v11227_v11 }
0x25dd   : > { %v8886_v19 = vpop.f32.mrf.mxu1 }
0x25de   : > { %v6349_v55 = vadd.f32 %v6319_v59, %v11221_v6  ;;  %v6330_v20 = vadd.f32 %v8886_v19, %v6247_v47  ;;  %v6363_v43 = vsel %vm462_vm0, %v6351_v61, 0.0 }
0x25df   : > { %v6321_v54 = vpop.f32.mrf.mxu1 }
0x25e0   : > { %v6322_v36 = vadd.f32 %v6321_v54, %v6247_v47  ;;  %v6357_v53 = vsel %vm462_vm0, %v6349_v55, 0.0  ;;  %v6352_v50 = vadd.f32 %v6330_v20, %v11229_v38 }
0x25e1   : > { %6358 = vadd.xlane.f32.xlu0 %v6357_v53  ;;  %v9065_v53 = vld [vmem:[%s11581_s7 + $0x8] sm:$0xff]  }
0x25e2   : > { %v6350_v4 = vadd.f32 %v6322_v36, %v11223_v27  ;;  %v6366_v6 = vsel %vm462_vm0, %v6352_v50, 0.0  ;;  %8891 = vmatprep.subr.bf16.mxu0 %v9065_v53 }
0x25e3   : > { %8892 = vmatpush3.bf16.msra.mxu0 %v9065_v53 }
0x25e4   : > { %v6360_v48 = vsel %vm462_vm0, %v6350_v4, 0.0 }
0x25e5   : > { %6361 = vadd.xlane.f32.xlu1 %v6360_v48  ;;  %6364 = vadd.xlane.f32.xlu0 %v6363_v43 }
0x25e9   : > { %6367 = vadd.xlane.f32.xlu1 %v6366_v6  ;;  %v8889_v58 = vpop.f32.mrf.mxu1 }
0x25ea   : > { %v6343_v45 = vadd.f32 %v8889_v58, %v6247_v47 }
0x25eb   : > { %v6334_v11 = vpop.f32.mrf.mxu1 }
0x25ec   : > { %v6335_v26 = vadd.f32 %v6334_v11, %v6247_v47  ;;  %v6355_v27 = vadd.f32 %v6343_v45, %v11245_v33 }
0x25ed   : > { %v8890_v5 = vpop.f32.mrf.mxu1 }
0x25ee   : > { %v6353_v49 = vadd.f32 %v6335_v26, %v11239_v23  ;;  %v6346_v38 = vadd.f32 %v8890_v5, %v6247_v47  ;;  %v6375_v40 = vsel %vm462_vm0, %v6355_v27, 0.0 }
0x25ef   : > { %v6337_v14 = vpop.f32.mrf.mxu1 }
0x25f0   : > { %v6338_v13 = vadd.f32 %v6337_v14, %v6247_v47  ;;  %v6369_v2 = vsel %vm462_vm0, %v6353_v49, 0.0  ;;  %v6356_v3 = vadd.f32 %v6346_v38, %v11247_v28 }
0x25f1   : > { %6370 = vadd.xlane.f32.xlu0 %v6369_v2 }
0x25f2   : > { %v6354_v0 = vadd.f32 %v6338_v13, %v11241_v41  ;;  %v6378_v23 = vsel %vm462_vm0, %v6356_v3, 0.0 }
0x25f4   : > { %v6372_v30 = vsel %vm462_vm0, %v6354_v0, 0.0 }
0x25f5   : > { %6373 = vadd.xlane.f32.xlu1 %v6372_v30  ;;  %6376 = vadd.xlane.f32.xlu0 %v6375_v40 }
0x25f9   : > { %6379 = vadd.xlane.f32.xlu1 %v6378_v23 }
0x266a   : > { %v6359_v31 = vpop.xlane.xlu0 %6358 }
0x266b   : > { %v6381_v33 = vmul.f32 0.03125, %v6359_v31 }
0x266d   : > { %v11288_v24 = vsub.f32 %v6349_v55, %v6381_v33 }
0x266e   : > { %v6365_v25 = vpop.xlane.xlu0 %6364  ;;  %v6362_v18 = vpop.xlane.xlu1 %6361 }
0x266f   : > { %v6383_v21 = vmul.f32 0.03125, %v6365_v25  ;;  %v6382_v39 = vmul.f32 0.03125, %v6362_v18  ;;  %v6397_v41 = vmul.f32 %v11288_v24, %v11288_v24 }
0x2671   : > { %v11292_v28 = vsub.f32 %v6351_v61, %v6383_v21  ;;  %v11294_v7 = vsub.f32 %v6350_v4, %v6382_v39  ;;  %v6405_v17 = vsel %vm462_vm0, %v6397_v41, 0.0  ;;  %v9066_v4 = vld [vmem:[%s11581_s7] sm:$0xff]  }
0x2672   : > { %6406 = vadd.xlane.f32.xlu0 %v6405_v17  ;;  %v6368_v63 = vpop.xlane.xlu1 %6367  ;;  %8893 = vmatprep.subr.bf16.mxu0 %v9066_v4 }
0x2673   : > { %v6384_v60 = vmul.f32 0.03125, %v6368_v63  ;;  %v6399_v46 = vmul.f32 %v11292_v28, %v11292_v28  ;;  %v6398_v12 = vmul.f32 %v11294_v7, %v11294_v7  ;;  %8894 = vmatpush3.bf16.msra.mxu0 %v9066_v4  ;;  %v11630_v63 = vsub.s32 7, %v9706_v22 }
0x2675   : > { %v11301_v62 = vsub.f32 %v6352_v50, %v6384_v60  ;;  %v6411_v10 = vsel %vm462_vm0, %v6399_v46, 0.0  ;;  %v6408_v8 = vsel %vm462_vm0, %v6398_v12, 0.0  ;;  %v6476_v60 = vrot.slane %v11133_v52, %v11630_v63 }
0x2676   : > { %6412 = vadd.xlane.f32.xlu0 %v6411_v10  ;;  %6409 = vadd.xlane.f32.xlu1 %v6408_v8 }
0x2677   : > { %v6400_v51 = vmul.f32 %v11301_v62, %v11301_v62 }
0x2679   : > { %v6414_v1 = vsel %vm462_vm0, %v6400_v51, 0.0 }
0x267a   : > { %v6371_v16 = vpop.xlane.xlu0 %6370  ;;  %6415 = vadd.xlane.f32.xlu1 %v6414_v1 }
0x267b   : > { %v6385_v15 = vmul.f32 0.03125, %v6371_v16 }
0x267d   : > { %v11308_v57 = vsub.f32 %v6353_v49, %v6385_v15 }
0x267e   : > { %v6377_v34 = vpop.xlane.xlu0 %6376  ;;  %v6374_v44 = vpop.xlane.xlu1 %6373 }
0x267f   : > { %v6387_v29 = vmul.f32 0.03125, %v6377_v34  ;;  %v6386_v56 = vmul.f32 0.03125, %v6374_v44  ;;  %v6401_v42 = vmul.f32 %v11308_v57, %v11308_v57 }
0x2681   : > { %v11312_v9 = vsub.f32 %v6355_v27, %v6387_v29  ;;  %v11314_v47 = vsub.f32 %v6354_v0, %v6386_v56  ;;  %v6417_v37 = vsel %vm462_vm0, %v6401_v42, 0.0 }
0x2682   : > { %6418 = vadd.xlane.f32.xlu0 %v6417_v37  ;;  %v6380_v32 = vpop.xlane.xlu1 %6379 }
0x2683   : > { %v6388_v35 = vmul.f32 0.03125, %v6380_v32  ;;  %v6403_v59 = vmul.f32 %v11312_v9, %v11312_v9  ;;  %v6402_v19 = vmul.f32 %v11314_v47, %v11314_v47 }
0x2685   : > { %v11321_v55 = vsub.f32 %v6356_v3, %v6388_v35  ;;  %v6423_v54 = vsel %vm462_vm0, %v6403_v59, 0.0  ;;  %v6420_v61 = vsel %vm462_vm0, %v6402_v19, 0.0  ;;  %v11629_v3 = vsub.s32 6, %v9706_v22 }
0x2686   : > { %6424 = vadd.xlane.f32.xlu0 %v6423_v54  ;;  %6421 = vadd.xlane.f32.xlu1 %v6420_v61 }
0x2687   : > { %v6404_v20 = vmul.f32 %v11321_v55, %v11321_v55  ;;  %v6464_v30 = vrot.slane %v11133_v52, %v11629_v3 }
0x2689   : > { %v6426_v36 = vsel %vm462_vm0, %v6404_v20, 0.0 }
0x268a   : > { %6427 = vadd.xlane.f32.xlu1 %v6426_v36 }
0x26fb   : > { %v6407_v50 = vpop.xlane.xlu0 %6406 }
0x26fc   : > { %v6429_v48 = vmul.f32 0.03125, %v6407_v50 }
0x26fe   : > { %v6437_v43 = vadd.f32 1e-12, %v6429_v48 }
0x26ff   : > { %v6413_v6 = vpop.xlane.xlu0 %6412  ;;  %v6410_v58 = vpop.xlane.xlu1 %6409 }
0x2700   : > { %9421 = vrsqrt.f32 %v6437_v43  ;;  %v6431_v11 = vmul.f32 0.03125, %v6413_v6  ;;  %v6430_v45 = vmul.f32 0.03125, %v6410_v58  ;;  %v9067_v58 = vld [vmem:[%s11582_s8 + $0x10] ss:$8 sps:$4 sm:$0xff]  }
0x2702   : > { %v6439_v26 = vadd.f32 1e-12, %v6431_v11  ;;  %v6438_v5 = vadd.f32 1e-12, %v6430_v45  ;;  %v9078_v11 = vld [vmem:[%s11582_s8 + $0x44] ss:$8 sps:$4 sm:$0xff]  }
0x2703   : > { %v6416_v49 = vpop.xlane.xlu1 %6415  ;;  %v9076_v45 = vld [vmem:[%s11582_s8 + $0x40] ss:$8 sps:$4 sm:$0xff]  }
0x2704   : > { %9423 = vrsqrt.f32 %v6439_v26  ;;  %v6432_v14 = vmul.f32 0.03125, %v6416_v49  ;;  %v9075_v26 = vld [vmem:[%s11582_s8 + $0x4] ss:$8 sps:$4 sm:$0xff]   ;;  %v9530_v49 = vmov 0  }
0x2705   : > { %9425 = vrsqrt.f32 %v6438_v5  ;;  %v9073_v5 = vld [vmem:[%s11582_s8] ss:$8 sps:$4 sm:$0xff]   ;;  %6668 = vmatprep.mubr.bf16.mxu1 %v9530_v49 }
0x2706   : > { %v6440_v27 = vadd.f32 1e-12, %v6432_v14  ;;  %v9081_v14 = vld [vmem:[%s11582_s8 + $0x34] ss:$8 sps:$4 sm:$0xff]  }
0x2708   : > { %9427 = vrsqrt.f32 %v6440_v27  ;;  %v9090_v27 = vld [vmem:[%s11582_s8 + $0x94] ss:$8 sps:$4 sm:$0xff]  }
0x270b   : > { %v6419_v38 = vpop.xlane.xlu0 %6418 }
0x270c   : > { %v6433_v13 = vmul.f32 0.03125, %v6419_v38  ;;  %v11387_v38 = vld [vmem:[%s11584_s10] sm:$0xff] }
0x270d   : > { %v9422_v2 = vpop.eup %9421 }
0x270e   : > { %v6441_v0 = vadd.f32 1e-12, %v6433_v13  ;;  %v6453_v31 = vmul.f32 %v9422_v2, %v11288_v24  ;;  %v11631_v13 = vld [vmem:[#allocation8_spill] sm:$0xff] }
0x270f   : > { %v6425_v40 = vpop.xlane.xlu0 %6424  ;;  %v6422_v23 = vpop.xlane.xlu1 %6421  ;;  %v6497_v2 = vrot.slane %v11387_v38, %v11631_v13 }
0x2710   : > { %9429 = vrsqrt.f32 %v6441_v0  ;;  %v6435_v33 = vmul.f32 0.03125, %v6425_v40  ;;  %v6434_v25 = vmul.f32 0.03125, %v6422_v23  ;;  %v6465_v10 = vmul.f32 %v6464_v30, %v6453_v31 }
0x2711   : > { %v9424_v18 = vpop.eup %9423 }
0x2712   : > { %v9426_v21 = vpop.eup %9425  ;;  %v6455_v39 = vmul.f32 %v9424_v18, %v11292_v28  ;;  %v6443_v41 = vadd.f32 1e-12, %v6435_v33  ;;  %v6442_v17 = vadd.f32 1e-12, %v6434_v25  ;;  %v6477_v28 = vadd.f32 %v6476_v60, %v6465_v10 }
0x2713   : > { %v6428_v46 = vpop.xlane.xlu1 %6427  ;;  %v6454_v12 = vmul.f32 %v9426_v21, %v11294_v7 }
0x2714   : > { %9431 = vrsqrt.f32 %v6443_v41  ;;  %v6436_v8 = vmul.f32 0.03125, %v6428_v46  ;;  %v6467_v1 = vmul.f32 %v6464_v30, %v6455_v39  ;;  %v9088_v39 = vld [vmem:[%s11582_s8 + $0x90] ss:$8 sps:$4 sm:$0xff]  }
0x2715   : > { %v9428_v24 = vpop.eup %9427  ;;  %9433 = vrsqrt.f32 %v6442_v17  ;;  %v6466_v51 = vmul.f32 %v6464_v30, %v6454_v12  ;;  %v9096_v17 = vld [vmem:[%s11582_s8 + $0x84] ss:$8 sps:$4 sm:$0xff]   ;;  %v9079_v46 = vld [vmem:[%s11582_s8 + $0x30] ss:$8 sps:$4 sm:$0xff]  }
0x2716   : > { %v6456_v16 = vmul.f32 %v9428_v24, %v11301_v62  ;;  %v6444_v15 = vadd.f32 1e-12, %v6436_v8  ;;  %v6479_v56 = vadd.f32 %v6476_v60, %v6467_v1  ;;  %v9084_v8 = vld [vmem:[%s11582_s8 + $0x24] ss:$8 sps:$4 sm:$0xff]   ;;  %v9102_v1 = vld [vmem:[%s11582_s8 + $0xd4] ss:$8 sps:$4 sm:$0xff]  }
0x2717   : > { %v6478_v34 = vadd.f32 %v6476_v60, %v6466_v51  ;;  %v9094_v51 = vld [vmem:[%s11582_s8 + $0x80] ss:$8 sps:$4 sm:$0xff]  }
0x2718   : > { %v6468_v44 = vmul.f32 %v6464_v30, %v6456_v16  ;;  %9435 = vrsqrt.f32 %v6444_v15 }
0x2719   : > { %v6486_v29 = vpack.c.bf16 %v6478_v34, %v6477_v28  ;;  %v9082_v28 = vld [vmem:[%s11582_s8 + $0x20] ss:$8 sps:$4 sm:$0xff]  }
0x271a   : > { %v6480_v52 = vadd.f32 %v6476_v60, %v6468_v44  ;;  %v9087_v44 = vld [vmem:[%s11582_s8 + $0x74] ss:$8 sps:$4 sm:$0xff]  }
0x271b   : > { %8895 = vmatprep.mubr.msk.bf16.mxu0 %vm462_vm0, %v6486_v29 }
0x271c   : > { %v6487_v7 = vpack.c.bf16 %v6480_v52, %v6479_v56  ;;  %v9085_v56 = vld [vmem:[%s11582_s8 + $0x70] ss:$8 sps:$4 sm:$0xff]  }
0x271d   : > { %v9430_v42 = vpop.eup %9429 }
0x271e   : > { %8896 = vmatmul.mubr.msk.bf16.vlgmr.msra.gmra.mxu0 %vm462_vm0, %v6487_v7  ;;  %v6457_v37 = vmul.f32 %v9430_v42, %v11308_v57  ;;  %v9093_v7 = vld [vmem:[%s11582_s8 + $0x64] ss:$8 sps:$4 sm:$0xff]   ;;  %v9091_v42 = vld [vmem:[%s11582_s8 + $0x60] ss:$8 sps:$4 sm:$0xff]  }
0x2720   : > { %v6469_v19 = vmul.f32 %v6464_v30, %v6457_v37 }
0x2721   : > { %v9432_v32 = vpop.eup %9431 }
0x2722   : > { %v9434_v35 = vpop.eup %9433  ;;  %v6459_v62 = vmul.f32 %v9432_v32, %v11312_v9  ;;  %v6481_v53 = vadd.f32 %v6476_v60, %v6469_v19  ;;  %v9072_v9 = vld [vmem:[%s11582_s8 + $0x54] ss:$8 sps:$4 sm:$0xff]   ;;  %v9100_v19 = vld [vmem:[%s11582_s8 + $0xd0] ss:$8 sps:$4 sm:$0xff]  }
0x2723   : > { %v6458_v59 = vmul.f32 %v9434_v35, %v11314_v47  ;;  %v9070_v47 = vld [vmem:[%s11582_s8 + $0x50] ss:$8 sps:$4 sm:$0xff]   ;;  %6796 = vmatprep.subr.bf16.mxu0 %v9072_v9  ;;  %v9099_v32 = vld [vmem:[%s11582_s8 + $0xb4] ss:$8 sps:$4 sm:$0xff]  }
0x2724   : > { %v6471_v36 = vmul.f32 %v6464_v30, %v6459_v62  ;;  %6797 = vmatpush1.bf16.msra.mxu0 %v9070_v47  ;;  %v9114_v47 = vld [vmem:[%s11582_s8 + $0xe4] ss:$8 sps:$4 sm:$0xff]  }
0x2725   : > { %v9436_v54 = vpop.eup %9435  ;;  %v6470_v61 = vmul.f32 %v6464_v30, %v6458_v59  ;;  %6798 = vmatprep.subr.bf16.mxu0 %v9078_v11  ;;  %v9097_v59 = vld [vmem:[%s11582_s8 + $0xb0] ss:$8 sps:$4 sm:$0xff]  }
0x2726   : > { %v6460_v20 = vmul.f32 %v9436_v54, %v11321_v55  ;;  %v6483_v43 = vadd.f32 %v6476_v60, %v6471_v36  ;;  %v9069_v55 = vld [vmem:[%s11582_s8 + $0x14] ss:$8 sps:$4 sm:$0xff]   ;;  %v9108_v36 = vld [vmem:[%s11582_s8 + $0xc4] ss:$8 sps:$4 sm:$0xff]  }
0x2727   : > { %v6482_v4 = vadd.f32 %v6476_v60, %v6470_v61  ;;  %6648 = vmatprep.subr.bf16.mxu1 %v9069_v55  ;;  %v9112_v55 = vld [vmem:[%s11582_s8 + $0xe0] ss:$8 sps:$4 sm:$0xff]  }
0x2728   : > { %v6472_v50 = vmul.f32 %v6464_v30, %v6460_v20  ;;  %6649 = vmatpush1.bf16.msra.mxu1 %v9067_v58  ;;  %6799 = vmatpush1.bf16.msra.mxu0 %v9076_v45  ;;  %v9105_v20 = vld [vmem:[%s11582_s8 + $0xa4] ss:$8 sps:$4 sm:$0xff]  }
0x2729   : > { %v6488_v48 = vpack.c.bf16 %v6482_v4, %v6481_v53  ;;  %6650 = vmatprep.subr.bf16.mxu1 %v9075_v26  ;;  %6944 = vmatprep.subr.bf16.mxu0 %v9090_v27  ;;  %v9103_v53 = vld [vmem:[%s11582_s8 + $0xa0] ss:$8 sps:$4 sm:$0xff]  }
0x272a   : > { %v6484_v6 = vadd.f32 %v6476_v60, %v6472_v50  ;;  %v9106_v4 = vld [vmem:[%s11582_s8 + $0xc0] ss:$8 sps:$4 sm:$0xff]  }
0x272b   : > { %8899 = vmatprep.mubr.msk.bf16.mxu0 %vm462_vm0, %v6488_v48  ;;  %v9111_v48 = vld [vmem:[%s11582_s8 + $0xf4] ss:$8 sps:$4 sm:$0xff]  }
0x272c   : > { %v6489_v57 = vpack.c.bf16 %v6484_v6, %v6483_v43  ;;  %6651 = vmatpush1.bf16.msra.mxu1 %v9073_v5  ;;  %v9109_v6 = vld [vmem:[%s11582_s8 + $0xf0] ss:$8 sps:$4 sm:$0xff]  }
0x272d   : > { %6722 = vmatprep.subr.bf16.mxu1 %v9081_v14  ;;  %v6600_v14 = vmul.u32 32, %v9706_v22 }
0x272e   : > { %8900 = vmatmul.mubr.msk.bf16.gmra.mxu0 %vm462_vm0, %v6489_v57 }
0x272f   : > { %6816 = vmatprep.mubr.bf16.mxu0 %v9530_v49 }
0x27de   : > { %v8897_v0 = vpop.f32.mrf.mxu0 }
0x27df   : > { %v6565_v3 = vadd.f32 %v8897_v0, %v6497_v2 }
0x27e0   : > { %v6556_v30 = vpop.f32.mrf.mxu0 }
0x27e1   : > { %9437 = vtanh.f32 %v6565_v3  ;;  %v6557_v40 = vadd.f32 %v6556_v30, %v6497_v2 }
0x27e2   : > { %v8898_v23 = vpop.f32.mrf.mxu0 }
0x27e3   : > { %9439 = vtanh.f32 %v6557_v40  ;;  %v6568_v25 = vadd.f32 %v8898_v23, %v6497_v2  ;;  %v6603_v40 = vadd.s32 32, %v6600_v14 }
0x27e4   : > { %v6559_v31 = vpop.f32.mrf.mxu0 }
0x27e5   : > { %v6560_v33 = vadd.f32 %v6559_v31, %v6497_v2 }
0x27e7   : > { %9441 = vtanh.f32 %v6560_v33 }
0x27e8   : > { %9443 = vtanh.f32 %v6568_v25 }
0x27ee   : > { %v9438_v18 = vpop.eup %9437  ;;  %v8901_v21 = vpop.f32.mrf.mxu0 }
0x27ef   : > { %v6755_v41 = vpack.c.bf16 %v9438_v18, %v9438_v18  ;;  %v6581_v16 = vadd.f32 %v8901_v21, %v6497_v2 }
0x27f0   : > { %v9440_v63 = vpop.eup %9439  ;;  %v6572_v60 = vpop.f32.mrf.mxu0 }
0x27f1   : > { %v6608_v12 = vpack.c.bf16 %v9440_v63, %v9440_v63  ;;  %v6573_v10 = vadd.f32 %v6572_v60, %v6497_v2  ;;  %7809 = vmatmul.mubr.msk.bf16.vlgmr.msra.gmra.mxu0 %vm462_vm0, %v6755_v41 }
0x27f2   : > { %v8902_v24 = vpop.f32.mrf.mxu0  ;;  %6945 = vmatpush1.bf16.msra.mxu0 %v9088_v39  ;;  %6964 = vmatprep.mubr.bf16.mxu0 %v9530_v49 }
0x27f3   : > { %9445 = vtanh.f32 %v6573_v10  ;;  %7791 = vmatmul.mubr.msk.bf16.vlgmr.msra.gmra.mxu1 %vm462_vm0, %v6608_v12  ;;  %6946 = vmatprep.subr.bf16.mxu0 %v9096_v17  ;;  %v6584_v37 = vadd.f32 %v8902_v24, %v6497_v2 }
0x27f4   : > { %v6575_v15 = vpop.f32.mrf.mxu0  ;;  %6723 = vmatpush1.bf16.msra.mxu1 %v9079_v46  ;;  %6742 = vmatprep.mubr.bf16.mxu1 %v9530_v49  ;;  %v9442_v29 = vpop.eup %9441  ;;  %9447 = vtanh.f32 %v6581_v16 }
0x27f5   : > { %v6576_v34 = vadd.f32 %v6575_v15, %v6497_v2  ;;  %6724 = vmatprep.subr.bf16.mxu1 %v9084_v8  ;;  %v6681_v52 = vpack.c.bf16 %v9442_v29, %v9442_v29  ;;  %v9444_v35 = vpop.eup %9443  ;;  %v11632_v2 = vlaneseq }
0x27f6   : > { %6947 = vmatpush1.bf16.msra.mxu0 %v9094_v51  ;;  %v6829_v54 = vpack.c.bf16 %v9444_v35, %v9444_v35 }
0x27f7   : > { %7092 = vmatprep.subr.bf16.mxu0 %v9102_v1  ;;  %9449 = vtanh.f32 %v6576_v34  ;;  %v6598_v0 = vand.u32 127, %v11632_v2 }
0x27f8   : > { %6725 = vmatpush1.bf16.msra.mxu1 %v9082_v28  ;;  %9451 = vtanh.f32 %v6584_v37 }
0x27f9   : > { %6870 = vmatprep.subr.bf16.mxu1 %v9087_v44  ;;  %vm6601_vm4 = vcmp.ge.s32.totalorder %v6598_v0, %v6600_v14  ;;  %vm6604_vm5 = vcmp.lt.s32.totalorder %v6598_v0, %v6603_v40 }
0x27fa   : > { %vm11473_vm8 = vmand %vm6601_vm4, %vm6604_vm5 }
0x27fb   : > { %7800 = vmatmul.mubr.msk.bf16.vlgmr.msra.gmra.mxu1 %vm462_vm0, %v6681_v52 }
0x27fc   : > { %6871 = vmatpush1.bf16.msra.mxu1 %v9085_v56  ;;  %6890 = vmatprep.mubr.bf16.mxu1 %v9530_v49 }
0x27fd   : > { %6872 = vmatprep.subr.bf16.mxu1 %v9093_v7 }
0x2800   : > { %v9446_v62 = vpop.eup %9445  ;;  %6873 = vmatpush1.bf16.msra.mxu1 %v9091_v42 }
0x2801   : > { %v6903_v61 = vpack.c.bf16 %v9446_v62, %v9446_v62  ;;  %7018 = vmatprep.subr.bf16.mxu1 %v9099_v32  ;;  %v9448_v50 = vpop.eup %9447 }
0x2802   : > { %v7051_v57 = vpack.c.bf16 %v9448_v50, %v9448_v50 }
0x2803   : > { %7818 = vmatmul.mubr.msk.bf16.vlgmr.msra.gmra.mxu1 %vm462_vm0, %v6829_v54  ;;  %7827 = vmatmul.mubr.msk.bf16.vlgmr.msra.gmra.mxu0 %vm462_vm0, %v6903_v61 }
0x2804   : > { %7019 = vmatpush1.bf16.msra.mxu1 %v9097_v59  ;;  %7093 = vmatpush1.bf16.msra.mxu0 %v9100_v19  ;;  %v9450_v43 = vpop.eup %9449 }
0x2805   : > { %7020 = vmatprep.subr.bf16.mxu1 %v9105_v20  ;;  %7094 = vmatprep.subr.bf16.mxu0 %v9108_v36  ;;  %v6977_v9 = vpack.c.bf16 %v9450_v43, %v9450_v43  ;;  %v9452_v58 = vpop.eup %9451 }
0x2806   : > { %7038 = vmatprep.mubr.bf16.mxu1 %v9530_v49  ;;  %7112 = vmatprep.mubr.bf16.mxu0 %v9530_v49  ;;  %v7125_v11 = vpack.c.bf16 %v9452_v58, %v9452_v58 }
0x2808   : > { %7021 = vmatpush1.bf16.msra.mxu1 %v9103_v53  ;;  %7095 = vmatpush1.bf16.msra.mxu0 %v9106_v4 }
0x2809   : > { %7166 = vmatprep.subr.bf16.mxu1 %v9111_v48 }
0x280b   : > { %7836 = vmatmul.mubr.msk.bf16.vlgmr.msra.gmra.mxu1 %vm462_vm0, %v6977_v9  ;;  %7845 = vmatmul.mubr.msk.bf16.vlgmr.msra.gmra.mxu0 %vm462_vm0, %v7051_v57 }
0x280c   : > { %7167 = vmatpush1.bf16.msra.mxu1 %v9109_v6  ;;  %7186 = vmatprep.mubr.bf16.mxu1 %v9530_v49  ;;  %v6599_v49 = vadd.s32 128, %v6598_v0 }
0x280d   : > { %7168 = vmatprep.subr.bf16.mxu1 %v9114_v47 }
0x280e   : > { %vm6602_vm6 = vcmp.ge.s32.totalorder %v6599_v49, %v6600_v14  ;;  %vm6605_vm7 = vcmp.lt.s32.totalorder %v6599_v49, %v6603_v40 }
0x280f   : > { %vm11479_vm9 = vmand %vm6602_vm6, %vm6605_vm7 }
0x2810   : > { %7169 = vmatpush1.bf16.msra.mxu1 %v9112_v55 }
0x2813   : > { %7854 = vmatmul.mubr.msk.bf16.vlgmr.msra.gmra.mxu1 %vm462_vm0, %v7125_v11 }
0x28b1   : > { %v6818_v45 = vpop.f32.mrf.mxu0 }
0x28b2   : > { %v6825_v51 = vsel %vm11473_vm8, %v6818_v45, 0.0 }
0x28b3   : > { %v6670_v26 = vpop.f32.mrf.mxu1  ;;  %v6820_v5 = vpop.f32.mrf.mxu0 }
0x28b4   : > { %v6677_v41 = vsel %vm11473_vm8, %v6670_v26, 0.0  ;;  %v6826_v34 = vsel %vm11479_vm9, %v6820_v5, 0.0 }
0x28b5   : > { %v6672_v27 = vpop.f32.mrf.mxu1  ;;  %v6822_v13 = vpop.f32.mrf.mxu0 }
0x28b6   : > { %v6678_v12 = vsel %vm11479_vm9, %v6672_v27, 0.0 }
0x28b7   : > { %v6674_v3 = vpop.f32.mrf.mxu1  ;;  %v6823_v30 = vpop.f32.mrf.mxu0 }
0x28b9   : > { %v6675_v23 = vpop.f32.mrf.mxu1 }
0x28bb   : > { %v6744_v31 = vpop.f32.mrf.mxu1 }
0x28bc   : > { %v6751_v18 = vsel %vm11473_vm8, %v6744_v31, 0.0 }
0x28bd   : > { %v6746_v33 = vpop.f32.mrf.mxu1  ;;  %v6753_v63 = vadd.f32 %v6751_v18, %v6677_v41 }
0x28be   : > { %v6752_v17 = vsel %vm11479_vm9, %v6746_v33, 0.0 }
0x28bf   : > { %v6748_v22 = vpop.f32.mrf.mxu1  ;;  %v6754_v10 = vadd.f32 %v6752_v17, %v6678_v12  ;;  %v6827_v16 = vadd.f32 %v6825_v51, %v6753_v63 }
0x28c1   : > { %v6749_v39 = vpop.f32.mrf.mxu1  ;;  %v6828_v56 = vadd.f32 %v6826_v34, %v6754_v10 }
0x28c3   : > { %v6892_v60 = vpop.f32.mrf.mxu1  ;;  %v6966_v46 = vpop.f32.mrf.mxu0 }
0x28c4   : > { %v6899_v1 = vsel %vm11473_vm8, %v6892_v60, 0.0  ;;  %v6973_v35 = vsel %vm11473_vm8, %v6966_v46, 0.0 }
0x28c5   : > { %v6894_v8 = vpop.f32.mrf.mxu1  ;;  %v6968_v24 = vpop.f32.mrf.mxu0  ;;  %v6901_v29 = vadd.f32 %v6899_v1, %v6827_v16 }
0x28c6   : > { %v6900_v44 = vsel %vm11479_vm9, %v6894_v8, 0.0  ;;  %v6974_v61 = vsel %vm11479_vm9, %v6968_v24, 0.0 }
0x28c7   : > { %v6896_v15 = vpop.f32.mrf.mxu1  ;;  %v6970_v28 = vpop.f32.mrf.mxu0  ;;  %v6902_v42 = vadd.f32 %v6900_v44, %v6828_v56  ;;  %v6975_v59 = vadd.f32 %v6973_v35, %v6901_v29 }
0x28c9   : > { %v6897_v52 = vpop.f32.mrf.mxu1  ;;  %v6971_v7 = vpop.f32.mrf.mxu0  ;;  %v6976_v36 = vadd.f32 %v6974_v61, %v6902_v42  ;;  %v9532_v42 = vmov 0.0   ;;  %v7259_v61 = vrot.slane %v11387_v38, 1 }
0x28ca   : > { %v9115_v7 = vld [vmem:[%s11583_s9 + $0x8] sm:$0xff]   ;;  %8903 = vmatprep.subr.bf16.mxu0 %v9532_v42  ;;  %8907 = vmatprep.mubr.msk.bf16.mxu0 %vm9533_vm11, %v9532_v42 }
0x28cb   : > { %v7040_v37 = vpop.f32.mrf.mxu1  ;;  %v7114_v32 = vpop.f32.mrf.mxu0  ;;  %8904 = vmatpush3.bf16.msra.mxu0 %v9115_v7 }
0x28cc   : > { %v7047_v62 = vsel %vm11473_vm8, %v7040_v37, 0.0  ;;  %v7121_v57 = vsel %vm11473_vm8, %v7114_v32, 0.0  ;;  %v9116_v37 = vld [vmem:[%s11583_s9] sm:$0xff]   ;;  %8905 = vmatprep.subr.bf16.mxu0 %v9532_v42 }
0x28cd   : > { %v7042_v19 = vpop.f32.mrf.mxu1  ;;  %v7116_v54 = vpop.f32.mrf.mxu0  ;;  %v7049_v53 = vadd.f32 %v7047_v62, %v6975_v59 }
0x28ce   : > { %v7048_v20 = vsel %vm11479_vm9, %v7042_v19, 0.0  ;;  %v7122_v55 = vsel %vm11479_vm9, %v7116_v54, 0.0 }
0x28cf   : > { %v7044_v4 = vpop.f32.mrf.mxu1  ;;  %v7118_v50 = vpop.f32.mrf.mxu0  ;;  %v7050_v48 = vadd.f32 %v7048_v20, %v6976_v36  ;;  %v7123_v9 = vadd.f32 %v7121_v57, %v7049_v53  ;;  %8906 = vmatpush3.bf16.msra.mxu0 %v9116_v37 }
0x28d0   : > { %v7281_v50 = vrot.slane %v11387_v38, 4 }
0x28d1   : > { %v7045_v43 = vpop.f32.mrf.mxu1  ;;  %v7119_v6 = vpop.f32.mrf.mxu0  ;;  %v7124_v11 = vadd.f32 %v7122_v55, %v7050_v48 }
0x28d3   : > { %v7188_v47 = vpop.f32.mrf.mxu1 }
0x28d4   : > { %v7195_v58 = vsel %vm11473_vm8, %v7188_v47, 0.0 }
0x28d5   : > { %v7197_v45 = vadd.f32 %v7195_v58, %v7123_v9  ;;  %v7190_v26 = vpop.f32.mrf.mxu1 }
0x28d6   : > { %v7196_v5 = vsel %vm11479_vm9, %v7190_v26, 0.0 }
0x28d7   : > { %v7199_v14 = vrot.slane %v7197_v45, 4  ;;  %v7198_v27 = vadd.f32 %v7196_v5, %v7124_v11  ;;  %v7192_v13 = vpop.f32.mrf.mxu1 }
0x28d9   : > { %v7200_v2 = vadd.f32 %v7199_v14, %v7197_v45  ;;  %v7205_v0 = vrot.slane %v7198_v27, 4  ;;  %v7193_v3 = vpop.f32.mrf.mxu1 }
0x28db   : > { %v7201_v30 = vrot.slane %v7200_v2, 2  ;;  %v7206_v40 = vadd.f32 %v7205_v0, %v7198_v27 }
0x28dd   : > { %v7202_v23 = vadd.f32 %v7201_v30, %v7200_v2  ;;  %v7207_v49 = vrot.slane %v7206_v40, 2 }
0x28df   : > { %v7203_v31 = vrot.slane %v7202_v23, 1  ;;  %v7208_v33 = vadd.f32 %v7207_v49, %v7206_v40 }
0x28e1   : > { %v7209_v25 = vrot.slane %v7208_v33, 1  ;;  %v7204_v22 = vadd.f32 %v7203_v31, %v7202_v23 }
0x28e3   : > { %7217 = vrot.lane.b32.xlu1 %v7204_v22, %s9520_s13  ;;  %7213 = vrot.lane.b32.xlu0 %v7204_v22, %s9519_s12  ;;  %v7210_v18 = vadd.f32 %v7209_v25, %v7208_v33  ;;  %v7211_v21 = vadd.f32 %v7204_v22, %v11387_v38 }
0x28e7   : > { %7221 = vrot.lane.b32.xlu1 %v7204_v22, %s9531_s16  ;;  %7227 = vrot.lane.b32.xlu0 %v7210_v18, %s9519_s12  ;;  %s9461_s12 = sshll.u32 %s9534_s21, 4  ;;  %s9462_s12 = int_to_ptr.vmem [resolvable:$false] %s9461_s12 }
0x28e8   : > { %p9464_p0 = scmp.lt.s32.totalorder %s11535_s29, %s9462_s12 }
0x28eb   : > { %7231 = vrot.lane.b32.xlu1 %v7210_v18, %s9520_s13  ;;  %7235 = vrot.lane.b32.xlu0 %v7210_v18, %s9531_s16  ;;  %s9457_s16 = scalar_lea.vmem %s11535_s29, 16  ;;  %s9463_s13 = scalar_lea.vmem %s9462_s12, 32 }
0x28ec   : > { %p9458_p11 = scmp.ne.s32.totalorder %s11535_s29, %s9457_s16  ;;  %p9465_p1 = scmp.lt.s32.totalorder %s9463_s13, %s9457_s16 }
0x28ee   : > { %p9459_p12 = pnand %p9458_p11, %p9633_p5  ;;  %p9466_p2 = por %p9465_p1, %p9464_p0 }
0x28f0   : > { %p9460_p13 = pneg %p9459_p12 }
0x28f2   : > { %p9467_p3 = pnand %p9466_p2, %p9460_p13 }
0x2955   : > { %v7218_v39 = vpop.permute.xlu1 %7217  ;;  %v7214_v41 = vpop.permute.xlu0 %7213 }
0x2956   : > { %v7216_v17 = vadd.f32 %v7214_v41, %v7211_v21 }
0x2958   : > { %v7220_v63 = vadd.f32 %v7218_v39, %v7216_v17 }
0x2959   : > { %v7222_v60 = vpop.permute.xlu1 %7221  ;;  %v7228_v12 = vpop.permute.xlu0 %7227 }
0x295a   : > { %v7224_v46 = vadd.f32 %v7222_v60, %v7220_v63 }
0x295c   : > { %v7225_v10 = vadd.f32 %v7224_v46, %v7210_v18 }
0x295d   : > { %v7232_v24 = vpop.permute.xlu1 %7231  ;;  %v7236_v1 = vpop.permute.xlu0 %7235 }
0x295e   : > { %v7230_v8 = vadd.f32 %v7228_v12, %v7225_v10 }
0x2960   : > { %v7234_v51 = vadd.f32 %v7232_v24, %v7230_v8 }
0x2962   : > { %v7238_v16 = vadd.f32 %v7236_v1, %v7234_v51 }
0x2964   : > { %v7239_v15 = vmax.f32 %v7238_v16, 0.0 }
0x2966   : > { %v7241_v28 = vsel %vm7240_vm10, %v7239_v15, 0.0 }
0x2967   : > { %7242 = vadd.xlane.f32.xlu1 %v7241_v28 }
0x29f0   : > { %v7243_v34 = vpop.xlane.xlu1 %7242 }
0x29f1   : > { %v7244_v44 = vmul.f32 0.03125, %v7243_v34 }
0x29f3   : > { %v7245_v29 = vsub.f32 %v7239_v15, %v7244_v44 }
0x29f5   : > { %v7246_v56 = vmul.f32 %v7245_v29, %v7245_v29 }
0x29f7   : > { %v7247_v52 = vsel %vm7240_vm10, %v7246_v56, 0.0 }
0x29f8   : > { %7248 = vadd.xlane.f32.xlu0 %v7247_v52 }
0x2a81   : > { %v7249_v32 = vpop.xlane.xlu0 %7248 }
0x2a82   : > { %v7250_v35 = vmul.f32 0.03125, %v7249_v32 }
0x2a84   : > { %v7251_v62 = vadd.f32 1e-12, %v7250_v35 }
0x2a86   : > { %9453 = vrsqrt.f32 %v7251_v62 }
0x2a93   : > { %v9454_v59 = vpop.eup %9453 }
0x2a94   : > { %v7253_v19 = vmul.f32 %v9454_v59, %v7245_v29 }
0x2a96   : > { %v7255_v54 = vrot.slane %v7253_v19, 7 }
0x2a98   : > { %v7257_v20 = vmul.f32 %v7255_v54, %v11387_v38 }
0x2a9a   : > { %v7261_v36 = vadd.f32 %v7259_v61, %v7257_v20 }
0x2a9c   : > { %v7262_v53 = vpack.c.bf16 %v7261_v36, %v7261_v36 }
0x2a9e   : > { %v7268_v4 = vrot.slane %v7262_v53, 1 }
0x2aa0   : > { %8908 = vmatmul.mubr.msk.bf16.vlgmr.msra.gmra.mxu0 %vm462_vm0, %v7268_v4 }
0x2b60   : > { %v7320_v48 = vpop.f32.mrf.mxu0 }
0x2b61   : > { %v7321_v43 = vadd.f32 %v7320_v48, %v7281_v50 }
0x2b62   : > { %v8909_v6 = vpop.f32.mrf.mxu0 }
0x2b63   : > { %7326 = vst [vmem:[%s378_s26] sm:$0x1] %v7321_v43 }
0x2b64   : > { %v7323_v57 = vpop.f32.mrf.mxu0 }
0x2b65   : > { %9470 = shalt.err (!%p9467_p3)
}
0x2b66   : > { %s9471_s14 = scalar_lea.hbm %s11533_s23, 16  ;;  %s9475_s22 = scalar_lea.hbm %s11585_s11, 32 }
0x2b67   : > { %p9472_p4 = scmp.ne.s32.totalorder %s11533_s23, %s9471_s14  ;;  %p9476_p9 = scmp.lt.s32.totalorder %s11533_s23, %s11585_s11 }
0x2b68   : > { %p9477_p10 = scmp.lt.s32.totalorder %s9475_s22, %s9471_s14 }
0x2b69   : > { %p9473_p7 = pnand %p9472_p4, %p9633_p5 }
0x2b6a   : > { %p9478_p11 = por %p9477_p10, %p9476_p9 }
0x2b6b   : > { %p9474_p8 = pneg %p9473_p7 }
0x2b6d   : > { %p9479_p12 = pnand %p9478_p11, %p9474_p8 }
0x2b6f   : > { %9482 = shalt.err (!%p9479_p12)
}
0x2b70   : > { %8951 = dma.vmem_to_hbm [thread:$0]  (%p9633_p5), %s11535_s29, 16, %s11533_s23, %s7328_s30   ;;  %v8910_v38 = vpop.f32.mrf.mxu0 }
0x2b71 PF: > { %p8957_p13 = scmp.ge.s32.totalorder %s9517_s20, 2  ;;  %s7352_s19 = sand.u32 1, %s9505_s17  }
0x2b72   : > { %s7353_s16 = scalar_lea.sflag [#allocation3], %s7352_s19 }
0x2b73   : > { %p8954_p0 = pnand %p8957_p13, %p9637_p6 }
0x2b75   : > { %p8955_p1 = pneg %p8954_p0 }
0x2b77   : > { %9500 = dma.done.wait (%p8955_p1), %s7353_s16, 16  }
0x2b78   : > { %9502 = vsyncadd (%p8955_p1), %s7353_s16, 4294967280  ;;  %s11637_s20 = sld [smem:[#allocation6_spill]]  ;;  %s11640_s17 = smov %s9509_s18 }
0x2b79   : > { %s11638_s21 = sld [smem:[#allocation5_spill]] }
0x2b7a   : > { %s11639_s19 = sld [smem:[#allocation7_spill]] }
0x2b7e   : > { %p21_p2 = scmp.ge.s32.totalorder %s11637_s20, 4  }
0x2b7f   : > { %s11641_s18 = smov %s11638_s21 }
0x2b80   :  { %23 = sbr.rel (!%p21_p2) target bundleno = 3 (0x3), region = 139 }
0x2b85   :  { %7357 = vsyncpa [#allocation3], 1 }
0x2b86   :  { %7359 = vsyncpa [#allocation3 + $0x1], 1 }

</bundles_post_ra>
